<compile_context>
chip_gen: v5e
topology: v5e:2x2
jax: 0.10.0
libtpu: 0.0.40
codegen_flags: <defaults>
</compile_context>

<pallas_src>
import math
from functools import partial

import jax
import jax.numpy as jnp
from jax.experimental import pallas as pl
from jax.experimental.pallas import tpu as pltpu


# --------------------------------------------------------------------------
# Per-layer kernel body; grid=(num_layers,), activations carried in VMEM
# scratch across grid steps.  x_ref: [M, D] with M = Lb * S (batch-major,
# seq inner).
# --------------------------------------------------------------------------
def _encoder_layer_kernel(nhead, Lb, S, D, F_ffn, eps, mm_dtype,
                          x_ref, wqkv_ref, wo_ref, w1_ref, w2_ref,
                          vecs_ref, b1_ref, o_ref, x_state):
    layer = pl.program_id(0)
    M = Lb * S
    hd = D // nhead

    @pl.when(layer == 0)
    def _():
        x_state[...] = x_ref[...].astype(jnp.float32)

    x = x_state[...]                                          # [M, D] f32

    wqkv = wqkv_ref[0].astype(mm_dtype)                       # [D, 3D] (pre-transposed,
    wo = wo_ref[0].astype(mm_dtype)                           #          q-scale folded)
    w1 = w1_ref[0].astype(mm_dtype)                           # [D, F]
    w2 = w2_ref[0].astype(mm_dtype)                           # [F, D]
    vecs = vecs_ref[0].astype(jnp.float32)                    # [9, D]
    b1 = b1_ref[0].astype(jnp.float32)                        # [1, F]

    def layernorm(y, g, b):
        mu = jnp.mean(y, axis=-1, keepdims=True)
        var = jnp.mean((y - mu) ** 2, axis=-1, keepdims=True)
        return (y - mu) * jax.lax.rsqrt(var + eps) * g + b

    # ---- multi-head self-attention (F.multi_head_attention_forward) ----
    qkv = jnp.dot(x.astype(mm_dtype), wqkv,
                  preferred_element_type=jnp.float32)         # [M, 3D]
    q = qkv[:, :D] + vecs[0:1]                                # scale already folded in
    k = qkv[:, D:2 * D] + vecs[1:2]
    v = qkv[:, 2 * D:] + vecs[2:3]

    q3 = q.reshape(Lb, S, D)                                  # leading-dim split (cheap)
    k3 = k.reshape(Lb, S, D)
    v3 = v.reshape(Lb, S, D)

    head_outs = []
    for h in range(nhead):                                    # static head loop,
        sl = slice(h * hd, (h + 1) * hd)                      # batched over Lb via einsum
        qh = q3[:, :, sl].astype(mm_dtype)
        kh = k3[:, :, sl].astype(mm_dtype)
        vh = v3[:, :, sl].astype(mm_dtype)
        s = jnp.einsum('bqd,bkd->bqk', qh, kh,
                       preferred_element_type=jnp.float32)    # [Lb, S, S]
        m = jnp.max(s, axis=-1, keepdims=True)
        p = jnp.exp(s - m)
        denom = jnp.sum(p, axis=-1, keepdims=True)
        r = pl.reciprocal(denom, approx=True)                 # EUP vrcp (free slot)
        r = r * (2.0 - denom * r)                             # one Newton step -> ~exact
        p = (p * r).astype(mm_dtype)
        head_outs.append(jnp.einsum('bqk,bkd->bqd', p, vh,
                                    preferred_element_type=jnp.float32))
    attn = jnp.concatenate(head_outs, axis=-1).reshape(M, D)
    attn = jnp.dot(attn.astype(mm_dtype), wo,
                   preferred_element_type=jnp.float32) + vecs[3:4]

    # ---- residual + LayerNorm1 (dropout1 = identity at inference) ----
    x = layernorm(x + attn, vecs[4:5], vecs[5:6])

    # ---- feed-forward: linear1 -> relu -> linear2 ----
    h1 = jnp.dot(x.astype(mm_dtype), w1,
                 preferred_element_type=jnp.float32) + b1
    h1 = jnp.maximum(h1, 0.0)
    h2 = jnp.dot(h1.astype(mm_dtype), w2,
                 preferred_element_type=jnp.float32) + vecs[6:7]

    # ---- residual + LayerNorm2 ----
    x = layernorm(x + h2, vecs[7:8], vecs[8:9])

    x_state[...] = x                                          # carry to next layer

    @pl.when(layer == pl.num_programs(0) - 1)
    def _():
        o_ref[...] = x.astype(o_ref.dtype)


def _fused_encoder(x2d, packed, *, num_layers, nhead, Lb, S, D, mm_dtype,
                   eps=1e-5):
    """x2d: [Lb*S, D] token slab -> same shape, all encoder layers applied."""
    F_ffn = packed["w1_t"].shape[-1]
    M = Lb * S
    kernel = partial(_encoder_layer_kernel, nhead, Lb, S, D, F_ffn, eps,
                     mm_dtype)
    return pl.pallas_call(
        kernel,
        out_shape=jax.ShapeDtypeStruct(x2d.shape, x2d.dtype),
        grid_spec=pltpu.PrefetchScalarGridSpec(
            num_scalar_prefetch=0,
            grid=(num_layers,),
            in_specs=[
                # Activation slab: same block every step -> fetched once.
                pl.BlockSpec((M, D), lambda l: (0, 0)),
                # Per-layer weights: streamed (double-buffered) over the layer
                # grid axis.
                pl.BlockSpec((1, D, 3 * D), lambda l: (l, 0, 0)),   # wqkv_t
                pl.BlockSpec((1, D, D), lambda l: (l, 0, 0)),       # wo_t
                pl.BlockSpec((1, D, F_ffn), lambda l: (l, 0, 0)),   # w1_t
                pl.BlockSpec((1, F_ffn, D), lambda l: (l, 0, 0)),   # w2_t
                pl.BlockSpec((1, 9, D), lambda l: (l, 0, 0)),       # vecs
                pl.BlockSpec((1, 1, F_ffn), lambda l: (l, 0, 0)),   # b1
            ],
            # Output block never changes -> written back to HBM once at the end.
            out_specs=pl.BlockSpec((M, D), lambda l: (0, 0)),
            scratch_shapes=[pltpu.VMEM((M, D), jnp.float32)],
        ),
        compiler_params=pltpu.CompilerParams(
            dimension_semantics=("arbitrary",),
            vmem_limit_bytes=32 * 1024 * 1024),
    )(x2d, packed["wqkv_t"], packed["wo_t"], packed["w1_t"], packed["w2_t"],
      packed["vecs"], packed["b1"])


# --------------------------------------------------------------------------
# Parameter construction & packing
# --------------------------------------------------------------------------
def init_params(key, d_model, nhead, d_ffn, num_layers):
    # PyTorch-layout weights ([out, in]).  Biases / LN params get small random
    # values (instead of PyTorch's zeros/ones) purely so the test exercises
    # every bias / gain path of the kernel.
    def unif(k, shape, fan_in):
        bound = 1.0 / math.sqrt(fan_in)
        return jax.random.uniform(k, shape, jnp.float32, -bound, bound)

    layers = []
    for _ in range(num_layers):
        key, *ks = jax.random.split(key, 13)
        layers.append({
            "wqkv": unif(ks[0], (3 * d_model, d_model), d_model),   # in_proj_weight
            "bqkv": unif(ks[1], (3 * d_model,), d_model),           # in_proj_bias
            "wo":   unif(ks[2], (d_model, d_model), d_model),       # out_proj.weight
            "bo":   unif(ks[3], (d_model,), d_model),               # out_proj.bias
            "g1":   1.0 + unif(ks[4], (d_model,), d_model),         # norm1.weight
            "be1":  unif(ks[5], (d_model,), d_model),               # norm1.bias
            "w1":   unif(ks[6], (d_ffn, d_model), d_model),         # linear1.weight
            "b1":   unif(ks[7], (d_ffn,), d_model),                 # linear1.bias
            "w2":   unif(ks[8], (d_model, d_ffn), d_ffn),           # linear2.weight
            "b2":   unif(ks[9], (d_model,), d_ffn),                 # linear2.bias
            "g2":   1.0 + unif(ks[10], (d_model,), d_model),        # norm2.weight
            "be2":  unif(ks[11], (d_model,), d_model),              # norm2.bias
        })
    return layers


def pack_params(layers, nhead, weight_dtype=jnp.float32):
    """Stack per-layer weights, pre-transpose matrices, fold the 1/sqrt(hd)
    query scale into Wq/bq, pack small vectors into one [L, 9, D] array."""
    D = layers[0]["wo"].shape[0]
    hd = D // nhead
    scale = 1.0 / math.sqrt(hd)

    def stack_t(name):
        return jnp.stack([p[name].T for p in layers]).astype(weight_dtype)

    wqkv_t = jnp.stack([p["wqkv"].T for p in layers])                # [L, D, 3D]
    wqkv_t = wqkv_t.at[:, :, :D].multiply(scale).astype(weight_dtype)

    # Row order: bq*scale, bk, bv, bo, g1, be1, b2, g2, be2 (width D, kept f32).
    vecs = jnp.stack([
        jnp.stack([p["bqkv"][:D] * scale, p["bqkv"][D:2 * D], p["bqkv"][2 * D:],
                   p["bo"], p["g1"], p["be1"], p["b2"], p["g2"], p["be2"]])
        for p in layers]).astype(jnp.float32)                        # [L, 9, D]
    b1 = jnp.stack([p["b1"][None, :] for p in layers]).astype(jnp.float32)  # [L, 1, F]

    return {
        "wqkv_t": wqkv_t,            # [L, D, 3D]
        "wo_t":   stack_t("wo"),     # [L, D, D]
        "w1_t":   stack_t("w1"),     # [L, D, F]
        "w2_t":   stack_t("w2"),     # [L, F, D]
        "vecs":   vecs,
        "b1":     b1,
    }


def make_positional_encoding(d_model, max_len):
    position = jnp.arange(max_len, dtype=jnp.float32)[:, None]
    div_term = jnp.exp(jnp.arange(0, d_model, 2, dtype=jnp.float32)
                       * (-math.log(10000.0) / d_model))
    pe = jnp.zeros((max_len, d_model), jnp.float32)
    pe = pe.at[:, 0::2].set(jnp.sin(position * div_term))
    pe = pe.at[:, 1::2].set(jnp.cos(position * div_term))
    return pe                                                    # [max_len, d_model]


# --------------------------------------------------------------------------
# Full forward pass (glue in plain JAX, hot path in the single Pallas kernel)
# --------------------------------------------------------------------------
def pytorch_transformer_block_forward(x_bln, layers, nhead,
                                      use_positional_encoding=True,
                                      max_len=5000, mm_dtype=jnp.float32):
    B, L, N = x_bln.shape
    if use_positional_encoding:
        pe = make_positional_encoding(N, max_len)
        # torch: x = x + pe[:x.size(0)]  (pe slice [B, 1, N], broadcast over L)
        x_bln = x_bln + pe[:B][:, None, :]
        # TODO(synk): nn.Dropout(p=0.1) omitted (identity at inference / eval).
    # batch_first=False: attention runs over dim 0 (B).  Put the batch axis (L)
    # first and fold (L, B) into one lane-dense [L*B, N] token slab.
    x2d = jnp.transpose(x_bln, (1, 0, 2)).reshape(L * B, N)
    packed = pack_params(layers, nhead, weight_dtype=mm_dtype)
    out2d = _fused_encoder(x2d, packed, num_layers=len(layers), nhead=nhead,
                           Lb=L, S=B, D=N, mm_dtype=mm_dtype)
    return jnp.transpose(out2d.reshape(L, B, N), (1, 0, 2))


# --------------------------------------------------------------------------
# Pure-JAX reference (same math, no Pallas) for a correctness check.
# --------------------------------------------------------------------------
def _reference_forward(x_bln, layers, nhead, max_len=5000, eps=1e-5):
    B, L, N = x_bln.shape
    hd = N // nhead
    pe = make_positional_encoding(N, max_len)
    x_bln = x_bln + pe[:B][:, None, :]
    x = jnp.transpose(x_bln, (1, 0, 2))          # [Lb, S, D]

    def layernorm(y, g, b):
        mu = jnp.mean(y, -1, keepdims=True)
        var = jnp.mean((y - mu) ** 2, -1, keepdims=True)
        return (y - mu) / jnp.sqrt(var + eps) * g + b

    for p in layers:
        def per_batch(xb, p=p):
            qkv = xb @ p["wqkv"].T + p["bqkv"]
            q = qkv[:, :N] / math.sqrt(hd)
            k = qkv[:, N:2 * N]
            v = qkv[:, 2 * N:]
            outs = []
            for h in range(nhead):
                sl = slice(h * hd, (h + 1) * hd)
                a = jax.nn.softmax(q[:, sl] @ k[:, sl].T, axis=-1)
                outs.append(a @ v[:, sl])
            attn = jnp.concatenate(outs, -1) @ p["wo"].T + p["bo"]
            y = layernorm(xb + attn, p["g1"], p["be1"])
            h1 = jnp.maximum(y @ p["w1"].T + p["b1"], 0.0)
            y = layernorm(y + h1 @ p["w2"].T + p["b2"], p["g2"], p["be2"])
            return y
        x = jax.vmap(per_batch)(x)
    return jnp.transpose(x, (1, 0, 2))


# --------------------------------------------------------------------------
if __name__ == "__main__":
    # Small shapes consistent with the module's [B, L, N] input convention.
    # B = seq axis (attention axis for batch_first=False), L = batch axis.
    # d_model=128 keeps the token slab / weights MXU- and lane-aligned.
    B, L, N = 16, 8, 128
    NHEAD, D_FFN, NUM_LAYERS = 8, 256, 2

    key = jax.random.PRNGKey(0)
    kx, kp = jax.random.split(key)
    x = jax.random.normal(kx, (B, L, N), jnp.float32)
    layers = init_params(kp, N, NHEAD, D_FFN, NUM_LAYERS)

    out = jax.block_until_ready(
        pytorch_transformer_block_forward(x, layers, NHEAD, max_len=64))
    ref = jax.block_until_ready(_reference_forward(x, layers, NHEAD, max_len=64))
    assert out.shape == (B, L, N)
    max_err = float(jnp.max(jnp.abs(out - ref)))
    assert jnp.allclose(out, ref, atol=1e-3, rtol=1e-3), (
        "mismatch vs reference, max abs err = %e" % max_err)

    # bf16 MXU-operand / streamed-weight variant (recommended on v6e/v7x);
    # softmax / LayerNorm / residual math stays f32.
    out_bf16 = jax.block_until_ready(
        pytorch_transformer_block_forward(x, layers, NHEAD, max_len=64,
                                          mm_dtype=jnp.bfloat16))
    assert out_bf16.shape == (B, L, N)
    assert bool(jnp.all(jnp.isfinite(out_bf16)))

    print("KERNEL_OK")
</pallas_src>

<mosaic_0001>
module attributes {stable_mosaic.version = 11 : i64} {
  func.func @_encoder_layer_kernel(%arg0: i32, %arg1: memref<128x128xf32, #tpu.memory_space<vmem>>, %arg2: memref<1x128x384xf32, #tpu.memory_space<vmem>>, %arg3: memref<1x128x128xf32, #tpu.memory_space<vmem>>, %arg4: memref<1x128x256xf32, #tpu.memory_space<vmem>>, %arg5: memref<1x256x128xf32, #tpu.memory_space<vmem>>, %arg6: memref<1x9x128xf32, #tpu.memory_space<vmem>>, %arg7: memref<1x1x256xf32, #tpu.memory_space<vmem>>, %arg8: memref<128x128xf32, #tpu.memory_space<vmem>>, %arg9: memref<128x128xf32, #tpu.memory_space<vmem>>) attributes {dimension_semantics = [#tpu.dimension_semantics<arbitrary>], iteration_bounds = array<i64: 2>, scalar_prefetch = 0 : i64, scratch_operands = 1 : i64, tpu.core_type = #tpu.core_type<tc>, window_params = [{pipeline_mode = #tpu.pipeline_mode<synchronous>, transform_indices = @transform_0, window_bounds = array<i64: 128, 128>}, {transform_indices = @transform_1, window_bounds = array<i64: 1, 128, 384>}, {transform_indices = @transform_2, window_bounds = array<i64: 1, 128, 128>}, {transform_indices = @transform_3, window_bounds = array<i64: 1, 128, 256>}, {transform_indices = @transform_4, window_bounds = array<i64: 1, 256, 128>}, {transform_indices = @transform_5, window_bounds = array<i64: 1, 9, 128>}, {transform_indices = @transform_6, window_bounds = array<i64: 1, 1, 256>}, {pipeline_mode = #tpu.pipeline_mode<synchronous>, transform_indices = @transform_7, window_bounds = array<i64: 128, 128>}]} {
    %c0_i32 = arith.constant 0 : i32
    %0 = arith.cmpi eq, %arg0, %c0_i32 : i32
    %1 = arith.extui %0 : i1 to i32
    %c0_i32_0 = arith.constant 0 : i32
    %2 = arith.cmpi ne, %1, %c0_i32_0 : i32
    scf.if %2 {
      %c0_77 = arith.constant 0 : index
      %c0_78 = arith.constant 0 : index
      %253 = vector.load %arg1[%c0_77, %c0_78] : memref<128x128xf32, #tpu.memory_space<vmem>>, vector<128x128xf32>
      %c0_79 = arith.constant 0 : index
      %c0_80 = arith.constant 0 : index
      %254 = vector.load %arg9[%c0_79, %c0_80] : memref<128x128xf32, #tpu.memory_space<vmem>>, vector<128x128xf32>
      tpu.vector_store %arg9[%c0_79, %c0_80], %253 {strides = array<i32>} : memref<128x128xf32, #tpu.memory_space<vmem>>, vector<128x128xf32>,
    } else {
    }
    %c0 = arith.constant 0 : index
    %c0_1 = arith.constant 0 : index
    %3 = vector.load %arg9[%c0, %c0_1] : memref<128x128xf32, #tpu.memory_space<vmem>>, vector<128x128xf32>
    %c0_2 = arith.constant 0 : index
    %c0_3 = arith.constant 0 : index
    %c0_4 = arith.constant 0 : index
    %4 = vector.load %arg2[%c0_2, %c0_3, %c0_4] : memref<1x128x384xf32, #tpu.memory_space<vmem>>, vector<1x128x384xf32>
    %5 = vector.shape_cast %4 : vector<1x128x384xf32> to vector<128x384xf32>
    %c0_5 = arith.constant 0 : index
    %c0_6 = arith.constant 0 : index
    %c0_7 = arith.constant 0 : index
    %6 = vector.load %arg3[%c0_5, %c0_6, %c0_7] : memref<1x128x128xf32, #tpu.memory_space<vmem>>, vector<1x128x128xf32>
    %7 = vector.shape_cast %6 : vector<1x128x128xf32> to vector<128x128xf32>
    %c0_8 = arith.constant 0 : index
    %c0_9 = arith.constant 0 : index
    %c0_10 = arith.constant 0 : index
    %8 = vector.load %arg4[%c0_8, %c0_9, %c0_10] : memref<1x128x256xf32, #tpu.memory_space<vmem>>, vector<1x128x256xf32>
    %9 = vector.shape_cast %8 : vector<1x128x256xf32> to vector<128x256xf32>
    %c0_11 = arith.constant 0 : index
    %c0_12 = arith.constant 0 : index
    %c0_13 = arith.constant 0 : index
    %10 = vector.load %arg5[%c0_11, %c0_12, %c0_13] : memref<1x256x128xf32, #tpu.memory_space<vmem>>, vector<1x256x128xf32>
    %11 = vector.shape_cast %10 : vector<1x256x128xf32> to vector<256x128xf32>
    %c0_14 = arith.constant 0 : index
    %c0_15 = arith.constant 0 : index
    %c0_16 = arith.constant 0 : index
    %12 = vector.load %arg6[%c0_14, %c0_15, %c0_16] : memref<1x9x128xf32, #tpu.memory_space<vmem>>, vector<1x9x128xf32>
    %13 = vector.shape_cast %12 : vector<1x9x128xf32> to vector<9x128xf32>
    %c0_17 = arith.constant 0 : index
    %c0_18 = arith.constant 0 : index
    %c0_19 = arith.constant 0 : index
    %14 = vector.load %arg7[%c0_17, %c0_18, %c0_19] : memref<1x1x256xf32, #tpu.memory_space<vmem>>, vector<1x1x256xf32>
    %15 = vector.shape_cast %14 : vector<1x1x256xf32> to vector<1x256xf32>
    %cst = arith.constant dense<0.000000e+00> : vector<128x384xf32>
    %16 = tpu.matmul %3, %5, %cst {dimension_numbers = #tpu.dot_dimension_numbers<[1], [0], [0], [1], [0, 0, 1, 1], [], []>} : vector<128x128xf32>, vector<128x384xf32>, vector<128x384xf32> -> vector<128x384xf32>
    %17 = vector.extract_strided_slice %16 {offsets = [0, 0], sizes = [128, 128], strides = [1, 1]} : vector<128x384xf32> to vector<128x128xf32>
    %18 = vector.extract_strided_slice %13 {offsets = [0, 0], sizes = [1, 128], strides = [1, 1]} : vector<9x128xf32> to vector<1x128xf32>
    %19 = vector.broadcast %18 : vector<1x128xf32> to vector<128x128xf32>
    %20 = arith.addf %17, %19 : vector<128x128xf32>
    %21 = vector.extract_strided_slice %16 {offsets = [0, 128], sizes = [128, 128], strides = [1, 1]} : vector<128x384xf32> to vector<128x128xf32>
    %22 = vector.extract_strided_slice %13 {offsets = [1, 0], sizes = [1, 128], strides = [1, 1]} : vector<9x128xf32> to vector<1x128xf32>
    %23 = vector.broadcast %22 : vector<1x128xf32> to vector<128x128xf32>
    %24 = arith.addf %21, %23 : vector<128x128xf32>
    %25 = vector.extract_strided_slice %16 {offsets = [0, 256], sizes = [128, 128], strides = [1, 1]} : vector<128x384xf32> to vector<128x128xf32>
    %26 = vector.extract_strided_slice %13 {offsets = [2, 0], sizes = [1, 128], strides = [1, 1]} : vector<9x128xf32> to vector<1x128xf32>
    %27 = vector.broadcast %26 : vector<1x128xf32> to vector<128x128xf32>
    %28 = arith.addf %25, %27 : vector<128x128xf32>
    %29 = vector.shape_cast %20 : vector<128x128xf32> to vector<8x16x128xf32>
    %30 = vector.shape_cast %24 : vector<128x128xf32> to vector<8x16x128xf32>
    %31 = vector.shape_cast %28 : vector<128x128xf32> to vector<8x16x128xf32>
    %32 = vector.extract_strided_slice %29 {offsets = [0, 0, 0], sizes = [8, 16, 16], strides = [1, 1, 1]} : vector<8x16x128xf32> to vector<8x16x16xf32>
    %33 = vector.extract_strided_slice %30 {offsets = [0, 0, 0], sizes = [8, 16, 16], strides = [1, 1, 1]} : vector<8x16x128xf32> to vector<8x16x16xf32>
    %34 = vector.extract_strided_slice %31 {offsets = [0, 0, 0], sizes = [8, 16, 16], strides = [1, 1, 1]} : vector<8x16x128xf32> to vector<8x16x16xf32>
    "tpu.trace_start"() <{level = 10 : i32, message = "bqd,bkd->bqk"}> : () -> ()
    %cst_20 = arith.constant dense<0.000000e+00> : vector<8x16x16xf32>
    %35 = tpu.matmul %32, %33, %cst_20 {dimension_numbers = #tpu.dot_dimension_numbers<[2], [2], [1], [1], [0, 0, 0, 1, 1, 1], [0], [0]>} : vector<8x16x16xf32>, vector<8x16x16xf32>, vector<8x16x16xf32> -> vector<8x16x16xf32>
    "tpu.trace_stop"() : () -> ()
    %cst_21 = arith.constant dense<0xFF800000> : vector<8x16xf32>
    %36 = vector.multi_reduction <maximumf>, %35, %cst_21 [2] : vector<8x16x16xf32> to vector<8x16xf32>
    %37 = vector.shape_cast %36 : vector<8x16xf32> to vector<8x16x1xf32>
    %38 = vector.broadcast %37 : vector<8x16x1xf32> to vector<8x16x16xf32>
    %39 = arith.subf %35, %38 : vector<8x16x16xf32>
    %40 = math.exp %39 : vector<8x16x16xf32>
    %cst_22 = arith.constant dense<0.000000e+00> : vector<8x16xf32>
    %41 = vector.multi_reduction <add>, %40, %cst_22 [2] : vector<8x16x16xf32> to vector<8x16xf32>
    %42 = vector.shape_cast %41 : vector<8x16xf32> to vector<8x16x1xf32>
    %43 = tpu.reciprocal %42 {approx = true} : vector<8x16x1xf32> -> vector<8x16x1xf32>
    %44 = arith.mulf %42, %43 : vector<8x16x1xf32>
    %cst_23 = arith.constant 2.000000e+00 : f32
    %45 = vector.broadcast %cst_23 : f32 to vector<8x16x1xf32>
    %46 = arith.subf %45, %44 : vector<8x16x1xf32>
    %47 = arith.mulf %43, %46 : vector<8x16x1xf32>
    %48 = vector.broadcast %47 : vector<8x16x1xf32> to vector<8x16x16xf32>
    %49 = arith.mulf %40, %48 : vector<8x16x16xf32>
    "tpu.trace_start"() <{level = 10 : i32, message = "bqk,bkd->bqd"}> : () -> ()
    %cst_24 = arith.constant dense<0.000000e+00> : vector<8x16x16xf32>
    %50 = tpu.matmul %49, %34, %cst_24 {dimension_numbers = #tpu.dot_dimension_numbers<[2], [1], [1], [2], [0, 0, 0, 1, 1, 2], [0], [0]>} : vector<8x16x16xf32>, vector<8x16x16xf32>, vector<8x16x16xf32> -> vector<8x16x16xf32>
    "tpu.trace_stop"() : () -> ()
    %51 = vector.extract_strided_slice %29 {offsets = [0, 0, 16], sizes = [8, 16, 16], strides = [1, 1, 1]} : vector<8x16x128xf32> to vector<8x16x16xf32>
    %52 = vector.extract_strided_slice %30 {offsets = [0, 0, 16], sizes = [8, 16, 16], strides = [1, 1, 1]} : vector<8x16x128xf32> to vector<8x16x16xf32>
    %53 = vector.extract_strided_slice %31 {offsets = [0, 0, 16], sizes = [8, 16, 16], strides = [1, 1, 1]} : vector<8x16x128xf32> to vector<8x16x16xf32>
    "tpu.trace_start"() <{level = 10 : i32, message = "bqd,bkd->bqk"}> : () -> ()
    %cst_25 = arith.constant dense<0.000000e+00> : vector<8x16x16xf32>
    %54 = tpu.matmul %51, %52, %cst_25 {dimension_numbers = #tpu.dot_dimension_numbers<[2], [2], [1], [1], [0, 0, 0, 1, 1, 1], [0], [0]>} : vector<8x16x16xf32>, vector<8x16x16xf32>, vector<8x16x16xf32> -> vector<8x16x16xf32>
    "tpu.trace_stop"() : () -> ()
    %cst_26 = arith.constant dense<0xFF800000> : vector<8x16xf32>
    %55 = vector.multi_reduction <maximumf>, %54, %cst_26 [2] : vector<8x16x16xf32> to vector<8x16xf32>
    %56 = vector.shape_cast %55 : vector<8x16xf32> to vector<8x16x1xf32>
    %57 = vector.broadcast %56 : vector<8x16x1xf32> to vector<8x16x16xf32>
    %58 = arith.subf %54, %57 : vector<8x16x16xf32>
    %59 = math.exp %58 : vector<8x16x16xf32>
    %cst_27 = arith.constant dense<0.000000e+00> : vector<8x16xf32>
    %60 = vector.multi_reduction <add>, %59, %cst_27 [2] : vector<8x16x16xf32> to vector<8x16xf32>
    %61 = vector.shape_cast %60 : vector<8x16xf32> to vector<8x16x1xf32>
    %62 = tpu.reciprocal %61 {approx = true} : vector<8x16x1xf32> -> vector<8x16x1xf32>
    %63 = arith.mulf %61, %62 : vector<8x16x1xf32>
    %cst_28 = arith.constant 2.000000e+00 : f32
    %64 = vector.broadcast %cst_28 : f32 to vector<8x16x1xf32>
    %65 = arith.subf %64, %63 : vector<8x16x1xf32>
    %66 = arith.mulf %62, %65 : vector<8x16x1xf32>
    %67 = vector.broadcast %66 : vector<8x16x1xf32> to vector<8x16x16xf32>
    %68 = arith.mulf %59, %67 : vector<8x16x16xf32>
    "tpu.trace_start"() <{level = 10 : i32, message = "bqk,bkd->bqd"}> : () -> ()
    %cst_29 = arith.constant dense<0.000000e+00> : vector<8x16x16xf32>
    %69 = tpu.matmul %68, %53, %cst_29 {dimension_numbers = #tpu.dot_dimension_numbers<[2], [1], [1], [2], [0, 0, 0, 1, 1, 2], [0], [0]>} : vector<8x16x16xf32>, vector<8x16x16xf32>, vector<8x16x16xf32> -> vector<8x16x16xf32>
    "tpu.trace_stop"() : () -> ()
    %70 = vector.extract_strided_slice %29 {offsets = [0, 0, 32], sizes = [8, 16, 16], strides = [1, 1, 1]} : vector<8x16x128xf32> to vector<8x16x16xf32>
    %71 = vector.extract_strided_slice %30 {offsets = [0, 0, 32], sizes = [8, 16, 16], strides = [1, 1, 1]} : vector<8x16x128xf32> to vector<8x16x16xf32>
    %72 = vector.extract_strided_slice %31 {offsets = [0, 0, 32], sizes = [8, 16, 16], strides = [1, 1, 1]} : vector<8x16x128xf32> to vector<8x16x16xf32>
    "tpu.trace_start"() <{level = 10 : i32, message = "bqd,bkd->bqk"}> : () -> ()
    %cst_30 = arith.constant dense<0.000000e+00> : vector<8x16x16xf32>
    %73 = tpu.matmul %70, %71, %cst_30 {dimension_numbers = #tpu.dot_dimension_numbers<[2], [2], [1], [1], [0, 0, 0, 1, 1, 1], [0], [0]>} : vector<8x16x16xf32>, vector<8x16x16xf32>, vector<8x16x16xf32> -> vector<8x16x16xf32>
    "tpu.trace_stop"() : () -> ()
    %cst_31 = arith.constant dense<0xFF800000> : vector<8x16xf32>
    %74 = vector.multi_reduction <maximumf>, %73, %cst_31 [2] : vector<8x16x16xf32> to vector<8x16xf32>
    %75 = vector.shape_cast %74 : vector<8x16xf32> to vector<8x16x1xf32>
    %76 = vector.broadcast %75 : vector<8x16x1xf32> to vector<8x16x16xf32>
    %77 = arith.subf %73, %76 : vector<8x16x16xf32>
    %78 = math.exp %77 : vector<8x16x16xf32>
    %cst_32 = arith.constant dense<0.000000e+00> : vector<8x16xf32>
    %79 = vector.multi_reduction <add>, %78, %cst_32 [2] : vector<8x16x16xf32> to vector<8x16xf32>
    %80 = vector.shape_cast %79 : vector<8x16xf32> to vector<8x16x1xf32>
    %81 = tpu.reciprocal %80 {approx = true} : vector<8x16x1xf32> -> vector<8x16x1xf32>
    %82 = arith.mulf %80, %81 : vector<8x16x1xf32>
    %cst_33 = arith.constant 2.000000e+00 : f32
    %83 = vector.broadcast %cst_33 : f32 to vector<8x16x1xf32>
    %84 = arith.subf %83, %82 : vector<8x16x1xf32>
    %85 = arith.mulf %81, %84 : vector<8x16x1xf32>
    %86 = vector.broadcast %85 : vector<8x16x1xf32> to vector<8x16x16xf32>
    %87 = arith.mulf %78, %86 : vector<8x16x16xf32>
    "tpu.trace_start"() <{level = 10 : i32, message = "bqk,bkd->bqd"}> : () -> ()
    %cst_34 = arith.constant dense<0.000000e+00> : vector<8x16x16xf32>
    %88 = tpu.matmul %87, %72, %cst_34 {dimension_numbers = #tpu.dot_dimension_numbers<[2], [1], [1], [2], [0, 0, 0, 1, 1, 2], [0], [0]>} : vector<8x16x16xf32>, vector<8x16x16xf32>, vector<8x16x16xf32> -> vector<8x16x16xf32>
    "tpu.trace_stop"() : () -> ()
    %89 = vector.extract_strided_slice %29 {offsets = [0, 0, 48], sizes = [8, 16, 16], strides = [1, 1, 1]} : vector<8x16x128xf32> to vector<8x16x16xf32>
    %90 = vector.extract_strided_slice %30 {offsets = [0, 0, 48], sizes = [8, 16, 16], strides = [1, 1, 1]} : vector<8x16x128xf32> to vector<8x16x16xf32>
    %91 = vector.extract_strided_slice %31 {offsets = [0, 0, 48], sizes = [8, 16, 16], strides = [1, 1, 1]} : vector<8x16x128xf32> to vector<8x16x16xf32>
    "tpu.trace_start"() <{level = 10 : i32, message = "bqd,bkd->bqk"}> : () -> ()
    %cst_35 = arith.constant dense<0.000000e+00> : vector<8x16x16xf32>
    %92 = tpu.matmul %89, %90, %cst_35 {dimension_numbers = #tpu.dot_dimension_numbers<[2], [2], [1], [1], [0, 0, 0, 1, 1, 1], [0], [0]>} : vector<8x16x16xf32>, vector<8x16x16xf32>, vector<8x16x16xf32> -> vector<8x16x16xf32>
    "tpu.trace_stop"() : () -> ()
    %cst_36 = arith.constant dense<0xFF800000> : vector<8x16xf32>
    %93 = vector.multi_reduction <maximumf>, %92, %cst_36 [2] : vector<8x16x16xf32> to vector<8x16xf32>
    %94 = vector.shape_cast %93 : vector<8x16xf32> to vector<8x16x1xf32>
    %95 = vector.broadcast %94 : vector<8x16x1xf32> to vector<8x16x16xf32>
    %96 = arith.subf %92, %95 : vector<8x16x16xf32>
    %97 = math.exp %96 : vector<8x16x16xf32>
    %cst_37 = arith.constant dense<0.000000e+00> : vector<8x16xf32>
    %98 = vector.multi_reduction <add>, %97, %cst_37 [2] : vector<8x16x16xf32> to vector<8x16xf32>
    %99 = vector.shape_cast %98 : vector<8x16xf32> to vector<8x16x1xf32>
    %100 = tpu.reciprocal %99 {approx = true} : vector<8x16x1xf32> -> vector<8x16x1xf32>
    %101 = arith.mulf %99, %100 : vector<8x16x1xf32>
    %cst_38 = arith.constant 2.000000e+00 : f32
    %102 = vector.broadcast %cst_38 : f32 to vector<8x16x1xf32>
    %103 = arith.subf %102, %101 : vector<8x16x1xf32>
    %104 = arith.mulf %100, %103 : vector<8x16x1xf32>
    %105 = vector.broadcast %104 : vector<8x16x1xf32> to vector<8x16x16xf32>
    %106 = arith.mulf %97, %105 : vector<8x16x16xf32>
    "tpu.trace_start"() <{level = 10 : i32, message = "bqk,bkd->bqd"}> : () -> ()
    %cst_39 = arith.constant dense<0.000000e+00> : vector<8x16x16xf32>
    %107 = tpu.matmul %106, %91, %cst_39 {dimension_numbers = #tpu.dot_dimension_numbers<[2], [1], [1], [2], [0, 0, 0, 1, 1, 2], [0], [0]>} : vector<8x16x16xf32>, vector<8x16x16xf32>, vector<8x16x16xf32> -> vector<8x16x16xf32>
    "tpu.trace_stop"() : () -> ()
    %108 = vector.extract_strided_slice %29 {offsets = [0, 0, 64], sizes = [8, 16, 16], strides = [1, 1, 1]} : vector<8x16x128xf32> to vector<8x16x16xf32>
    %109 = vector.extract_strided_slice %30 {offsets = [0, 0, 64], sizes = [8, 16, 16], strides = [1, 1, 1]} : vector<8x16x128xf32> to vector<8x16x16xf32>
    %110 = vector.extract_strided_slice %31 {offsets = [0, 0, 64], sizes = [8, 16, 16], strides = [1, 1, 1]} : vector<8x16x128xf32> to vector<8x16x16xf32>
    "tpu.trace_start"() <{level = 10 : i32, message = "bqd,bkd->bqk"}> : () -> ()
    %cst_40 = arith.constant dense<0.000000e+00> : vector<8x16x16xf32>
    %111 = tpu.matmul %108, %109, %cst_40 {dimension_numbers = #tpu.dot_dimension_numbers<[2], [2], [1], [1], [0, 0, 0, 1, 1, 1], [0], [0]>} : vector<8x16x16xf32>, vector<8x16x16xf32>, vector<8x16x16xf32> -> vector<8x16x16xf32>
    "tpu.trace_stop"() : () -> ()
    %cst_41 = arith.constant dense<0xFF800000> : vector<8x16xf32>
    %112 = vector.multi_reduction <maximumf>, %111, %cst_41 [2] : vector<8x16x16xf32> to vector<8x16xf32>
    %113 = vector.shape_cast %112 : vector<8x16xf32> to vector<8x16x1xf32>
    %114 = vector.broadcast %113 : vector<8x16x1xf32> to vector<8x16x16xf32>
    %115 = arith.subf %111, %114 : vector<8x16x16xf32>
    %116 = math.exp %115 : vector<8x16x16xf32>
    %cst_42 = arith.constant dense<0.000000e+00> : vector<8x16xf32>
    %117 = vector.multi_reduction <add>, %116, %cst_42 [2] : vector<8x16x16xf32> to vector<8x16xf32>
    %118 = vector.shape_cast %117 : vector<8x16xf32> to vector<8x16x1xf32>
    %119 = tpu.reciprocal %118 {approx = true} : vector<8x16x1xf32> -> vector<8x16x1xf32>
    %120 = arith.mulf %118, %119 : vector<8x16x1xf32>
    %cst_43 = arith.constant 2.000000e+00 : f32
    %121 = vector.broadcast %cst_43 : f32 to vector<8x16x1xf32>
    %122 = arith.subf %121, %120 : vector<8x16x1xf32>
    %123 = arith.mulf %119, %122 : vector<8x16x1xf32>
    %124 = vector.broadcast %123 : vector<8x16x1xf32> to vector<8x16x16xf32>
    %125 = arith.mulf %116, %124 : vector<8x16x16xf32>
    "tpu.trace_start"() <{level = 10 : i32, message = "bqk,bkd->bqd"}> : () -> ()
    %cst_44 = arith.constant dense<0.000000e+00> : vector<8x16x16xf32>
    %126 = tpu.matmul %125, %110, %cst_44 {dimension_numbers = #tpu.dot_dimension_numbers<[2], [1], [1], [2], [0, 0, 0, 1, 1, 2], [0], [0]>} : vector<8x16x16xf32>, vector<8x16x16xf32>, vector<8x16x16xf32> -> vector<8x16x16xf32>
    "tpu.trace_stop"() : () -> ()
    %127 = vector.extract_strided_slice %29 {offsets = [0, 0, 80], sizes = [8, 16, 16], strides = [1, 1, 1]} : vector<8x16x128xf32> to vector<8x16x16xf32>
    %128 = vector.extract_strided_slice %30 {offsets = [0, 0, 80], sizes = [8, 16, 16], strides = [1, 1, 1]} : vector<8x16x128xf32> to vector<8x16x16xf32>
    %129 = vector.extract_strided_slice %31 {offsets = [0, 0, 80], sizes = [8, 16, 16], strides = [1, 1, 1]} : vector<8x16x128xf32> to vector<8x16x16xf32>
    "tpu.trace_start"() <{level = 10 : i32, message = "bqd,bkd->bqk"}> : () -> ()
    %cst_45 = arith.constant dense<0.000000e+00> : vector<8x16x16xf32>
    %130 = tpu.matmul %127, %128, %cst_45 {dimension_numbers = #tpu.dot_dimension_numbers<[2], [2], [1], [1], [0, 0, 0, 1, 1, 1], [0], [0]>} : vector<8x16x16xf32>, vector<8x16x16xf32>, vector<8x16x16xf32> -> vector<8x16x16xf32>
    "tpu.trace_stop"() : () -> ()
    %cst_46 = arith.constant dense<0xFF800000> : vector<8x16xf32>
    %131 = vector.multi_reduction <maximumf>, %130, %cst_46 [2] : vector<8x16x16xf32> to vector<8x16xf32>
    %132 = vector.shape_cast %131 : vector<8x16xf32> to vector<8x16x1xf32>
    %133 = vector.broadcast %132 : vector<8x16x1xf32> to vector<8x16x16xf32>
    %134 = arith.subf %130, %133 : vector<8x16x16xf32>
    %135 = math.exp %134 : vector<8x16x16xf32>
    %cst_47 = arith.constant dense<0.000000e+00> : vector<8x16xf32>
    %136 = vector.multi_reduction <add>, %135, %cst_47 [2] : vector<8x16x16xf32> to vector<8x16xf32>
    %137 = vector.shape_cast %136 : vector<8x16xf32> to vector<8x16x1xf32>
    %138 = tpu.reciprocal %137 {approx = true} : vector<8x16x1xf32> -> vector<8x16x1xf32>
    %139 = arith.mulf %137, %138 : vector<8x16x1xf32>
    %cst_48 = arith.constant 2.000000e+00 : f32
    %140 = vector.broadcast %cst_48 : f32 to vector<8x16x1xf32>
    %141 = arith.subf %140, %139 : vector<8x16x1xf32>
    %142 = arith.mulf %138, %141 : vector<8x16x1xf32>
    %143 = vector.broadcast %142 : vector<8x16x1xf32> to vector<8x16x16xf32>
    %144 = arith.mulf %135, %143 : vector<8x16x16xf32>
    "tpu.trace_start"() <{level = 10 : i32, message = "bqk,bkd->bqd"}> : () -> ()
    %cst_49 = arith.constant dense<0.000000e+00> : vector<8x16x16xf32>
    %145 = tpu.matmul %144, %129, %cst_49 {dimension_numbers = #tpu.dot_dimension_numbers<[2], [1], [1], [2], [0, 0, 0, 1, 1, 2], [0], [0]>} : vector<8x16x16xf32>, vector<8x16x16xf32>, vector<8x16x16xf32> -> vector<8x16x16xf32>
    "tpu.trace_stop"() : () -> ()
    %146 = vector.extract_strided_slice %29 {offsets = [0, 0, 96], sizes = [8, 16, 16], strides = [1, 1, 1]} : vector<8x16x128xf32> to vector<8x16x16xf32>
    %147 = vector.extract_strided_slice %30 {offsets = [0, 0, 96], sizes = [8, 16, 16], strides = [1, 1, 1]} : vector<8x16x128xf32> to vector<8x16x16xf32>
    %148 = vector.extract_strided_slice %31 {offsets = [0, 0, 96], sizes = [8, 16, 16], strides = [1, 1, 1]} : vector<8x16x128xf32> to vector<8x16x16xf32>
    "tpu.trace_start"() <{level = 10 : i32, message = "bqd,bkd->bqk"}> : () -> ()
    %cst_50 = arith.constant dense<0.000000e+00> : vector<8x16x16xf32>
    %149 = tpu.matmul %146, %147, %cst_50 {dimension_numbers = #tpu.dot_dimension_numbers<[2], [2], [1], [1], [0, 0, 0, 1, 1, 1], [0], [0]>} : vector<8x16x16xf32>, vector<8x16x16xf32>, vector<8x16x16xf32> -> vector<8x16x16xf32>
    "tpu.trace_stop"() : () -> ()
    %cst_51 = arith.constant dense<0xFF800000> : vector<8x16xf32>
    %150 = vector.multi_reduction <maximumf>, %149, %cst_51 [2] : vector<8x16x16xf32> to vector<8x16xf32>
    %151 = vector.shape_cast %150 : vector<8x16xf32> to vector<8x16x1xf32>
    %152 = vector.broadcast %151 : vector<8x16x1xf32> to vector<8x16x16xf32>
    %153 = arith.subf %149, %152 : vector<8x16x16xf32>
    %154 = math.exp %153 : vector<8x16x16xf32>
    %cst_52 = arith.constant dense<0.000000e+00> : vector<8x16xf32>
    %155 = vector.multi_reduction <add>, %154, %cst_52 [2] : vector<8x16x16xf32> to vector<8x16xf32>
    %156 = vector.shape_cast %155 : vector<8x16xf32> to vector<8x16x1xf32>
    %157 = tpu.reciprocal %156 {approx = true} : vector<8x16x1xf32> -> vector<8x16x1xf32>
    %158 = arith.mulf %156, %157 : vector<8x16x1xf32>
    %cst_53 = arith.constant 2.000000e+00 : f32
    %159 = vector.broadcast %cst_53 : f32 to vector<8x16x1xf32>
    %160 = arith.subf %159, %158 : vector<8x16x1xf32>
    %161 = arith.mulf %157, %160 : vector<8x16x1xf32>
    %162 = vector.broadcast %161 : vector<8x16x1xf32> to vector<8x16x16xf32>
    %163 = arith.mulf %154, %162 : vector<8x16x16xf32>
    "tpu.trace_start"() <{level = 10 : i32, message = "bqk,bkd->bqd"}> : () -> ()
    %cst_54 = arith.constant dense<0.000000e+00> : vector<8x16x16xf32>
    %164 = tpu.matmul %163, %148, %cst_54 {dimension_numbers = #tpu.dot_dimension_numbers<[2], [1], [1], [2], [0, 0, 0, 1, 1, 2], [0], [0]>} : vector<8x16x16xf32>, vector<8x16x16xf32>, vector<8x16x16xf32> -> vector<8x16x16xf32>
    "tpu.trace_stop"() : () -> ()
    %165 = vector.extract_strided_slice %29 {offsets = [0, 0, 112], sizes = [8, 16, 16], strides = [1, 1, 1]} : vector<8x16x128xf32> to vector<8x16x16xf32>
    %166 = vector.extract_strided_slice %30 {offsets = [0, 0, 112], sizes = [8, 16, 16], strides = [1, 1, 1]} : vector<8x16x128xf32> to vector<8x16x16xf32>
    %167 = vector.extract_strided_slice %31 {offsets = [0, 0, 112], sizes = [8, 16, 16], strides = [1, 1, 1]} : vector<8x16x128xf32> to vector<8x16x16xf32>
    "tpu.trace_start"() <{level = 10 : i32, message = "bqd,bkd->bqk"}> : () -> ()
    %cst_55 = arith.constant dense<0.000000e+00> : vector<8x16x16xf32>
    %168 = tpu.matmul %165, %166, %cst_55 {dimension_numbers = #tpu.dot_dimension_numbers<[2], [2], [1], [1], [0, 0, 0, 1, 1, 1], [0], [0]>} : vector<8x16x16xf32>, vector<8x16x16xf32>, vector<8x16x16xf32> -> vector<8x16x16xf32>
    "tpu.trace_stop"() : () -> ()
    %cst_56 = arith.constant dense<0xFF800000> : vector<8x16xf32>
    %169 = vector.multi_reduction <maximumf>, %168, %cst_56 [2] : vector<8x16x16xf32> to vector<8x16xf32>
    %170 = vector.shape_cast %169 : vector<8x16xf32> to vector<8x16x1xf32>
    %171 = vector.broadcast %170 : vector<8x16x1xf32> to vector<8x16x16xf32>
    %172 = arith.subf %168, %171 : vector<8x16x16xf32>
    %173 = math.exp %172 : vector<8x16x16xf32>
    %cst_57 = arith.constant dense<0.000000e+00> : vector<8x16xf32>
    %174 = vector.multi_reduction <add>, %173, %cst_57 [2] : vector<8x16x16xf32> to vector<8x16xf32>
    %175 = vector.shape_cast %174 : vector<8x16xf32> to vector<8x16x1xf32>
    %176 = tpu.reciprocal %175 {approx = true} : vector<8x16x1xf32> -> vector<8x16x1xf32>
    %177 = arith.mulf %175, %176 : vector<8x16x1xf32>
    %cst_58 = arith.constant 2.000000e+00 : f32
    %178 = vector.broadcast %cst_58 : f32 to vector<8x16x1xf32>
    %179 = arith.subf %178, %177 : vector<8x16x1xf32>
    %180 = arith.mulf %176, %179 : vector<8x16x1xf32>
    %181 = vector.broadcast %180 : vector<8x16x1xf32> to vector<8x16x16xf32>
    %182 = arith.mulf %173, %181 : vector<8x16x16xf32>
    "tpu.trace_start"() <{level = 10 : i32, message = "bqk,bkd->bqd"}> : () -> ()
    %cst_59 = arith.constant dense<0.000000e+00> : vector<8x16x16xf32>
    %183 = tpu.matmul %182, %167, %cst_59 {dimension_numbers = #tpu.dot_dimension_numbers<[2], [1], [1], [2], [0, 0, 0, 1, 1, 2], [0], [0]>} : vector<8x16x16xf32>, vector<8x16x16xf32>, vector<8x16x16xf32> -> vector<8x16x16xf32>
    "tpu.trace_stop"() : () -> ()
    %184 = tpu.concatenate %50, %69, %88, %107, %126, %145, %164, %183 in 2 : vector<8x16x16xf32>, vector<8x16x16xf32>, vector<8x16x16xf32>, vector<8x16x16xf32>, vector<8x16x16xf32>, vector<8x16x16xf32>, vector<8x16x16xf32>, vector<8x16x16xf32> -> vector<8x16x128xf32>
    %185 = vector.shape_cast %184 : vector<8x16x128xf32> to vector<128x128xf32>
    %cst_60 = arith.constant dense<0.000000e+00> : vector<128x128xf32>
    %186 = tpu.matmul %185, %7, %cst_60 {dimension_numbers = #tpu.dot_dimension_numbers<[1], [0], [0], [1], [0, 0, 1, 1], [], []>} : vector<128x128xf32>, vector<128x128xf32>, vector<128x128xf32> -> vector<128x128xf32>
    %187 = vector.extract_strided_slice %13 {offsets = [3, 0], sizes = [1, 128], strides = [1, 1]} : vector<9x128xf32> to vector<1x128xf32>
    %188 = vector.broadcast %187 : vector<1x128xf32> to vector<128x128xf32>
    %189 = arith.addf %186, %188 : vector<128x128xf32>
    %190 = arith.addf %3, %189 : vector<128x128xf32>
    %191 = vector.extract_strided_slice %13 {offsets = [4, 0], sizes = [1, 128], strides = [1, 1]} : vector<9x128xf32> to vector<1x128xf32>
    %192 = vector.extract_strided_slice %13 {offsets = [5, 0], sizes = [1, 128], strides = [1, 1]} : vector<9x128xf32> to vector<1x128xf32>
    %cst_61 = arith.constant dense<0.000000e+00> : vector<128xf32>
    %193 = vector.multi_reduction <add>, %190, %cst_61 [1] : vector<128x128xf32> to vector<128xf32>
    %194 = vector.shape_cast %193 : vector<128xf32> to vector<128x1xf32>
    %cst_62 = arith.constant 1.280000e+02 : f32
    %195 = vector.broadcast %cst_62 : f32 to vector<128x1xf32>
    %196 = arith.divf %194, %195 : vector<128x1xf32>
    %197 = vector.broadcast %196 : vector<128x1xf32> to vector<128x128xf32>
    %198 = arith.subf %190, %197 : vector<128x128xf32>
    %199 = arith.mulf %198, %198 : vector<128x128xf32>
    %cst_63 = arith.constant dense<0.000000e+00> : vector<128xf32>
    %200 = vector.multi_reduction <add>, %199, %cst_63 [1] : vector<128x128xf32> to vector<128xf32>
    %201 = vector.shape_cast %200 : vector<128xf32> to vector<128x1xf32>
    %cst_64 = arith.constant 1.280000e+02 : f32
    %202 = vector.broadcast %cst_64 : f32 to vector<128x1xf32>
    %203 = arith.divf %201, %202 : vector<128x1xf32>
    %204 = vector.broadcast %196 : vector<128x1xf32> to vector<128x128xf32>
    %205 = arith.subf %190, %204 : vector<128x128xf32>
    %cst_65 = arith.constant 9.99999974E-6 : f32
    %206 = vector.broadcast %cst_65 : f32 to vector<128x1xf32>
    %207 = arith.addf %203, %206 : vector<128x1xf32>
    %208 = math.rsqrt %207 : vector<128x1xf32>
    %209 = vector.broadcast %208 : vector<128x1xf32> to vector<128x128xf32>
    %210 = arith.mulf %205, %209 : vector<128x128xf32>
    %211 = vector.broadcast %191 : vector<1x128xf32> to vector<128x128xf32>
    %212 = arith.mulf %210, %211 : vector<128x128xf32>
    %213 = vector.broadcast %192 : vector<1x128xf32> to vector<128x128xf32>
    %214 = arith.addf %212, %213 : vector<128x128xf32>
    %cst_66 = arith.constant dense<0.000000e+00> : vector<128x256xf32>
    %215 = tpu.matmul %214, %9, %cst_66 {dimension_numbers = #tpu.dot_dimension_numbers<[1], [0], [0], [1], [0, 0, 1, 1], [], []>} : vector<128x128xf32>, vector<128x256xf32>, vector<128x256xf32> -> vector<128x256xf32>
    %216 = vector.broadcast %15 : vector<1x256xf32> to vector<128x256xf32>
    %217 = arith.addf %215, %216 : vector<128x256xf32>
    %cst_67 = arith.constant 0.000000e+00 : f32
    %218 = vector.broadcast %cst_67 : f32 to vector<128x256xf32>
    %219 = arith.maximumf %217, %218 : vector<128x256xf32>
    %cst_68 = arith.constant dense<0.000000e+00> : vector<128x128xf32>
    %220 = tpu.matmul %219, %11, %cst_68 {dimension_numbers = #tpu.dot_dimension_numbers<[1], [0], [0], [1], [0, 0, 1, 1], [], []>} : vector<128x256xf32>, vector<256x128xf32>, vector<128x128xf32> -> vector<128x128xf32>
    %221 = vector.extract_strided_slice %13 {offsets = [6, 0], sizes = [1, 128], strides = [1, 1]} : vector<9x128xf32> to vector<1x128xf32>
    %222 = vector.broadcast %221 : vector<1x128xf32> to vector<128x128xf32>
    %223 = arith.addf %220, %222 : vector<128x128xf32>
    %224 = arith.addf %214, %223 : vector<128x128xf32>
    %225 = vector.extract_strided_slice %13 {offsets = [7, 0], sizes = [1, 128], strides = [1, 1]} : vector<9x128xf32> to vector<1x128xf32>
    %226 = vector.extract_strided_slice %13 {offsets = [8, 0], sizes = [1, 128], strides = [1, 1]} : vector<9x128xf32> to vector<1x128xf32>
    %cst_69 = arith.constant dense<0.000000e+00> : vector<128xf32>
    %227 = vector.multi_reduction <add>, %224, %cst_69 [1] : vector<128x128xf32> to vector<128xf32>
    %228 = vector.shape_cast %227 : vector<128xf32> to vector<128x1xf32>
    %cst_70 = arith.constant 1.280000e+02 : f32
    %229 = vector.broadcast %cst_70 : f32 to vector<128x1xf32>
    %230 = arith.divf %228, %229 : vector<128x1xf32>
    %231 = vector.broadcast %230 : vector<128x1xf32> to vector<128x128xf32>
    %232 = arith.subf %224, %231 : vector<128x128xf32>
    %233 = arith.mulf %232, %232 : vector<128x128xf32>
    %cst_71 = arith.constant dense<0.000000e+00> : vector<128xf32>
    %234 = vector.multi_reduction <add>, %233, %cst_71 [1] : vector<128x128xf32> to vector<128xf32>
    %235 = vector.shape_cast %234 : vector<128xf32> to vector<128x1xf32>
    %cst_72 = arith.constant 1.280000e+02 : f32
    %236 = vector.broadcast %cst_72 : f32 to vector<128x1xf32>
    %237 = arith.divf %235, %236 : vector<128x1xf32>
    %238 = vector.broadcast %230 : vector<128x1xf32> to vector<128x128xf32>
    %239 = arith.subf %224, %238 : vector<128x128xf32>
    %cst_73 = arith.constant 9.99999974E-6 : f32
    %240 = vector.broadcast %cst_73 : f32 to vector<128x1xf32>
    %241 = arith.addf %237, %240 : vector<128x1xf32>
    %242 = math.rsqrt %241 : vector<128x1xf32>
    %243 = vector.broadcast %242 : vector<128x1xf32> to vector<128x128xf32>
    %244 = arith.mulf %239, %243 : vector<128x128xf32>
    %245 = vector.broadcast %225 : vector<1x128xf32> to vector<128x128xf32>
    %246 = arith.mulf %244, %245 : vector<128x128xf32>
    %247 = vector.broadcast %226 : vector<1x128xf32> to vector<128x128xf32>
    %248 = arith.addf %246, %247 : vector<128x128xf32>
    %c0_74 = arith.constant 0 : index
    %c0_75 = arith.constant 0 : index
    %249 = vector.load %arg9[%c0_74, %c0_75] : memref<128x128xf32, #tpu.memory_space<vmem>>, vector<128x128xf32>
    tpu.vector_store %arg9[%c0_74, %c0_75], %248 {strides = array<i32>} : memref<128x128xf32, #tpu.memory_space<vmem>>, vector<128x128xf32>,
    %c1_i32 = arith.constant 1 : i32
    %250 = arith.cmpi eq, %arg0, %c1_i32 : i32
    %251 = arith.extui %250 : i1 to i32
    %c0_i32_76 = arith.constant 0 : i32
    %252 = arith.cmpi ne, %251, %c0_i32_76 : i32
    scf.if %252 {
      %c0_77 = arith.constant 0 : index
      %c0_78 = arith.constant 0 : index
      %253 = vector.load %arg8[%c0_77, %c0_78] : memref<128x128xf32, #tpu.memory_space<vmem>>, vector<128x128xf32>
      tpu.vector_store %arg8[%c0_77, %c0_78], %248 {strides = array<i32>} : memref<128x128xf32, #tpu.memory_space<vmem>>, vector<128x128xf32>,
    } else {
    }
    return
  }
  func.func @transform_0(%arg0: i32) -> (i32, i32) {
    %c0_i32 = arith.constant 0 : i32
    %c0_i32_0 = arith.constant 0 : i32
    %c0_i32_1 = arith.constant 0 : i32
    return %c0_i32, %c0_i32_0 : i32, i32
  }
  func.func @transform_1(%arg0: i32) -> (i32, i32, i32) {
    %c0_i32 = arith.constant 0 : i32
    %c0_i32_0 = arith.constant 0 : i32
    %c0_i32_1 = arith.constant 0 : i32
    return %arg0, %c0_i32, %c0_i32_0 : i32, i32, i32
  }
  func.func @transform_2(%arg0: i32) -> (i32, i32, i32) {
    %c0_i32 = arith.constant 0 : i32
    %c0_i32_0 = arith.constant 0 : i32
    %c0_i32_1 = arith.constant 0 : i32
    return %arg0, %c0_i32, %c0_i32_0 : i32, i32, i32
  }
  func.func @transform_3(%arg0: i32) -> (i32, i32, i32) {
    %c0_i32 = arith.constant 0 : i32
    %c0_i32_0 = arith.constant 0 : i32
    %c0_i32_1 = arith.constant 0 : i32
    return %arg0, %c0_i32, %c0_i32_0 : i32, i32, i32
  }
  func.func @transform_4(%arg0: i32) -> (i32, i32, i32) {
    %c0_i32 = arith.constant 0 : i32
    %c0_i32_0 = arith.constant 0 : i32
    %c0_i32_1 = arith.constant 0 : i32
    return %arg0, %c0_i32, %c0_i32_0 : i32, i32, i32
  }
  func.func @transform_5(%arg0: i32) -> (i32, i32, i32) {
    %c0_i32 = arith.constant 0 : i32
    %c0_i32_0 = arith.constant 0 : i32
    %c0_i32_1 = arith.constant 0 : i32
    return %arg0, %c0_i32, %c0_i32_0 : i32, i32, i32
  }
  func.func @transform_6(%arg0: i32) -> (i32, i32, i32) {
    %c0_i32 = arith.constant 0 : i32
    %c0_i32_0 = arith.constant 0 : i32
    %c0_i32_1 = arith.constant 0 : i32
    return %arg0, %c0_i32, %c0_i32_0 : i32, i32, i32
  }
  func.func @transform_7(%arg0: i32) -> (i32, i32) {
    %c0_i32 = arith.constant 0 : i32
    %c0_i32_0 = arith.constant 0 : i32
    %c0_i32_1 = arith.constant 0 : i32
    return %c0_i32, %c0_i32_0 : i32, i32
  }
}

</mosaic_0001>

<bundles_post_ra>
// kernel: tpu_custom_call.1
= control target key start
LH: loop header
LB: loop body
LE: loop exit
PB: predicated region body
PF: predicated region fallthrough
CT: control target
= control target key end

     0   :  { %s15941_s0 = inlined_call_operand.hbm [shape: f32[128,128], index: 0, kind: input, shape index: {}]   ;;  %s15942_s1 = inlined_call_operand.hbm [shape: f32[2,128,384], index: 1, kind: input, shape index: {}]   ;;  %s15943_s2 = inlined_call_operand.hbm [shape: f32[2,128,128], index: 2, kind: input, shape index: {}]   ;;  %s15944_s3 = inlined_call_operand.hbm [shape: f32[2,128,256], index: 3, kind: input, shape index: {}]   ;;  %s15945_s4 = inlined_call_operand.hbm [shape: f32[2,256,128], index: 4, kind: input, shape index: {}]   ;;  %s15946_s5 = inlined_call_operand.vmem [shape: f32[2,9,128], index: 5, kind: input, shape index: {}]   ;;  %s15947_s6 = inlined_call_operand.vmem [shape: f32[2,1,256], index: 6, kind: input, shape index: {}]   ;;  %s15948_s7 = inlined_call_operand.hbm [shape: f32[128,128], index: 7, kind: output, shape index: {}]  }
   0x1   :  { %16070 = sst [smem:[#allocation141_spill]] %s15941_s0 }
   0x2   :  { %16071 = sst [smem:[#allocation142_spill]] %s15942_s1 }
   0x3   :  { %16072 = sst [smem:[#allocation143_spill]] %s15944_s3 }
   0x4   :  { %12 = vsyncpa [#allocation4], 0 }
   0x5   :  { %13 = vsyncpa [#allocation7], 0 }
   0x6   :  { %15 = vsyncpa [#allocation7 + $0x1], 0 }
   0x7   :  { %16 = vsyncpa [#allocation10], 0 }
   0x8   :  { %18 = vsyncpa [#allocation10 + $0x1], 0 }
   0x9   :  { %19 = vsyncpa [#allocation5], 0  ;;  %s11195_s24 = smov 0   ;;  %s11197_s25 = smov 0  }
   0xa   :  { %s11199_s26 = smov 0   ;;  %s11201_s27 = smov 0  }
   0xb LB: > { %16073 = sst [smem:[#allocation17_spill]] %s11131_s26  ;;  %s11216_s28 = sadd.s32 1, %s11135_s27   ;;  %s11135_s27 = sphi %s11201_s27, %s16635_s27   ;;  %s11131_s26 = sphi %s11199_s26, %s16632_s26   ;;  %s11127_s25 = sphi %s11197_s25, %s16634_s25   ;;  %s11123_s24 = sphi %s11195_s24, %s16633_s24  }
   0xc   : > { %s53_s29 = sadd.s32 1, %s11131_s26  ;;  %s50_s30 = ssub.s32 %s11135_s27, %s11216_s28 }
   0xd   : > { %p60_p0 = scmp.ne.s32.totalorder %s11131_s26, %s11127_s25  ;;  %p51_p1 = scmp.eq.s32.totalorder %s50_s30, 0 }
   0xe   : > { %p61_p2 = scmp.eq.s32.totalorder %s11135_s27, 0  ;;  %p9715_p3 = scmp.lt.s32.totalorder %s11135_s27, 2 }
   0xf   : > { %s11226_s8 = scalar_select %p51_p1, %s11131_s26, %s53_s29  }
  0x10   : > { %p62_p4 = por %p61_p2, %p60_p0  ;;  %s255_s9 = sand.u32 1, %s11135_s27  }
  0x11   : > { %16074 = sst [smem:[#allocation18_spill]] %s11226_s8  ;;  %s11230_s10 = sand.u32 1, %s11131_s26  }
  0x12   : > { %s9678_s11 = smul.u32 384, %s11230_s10  ;;  %p11233_p5 = pnand %p9715_p3, %p62_p4 }
  0x13   : > { %s9679_s13 = smul.u32 384, %s11135_s27  ;;  %s16076_s1 = sld [smem:[#allocation142_spill]] }
  0x14   : > { %s259_s17 = scalar_lea.vmem [#allocation6], %s9678_s11  ;;  %s11243_s20 = scalar_lea.sflag [#allocation7], %s255_s9 }
  0x15   : > { %s267_s18 = sshll.u32 %s259_s17, 4  ;;  %p10915_p7 = pneg %p11233_p5  ;;  %s268_s18 = int_to_ptr.vmem [resolvable:$true] %s267_s18 }
  0x19   : > { %s264_s16 = scalar_lea.hbm %s16076_s1, %s9679_s13  ;;  %s10918_s30 = scalar_lea.hbm %s16076_s1, 768 }
  0x1a   : > { %s265_s19 = sshll.u32 %s264_s16, 4  ;;  %s266_s19 = int_to_ptr.hbm [resolvable:$true] %s265_s19 }
  0x1b   : > { %s10911_s21 = sshra.s32 %s266_s19, 4  ;;  %s10912_s21 = int_to_ptr.hbm [resolvable:$true] %s10911_s21 }
  0x1c   : > { %s10913_s22 = scalar_lea.hbm %s10912_s21, 384  ;;  %p10919_p10 = scmp.lt.s32.totalorder %s10912_s21, %s16076_s1 }
  0x1d   : > { %p10914_p6 = scmp.ne.s32.totalorder %s10912_s21, %s10913_s22  ;;  %p10920_p11 = scmp.lt.s32.totalorder %s10918_s30, %s10913_s22 }
  0x1f   : > { %p10916_p8 = pnand %p10915_p7, %p10914_p6  ;;  %p10921_p12 = por %p10920_p11, %p10919_p10 }
  0x21   : > { %p10917_p9 = pneg %p10916_p8 }
  0x23   : > { %p10922_p13 = pnand %p10921_p12, %p10917_p9 }
  0x25   : > { %10925 = shalt.err (!%p10922_p13)
}
  0x26   : > { %s11137_s14 = smov 384   ;;  %s11138_s15 = smov 24  }
  0x27   : > { %9704 = dma.hbm_to_vmem [thread:$0]  (!%p11233_p5), %s266_s19, 6144, %s268_s18, %s11243_s20, %s11137_s14, %s11137_s14, %s11138_s15  }
  0x28   : > { %s9236_s16 = sshll.u32 %s11230_s10, 8  ;;  %s9641_s17 = sshll.u32 %s11135_s27, 8 }
  0x29   : > { %s16077_s3 = sld [smem:[#allocation143_spill]]  ;;  %s303_s22 = scalar_lea.vmem [#allocation9], %s9236_s16 }
  0x2a   : > { %s311_s30 = sshll.u32 %s303_s22, 4  ;;  %s11266_s13 = scalar_lea.sflag [#allocation10], %s255_s9  ;;  %s312_s30 = int_to_ptr.vmem [resolvable:$true] %s311_s30 }
  0x2f   : > { %s308_s21 = scalar_lea.hbm %s16077_s3, %s9641_s17  ;;  %s10948_s14 = scalar_lea.hbm %s16077_s3, 512 }
  0x30   : > { %s309_s11 = sshll.u32 %s308_s21, 4  ;;  %s310_s11 = int_to_ptr.hbm [resolvable:$true] %s309_s11 }
  0x31   : > { %s10941_s1 = sshra.s32 %s310_s11, 4  ;;  %s10942_s1 = int_to_ptr.hbm [resolvable:$true] %s10941_s1 }
  0x32   : > { %s10943_s8 = scalar_lea.hbm %s10942_s1, 256  ;;  %p10949_p3 = scmp.lt.s32.totalorder %s10942_s1, %s16077_s3 }
  0x33   : > { %p10944_p0 = scmp.ne.s32.totalorder %s10942_s1, %s10943_s8  ;;  %p10950_p4 = scmp.lt.s32.totalorder %s10948_s14, %s10943_s8 }
  0x35   : > { %p10946_p1 = pnand %p10944_p0, %p10915_p7  ;;  %p10951_p6 = por %p10950_p4, %p10949_p3 }
  0x37   : > { %p10947_p2 = pneg %p10946_p1 }
  0x39   : > { %p10952_p8 = pnand %p10951_p6, %p10947_p2 }
  0x3b   : > { %10955 = shalt.err (!%p10952_p8)
}
  0x3c   : > { %s11139_s9 = smov 256   ;;  %s11140_s29 = smov 16  }
  0x3d   : > { %9710 = dma.hbm_to_vmem [thread:$0]  (!%p11233_p5), %s310_s11, 4096, %s312_s30, %s11266_s13, %s11139_s9, %s11139_s9, %s11140_s29  }
  0x3e   : > { %s330_s18 = scalar_lea.hbm %s15945_s4, %s9641_s17  ;;  %s325_s1 = scalar_lea.vmem [#allocation11], %s9236_s16 }
  0x3f   : > { %s333_s8 = sshll.u32 %s325_s1, 4  ;;  %s331_s19 = sshll.u32 %s330_s18, 4  ;;  %s11283_s8 = int_to_ptr.vmem [resolvable:$true] %s333_s8  ;;  %s11285_s19 = int_to_ptr.hbm [resolvable:$true] %s331_s19 }
  0x40   : > { %s11288_s14 = sadd.s32 4294967295, %s11135_s27   ;;  %p66_p9 = scmp.ne.s32.totalorder %s11127_s25, %s11123_s24 }
  0x41   : > { %p67_p10 = scmp.eq.s32.totalorder %s11288_s14, 0  ;;  %p9229_p11 = scmp.ge.s32.totalorder %s11135_s27, 1 }
  0x42   : > { %p228_p12 = scmp.lt.s32.totalorder %s11135_s27, 3  ;;  %p9230_p0 = scmp.ne.s32.totalorder %s11288_s14, 0 }
  0x43   : > { %p11297_p13 = por %p67_p10, %p66_p9  ;;  %s16080_s0 = sld [smem:[#allocation141_spill]] }
  0x44   : > { %p11302_p1 = pnand %p9229_p11, %p228_p12  ;;  %s11141_s24 = smov [#allocation3]  }
  0x45   : > { %s241_s23 = sshll.u32 %s11141_s24, 4  ;;  %s9233_s9 = sshll.u32 %s11230_s10, 7  ;;  %s242_s23 = int_to_ptr.vmem [resolvable:$true] %s241_s23 }
  0x46   : > { %p9697_p2 = pneg %p11302_p1  ;;  %s9640_s29 = sshll.u32 %s11135_s27, 7 }
  0x47   : > { %s11142_s21 = smov 128   ;;  %s11143_s22 = smov 8  }
  0x48   : > { %p9698_p3 = pnand %p9697_p2, %p67_p10  ;;  %s286_s30 = scalar_lea.hbm %s15943_s2, %s9640_s29 }
  0x49   : > { %s239_s15 = sshll.u32 %s16080_s0, 4  ;;  %s281_s11 = scalar_lea.vmem [#allocation8], %s9233_s9  ;;  %s240_s15 = int_to_ptr.hbm [resolvable:$true] %s239_s15 }
  0x4a   : > { %9700 = dma.hbm_to_vmem [thread:$0]  (!%p9698_p3), %s240_s15, 2048, %s242_s23, [#allocation4], %s11142_s21, %s11142_s21, %s11143_s22  }
  0x4b   : > { %s289_s0 = sshll.u32 %s281_s11, 4  ;;  %s287_s3 = sshll.u32 %s286_s30, 4  ;;  %s290_s0 = int_to_ptr.vmem [resolvable:$true] %s289_s0  ;;  %s288_s3 = int_to_ptr.hbm [resolvable:$true] %s287_s3 }
  0x4c   : > { %s11001_s24 = sshra.s32 %s288_s3, 4  ;;  %s11008_s15 = scalar_lea.hbm %s15943_s2, 256  ;;  %s11002_s24 = int_to_ptr.hbm [resolvable:$true] %s11001_s24 }
  0x4d   : > { %s11003_s26 = scalar_lea.hbm %s11002_s24, 128  ;;  %p11009_p9 = scmp.lt.s32.totalorder %s11002_s24, %s15943_s2 }
  0x4e   : > { %p11004_p4 = scmp.ne.s32.totalorder %s11002_s24, %s11003_s26  ;;  %p11010_p11 = scmp.lt.s32.totalorder %s11008_s15, %s11003_s26 }
  0x50   : > { %p11006_p6 = pnand %p11004_p4, %p10915_p7  ;;  %p11011_p12 = por %p11010_p11, %p11009_p9 }
  0x52   : > { %p11007_p8 = pneg %p11006_p6 }
  0x54   : > { %p11012_p2 = pnand %p11011_p12, %p11007_p8 }
  0x56   : > { %11015 = shalt.err (!%p11012_p2)
}
  0x57   : > { %9707 = dma.hbm_to_vmem [thread:$0]  (!%p11233_p5), %s288_s3, 2048, %s290_s0, %s11243_s20, %s11142_s21, %s11142_s21, %s11143_s22  }
  0x58   : > { %s11031_s9 = sshra.s32 %s11285_s19, 4  ;;  %s11038_s30 = scalar_lea.hbm %s15945_s4, 512  ;;  %s11032_s9 = int_to_ptr.hbm [resolvable:$true] %s11031_s9 }
  0x59   : > { %s11033_s29 = scalar_lea.hbm %s11032_s9, 256  ;;  %p11039_p8 = scmp.lt.s32.totalorder %s11032_s9, %s15945_s4 }
  0x5a   : > { %p11034_p3 = scmp.ne.s32.totalorder %s11032_s9, %s11033_s29  ;;  %p11040_p9 = scmp.lt.s32.totalorder %s11038_s30, %s11033_s29 }
  0x5c   : > { %p11036_p4 = pnand %p11034_p3, %p10915_p7  ;;  %p11041_p11 = por %p11040_p9, %p11039_p8 }
  0x5e   : > { %p11037_p6 = pneg %p11036_p4 }
  0x60   : > { %p11042_p12 = pnand %p11041_p11, %p11037_p6 }
  0x62   : > { %11045 = shalt.err (!%p11042_p12)
}
  0x63   : > { %9713 = dma.hbm_to_vmem [thread:$0]  (!%p11233_p5), %s11285_s19, 4096, %s11283_s8, %s11266_s13, %s11142_s21, %s11142_s21, %s11143_s22  }
  0x64   : > { %360 = sbr.rel (%p11302_p1) target bundleno = 6045 (0x179d), region = 48 }
  0x69   : > { %11106 = dma.done.wait (%p67_p10), [#allocation4], 2048  }
  0x6a   : > { %11108 = vsyncadd (%p67_p10), [#allocation4], 4294965248  ;;  %s367_s0 = sand.u32 1, %s11288_s14   ;;  %s369_s3 = sand.u32 1, %s11127_s25  }
  0x6b   : > { %s9680_s12 = smul.u32 384, %s369_s3  ;;  %s368_s20 = scalar_lea.sflag [#allocation7], %s367_s0 }
  0x6d   : > { %s11362_s27 = scalar_lea.vmem [#allocation6], %s9680_s12 }
  0x6e   : > { %11110 = dma.done.wait (%p11297_p13), %s368_s20, 8192  }
  0x6f   : > { %11112 = vsyncadd (%p11297_p13), %s368_s20, 4294959104  ;;  %s9244_s13 = sshll.u32 %s369_s3, 7  ;;  %s9245_s8 = sshll.u32 %s369_s3, 8 }
  0x70   : > { %s11368_s19 = scalar_lea.vmem [#allocation8], %s9244_s13  ;;  %s388_s17 = scalar_lea.sflag [#allocation10], %s367_s0 }
  0x71   : > { %s11370_s21 = scalar_lea.vmem [#allocation9], %s9245_s8 }
  0x72   : > { %11114 = dma.done.wait (%p11297_p13), %s388_s17, 8192  }
  0x73   : > { %11116 = vsyncadd (%p11297_p13), %s388_s17, 4294959104  ;;  %p452_p5 = scmp.lt.s32.totalorder %s11288_s14, 1  ;;  %s11388_s30 = scalar_lea.vmem [#allocation11], %s9245_s8 }
  0x74   : > { %464 = sbr.rel (%p9230_p0) target bundleno = 138 (0x8a), region = 72 }
  0x75   : > { %s453_s22 = scalar_select %p452_p5, %s11288_s14, 1 }
  0x77   : > { %s9643_s10 = sshll.u32 %s453_s22, 4  ;;  %s9249_s15 = sshll.u32 %s453_s22, 1 }
  0x78   : > { %s11381_s9 = scalar_lea.vmem %s15946_s5, %s9643_s10  ;;  %s11386_s1 = scalar_lea.vmem %s15947_s6, %s9249_s15 }
  0x79   : > { %v465_v0 = vld [vmem:[#allocation3] sm:$0xff]  ;;  %v466_v1 = vld [vmem:[#allocation3 + $0x8] sm:$0xff]  ;;  %v467_v2 = vld [vmem:[#allocation3 + $0x10] sm:$0xff] }
  0x7a   : > { %481 = vst [vmem:[#allocation2 + $0x30] sm:$0xff] %v465_v0  ;;  %v468_v3 = vld [vmem:[#allocation3 + $0x18] sm:$0xff]  ;;  %v469_v4 = vld [vmem:[#allocation3 + $0x20] sm:$0xff]  ;;  %v470_v5 = vld [vmem:[#allocation3 + $0x28] sm:$0xff] }
  0x7b   : > { %482 = vst [vmem:[#allocation2] sm:$0xff] %v466_v1  ;;  %v471_v6 = vld [vmem:[#allocation3 + $0x30] sm:$0xff]  ;;  %v472_v7 = vld [vmem:[#allocation3 + $0x38] sm:$0xff]  ;;  %v473_v8 = vld [vmem:[#allocation3 + $0x40] sm:$0xff] }
  0x7c   : > { %483 = vst [vmem:[#allocation2 + $0x58] sm:$0xff] %v467_v2  ;;  %v474_v9 = vld [vmem:[#allocation3 + $0x48] sm:$0xff]  ;;  %v475_v10 = vld [vmem:[#allocation3 + $0x50] sm:$0xff]  ;;  %v476_v11 = vld [vmem:[#allocation3 + $0x58] sm:$0xff] }
  0x7d   : > { %484 = vst [vmem:[#allocation2 + $0x18] sm:$0xff] %v468_v3  ;;  %v477_v12 = vld [vmem:[#allocation3 + $0x60] sm:$0xff]  ;;  %v478_v13 = vld [vmem:[#allocation3 + $0x68] sm:$0xff]  ;;  %v479_v14 = vld [vmem:[#allocation3 + $0x70] sm:$0xff] }
  0x7e   : > { %485 = vst [vmem:[#allocation2 + $0x50] sm:$0xff] %v469_v4  ;;  %v480_v15 = vld [vmem:[#allocation3 + $0x78] sm:$0xff] }
  0x7f   : > { %486 = vst [vmem:[#allocation2 + $0x68] sm:$0xff] %v470_v5 }
  0x80   : > { %487 = vst [vmem:[#allocation2 + $0x8] sm:$0xff] %v471_v6 }
  0x81   : > { %488 = vst [vmem:[#allocation2 + $0x48] sm:$0xff] %v472_v7 }
  0x82   : > { %489 = vst [vmem:[#allocation2 + $0x40] sm:$0xff] %v473_v8 }
  0x83   : > { %490 = vst [vmem:[#allocation2 + $0x20] sm:$0xff] %v474_v9 }
  0x84   : > { %491 = vst [vmem:[#allocation2 + $0x10] sm:$0xff] %v475_v10 }
  0x85   : > { %492 = vst [vmem:[#allocation2 + $0x38] sm:$0xff] %v476_v11 }
  0x86   : > { %493 = vst [vmem:[#allocation2 + $0x60] sm:$0xff] %v477_v12 }
  0x87   : > { %494 = vst [vmem:[#allocation2 + $0x70] sm:$0xff] %v478_v13 }
  0x88   : > { %495 = vst [vmem:[#allocation2 + $0x78] sm:$0xff] %v479_v14 }
  0x89   : > { %496 = vst [vmem:[#allocation2 + $0x28] sm:$0xff] %v480_v15 }
  0x8a PF: > { %v558_v16 = vld [vmem:[%s11362_s27 + $0x168] sm:$0xff]  ;;  %v559_v17 = vld [vmem:[%s11362_s27 + $0x170] sm:$0xff]  ;;  %v556_v19 = vld [vmem:[%s11362_s27 + $0x158] sm:$0xff]  ;;  %s11144_s16 = smov 112   ;;  %s11145_s11 = smov 96   ;;  %vm890_vm0 = vcmask 130048  }
  0x8b   : > { %v555_v18 = vld [vmem:[%s11362_s27 + $0x150] sm:$0xff]  ;;  %644 = vmatpush.msra.mxu0 %v558_v16  ;;  %709 = vmatpush.msra.mxu1 %v559_v17  ;;  %v552_v20 = vld [vmem:[%s11362_s27 + $0x138] sm:$0xff]  ;;  %v553_v21 = vld [vmem:[%s11362_s27 + $0x140] sm:$0xff]  ;;  %s11146_s24 = smov 80   ;;  %s11147_s0 = smov 64   ;;  %vm7819_vm1 = vcmask 261120  }
  0x8c   : > { %v560_v22 = vld [vmem:[%s11362_s27 + $0x178] sm:$0xff]  ;;  %v549_v23 = vld [vmem:[%s11362_s27 + $0x120] sm:$0xff]  ;;  %v550_v24 = vld [vmem:[%s11362_s27 + $0x128] sm:$0xff]  ;;  %s11148_s3 = smov 48   ;;  %s11149_s12 = smov 32   ;;  %vm7836_vm2 = vcmask 392192  }
  0x8d   : > { %645 = vmatpush.msra.mxu0 %v555_v18  ;;  %710 = vmatpush.msra.mxu1 %v556_v19  ;;  %v557_v25 = vld [vmem:[%s11362_s27 + $0x160] sm:$0xff]  ;;  %v554_v26 = vld [vmem:[%s11362_s27 + $0x148] sm:$0xff]  ;;  %v547_v28 = vld [vmem:[%s11362_s27 + $0x110] sm:$0xff]  ;;  %s11150_s20 = smov 16   ;;  %vm7853_vm3 = vcmask 523264   ;;  %vm7870_vm4 = vcmask 654336  }
  0x8e   : > { %774 = vmatpush.msra.mxu2 %v560_v22  ;;  %v546_v27 = vld [vmem:[%s11362_s27 + $0x108] sm:$0xff]  ;;  %v551_v29 = vld [vmem:[%s11362_s27 + $0x130] sm:$0xff]  ;;  %v544_v31 = vld [vmem:[%s11362_s27 + $0xf8] sm:$0xff]  ;;  %vm7887_vm5 = vcmask 785408   ;;  %vm7904_vm6 = vcmask 916480   ;;  %p9635_p7 = scmp.ne.s32.totalorder %s11288_s14, 1 }
  0x8f   : > { %646 = vmatpush.msra.mxu0 %v552_v20  ;;  %711 = vmatpush.msra.mxu1 %v553_v21  ;;  %v543_v30 = vld [vmem:[%s11362_s27 + $0xf0] sm:$0xff]  ;;  %v548_v32 = vld [vmem:[%s11362_s27 + $0x118] sm:$0xff]  ;;  %v541_v34 = vld [vmem:[%s11362_s27 + $0xe0] sm:$0xff] }
  0x90   : > { %775 = vmatpush.msra.mxu2 %v557_v25  ;;  %v540_v33 = vld [vmem:[%s11362_s27 + $0xd8] sm:$0xff]  ;;  %v545_v35 = vld [vmem:[%s11362_s27 + $0x100] sm:$0xff]  ;;  %v538_v37 = vld [vmem:[%s11362_s27 + $0xc8] sm:$0xff] }
  0x91   : > { %647 = vmatpush.msra.mxu0 %v549_v23  ;;  %712 = vmatpush.msra.mxu1 %v550_v24  ;;  %v537_v36 = vld [vmem:[%s11362_s27 + $0xc0] sm:$0xff]  ;;  %v542_v38 = vld [vmem:[%s11362_s27 + $0xe8] sm:$0xff]  ;;  %v535_v40 = vld [vmem:[%s11362_s27 + $0xb0] sm:$0xff] }
  0x92   : > { %776 = vmatpush.msra.mxu2 %v554_v26  ;;  %v534_v39 = vld [vmem:[%s11362_s27 + $0xa8] sm:$0xff]  ;;  %v539_v41 = vld [vmem:[%s11362_s27 + $0xd0] sm:$0xff]  ;;  %v532_v43 = vld [vmem:[%s11362_s27 + $0x98] sm:$0xff] }
  0x93   : > { %648 = vmatpush.msra.mxu0 %v546_v27  ;;  %713 = vmatpush.msra.mxu1 %v547_v28  ;;  %v531_v42 = vld [vmem:[%s11362_s27 + $0x90] sm:$0xff]  ;;  %v536_v44 = vld [vmem:[%s11362_s27 + $0xb8] sm:$0xff]  ;;  %v529_v46 = vld [vmem:[%s11362_s27 + $0x80] sm:$0xff] }
  0x94   : > { %777 = vmatpush.msra.mxu2 %v551_v29  ;;  %v528_v45 = vld [vmem:[%s11362_s27 + $0x78] sm:$0xff]  ;;  %v533_v47 = vld [vmem:[%s11362_s27 + $0xa0] sm:$0xff]  ;;  %v526_v49 = vld [vmem:[%s11362_s27 + $0x68] sm:$0xff] }
  0x95   : > { %649 = vmatpush.msra.mxu0 %v543_v30  ;;  %714 = vmatpush.msra.mxu1 %v544_v31  ;;  %v525_v48 = vld [vmem:[%s11362_s27 + $0x60] sm:$0xff]  ;;  %v530_v50 = vld [vmem:[%s11362_s27 + $0x88] sm:$0xff]  ;;  %v523_v52 = vld [vmem:[%s11362_s27 + $0x50] sm:$0xff] }
  0x96   : > { %778 = vmatpush.msra.mxu2 %v548_v32  ;;  %v522_v51 = vld [vmem:[%s11362_s27 + $0x48] sm:$0xff]  ;;  %v527_v53 = vld [vmem:[%s11362_s27 + $0x70] sm:$0xff]  ;;  %v520_v55 = vld [vmem:[%s11362_s27 + $0x38] sm:$0xff] }
  0x97   : > { %650 = vmatpush.msra.mxu0 %v540_v33  ;;  %715 = vmatpush.msra.mxu1 %v541_v34  ;;  %v519_v54 = vld [vmem:[%s11362_s27 + $0x30] sm:$0xff]  ;;  %v524_v56 = vld [vmem:[%s11362_s27 + $0x58] sm:$0xff]  ;;  %v517_v58 = vld [vmem:[%s11362_s27 + $0x20] sm:$0xff] }
  0x98   : > { %779 = vmatpush.msra.mxu2 %v545_v35  ;;  %v516_v57 = vld [vmem:[%s11362_s27 + $0x18] sm:$0xff]  ;;  %v521_v59 = vld [vmem:[%s11362_s27 + $0x40] sm:$0xff]  ;;  %v514_v61 = vld [vmem:[%s11362_s27 + $0x8] sm:$0xff] }
  0x99   : > { %651 = vmatpush.msra.mxu0 %v537_v36  ;;  %716 = vmatpush.msra.mxu1 %v538_v37  ;;  %v513_v60 = vld [vmem:[%s11362_s27] sm:$0xff]  ;;  %v497_v62 = vld [vmem:[#allocation2 + $0x30] sm:$0xff]  ;;  %v518_v63 = vld [vmem:[%s11362_s27 + $0x28] sm:$0xff] }
  0x9a   : > { %780 = vmatpush.msra.mxu2 %v542_v38  ;;  %v515_v0 = vld [vmem:[%s11362_s27 + $0x10] sm:$0xff]  ;;  %v498_v1 = vld [vmem:[#allocation2] sm:$0xff]  ;;  %v499_v2 = vld [vmem:[#allocation2 + $0x58] sm:$0xff] }
  0x9b   : > { %652 = vmatpush.msra.mxu0 %v534_v39  ;;  %717 = vmatpush.msra.mxu1 %v535_v40  ;;  %v500_v3 = vld [vmem:[#allocation2 + $0x18] sm:$0xff]  ;;  %v501_v4 = vld [vmem:[#allocation2 + $0x50] sm:$0xff]  ;;  %v502_v5 = vld [vmem:[#allocation2 + $0x68] sm:$0xff] }
  0x9c   : > { %781 = vmatpush.msra.mxu2 %v539_v41  ;;  %v503_v6 = vld [vmem:[#allocation2 + $0x8] sm:$0xff]  ;;  %v505_v8 = vld [vmem:[#allocation2 + $0x40] sm:$0xff]  ;;  %v507_v10 = vld [vmem:[#allocation2 + $0x10] sm:$0xff] }
  0x9d   : > { %653 = vmatpush.msra.mxu0 %v531_v42  ;;  %718 = vmatpush.msra.mxu1 %v532_v43  ;;  %v504_v7 = vld [vmem:[#allocation2 + $0x48] sm:$0xff]  ;;  %v506_v9 = vld [vmem:[#allocation2 + $0x20] sm:$0xff]  ;;  %v508_v11 = vld [vmem:[#allocation2 + $0x38] sm:$0xff] }
  0x9e   : > { %782 = vmatpush.msra.mxu2 %v536_v44  ;;  %v509_v12 = vld [vmem:[#allocation2 + $0x60] sm:$0xff]  ;;  %v510_v13 = vld [vmem:[#allocation2 + $0x70] sm:$0xff]  ;;  %v511_v14 = vld [vmem:[#allocation2 + $0x78] sm:$0xff] }
  0x9f   : > { %654 = vmatpush.msra.mxu0 %v528_v45  ;;  %719 = vmatpush.msra.mxu1 %v529_v46  ;;  %v512_v15 = vld [vmem:[#allocation2 + $0x28] sm:$0xff]  ;;  %v641_v16 = vld [vmem:[%s11381_s9] sm:$0xff] }
  0xa0   : > { %783 = vmatpush.msra.mxu2 %v533_v47  ;;  %v11441_v17 = vperm.slane %v641_v16, 0  ;;  %v11443_v18 = vperm.slane %v641_v16, 1  ;;  %v11466_v27 = vperm.slane %v641_v16, 2 }
  0xa1   : > { %655 = vmatpush.msra.mxu0 %v525_v48  ;;  %720 = vmatpush.msra.mxu1 %v526_v49 }
  0xa2   : > { %784 = vmatpush.msra.mxu2 %v530_v50 }
  0xa3   : > { %656 = vmatpush.msra.mxu0 %v522_v51  ;;  %721 = vmatpush.msra.mxu1 %v523_v52 }
  0xa4   : > { %785 = vmatpush.msra.mxu2 %v527_v53 }
  0xa5   : > { %657 = vmatpush.msra.mxu0 %v519_v54  ;;  %722 = vmatpush.msra.mxu1 %v520_v55 }
  0xa6   : > { %786 = vmatpush.msra.mxu2 %v524_v56 }
  0xa7   : > { %658 = vmatpush.msra.mxu0 %v516_v57  ;;  %723 = vmatpush.msra.mxu1 %v517_v58 }
  0xa8   : > { %787 = vmatpush.msra.mxu2 %v521_v59 }
  0xa9   : > { %659 = vmatpush.msra.mxu0 %v513_v60  ;;  %724 = vmatpush.msra.mxu1 %v514_v61 }
  0xaa   : > { %660 = vmatmul.f32.vlgmr.msra.gmra.mxu0 %v497_v62  ;;  %725 = vmatmul.f32.vlgmr.msra.gmra.mxu1 %v497_v62 }
  0xab   : > { %788 = vmatpush.msra.mxu2 %v518_v63 }
  0xad   : > { %789 = vmatpush.msra.mxu2 %v515_v0 }
  0xae   : > { %790 = vmatmul.f32.vlgmr.msra.gmra.mxu2 %v497_v62 }
  0xb2   : > { %663 = vmatmul.f32.gmra.mxu0 %v498_v1  ;;  %728 = vmatmul.f32.gmra.mxu1 %v498_v1 }
  0xb6   : > { %793 = vmatmul.f32.gmra.mxu2 %v498_v1 }
  0xba   : > { %666 = vmatmul.f32.gmra.mxu0 %v499_v2  ;;  %731 = vmatmul.f32.gmra.mxu1 %v499_v2 }
  0xbe   : > { %796 = vmatmul.f32.gmra.mxu2 %v499_v2 }
  0xc2   : > { %669 = vmatmul.f32.gmra.mxu0 %v500_v3  ;;  %734 = vmatmul.f32.gmra.mxu1 %v500_v3 }
  0xc6   : > { %799 = vmatmul.f32.gmra.mxu2 %v500_v3 }
  0xca   : > { %672 = vmatmul.f32.gmra.mxu0 %v501_v4  ;;  %737 = vmatmul.f32.gmra.mxu1 %v501_v4 }
  0xce   : > { %802 = vmatmul.f32.gmra.mxu2 %v501_v4 }
  0xd2   : > { %675 = vmatmul.f32.gmra.mxu0 %v502_v5  ;;  %740 = vmatmul.f32.gmra.mxu1 %v502_v5 }
  0xd6   : > { %805 = vmatmul.f32.gmra.mxu2 %v502_v5 }
  0xda   : > { %678 = vmatmul.f32.gmra.mxu0 %v503_v6  ;;  %743 = vmatmul.f32.gmra.mxu1 %v503_v6 }
  0xde   : > { %808 = vmatmul.f32.gmra.mxu2 %v503_v6 }
  0xe2   : > { %681 = vmatmul.f32.gmra.mxu0 %v504_v7  ;;  %746 = vmatmul.f32.gmra.mxu1 %v504_v7 }
  0xe6   : > { %811 = vmatmul.f32.gmra.mxu2 %v504_v7 }
  0xea   : > { %684 = vmatmul.f32.gmra.mxu0 %v505_v8  ;;  %749 = vmatmul.f32.gmra.mxu1 %v505_v8 }
  0xee   : > { %814 = vmatmul.f32.gmra.mxu2 %v505_v8 }
  0xf2   : > { %687 = vmatmul.f32.gmra.mxu0 %v506_v9  ;;  %752 = vmatmul.f32.gmra.mxu1 %v506_v9 }
  0xf6   : > { %817 = vmatmul.f32.gmra.mxu2 %v506_v9 }
  0xfa   : > { %755 = vmatmul.f32.gmra.mxu1 %v507_v10  ;;  %690 = vmatmul.f32.gmra.mxu0 %v507_v10 }
  0xfe   : > { %820 = vmatmul.f32.gmra.mxu2 %v507_v10 }
 0x102   : > { %758 = vmatmul.f32.gmra.mxu1 %v508_v11  ;;  %693 = vmatmul.f32.gmra.mxu0 %v508_v11 }
 0x106   : > { %823 = vmatmul.f32.gmra.mxu2 %v508_v11 }
 0x10a   : > { %761 = vmatmul.f32.gmra.mxu1 %v509_v12  ;;  %696 = vmatmul.f32.gmra.mxu0 %v509_v12 }
 0x10e   : > { %826 = vmatmul.f32.gmra.mxu2 %v509_v12 }
 0x112   : > { %764 = vmatmul.f32.gmra.mxu1 %v510_v13  ;;  %699 = vmatmul.f32.gmra.mxu0 %v510_v13 }
 0x116   : > { %829 = vmatmul.f32.gmra.mxu2 %v510_v13 }
 0x11a   : > { %767 = vmatmul.f32.gmra.mxu1 %v511_v14  ;;  %702 = vmatmul.f32.gmra.mxu0 %v511_v14 }
 0x11e   : > { %832 = vmatmul.f32.gmra.mxu2 %v511_v14 }
 0x122   : > { %770 = vmatmul.f32.gmra.mxu1 %v512_v15  ;;  %705 = vmatmul.f32.gmra.mxu0 %v512_v15 }
 0x126   : > { %835 = vmatmul.f32.gmra.mxu2 %v512_v15 }
 0x127   : > { %v661_v19 = vpop.f32.mrf.mxu0  ;;  %v726_v20 = vpop.f32.mrf.mxu1 }
 0x128   : > { %v11446_v21 = vadd.f32 %v11441_v17, %v661_v19  ;;  %v11449_v22 = vadd.f32 %v11443_v18, %v726_v20 }
 0x12a   : > { %16081 = vst [vmem:[#allocation19_spill] sm:$0xff] %v11446_v21  ;;  %1631 = vrot.lane.b32.xlu2 %v11449_v22, %s11144_s16  ;;  %2459 = vrot.lane.b32.xlu1 %v11446_v21, %s11145_s11 }
 0x12b   : > { %16082 = vst [vmem:[#allocation20_spill] sm:$0xff] %v11449_v22  ;;  %1627 = vrot.lane.b32.xlu0 %v11446_v21, %s11144_s16 }
 0x12f   : > { %v664_v23 = vpop.f32.mrf.mxu0  ;;  %v729_v24 = vpop.f32.mrf.mxu1 }
 0x130   : > { %v11458_v25 = vadd.f32 %v11443_v18, %v729_v24  ;;  %v11469_v28 = vadd.f32 %v11441_v17, %v664_v23 }
 0x131   : > { %v791_v26 = vpop.f32.mrf.mxu2 }
 0x132   : > { %16083 = vst [vmem:[#allocation21_spill] sm:$0xff] %v11458_v25  ;;  %9251 = vmatpush.xpose.msk.msra.mxu3 %vm890_vm0, %v11458_v25  ;;  %1633 = vrot.lane.b32.xlu1 %v11458_v25, %s11144_s16  ;;  %v11474_v31 = vadd.f32 %v11466_v27, %v791_v26 }
 0x133   : > { %2463 = vrot.lane.b32.xlu0 %v11449_v22, %s11145_s11  ;;  %16084 = vst [vmem:[#allocation22_spill] sm:$0xff] %v11469_v28 }
 0x136   : > { %9252 = vmatpush.xpose.msk.msra.mxu3 %vm890_vm0, %v11449_v22 }
 0x137   : > { %v667_v29 = vpop.f32.mrf.mxu0  ;;  %v732_v30 = vpop.f32.mrf.mxu1 }
 0x138   : > { %v11495_v38 = vadd.f32 %v11443_v18, %v732_v30  ;;  %v11508_v40 = vadd.f32 %v11441_v17, %v667_v29 }
 0x139   : > { %9253 = vmatmul.msk.f32.vlgmr.msra.gmra.mxu3 %vm890_vm0, %v11446_v21  ;;  %v794_v32 = vpop.f32.mrf.mxu2 }
 0x13a   : > { %1629 = vrot.lane.b32.xlu1 %v11469_v28, %s11144_s16  ;;  %v11481_v33 = vadd.f32 %v11466_v27, %v794_v32  ;;  %16087 = vst [vmem:[#allocation25_spill] sm:$0xff] %v11495_v38 }
 0x13b   : > { %2465 = vrot.lane.b32.xlu0 %v11458_v25, %s11145_s11  ;;  %16088 = vst [vmem:[#allocation26_spill] sm:$0xff] %v11508_v40 }
 0x13c   : > { %v11487_v34 = vpack.i.bf16 %v11474_v31, %v11481_v33 }
 0x13e   : > { %16085 = vst [vmem:[#allocation23_spill] sm:$0xff] %v11487_v34  ;;  %9770 = vrot.lane.b32.xlu2 %v11487_v34, %s11144_s16 }
 0x13f   : > { %v670_v35 = vpop.f32.mrf.mxu0  ;;  %v735_v36 = vpop.f32.mrf.mxu1 }
 0x140   : > { %v11492_v37 = vadd.f32 %v11443_v18, %v735_v36  ;;  %v11529_v46 = vadd.f32 %v11441_v17, %v670_v35 }
 0x141   : > { %9254 = vmatmul.msk.f32.gmra.mxu3 %vm890_vm0, %v11469_v28  ;;  %v11499_v39 = vpop.f32.mrf.mxu2 }
 0x142   : > { %16086 = vst [vmem:[#allocation24_spill] sm:$0xff] %v11492_v37  ;;  %2461 = vrot.lane.b32.xlu1 %v11469_v28, %s11145_s11  ;;  %9255 = vmatpush.xpose.msk.msrb.mxu3 %vm890_vm0, %v11492_v37 }
 0x143   : > { %1670 = vrot.lane.b32.xlu0 %v11495_v38, %s11144_s16  ;;  %16091 = vst [vmem:[#allocation29_spill] sm:$0xff] %v11529_v46 }
 0x146   : > { %9256 = vmatpush.xpose.msk.msrb.mxu3 %vm890_vm0, %v11495_v38 }
 0x147   : > { %v673_v41 = vpop.f32.mrf.mxu0  ;;  %v738_v42 = vpop.f32.mrf.mxu1 }
 0x148   : > { %v11513_v43 = vadd.f32 %v11443_v18, %v738_v42  ;;  %v11516_v44 = vadd.f32 %v11441_v17, %v673_v41 }
 0x149   : > { %9257 = vmatmul.msk.f32.vlgmr.msrb.gmra.mxu3 %vm890_vm0, %v11508_v40  ;;  %v11520_v45 = vpop.f32.mrf.mxu2 }
 0x14a   : > { %16089 = vst [vmem:[#allocation27_spill] sm:$0xff] %v11513_v43  ;;  %1666 = vrot.lane.b32.xlu1 %v11508_v40, %s11144_s16  ;;  %1709 = vrot.lane.b32.xlu2 %v11513_v43, %s11144_s16  ;;  %v11629_v20 = vadd.f32 %v11466_v27, %v11520_v45 }
 0x14b   : > { %16090 = vst [vmem:[#allocation28_spill] sm:$0xff] %v11516_v44  ;;  %1705 = vrot.lane.b32.xlu0 %v11516_v44, %s11144_s16 }
 0x14c   : > { %16107 = vst [vmem:[#allocation45_spill] sm:$0xff] %v11629_v20 }
 0x14f   : > { %v676_v47 = vpop.f32.mrf.mxu0  ;;  %v741_v48 = vpop.f32.mrf.mxu1 }
 0x150   : > { %v11532_v49 = vadd.f32 %v11443_v18, %v741_v48  ;;  %v11554_v57 = vadd.f32 %v11441_v17, %v676_v47 }
 0x151   : > { %9258 = vmatmul.msk.f32.gmra.mxu3 %vm890_vm0, %v11529_v46  ;;  %v803_v50 = vpop.f32.mrf.mxu2 }
 0x152   : > { %16092 = vst [vmem:[#allocation30_spill] sm:$0xff] %v11532_v49  ;;  %2502 = vrot.lane.b32.xlu1 %v11495_v38, %s11145_s11  ;;  %9259 = vmatpush.xpose.msk.msra.mxu3 %vm890_vm0, %v11532_v49  ;;  %v878_v55 = vadd.f32 %v11466_v27, %v803_v50 }
 0x153   : > { %16094 = vst [vmem:[#allocation32_spill] sm:$0xff] %v11554_v57 }
 0x156   : > { %9260 = vmatpush.xpose.msk.msra.mxu3 %vm890_vm0, %v11513_v43 }
 0x157   : > { %v679_v51 = vpop.f32.mrf.mxu0  ;;  %v744_v52 = vpop.f32.mrf.mxu1 }
 0x158   : > { %v11543_v53 = vadd.f32 %v11441_v17, %v679_v51  ;;  %v11562_v62 = vadd.f32 %v11443_v18, %v744_v52 }
 0x159   : > { %9261 = vmatmul.msk.f32.vlgmr.msra.gmra.mxu3 %vm890_vm0, %v11516_v44  ;;  %v806_v54 = vpop.f32.mrf.mxu2 }
 0x15a   : > { %16093 = vst [vmem:[#allocation31_spill] sm:$0xff] %v11543_v53  ;;  %2498 = vrot.lane.b32.xlu1 %v11508_v40, %s11145_s11  ;;  %v879_v56 = vadd.f32 %v11466_v27, %v806_v54  ;;  %1744 = vrot.lane.b32.xlu2 %v11543_v53, %s11144_s16 }
 0x15b   : > { %16096 = vst [vmem:[#allocation34_spill] sm:$0xff] %v11562_v62 }
 0x15c   : > { %1473 = vmatpush.msrb.mxu1 %v879_v56  ;;  %v11610_v11 = vpack.i.bf16 %v878_v55, %v879_v56 }
 0x15e   : > { %1474 = vmatpush.msrb.mxu1 %v878_v55  ;;  %16103 = vst [vmem:[#allocation41_spill] sm:$0xff] %v11610_v11 }
 0x15f   : > { %v682_v58 = vpop.f32.mrf.mxu0  ;;  %v747_v59 = vpop.f32.mrf.mxu1 }
 0x160   : > { %v11557_v60 = vadd.f32 %v11443_v18, %v747_v59  ;;  %v11573_v63 = vadd.f32 %v11441_v17, %v682_v58 }
 0x161   : > { %9262 = vmatmul.msk.f32.gmra.mxu3 %vm890_vm0, %v11554_v57  ;;  %v809_v61 = vpop.f32.mrf.mxu2 }
 0x162   : > { %16095 = vst [vmem:[#allocation33_spill] sm:$0xff] %v11557_v60  ;;  %1672 = vrot.lane.b32.xlu1 %v11492_v37, %s11144_s16  ;;  %9263 = vmatpush.xpose.msk.msrb.mxu3 %vm890_vm0, %v11557_v60  ;;  %v11581_v4 = vadd.f32 %v11466_v27, %v809_v61 }
 0x163   : > { %1750 = vrot.lane.b32.xlu0 %v11557_v60, %s11144_s16  ;;  %16097 = vst [vmem:[#allocation35_spill] sm:$0xff] %v11573_v63 }
 0x164   : > { %16099 = vst [vmem:[#allocation37_spill] sm:$0xff] %v11581_v4 }
 0x166   : > { %9264 = vmatpush.xpose.msk.msrb.mxu3 %vm890_vm0, %v11562_v62 }
 0x167   : > { %v685_v0 = vpop.f32.mrf.mxu0  ;;  %v750_v1 = vpop.f32.mrf.mxu1 }
 0x168   : > { %v11576_v2 = vadd.f32 %v11443_v18, %v750_v1  ;;  %v11613_v12 = vadd.f32 %v11441_v17, %v685_v0 }
 0x169   : > { %9265 = vmatmul.msk.f32.vlgmr.msrb.gmra.mxu3 %vm890_vm0, %v11543_v53  ;;  %v812_v3 = vpop.f32.mrf.mxu2 }
 0x16a   : > { %16098 = vst [vmem:[#allocation36_spill] sm:$0xff] %v11576_v2  ;;  %1668 = vrot.lane.b32.xlu1 %v11529_v46, %s11144_s16  ;;  %2619 = vrot.lane.b32.xlu2 %v11576_v2, %s11145_s11  ;;  %v11588_v5 = vadd.f32 %v11466_v27, %v812_v3 }
 0x16b   : > { %1746 = vrot.lane.b32.xlu0 %v11573_v63, %s11144_s16  ;;  %16104 = vst [vmem:[#allocation42_spill] sm:$0xff] %v11613_v12 }
 0x16c   : > { %16100 = vst [vmem:[#allocation38_spill] sm:$0xff] %v11588_v5  ;;  %1502 = vmatpush.msra.mxu1 %v11588_v5 }
 0x16e   : > { %1503 = vmatpush.msra.mxu1 %v11581_v4 }
 0x16f   : > { %v688_v6 = vpop.f32.mrf.mxu0  ;;  %v753_v7 = vpop.f32.mrf.mxu1 }
 0x170   : > { %v11595_v8 = vadd.f32 %v11441_v17, %v688_v6  ;;  %v11598_v9 = vadd.f32 %v11443_v18, %v753_v7 }
 0x171   : > { %9266 = vmatmul.msk.f32.gmra.mxu3 %vm890_vm0, %v11573_v63  ;;  %v815_v10 = vpop.f32.mrf.mxu2 }
 0x172   : > { %16101 = vst [vmem:[#allocation39_spill] sm:$0xff] %v11595_v8  ;;  %2504 = vrot.lane.b32.xlu1 %v11492_v37, %s11145_s11  ;;  %1785 = vrot.lane.b32.xlu2 %v11595_v8, %s11144_s16  ;;  %v11636_v23 = vadd.f32 %v11466_v27, %v815_v10 }
 0x173   : > { %16102 = vst [vmem:[#allocation40_spill] sm:$0xff] %v11598_v9  ;;  %9267 = vmatpush.xpose.msk.msra.mxu3 %vm890_vm0, %v11598_v9  ;;  %2621 = vrot.lane.b32.xlu0 %v11598_v9, %s11145_s11 }
 0x174   : > { %16108 = vst [vmem:[#allocation46_spill] sm:$0xff] %v11636_v23 }
 0x177   : > { %v756_v13 = vpop.f32.mrf.mxu1  ;;  %9268 = vmatpush.xpose.msk.msra.mxu3 %vm890_vm0, %v11576_v2  ;;  %v691_v14 = vpop.f32.mrf.mxu0 }
 0x178   : > { %v11618_v15 = vadd.f32 %v11443_v18, %v756_v13  ;;  %v11663_v41 = vadd.f32 %v11441_v17, %v691_v14 }
 0x179   : > { %v818_v16 = vpop.f32.mrf.mxu2 }
 0x17a   : > { %16105 = vst [vmem:[#allocation43_spill] sm:$0xff] %v11618_v15  ;;  %2500 = vrot.lane.b32.xlu1 %v11529_v46, %s11145_s11  ;;  %9269 = vmatmul.msk.f32.vlgmr.msra.gmra.mxu3 %vm890_vm0, %v11613_v12  ;;  %v11625_v19 = vadd.f32 %v11466_v27, %v818_v16 }
 0x17b   : > { %2617 = vrot.lane.b32.xlu2 %v11595_v8, %s11145_s11  ;;  %1826 = vrot.lane.b32.xlu0 %v11618_v15, %s11144_s16  ;;  %16112 = vst [vmem:[#allocation50_spill] sm:$0xff] %v11663_v41 }
 0x17c   : > { %16106 = vst [vmem:[#allocation44_spill] sm:$0xff] %v11625_v19  ;;  %9644 = vmatpush.msrb.mxu2 %v11625_v19  ;;  %v11642_v26 = vpack.i.bf16 %v11625_v19, %v11629_v20 }
 0x17e   : > { %9645 = vmatpush.msrb.mxu2 %v11636_v23  ;;  %16109 = vst [vmem:[#allocation47_spill] sm:$0xff] %v11642_v26 }
 0x17f   : > { %v759_v24 = vpop.f32.mrf.mxu1  ;;  %v694_v29 = vpop.f32.mrf.mxu0 }
 0x180   : > { %v11645_v30 = vadd.f32 %v11443_v18, %v759_v24  ;;  %v11648_v32 = vadd.f32 %v11441_v17, %v694_v29 }
 0x181   : > { %v821_v35 = vpop.f32.mrf.mxu2 }
 0x182   : > { %16110 = vst [vmem:[#allocation48_spill] sm:$0xff] %v11645_v30  ;;  %1711 = vrot.lane.b32.xlu1 %v11532_v49, %s11144_s16  ;;  %9270 = vmatmul.msk.f32.gmra.mxu3 %vm890_vm0, %v11595_v8  ;;  %v11675_v48 = vadd.f32 %v11466_v27, %v821_v35 }
 0x183   : > { %16111 = vst [vmem:[#allocation49_spill] sm:$0xff] %v11648_v32  ;;  %9780 = vrot.lane.b32.xlu2 %v11642_v26, %s11144_s16  ;;  %9271 = vmatpush.xpose.msk.msrb.mxu3 %vm890_vm0, %v11645_v30 }
 0x184   : > { %1824 = vrot.lane.b32.xlu0 %v11648_v32, %s11144_s16  ;;  %v1632_v35 = vpop.permute.xlu2 %1631 }
 0x187   : > { %v762_v42 = vpop.f32.mrf.mxu1  ;;  %9272 = vmatpush.xpose.msk.msrb.mxu3 %vm890_vm0, %v11618_v15  ;;  %v697_v55 = vpop.f32.mrf.mxu0 }
 0x188   : > { %v11668_v45 = vadd.f32 %v11443_v18, %v762_v42  ;;  %v11700_v58 = vadd.f32 %v11441_v17, %v697_v55 }
 0x189   : > { %v824_v47 = vpop.f32.mrf.mxu2 }
 0x18a   : > { %16113 = vst [vmem:[#allocation51_spill] sm:$0xff] %v11668_v45  ;;  %1707 = vrot.lane.b32.xlu1 %v11554_v57, %s11144_s16  ;;  %9273 = vmatmul.msk.f32.vlgmr.msrb.gmra.mxu3 %vm890_vm0, %v11663_v41  ;;  %v11680_v50 = vadd.f32 %v11466_v27, %v824_v47 }
 0x18b   : > { %1822 = vrot.lane.b32.xlu2 %v11663_v41, %s11144_s16  ;;  %16116 = vst [vmem:[#allocation54_spill] sm:$0xff] %v11700_v58 }
 0x18c   : > { %1865 = vrot.lane.b32.xlu0 %v11668_v45, %s11144_s16  ;;  %v11686_v52 = vpack.i.bf16 %v11675_v48, %v11680_v50 }
 0x18e   : > { %16114 = vst [vmem:[#allocation52_spill] sm:$0xff] %v11686_v52 }
 0x18f   : > { %v765_v51 = vpop.f32.mrf.mxu1  ;;  %v700_v1 = vpop.f32.mrf.mxu0 }
 0x190   : > { %v11689_v54 = vadd.f32 %v11443_v18, %v765_v51  ;;  %v11726_v10 = vadd.f32 %v11441_v17, %v700_v1 }
 0x191   : > { %v827_v56 = vpop.f32.mrf.mxu2 }
 0x192   : > { %16115 = vst [vmem:[#allocation53_spill] sm:$0xff] %v11689_v54  ;;  %1748 = vrot.lane.b32.xlu1 %v11562_v62, %s11144_s16  ;;  %9274 = vmatmul.msk.f32.gmra.mxu3 %vm890_vm0, %v11648_v32  ;;  %v11721_v7 = vadd.f32 %v11466_v27, %v827_v56 }
 0x193   : > { %9785 = vrot.lane.b32.xlu2 %v11686_v52, %s11144_s16  ;;  %9275 = vmatpush.xpose.msk.msra.mxu3 %vm890_vm0, %v11689_v54  ;;  %16121 = vst [vmem:[#allocation59_spill] sm:$0xff] %v11726_v10 }
 0x194   : > { %16120 = vst [vmem:[#allocation58_spill] sm:$0xff] %v11721_v7 }
 0x197   : > { %v768_v59 = vpop.f32.mrf.mxu1  ;;  %9276 = vmatpush.xpose.msk.msra.mxu3 %vm890_vm0, %v11668_v45  ;;  %v703_v24 = vpop.f32.mrf.mxu0 }
 0x198   : > { %v11705_v61 = vadd.f32 %v11443_v18, %v768_v59 }
 0x199   : > { %v830_v0 = vpop.f32.mrf.mxu2 }
 0x19a   : > { %16117 = vst [vmem:[#allocation55_spill] sm:$0xff] %v11705_v61  ;;  %1787 = vrot.lane.b32.xlu1 %v11576_v2, %s11144_s16  ;;  %1904 = vrot.lane.b32.xlu0 %v11705_v61, %s11144_s16  ;;  %v11712_v3 = vadd.f32 %v11466_v27, %v830_v0 }
 0x19b   : > { %1867 = vrot.lane.b32.xlu2 %v11689_v54, %s11144_s16  ;;  %9277 = vmatmul.msk.f32.vlgmr.msra.gmra.mxu3 %vm890_vm0, %v11700_v58 }
 0x19c   : > { %16118 = vst [vmem:[#allocation56_spill] sm:$0xff] %v11712_v3  ;;  %v11718_v6 = vpop.permute.xlu1 %2459  ;;  %1589 = vmatpush.msrb.mxu0 %v11712_v3  ;;  %v11750_v29 = vpack.i.bf16 %v11712_v3, %v11588_v5  ;;  %v11825_v3 = vpop.permute.xlu2 %9770 }
 0x19d   : > { %16119 = vst [vmem:[#allocation57_spill] sm:$0xff] %v11718_v6  ;;  %v11799_v0 = vpop.permute.xlu0 %1627 }
 0x19e   : > { %1590 = vmatpush.msrb.mxu0 %v11721_v7  ;;  %16124 = vst [vmem:[#allocation62_spill] sm:$0xff] %v11750_v29 }
 0x19f   : > { %v771_v13 = vpop.f32.mrf.mxu1 }
 0x1a0   : > { %v11729_v14 = vadd.f32 %v11443_v18, %v771_v13  ;;  %v11745_v18 = vadd.f32 %v11441_v17, %v703_v24 }
 0x1a1   : > { %v833_v59 = vpop.f32.mrf.mxu2 }
 0x1a2   : > { %16122 = vst [vmem:[#allocation60_spill] sm:$0xff] %v11729_v14  ;;  %1783 = vrot.lane.b32.xlu1 %v11613_v12, %s11144_s16  ;;  %9279 = vmatpush.xpose.msk.msrb.mxu3 %vm890_vm0, %v11729_v14 }
 0x1a3   : > { %2656 = vrot.lane.b32.xlu0 %v11648_v32, %s11145_s11  ;;  %1863 = vrot.lane.b32.xlu2 %v11726_v10, %s11144_s16  ;;  %16123 = vst [vmem:[#allocation61_spill] sm:$0xff] %v11745_v18 }
 0x1a4   : > { %9278 = vmatmul.msk.f32.gmra.mxu3 %vm890_vm0, %v11726_v10  ;;  %v1634_v16 = vpop.permute.xlu1 %1633 }
 0x1a5   : > { %9299 = vmatpush.xpose.msk.msra.mxu2 %vm890_vm0, %v1634_v16  ;;  %v11809_v24 = vpop.permute.xlu0 %2463 }
 0x1a6   : > { %9280 = vmatpush.xpose.msk.msrb.mxu3 %vm890_vm0, %v11705_v61  ;;  %16133 = vst [vmem:[#allocation71_spill] sm:$0xff] %v11809_v24 }
 0x1a9   : > { %9300 = vmatpush.xpose.msk.msra.mxu2 %vm890_vm0, %v1632_v35  ;;  %v836_v16 = vpop.f32.mrf.mxu2  ;;  %v11814_v35 = vadd.f32 %v11466_v27, %v833_v59 }
 0x1aa   : > { %1415 = vmatpush.msra.mxu3 %v11481_v33  ;;  %2615 = vrot.lane.b32.xlu1 %v11613_v12, %s11145_s11  ;;  %v11762_v33 = vadd.f32 %v11466_v27, %v11499_v39  ;;  %v11779_v39 = vpack.i.bf16 %v11721_v7, %v11581_v4  ;;  %v1710_v4 = vpop.permute.xlu2 %1709 }
 0x1ab   : > { %9795 = vrot.lane.b32.xlu0 %v11750_v29, %s11144_s16  ;;  %1900 = vrot.lane.b32.xlu2 %v11745_v18, %s11144_s16 }
 0x1ac   : > { %1416 = vmatpush.msra.mxu3 %v11474_v31  ;;  %16125 = vst [vmem:[#allocation63_spill] sm:$0xff] %v11762_v33  ;;  %v11766_v42 = vpop.permute.xlu1 %1629  ;;  %v706_v31 = vpop.f32.mrf.mxu0  ;;  %v11772_v47 = vpack.i.bf16 %v11636_v23, %v11762_v33 }
 0x1ad   : > { %9281 = vmatmul.msk.f32.vlgmr.msrb.gmra.mxu3 %vm890_vm0, %v11745_v18  ;;  %16126 = vst [vmem:[#allocation64_spill] sm:$0xff] %v11766_v42  ;;  %v11775_v51 = vadd.f32 %v11441_v17, %v706_v31  ;;  %v11819_v31 = vadd.f32 %v11466_v27, %v836_v16  ;;  %v11833_v59 = vpop.permute.xlu0 %2465 }
 0x1ae   : > { %1444 = vmatpush.msrb.mxu3 %v11629_v20  ;;  %16127 = vst [vmem:[#allocation65_spill] sm:$0xff] %v11772_v47 }
 0x1af   : > { %16128 = vst [vmem:[#allocation66_spill] sm:$0xff] %v11775_v51  ;;  %v11829_v5 = vpack.i.bf16 %v11814_v35, %v11819_v31 }
 0x1b0   : > { %1445 = vmatpush.msrb.mxu3 %v11762_v33  ;;  %16129 = vst [vmem:[#allocation67_spill] sm:$0xff] %v11779_v39 }
 0x1b1   : > { %16135 = vst [vmem:[#allocation73_spill] sm:$0xff] %v11829_v5 }
 0x1b2   : > { %9775 = vrot.lane.b32.xlu1 %v11772_v47, %s11144_s16  ;;  %16136 = vst [vmem:[#allocation74_spill] sm:$0xff] %v11833_v59 }
 0x1b3   : > { %2539 = vrot.lane.b32.xlu0 %v11554_v57, %s11145_s11  ;;  %9800 = vrot.lane.b32.xlu2 %v11779_v39, %s11144_s16 }
 0x1b4   : > { %v11787_v55 = vpop.permute.xlu1 %2461  ;;  %v11853_v6 = vpop.permute.xlu2 %1744 }
 0x1b5   : > { %16130 = vst [vmem:[#allocation68_spill] sm:$0xff] %v11787_v55  ;;  %9282 = vmatmul.msk.f32.gmra.mxu3 %vm890_vm0, %v11775_v51  ;;  %v11843_v33 = vpop.permute.xlu0 %1670 }
 0x1b6   : > { %16138 = vst [vmem:[#allocation76_spill] sm:$0xff] %v11853_v6 }
 0x1ba   : > { %1789 = vrot.lane.b32.xlu1 %v11598_v9, %s11144_s16 }
 0x1bb   : > { %2541 = vrot.lane.b32.xlu2 %v11513_v43, %s11145_s11 }
 0x1bc   : > { %v11795_v17 = vpop.f32.mrf.mxu3  ;;  %v11797_v56 = vpop.permute.xlu1 %1666 }
 0x1bd   : > { %16131 = vst [vmem:[#allocation69_spill] sm:$0xff] %v11797_v56 }
 0x1c2   : > { %2658 = vrot.lane.b32.xlu1 %v11618_v15, %s11145_s11 }
 0x1c3   : > { %2537 = vrot.lane.b32.xlu2 %v11516_v44, %s11145_s11 }
 0x1c4   : > { %v11805_v1 = vpop.f32.mrf.mxu3  ;;  %v11807_v13 = vpop.permute.xlu1 %2502 }
 0x1c5   : > { %16132 = vst [vmem:[#allocation70_spill] sm:$0xff] %v11807_v13  ;;  %v11857_v13 = vpop.permute.xlu0 %1705  ;;  %v1174_v43 = vsel %vm890_vm0, %v11805_v1, -inf }
 0x1c6   : > { %16139 = vst [vmem:[#allocation77_spill] sm:$0xff] %v11857_v13 }
 0x1ca   : > { %1828 = vrot.lane.b32.xlu1 %v11645_v30, %s11144_s16 }
 0x1cb   : > { %2699 = vrot.lane.b32.xlu2 %v11689_v54, %s11145_s11 }
 0x1cc   : > { %v11821_v36 = vpop.permute.xlu1 %2498  ;;  %v11823_v7 = vpop.f32.mrf.mxu3 }
 0x1cd   : > { %16134 = vst [vmem:[#allocation72_spill] sm:$0xff] %v11821_v36  ;;  %v1171_v36 = vsel %vm890_vm0, %v11795_v17, -inf }
 0x1d2   : > { %2660 = vrot.lane.b32.xlu1 %v11645_v30, %s11145_s11 }
 0x1d3   : > { %9805 = vrot.lane.b32.xlu2 %v11829_v5, %s11144_s16 }
 0x1d4   : > { %v11837_v27 = vpop.permute.xlu1 %1672  ;;  %v11839_v16 = vpop.f32.mrf.mxu3 }
 0x1da   : > { %1861 = vrot.lane.b32.xlu1 %v11700_v58, %s11144_s16 }
 0x1db   : > { %2697 = vrot.lane.b32.xlu2 %v11668_v45, %s11145_s11 }
 0x1dc   : > { %v11847_v20 = vpop.permute.xlu1 %1668  ;;  %v11851_v55 = vpop.f32.mrf.mxu3 }
 0x1dd   : > { %16137 = vst [vmem:[#allocation75_spill] sm:$0xff] %v11847_v20  ;;  %1172 = vmax.xlane.f32.xlu0 %v1171_v36  ;;  %v11869_v36 = vpop.permute.xlu2 %2619 }
 0x1de   : > { %16141 = vst [vmem:[#allocation79_spill] sm:$0xff] %v11869_v36 }
 0x1e2   : > { %2654 = vrot.lane.b32.xlu1 %v11663_v41, %s11145_s11 }
 0x1e3   : > { %2693 = vrot.lane.b32.xlu2 %v11700_v58, %s11145_s11  ;;  %v11877_v58 = vpop.permute.xlu0 %1750 }
 0x1e4   : > { %v11861_v57 = vpop.permute.xlu1 %2504  ;;  %v11865_v45 = vpop.f32.mrf.mxu3  ;;  %16143 = vst [vmem:[#allocation81_spill] sm:$0xff] %v11877_v58 }
 0x1e5   : > { %16140 = vst [vmem:[#allocation78_spill] sm:$0xff] %v11861_v57  ;;  %1175 = vmax.xlane.f32.xlu0 %v1174_v43  ;;  %v11884_v43 = vpop.permute.xlu2 %1785 }
 0x1e6   : > { %16144 = vst [vmem:[#allocation82_spill] sm:$0xff] %v11884_v43 }
 0x1ea   : > { %1906 = vrot.lane.b32.xlu1 %v11729_v14, %s11144_s16 }
 0x1eb   : > { %2738 = vrot.lane.b32.xlu2 %v11729_v14, %s11145_s11  ;;  %v11886_v36 = vpop.permute.xlu0 %1746 }
 0x1ec   : > { %v11873_v54 = vpop.permute.xlu1 %2500  ;;  %v11875_v44 = vpop.f32.mrf.mxu3  ;;  %16145 = vst [vmem:[#allocation83_spill] sm:$0xff] %v11886_v36 }
 0x1ed   : > { %16142 = vst [vmem:[#allocation80_spill] sm:$0xff] %v11873_v54  ;;  %v11897_v59 = vpop.permute.xlu2 %2617  ;;  %v1189_v20 = vsel %vm890_vm0, %v11875_v44, -inf }
 0x1ee   : > { %16147 = vst [vmem:[#allocation85_spill] sm:$0xff] %v11897_v59 }
 0x1f2   : > { %1902 = vrot.lane.b32.xlu1 %v11775_v51, %s11144_s16 }
 0x1f4   : > { %v1712_v57 = vpop.permute.xlu1 %1711  ;;  %v11881_v24 = vpop.f32.mrf.mxu3 }
 0x1f5   : > { %9307 = vmatpush.xpose.msk.msra.mxu0 %vm890_vm0, %v1712_v57  ;;  %v11901_v57 = vpop.permute.xlu0 %2621  ;;  %v11909_v5 = vpop.permute.xlu2 %9780 }
 0x1f6   : > { %16148 = vst [vmem:[#allocation86_spill] sm:$0xff] %v11901_v57 }
 0x1f7   : > { %16150 = vst [vmem:[#allocation88_spill] sm:$0xff] %v11909_v5 }
 0x1f9   : > { %2578 = vrot.lane.b32.xlu0 %v11573_v63, %s11145_s11  ;;  %9308 = vmatpush.xpose.msk.msra.mxu0 %vm890_vm0, %v1710_v4 }
 0x1fa   : > { %9790 = vrot.lane.b32.xlu1 %v11610_v11, %s11144_s16 }
 0x1fc   : > { %v11895_v14 = vpop.permute.xlu1 %1707 }
 0x1fd   : > { %v11893_v54 = vpop.f32.mrf.mxu3  ;;  %16146 = vst [vmem:[#allocation84_spill] sm:$0xff] %v11895_v14  ;;  %v11913_v39 = vpop.permute.xlu0 %1826 }
 0x1fe   : > { %16151 = vst [vmem:[#allocation89_spill] sm:$0xff] %v11913_v39  ;;  %v11921_v57 = vpop.permute.xlu2 %1822 }
 0x1ff   : > { %16152 = vst [vmem:[#allocation90_spill] sm:$0xff] %v11921_v57 }
 0x201   : > { %2736 = vrot.lane.b32.xlu0 %v11705_v61, %s11145_s11  ;;  %v1186_v61 = vsel %vm890_vm0, %v11865_v45, -inf }
 0x202   : > { %2543 = vrot.lane.b32.xlu1 %v11532_v49, %s11145_s11 }
 0x204   : > { %v11907_v4 = vpop.permute.xlu1 %1748 }
 0x205   : > { %v11905_v63 = vpop.f32.mrf.mxu3  ;;  %16149 = vst [vmem:[#allocation87_spill] sm:$0xff] %v11907_v4  ;;  %v11923_v49 = vpop.permute.xlu0 %1824 }
 0x206   : > { %16153 = vst [vmem:[#allocation91_spill] sm:$0xff] %v11923_v49  ;;  %v11931_v56 = vpop.permute.xlu2 %9785  ;;  %v1198_v4 = vsel %vm890_vm0, %v11905_v63, -inf }
 0x207   : > { %16155 = vst [vmem:[#allocation93_spill] sm:$0xff] %v11931_v56  ;;  %v1183_v56 = vsel %vm890_vm0, %v11851_v55, -inf }
 0x20a   : > { %2582 = vrot.lane.b32.xlu1 %v11557_v60, %s11145_s11 }
 0x20c   : > { %v11917_v36 = vpop.permute.xlu1 %1787 }
 0x20d   : > { %v11915_v59 = vpop.f32.mrf.mxu3  ;;  %v11933_v39 = vpop.permute.xlu0 %1865 }
 0x20e   : > { %16156 = vst [vmem:[#allocation94_spill] sm:$0xff] %v11933_v39  ;;  %v11941_v49 = vpop.permute.xlu2 %1867  ;;  %v1201_v57 = vsel %vm890_vm0, %v11915_v59, -inf }
 0x214   : > { %1187 = vmax.xlane.f32.xlu2 %v1186_v61  ;;  %v11929_v60 = vpop.permute.xlu1 %1783 }
 0x215   : > { %v11925_v6 = vpop.f32.mrf.mxu3  ;;  %16154 = vst [vmem:[#allocation92_spill] sm:$0xff] %v11929_v60  ;;  %v1195_v60 = vsel %vm890_vm0, %v11893_v54, -inf }
 0x21c   : > { %1190 = vmax.xlane.f32.xlu2 %v1189_v20  ;;  %v11939_v61 = vpop.permute.xlu1 %2615  ;;  %v11945_v20 = vpop.permute.xlu0 %1904 }
 0x21d   : > { %16157 = vst [vmem:[#allocation95_spill] sm:$0xff] %v11939_v61  ;;  %v11955_v61 = vpop.permute.xlu2 %1863 }
 0x21e   : > { %v11937_v58 = vpop.f32.mrf.mxu3  ;;  %16158 = vst [vmem:[#allocation96_spill] sm:$0xff] %v11945_v20  ;;  %v1177_v20 = vsel %vm890_vm0, %v11823_v7, -inf }
 0x21f   : > { %16160 = vst [vmem:[#allocation98_spill] sm:$0xff] %v11955_v61 }
 0x224   : > { %1199 = vmax.xlane.f32.xlu2 %v1198_v4  ;;  %v11951_v14 = vpop.permute.xlu1 %9775  ;;  %v1207_v4 = vsel %vm890_vm0, %v11937_v58, -inf  ;;  %v11961_v13 = vpop.permute.xlu0 %2656 }
 0x225   : > { %16159 = vst [vmem:[#allocation97_spill] sm:$0xff] %v11951_v14  ;;  %v11973_v5 = vpop.permute.xlu2 %1900 }
 0x226   : > { %16161 = vst [vmem:[#allocation99_spill] sm:$0xff] %v11961_v13 }
 0x227   : > { %v11949_v43 = vpop.f32.mrf.mxu3  ;;  %16162 = vst [vmem:[#allocation100_spill] sm:$0xff] %v11973_v5 }
 0x22b   : > { %1184 = vmax.xlane.f32.xlu0 %v1183_v56 }
 0x22c   : > { %1202 = vmax.xlane.f32.xlu2 %v1201_v57  ;;  %v1204_v57 = vsel %vm890_vm0, %v11925_v6, -inf  ;;  %v11969_v61 = vpop.permute.xlu1 %1789 }
 0x22d   : > { %v11983_v42 = vpop.permute.xlu2 %9800 }
 0x22e   : > { %16165 = vst [vmem:[#allocation103_spill] sm:$0xff] %v11983_v42 }
 0x230   : > { %v11963_v56 = vpop.f32.mrf.mxu3 }
 0x231   : > { %v1213_v14 = vsel %vm890_vm0, %v11963_v56, -inf }
 0x233   : > { %1196 = vmax.xlane.f32.xlu0 %v1195_v60  ;;  %v1180_v60 = vsel %vm890_vm0, %v11839_v16, -inf }
 0x234   : > { %1208 = vmax.xlane.f32.xlu2 %v1207_v4  ;;  %1178 = vmax.xlane.f32.xlu1 %v1177_v20  ;;  %v11975_v4 = vpop.permute.xlu0 %9795  ;;  %v1210_v20 = vsel %vm890_vm0, %v11949_v43, -inf  ;;  %v11979_v13 = vpop.permute.xlu1 %2658 }
 0x235   : > { %16163 = vst [vmem:[#allocation101_spill] sm:$0xff] %v11975_v4 }
 0x236   : > { %16164 = vst [vmem:[#allocation102_spill] sm:$0xff] %v11979_v13 }
 0x238   : > { %v11981_v41 = vpop.f32.mrf.mxu3 }
 0x239   : > { %v1216_v15 = vsel %vm890_vm0, %v11981_v41, -inf }
 0x23b   : > { %1205 = vmax.xlane.f32.xlu0 %v1204_v57 }
 0x23c   : > { %1214 = vmax.xlane.f32.xlu2 %v1213_v14  ;;  %1181 = vmax.xlane.f32.xlu1 %v1180_v60  ;;  %v11985_v57 = vpop.permute.xlu0 %2539  ;;  %v11989_v14 = vpop.permute.xlu1 %1828 }
 0x23d   : > { %16166 = vst [vmem:[#allocation104_spill] sm:$0xff] %v11985_v57  ;;  %v11991_v60 = vpop.permute.xlu2 %2541 }
 0x23e   : > { %16167 = vst [vmem:[#allocation105_spill] sm:$0xff] %v11989_v14 }
 0x23f   : > { %16168 = vst [vmem:[#allocation106_spill] sm:$0xff] %v11991_v60 }
 0x243   : > { %1211 = vmax.xlane.f32.xlu0 %v1210_v20 }
 0x244   : > { %v11997_v13 = vpop.permute.xlu1 %2660 }
 0x245   : > { %16169 = vst [vmem:[#allocation107_spill] sm:$0xff] %v11997_v13  ;;  %v12000_v4 = vpop.permute.xlu2 %2537 }
 0x246   : > { %16170 = vst [vmem:[#allocation108_spill] sm:$0xff] %v12000_v4 }
 0x24b   : > { %1217 = vmax.xlane.f32.xlu0 %v1216_v15 }
 0x24c   : > { %v12006_v60 = vpop.permute.xlu1 %1861 }
 0x24d   : > { %16171 = vst [vmem:[#allocation109_spill] sm:$0xff] %v12006_v60  ;;  %v12008_v14 = vpop.permute.xlu2 %2699 }
 0x24e   : > { %16172 = vst [vmem:[#allocation110_spill] sm:$0xff] %v12008_v14 }
 0x250   : > { %v11993_v5 = vpop.xlane.xlu0 %1172 }
 0x255   : > { %2580 = vrot.lane.b32.xlu1 %v11562_v62, %s11145_s11 }
 0x258   : > { %v1176_v20 = vpop.xlane.xlu0 %1175 }
 0x259   : > { %v1220_v42 = vsub.f32 %v11805_v1, %v1176_v20  ;;  %v12014_v1 = vpop.permute.xlu1 %2654 }
 0x25a   : > { %16173 = vst [vmem:[#allocation111_spill] sm:$0xff] %v12014_v1  ;;  %v1192_v1 = vsel %vm890_vm0, %v11881_v24, -inf }
 0x25b   : > { %v1237_v57 = vmul.f32 1.442695, %v1220_v42  ;;  %v12016_v42 = vpop.permute.xlu2 %9805 }
 0x25c   : > { %16174 = vst [vmem:[#allocation112_spill] sm:$0xff] %v12016_v42 }
 0x25d   : > { %10315 = vpow2.f32 %v1237_v57  ;;  %2576 = vrot.lane.b32.xlu1 %v11543_v53, %s11145_s11 }
 0x261   : > { %v12018_v57 = vpop.permute.xlu1 %1906 }
 0x262   : > { %16175 = vst [vmem:[#allocation113_spill] sm:$0xff] %v12018_v57 }
 0x263   : > { %v12004_v15 = vpop.eup %10315  ;;  %v12020_v20 = vpop.permute.xlu2 %2697 }
 0x264   : > { %v1270_v62 = vsel %vm890_vm0, %v12004_v15, 0.0  ;;  %16176 = vst [vmem:[#allocation114_spill] sm:$0xff] %v12020_v20 }
 0x265   : > { %1271 = vadd.xlane.f32.xlu2 %v1270_v62  ;;  %2695 = vrot.lane.b32.xlu1 %v11726_v10, %s11145_s11 }
 0x269   : > { %v12024_v4 = vpop.permute.xlu1 %1902 }
 0x26a   : > { %16177 = vst [vmem:[#allocation115_spill] sm:$0xff] %v12024_v4 }
 0x26b   : > { %v12026_v14 = vpop.permute.xlu2 %2693  ;;  %v12032_v53 = vpop.permute.xlu0 %2578 }
 0x26c   : > { %16178 = vst [vmem:[#allocation116_spill] sm:$0xff] %v12026_v14 }
 0x26d   : > { %16181 = vst [vmem:[#allocation119_spill] sm:$0xff] %v12032_v53 }
 0x271   : > { %v12028_v13 = vpop.permute.xlu1 %9790 }
 0x272   : > { %16179 = vst [vmem:[#allocation117_spill] sm:$0xff] %v12028_v13 }
 0x273   : > { %v12030_v62 = vpop.permute.xlu2 %2738  ;;  %v12038_v20 = vpop.permute.xlu0 %2736 }
 0x274   : > { %16180 = vst [vmem:[#allocation118_spill] sm:$0xff] %v12030_v62 }
 0x275   : > { %16182 = vst [vmem:[#allocation120_spill] sm:$0xff] %v12038_v20 }
 0x279   : > { %v12036_v42 = vpop.permute.xlu1 %2543 }
 0x27d   : > { %2734 = vrot.lane.b32.xlu2 %v11775_v51, %s11145_s11 }
 0x281   : > { %v12040_v4 = vpop.permute.xlu1 %2582 }
 0x282   : > { %16183 = vst [vmem:[#allocation121_spill] sm:$0xff] %v12040_v4 }
 0x287   : > { %v1188_v10 = vpop.xlane.xlu2 %1187 }
 0x28f   : > { %1193 = vmax.xlane.f32.xlu1 %v1192_v1  ;;  %v1191_v51 = vpop.xlane.xlu2 %1190 }
 0x290   : > { %v1225_v60 = vsub.f32 %v11875_v44, %v1191_v51 }
 0x292   : > { %v1247_v53 = vmul.f32 1.442695, %v1225_v60 }
 0x29e   : > { %v1185_v57 = vpop.xlane.xlu0 %1184 }
 0x29f   : > { %v1223_v14 = vsub.f32 %v11851_v55, %v1185_v57 }
 0x2a1   : > { %v1243_v62 = vmul.f32 1.442695, %v1223_v14 }
 0x2a3   : > { %10317 = vpow2.f32 %v1243_v62 }
 0x2a4   : > { %10319 = vpow2.f32 %v1247_v53 }
 0x2a6   : > { %v1197_v13 = vpop.xlane.xlu0 %1196 }
 0x2a7   : > { %v1179_v39 = vpop.xlane.xlu1 %1178 }
 0x2a8   : > { %2732 = vrot.lane.b32.xlu1 %v11745_v18, %s11145_s11 }
 0x2a9   : > { %v12046_v1 = vpop.eup %10317 }
 0x2aa   : > { %v1279_v20 = vsel %vm890_vm0, %v12046_v1, 0.0  ;;  %v12052_v55 = vpop.eup %10319 }
 0x2ab   : > { %1280 = vadd.xlane.f32.xlu2 %v1279_v20  ;;  %v1285_v60 = vsel %vm890_vm0, %v12052_v55, 0.0 }
 0x2ae   : > { %v12050_v4 = vpop.xlane.xlu0 %1205 }
 0x2af   : > { %v1182_v44 = vpop.xlane.xlu1 %1181 }
 0x2b0   : > { %v1222_v51 = vsub.f32 %v11839_v16, %v1182_v44  ;;  %v1219_v16 = vsub.f32 %v11795_v17, %v11993_v5 }
 0x2b2   : > { %v1241_v14 = vmul.f32 1.442695, %v1222_v51 }
 0x2b3   : > { %1286 = vadd.xlane.f32.xlu2 %v1285_v60 }
 0x2b4   : > { %10321 = vpow2.f32 %v1241_v14  ;;  %v1235_v14 = vmul.f32 1.442695, %v1219_v16  ;;  %v1227_v16 = vsub.f32 %v11893_v54, %v1197_v13 }
 0x2b6   : > { %v1212_v57 = vpop.xlane.xlu0 %1211 }
 0x2b7   : > { %v1232_v53 = vsub.f32 %v11949_v43, %v1212_v57  ;;  %v1221_v43 = vsub.f32 %v11823_v7, %v1179_v39 }
 0x2b9   : > { %v1261_v62 = vmul.f32 1.442695, %v1232_v53  ;;  %v1239_v60 = vmul.f32 1.442695, %v1221_v43  ;;  %v1224_v53 = vsub.f32 %v11865_v45, %v1188_v10  ;;  %v1251_v45 = vmul.f32 1.442695, %v1227_v16 }
 0x2ba   : > { %v12058_v18 = vpop.eup %10321 }
 0x2bb   : > { %10323 = vpow2.f32 %v1261_v62  ;;  %v1276_v20 = vsel %vm890_vm0, %v12058_v18, 0.0  ;;  %v1200_v62 = vpop.xlane.xlu2 %1199  ;;  %v1245_v17 = vmul.f32 1.442695, %v1224_v53 }
 0x2bc   : > { %1277 = vadd.xlane.f32.xlu0 %v1276_v20  ;;  %10325 = vpow2.f32 %v1235_v14 }
 0x2bd   : > { %10327 = vpow2.f32 %v1239_v60 }
 0x2be   : > { %10329 = vpow2.f32 %v1245_v17 }
 0x2bf   : > { %10331 = vpow2.f32 %v1251_v45 }
 0x2c1   : > { %v12064_v44 = vpop.eup %10323 }
 0x2c2   : > { %v1306_v51 = vsel %vm890_vm0, %v12064_v44, 0.0  ;;  %v12069_v57 = vpop.eup %10325 }
 0x2c3   : > { %1307 = vadd.xlane.f32.xlu2 %v1306_v51  ;;  %v1267_v5 = vsel %vm890_vm0, %v12069_v57, 0.0  ;;  %v12074_v20 = vpop.eup %10327  ;;  %v1203_v39 = vpop.xlane.xlu2 %1202  ;;  %v1228_v51 = vsub.f32 %v11905_v63, %v1200_v62 }
 0x2c4   : > { %v1273_v7 = vsel %vm890_vm0, %v12074_v20, 0.0  ;;  %v12081_v10 = vpop.eup %10329  ;;  %v1218_v62 = vpop.xlane.xlu0 %1217 }
 0x2c5   : > { %v1282_v14 = vsel %vm890_vm0, %v12081_v10, 0.0  ;;  %v1253_v43 = vmul.f32 1.442695, %v1228_v51  ;;  %v12086_v13 = vpop.eup %10331  ;;  %v1234_v45 = vsub.f32 %v11981_v41, %v1218_v62  ;;  %v1229_v62 = vsub.f32 %v11915_v59, %v1203_v39 }
 0x2c7   : > { %v12088_v60 = vpop.permute.xlu1 %2580  ;;  %10333 = vpow2.f32 %v1253_v43 }
 0x2cb   : > { %v1209_v54 = vpop.xlane.xlu2 %1208 }
 0x2cc   : > { %v1231_v53 = vsub.f32 %v11937_v58, %v1209_v54  ;;  %v1265_v58 = vmul.f32 1.442695, %v1234_v45  ;;  %v1255_v45 = vmul.f32 1.442695, %v1229_v62 }
 0x2cd   : > { %v12093_v63 = vpop.eup %10333 }
 0x2ce   : > { %v1259_v17 = vmul.f32 1.442695, %v1231_v53 }
 0x2cf   : > { %v12095_v16 = vpop.permute.xlu1 %2576 }
 0x2d0   : > { %10335 = vpow2.f32 %v1259_v17  ;;  %16184 = vst [vmem:[#allocation122_spill] sm:$0xff] %v12095_v16 }
 0x2d1   : > { %10337 = vpow2.f32 %v1265_v58 }
 0x2d2   : > { %1268 = vadd.xlane.f32.xlu1 %v1267_v5  ;;  %v1291_v5 = vsel %vm890_vm0, %v12086_v13, 0.0 }
 0x2d3   : > { %v1215_v41 = vpop.xlane.xlu2 %1214 }
 0x2d6   : > { %v12100_v51 = vpop.eup %10335 }
 0x2d7   : > { %v12104_v43 = vpop.permute.xlu1 %2695  ;;  %v12106_v54 = vpop.eup %10337 }
 0x2d8   : > { %v1312_v17 = vsel %vm890_vm0, %v12106_v54, 0.0 }
 0x2da   : > { %1274 = vadd.xlane.f32.xlu1 %v1273_v7  ;;  %v1294_v7 = vsel %vm890_vm0, %v12093_v63, 0.0 }
 0x2db   : > { %9810 = vrot.lane.b32.xlu2 %v11487_v34, %s11145_s11  ;;  %v1272_v34 = vpop.xlane.xlu2 %1271 }
 0x2e2   : > { %1283 = vadd.xlane.f32.xlu1 %v1282_v14  ;;  %v1303_v14 = vsel %vm890_vm0, %v12100_v51, 0.0 }
 0x2e3   : > { %v12122_v59 = vpop.permute.xlu2 %2734 }
 0x2ea   : > { %1292 = vadd.xlane.f32.xlu1 %v1291_v5 }
 0x2f2   : > { %1295 = vadd.xlane.f32.xlu1 %v1294_v7 }
 0x2fa   : > { %1304 = vadd.xlane.f32.xlu1 %v1303_v14  ;;  %v1230_v14 = vsub.f32 %v11925_v6, %v12050_v4 }
 0x302   : > { %v1194_v53 = vpop.xlane.xlu1 %1193 }
 0x303   : > { %v1226_v5 = vsub.f32 %v11881_v24, %v1194_v53  ;;  %v1257_v53 = vmul.f32 1.442695, %v1230_v14  ;;  %v1233_v14 = vsub.f32 %v11963_v56, %v1215_v41 }
 0x304   : > { %1313 = vadd.xlane.f32.xlu2 %v1312_v17 }
 0x305   : > { %v1249_v7 = vmul.f32 1.442695, %v1226_v5 }
 0x307   : > { %10339 = vpow2.f32 %v1249_v7 }
 0x308   : > { %10341 = vpow2.f32 %v1255_v45 }
 0x309   : > { %10343 = vpow2.f32 %v1257_v53  ;;  %v1263_v53 = vmul.f32 1.442695, %v1233_v14 }
 0x30d   : > { %v12112_v58 = vpop.eup %10339 }
 0x30e   : > { %v1288_v24 = vsel %vm890_vm0, %v12112_v58, 0.0  ;;  %v12118_v16 = vpop.eup %10341 }
 0x30f   : > { %1289 = vadd.xlane.f32.xlu0 %v1288_v24  ;;  %v1297_v39 = vsel %vm890_vm0, %v12118_v16, 0.0  ;;  %v12126_v5 = vpop.eup %10343 }
 0x310   : > { %v1300_v4 = vsel %vm890_vm0, %v12126_v5, 0.0 }
 0x313   : > { %9820 = vrot.lane.b32.xlu1 %v11772_v47, %s11145_s11 }
 0x317   : > { %1298 = vadd.xlane.f32.xlu0 %v1297_v39 }
 0x31c   : > { %3281 = vrot.lane.b32.xlu2 %v11458_v25, %s11146_s24 }
 0x31e   : > { %v1281_v6 = vpop.xlane.xlu2 %1280 }
 0x31f   : > { %10345 = vrcp.f32 %v1281_v6  ;;  %1301 = vadd.xlane.f32.xlu0 %v1300_v4 }
 0x320   : > { %10347 = vpow2.f32 %v1263_v53 }
 0x321   : > { %10349 = vrcp.f32 %v1272_v34 }
 0x324   : > { %3275 = vrot.lane.b32.xlu2 %v11446_v21, %s11146_s24 }
 0x325   : > { %v10346_v17 = vpop.eup %10345 }
 0x326   : > { %v1335_v62 = vmul.f32 %v10346_v17, %v1281_v6  ;;  %v12143_v39 = vpop.eup %10347  ;;  %v1287_v14 = vpop.xlane.xlu2 %1286 }
 0x327   : > { %v1309_v56 = vsel %vm890_vm0, %v12143_v39, 0.0  ;;  %v10350_v6 = vpop.eup %10349 }
 0x328   : > { %v1351_v7 = vsub.f32 2.0, %v1335_v62 }
 0x32a   : > { %v1367_v45 = vmul.f32 %v10346_v17, %v1351_v7  ;;  %v1332_v7 = vmul.f32 %v10350_v6, %v1272_v34 }
 0x32c   : > { %3433 = vrot.lane.b32.xlu2 %v11595_v8, %s11146_s24  ;;  %v1383_v24 = vmul.f32 %v12046_v1, %v1367_v45  ;;  %v12149_v1 = vpop.permute.xlu1 %2732 }
 0x32e   : > { %9287 = vmatmul.msk.f32.vlgmr.msrb.gmra.mxu1 %vm890_vm0, %v1383_v24 }
 0x32f   : > { %1531 = vmatpush.msrb.mxu1 %v11625_v19  ;;  %v1278_v53 = vpop.xlane.xlu0 %1277 }
 0x331   : > { %1532 = vmatpush.msrb.mxu1 %v11636_v23 }
 0x333   : > { %9815 = vrot.lane.b32.xlu0 %v11642_v26, %s11145_s11 }
 0x33b   : > { %9825 = vrot.lane.b32.xlu0 %v11686_v52, %s11145_s11 }
 0x33d   : > { %1310 = vadd.xlane.f32.xlu1 %v1309_v56  ;;  %v1348_v56 = vsub.f32 2.0, %v1332_v7 }
 0x343   : > { %3277 = vrot.lane.b32.xlu0 %v11469_v28, %s11146_s24 }
 0x345   : > { %v1269_v41 = vpop.xlane.xlu1 %1268 }
 0x346   : > { %10351 = vrcp.f32 %v1269_v41 }
 0x34b   : > { %3437 = vrot.lane.b32.xlu0 %v11598_v9, %s11146_s24 }
 0x34c   : > { %v10352_v4 = vpop.eup %10351 }
 0x34d   : > { %v1331_v17 = vmul.f32 %v10352_v4, %v1269_v41  ;;  %v1275_v62 = vpop.xlane.xlu1 %1274  ;;  %v1364_v41 = vmul.f32 %v10350_v6, %v1348_v56 }
 0x34e   : > { %10353 = vrcp.f32 %v1275_v62 }
 0x34f   : > { %v1347_v45 = vsub.f32 2.0, %v1331_v17  ;;  %10355 = vrcp.f32 %v1287_v14  ;;  %v1380_v7 = vmul.f32 %v12004_v15, %v1364_v41 }
 0x350   : > { %10357 = vrcp.f32 %v1278_v53 }
 0x351   : > { %v1363_v24 = vmul.f32 %v10352_v4, %v1347_v45 }
 0x353   : > { %v1379_v23 = vmul.f32 %v12069_v57, %v1363_v24  ;;  %3435 = vrot.lane.b32.xlu0 %v11576_v2, %s11146_s24 }
 0x354   : > { %v10354_v19 = vpop.eup %10353 }
 0x355   : > { %v1284_v21 = vpop.xlane.xlu1 %1283  ;;  %9283 = vmatmul.msk.f32.vlgmr.msra.gmra.mxu3 %vm890_vm0, %v1379_v23  ;;  %v1333_v34 = vmul.f32 %v10354_v19, %v1275_v62  ;;  %v10356_v57 = vpop.eup %10355 }
 0x356   : > { %10359 = vrcp.f32 %v1284_v21  ;;  %1560 = vmatpush.msra.mxu3 %v11680_v50  ;;  %3279 = vrot.lane.b32.xlu1 %v11449_v22, %s11146_s24  ;;  %v10358_v4 = vpop.eup %10357  ;;  %v1337_v50 = vmul.f32 %v10356_v57, %v1287_v14 }
 0x357   : > { %v1349_v17 = vsub.f32 2.0, %v1333_v34  ;;  %v1334_v6 = vmul.f32 %v10358_v4, %v1278_v53 }
 0x358   : > { %1561 = vmatpush.msra.mxu3 %v11675_v48  ;;  %v1353_v34 = vsub.f32 2.0, %v1337_v50  ;;  %v16186_v50 = vld [vmem:[#allocation43_spill] sm:$0xff] }
 0x359   : > { %v1365_v48 = vmul.f32 %v10354_v19, %v1349_v17  ;;  %v1350_v9 = vsub.f32 2.0, %v1334_v6 }
 0x35a   : > { %v1369_v19 = vmul.f32 %v10356_v57, %v1353_v34  ;;  %v16189_v34 = vld [vmem:[#allocation88_spill] sm:$0xff] }
 0x35b   : > { %3314 = vrot.lane.b32.xlu0 %v11508_v40, %s11146_s24  ;;  %v1381_v8 = vmul.f32 %v12074_v20, %v1365_v48  ;;  %v1366_v14 = vmul.f32 %v10358_v4, %v1350_v9  ;;  %v1308_v20 = vpop.xlane.xlu2 %1307 }
 0x35c   : > { %v10360_v45 = vpop.eup %10359 }
 0x35d   : > { %v1336_v23 = vmul.f32 %v10360_v45, %v1284_v21  ;;  %v12166_v24 = vpop.xlane.xlu1 %1292  ;;  %9284 = vmatmul.msk.f32.gmra.mxu3 %vm890_vm0, %v1380_v7 }
 0x35e   : > { %3320 = vrot.lane.b32.xlu1 %v11492_v37, %s11146_s24 }
 0x35f   : > { %v1352_v62 = vsub.f32 2.0, %v1336_v23  ;;  %v16185_v23 = vld [vmem:[#allocation94_spill] sm:$0xff] }
 0x361   : > { %v1368_v56 = vmul.f32 %v10360_v45, %v1352_v62  ;;  %v9772_v45 = vunpack.i.l.bf16 %v11825_v3 }
 0x363   : > { %3431 = vrot.lane.b32.xlu0 %v11613_v12, %s11146_s24  ;;  %v1384_v21 = vmul.f32 %v12081_v10, %v1368_v56  ;;  %v1385_v10 = vmul.f32 %v12052_v55, %v1369_v19  ;;  %v16188_v56 = vld [vmem:[#allocation50_spill] sm:$0xff] }
 0x365   : > { %9288 = vmatmul.msk.f32.gmra.mxu1 %vm890_vm0, %v1384_v21  ;;  %v1296_v15 = vpop.xlane.xlu1 %1295  ;;  %9285 = vmatmul.msk.f32.vlgmr.msrb.gmra.mxu3 %vm890_vm0, %v1381_v8  ;;  %v1382_v8 = vmul.f32 %v12058_v18, %v1366_v14  ;;  %v9783_v21 = vunpack.i.h.bf16 %v16189_v34 }
 0x366   : > { %10361 = vrcp.f32 %v1296_v15  ;;  %9303 = vmatpush.xpose.msk.msrb.mxu3 %vm890_vm0, %v11837_v27  ;;  %3318 = vrot.lane.b32.xlu1 %v11495_v38, %s11146_s24 }
 0x367   : > { %10363 = vrcp.f32 %v1308_v20 }
 0x36a   : > { %9304 = vmatpush.xpose.msk.msrb.mxu3 %vm890_vm0, %v11843_v33 }
 0x36b   : > { %3316 = vrot.lane.b32.xlu0 %v11529_v46, %s11146_s24 }
 0x36c   : > { %v10362_v53 = vpop.eup %10361 }
 0x36d   : > { %v1340_v41 = vmul.f32 %v10362_v53, %v1296_v15  ;;  %9289 = vmatmul.msk.f32.vlgmr.msra.gmra.mxu1 %vm890_vm0, %v1385_v10  ;;  %v1305_v27 = vpop.xlane.xlu1 %1304  ;;  %9286 = vmatmul.msk.f32.gmra.mxu3 %vm890_vm0, %v1382_v8  ;;  %v10364_v55 = vpop.eup %10363  ;;  %v16190_v15 = vld [vmem:[#allocation117_spill] sm:$0xff]  ;;  %v16192_v10 = vld [vmem:[#allocation92_spill] sm:$0xff] }
 0x36e   : > { %1618 = vmatpush.msra.mxu1 %v11819_v31  ;;  %10365 = vrcp.f32 %v1305_v27  ;;  %3472 = vrot.lane.b32.xlu1 %v11648_v32, %s11146_s24  ;;  %v1344_v31 = vmul.f32 %v10364_v55, %v1308_v20  ;;  %v9792_v19 = vunpack.i.l.bf16 %v16190_v15  ;;  %v16191_v20 = vld [vmem:[#allocation77_spill] sm:$0xff] }
 0x36f   : > { %v1356_v9 = vsub.f32 2.0, %v1340_v41  ;;  %10367 = vrcp.f32 %v12166_v24  ;;  %v16193_v8 = vld [vmem:[#allocation97_spill] sm:$0xff]  ;;  %v9793_v41 = vunpack.i.h.bf16 %v16190_v15  ;;  %v16203_v15 = vld [vmem:[#allocation98_spill] sm:$0xff] }
 0x370   : > { %1619 = vmatpush.msra.mxu1 %v11814_v35  ;;  %v1360_v7 = vsub.f32 2.0, %v1344_v31  ;;  %v16194_v31 = vld [vmem:[#allocation84_spill] sm:$0xff] }
 0x371   : > { %v1372_v33 = vmul.f32 %v10362_v53, %v1356_v9  ;;  %v9778_v53 = vunpack.i.h.bf16 %v16193_v8 }
 0x373   : > { %3476 = vrot.lane.b32.xlu0 %v11645_v30, %s11146_s24  ;;  %v1388_v18 = vmul.f32 %v12093_v63, %v1372_v33 }
 0x374   : > { %v10366_v57 = vpop.eup %10365 }
 0x375   : > { %v1343_v4 = vmul.f32 %v10366_v57, %v1305_v27  ;;  %9292 = vmatmul.msk.f32.vlgmr.msrb.gmra.mxu2 %vm890_vm0, %v1388_v18 }
 0x376   : > { %9315 = vmatpush.xpose.msk.msrb.mxu2 %vm890_vm0, %v11969_v61  ;;  %9835 = vrot.lane.b32.xlu1 %v11750_v29, %s11145_s11  ;;  %v9773_v61 = vunpack.i.h.bf16 %v11825_v3  ;;  %v16187_v3 = vld [vmem:[#allocation64_spill] sm:$0xff] }
 0x377   : > { %v1359_v17 = vsub.f32 2.0, %v1343_v4 }
 0x379   : > { %v1375_v35 = vmul.f32 %v10366_v57, %v1359_v17  ;;  %v16195_v17 = vld [vmem:[#allocation82_spill] sm:$0xff] }
 0x37a   : > { %9316 = vmatpush.xpose.msk.msrb.mxu2 %vm890_vm0, %v11917_v36  ;;  %v1376_v36 = vmul.f32 %v10364_v55, %v1360_v7 }
 0x37b   : > { %9830 = vrot.lane.b32.xlu0 %v11610_v11, %s11145_s11  ;;  %v1391_v63 = vmul.f32 %v12100_v51, %v1375_v35 }
 0x37d   : > { %9295 = vmatmul.msk.f32.vlgmr.msrb.gmra.mxu0 %vm890_vm0, %v1391_v63  ;;  %9301 = vmatmul.msk.f32.vlgmr.msra.gmra.mxu2 %vm890_vm0, %v11799_v0  ;;  %v1392_v0 = vmul.f32 %v12064_v44, %v1376_v36  ;;  %v16197_v36 = vld [vmem:[#allocation105_spill] sm:$0xff] }
 0x37e   : > { %9323 = vmatpush.xpose.msk.msrb.mxu0 %vm890_vm0, %v11941_v49  ;;  %2191 = vmatpush.msra.mxu2 %v9772_v45  ;;  %v10368_v49 = vpop.eup %10367 }
 0x37f   : > { %v1339_v14 = vmul.f32 %v10368_v49, %v12166_v24 }
 0x380   : > { %2192 = vmatpush.msra.mxu2 %v9773_v61  ;;  %v16196_v61 = vld [vmem:[#allocation81_spill] sm:$0xff] }
 0x381   : > { %v1355_v9 = vsub.f32 2.0, %v1339_v14  ;;  %v9782_v14 = vunpack.i.l.bf16 %v16189_v34 }
 0x382   : > { %9324 = vmatpush.xpose.msk.msrb.mxu0 %vm890_vm0, %v16185_v23  ;;  %v1290_v51 = vpop.xlane.xlu0 %1289  ;;  %v16198_v23 = vld [vmem:[#allocation101_spill] sm:$0xff] }
 0x383   : > { %10369 = vrcp.f32 %v1290_v51  ;;  %3474 = vrot.lane.b32.xlu0 %v16186_v50, %s11146_s24  ;;  %v1371_v57 = vmul.f32 %v10368_v49, %v1355_v9 }
 0x385   : > { %9296 = vmatmul.msk.f32.gmra.mxu0 %vm890_vm0, %v1392_v0  ;;  %9302 = vmatmul.msk.f32.gmra.mxu2 %vm890_vm0, %v16187_v3  ;;  %v1387_v7 = vmul.f32 %v12086_v13, %v1371_v57  ;;  %v16199_v3 = vld [vmem:[#allocation109_spill] sm:$0xff]  ;;  %v16200_v13 = vld [vmem:[#allocation103_spill] sm:$0xff] }
 0x389   : > { %v10370_v6 = vpop.eup %10369 }
 0x38a   : > { %v1338_v48 = vmul.f32 %v10370_v6, %v1290_v51  ;;  %v1299_v62 = vpop.xlane.xlu0 %1298  ;;  %v9798_v51 = vunpack.i.h.bf16 %v16198_v23 }
 0x38b   : > { %10371 = vrcp.f32 %v1299_v62  ;;  %3470 = vrot.lane.b32.xlu0 %v16188_v56, %s11146_s24 }
 0x38c   : > { %v1354_v44 = vsub.f32 2.0, %v1338_v48  ;;  %v16202_v48 = vld [vmem:[#allocation89_spill] sm:$0xff] }
 0x38d   : > { %9309 = vmatmul.msk.f32.vlgmr.msra.gmra.mxu0 %vm890_vm0, %v16191_v20  ;;  %9317 = vmatmul.msk.f32.vlgmr.msrb.gmra.mxu2 %vm890_vm0, %v16192_v10  ;;  %v9777_v20 = vunpack.i.l.bf16 %v16193_v8 }
 0x38e   : > { %2265 = vmatpush.msra.mxu0 %v9792_v19  ;;  %2339 = vmatpush.msrb.mxu2 %v9783_v21  ;;  %v1370_v27 = vmul.f32 %v10370_v6, %v1354_v44  ;;  %v16201_v6 = vld [vmem:[#allocation87_spill] sm:$0xff]  ;;  %v12257_v21 = vpop.permute.xlu2 %9810  ;;  %v12261_v19 = vpop.permute.xlu1 %9820  ;;  %v16204_v44 = vld [vmem:[#allocation69_spill] sm:$0xff] }
 0x390   : > { %2266 = vmatpush.msra.mxu0 %v9793_v41  ;;  %2340 = vmatpush.msrb.mxu2 %v9778_v53  ;;  %v1386_v33 = vmul.f32 %v12112_v58, %v1370_v27  ;;  %v16205_v53 = vld [vmem:[#allocation75_spill] sm:$0xff] }
 0x391   : > { %v10372_v24 = vpop.eup %10371 }
 0x392   : > { %v1341_v55 = vmul.f32 %v10372_v24, %v1299_v62  ;;  %9290 = vmatmul.msk.f32.gmra.mxu1 %vm890_vm0, %v1386_v33  ;;  %v1302_v18 = vpop.xlane.xlu0 %1301  ;;  %v16206_v33 = vld [vmem:[#allocation93_spill] sm:$0xff] }
 0x393   : > { %10373 = vrcp.f32 %v1302_v18  ;;  %v9788_v8 = vunpack.i.h.bf16 %v16206_v33 }
 0x394   : > { %v1357_v4 = vsub.f32 2.0, %v1341_v55 }
 0x395   : > { %9310 = vmatmul.msk.f32.gmra.mxu0 %vm890_vm0, %v16194_v31  ;;  %9318 = vmatmul.msk.f32.gmra.mxu2 %vm890_vm0, %v16195_v17  ;;  %v16208_v17 = vld [vmem:[#allocation113_spill] sm:$0xff] }
 0x396   : > { %v1373_v35 = vmul.f32 %v10372_v24, %v1357_v4  ;;  %v1314_v10 = vpop.xlane.xlu2 %1313  ;;  %v9787_v24 = vunpack.i.l.bf16 %v16206_v33 }
 0x397   : > { %10375 = vrcp.f32 %v1314_v10 }
 0x398   : > { %v1389_v63 = vmul.f32 %v12118_v16, %v1373_v35  ;;  %v9803_v16 = vunpack.i.h.bf16 %v16200_v13  ;;  %v16209_v35 = vld [vmem:[#allocation91_spill] sm:$0xff] }
 0x399   : > { %v10374_v58 = vpop.eup %10373 }
 0x39a   : > { %v1342_v45 = vmul.f32 %v10374_v58, %v1302_v18  ;;  %9291 = vmatmul.msk.f32.vlgmr.msrb.gmra.mxu1 %vm890_vm0, %v1387_v7  ;;  %9293 = vmatmul.msk.f32.vlgmr.msra.gmra.mxu3 %vm890_vm0, %v1389_v63  ;;  %v16207_v18 = vld [vmem:[#allocation90_spill] sm:$0xff]  ;;  %v16210_v63 = vld [vmem:[#allocation96_spill] sm:$0xff] }
 0x39b   : > { %9311 = vmatpush.xpose.msk.msrb.mxu1 %vm890_vm0, %v16196_v61  ;;  %9319 = vmatpush.xpose.msk.msra.mxu3 %vm890_vm0, %v16197_v36  ;;  %v16211_v61 = vld [vmem:[#allocation76_spill] sm:$0xff]  ;;  %v16212_v36 = vld [vmem:[#allocation83_spill] sm:$0xff] }
 0x39c   : > { %v1358_v0 = vsub.f32 2.0, %v1342_v45  ;;  %v9797_v45 = vunpack.i.l.bf16 %v16198_v23  ;;  %v16215_v23 = vld [vmem:[#allocation115_spill] sm:$0xff] }
 0x39d   : > { %9325 = vmatmul.msk.f32.vlgmr.msrb.gmra.mxu0 %vm890_vm0, %v16199_v3  ;;  %v10376_v41 = vpop.eup %10375  ;;  %v16214_v3 = vld [vmem:[#allocation100_spill] sm:$0xff] }
 0x39e   : > { %2413 = vmatpush.msrb.mxu0 %v9798_v51  ;;  %v1374_v49 = vmul.f32 %v10374_v58, %v1358_v0  ;;  %v1346_v34 = vmul.f32 %v10376_v41, %v1314_v10  ;;  %v16213_v51 = vld [vmem:[#allocation112_spill] sm:$0xff] }
 0x39f   : > { %9312 = vmatpush.xpose.msk.msrb.mxu1 %vm890_vm0, %v16201_v6  ;;  %9320 = vmatpush.xpose.msk.msra.mxu3 %vm890_vm0, %v16202_v48  ;;  %v9807_v0 = vunpack.i.l.bf16 %v16213_v51 }
 0x3a0   : > { %2414 = vmatpush.msrb.mxu0 %v9803_v16  ;;  %v1390_v62 = vmul.f32 %v12126_v5, %v1374_v49  ;;  %v1362_v4 = vsub.f32 2.0, %v1346_v34 }
 0x3a2   : > { %9294 = vmatmul.msk.f32.gmra.mxu3 %vm890_vm0, %v1390_v62  ;;  %v1378_v7 = vmul.f32 %v10376_v41, %v1362_v4 }
 0x3a4   : > { %v1394_v58 = vmul.f32 %v12106_v54, %v1378_v7  ;;  %v9808_v54 = vunpack.i.h.bf16 %v16213_v51 }
 0x3a5   : > { %9326 = vmatmul.msk.f32.gmra.mxu0 %vm890_vm0, %v16203_v15  ;;  %v12299_v49 = vpop.permute.xlu0 %9815 }
 0x3aa   : > { %9305 = vmatmul.msk.f32.vlgmr.msrb.gmra.mxu3 %vm890_vm0, %v16204_v44 }
 0x3ab   : > { %2228 = vmatpush.msrb.mxu3 %v9782_v14  ;;  %v12341_v4 = vpop.f32.mrf.mxu1 }
 0x3ac   : > { %16228 = vst [vmem:[#allocation109_spill] sm:$0xff] %v12341_v4 }
 0x3ad   : > { %2229 = vmatpush.msrb.mxu3 %v9777_v20  ;;  %v12309_v14 = vpop.permute.xlu0 %9825 }
 0x3b0   : > { %v1311_v5 = vpop.xlane.xlu1 %1310 }
 0x3b1   : > { %10377 = vrcp.f32 %v1311_v5 }
 0x3b2   : > { %9306 = vmatmul.msk.f32.gmra.mxu3 %vm890_vm0, %v16205_v53 }
 0x3b5   : > { %v12321_v41 = vpop.permute.xlu0 %3277 }
 0x3b6   : > { %16221 = vst [vmem:[#allocation92_spill] sm:$0xff] %v12321_v41 }
 0x3b7   : > { %v10378_v27 = vpop.eup %10377 }
 0x3b8   : > { %v1345_v9 = vmul.f32 %v10378_v27, %v1311_v5 }
 0x3ba   : > { %v1361_v55 = vsub.f32 2.0, %v1345_v9  ;;  %9321 = vmatmul.msk.f32.vlgmr.msra.gmra.mxu3 %vm890_vm0, %v16207_v18 }
 0x3bb   : > { %2376 = vmatpush.msra.mxu3 %v9787_v24 }
 0x3bc   : > { %v1377_v57 = vmul.f32 %v10378_v27, %v1361_v55 }
 0x3bd   : > { %2377 = vmatpush.msra.mxu3 %v9788_v8  ;;  %v12327_v33 = vpop.permute.xlu0 %3437 }
 0x3be   : > { %v1393_v31 = vmul.f32 %v12143_v39, %v1377_v57  ;;  %v9802_v39 = vunpack.i.l.bf16 %v16200_v13  ;;  %16224 = vst [vmem:[#allocation82_spill] sm:$0xff] %v12327_v33 }
 0x3c0   : > { %9297 = vmatmul.msk.f32.vlgmr.msra.gmra.mxu1 %vm890_vm0, %v1393_v31 }
 0x3c1   : > { %9327 = vmatpush.xpose.msk.msra.mxu1 %vm890_vm0, %v16208_v17 }
 0x3c2   : > { %9322 = vmatmul.msk.f32.gmra.mxu3 %vm890_vm0, %v16209_v35 }
 0x3c5   : > { %9328 = vmatpush.xpose.msk.msra.mxu1 %vm890_vm0, %v16210_v63  ;;  %v12335_v18 = vpop.permute.xlu0 %3435 }
 0x3c6   : > { %16227 = vst [vmem:[#allocation101_spill] sm:$0xff] %v12335_v18 }
 0x3c8   : > { %9298 = vmatmul.msk.f32.gmra.mxu1 %vm890_vm0, %v1394_v58 }
 0x3cd   : > { %v12345_v17 = vpop.permute.xlu0 %3314 }
 0x3ce   : > { %16229 = vst [vmem:[#allocation103_spill] sm:$0xff] %v12345_v17 }
 0x3d0   : > { %9313 = vmatmul.msk.f32.vlgmr.msrb.gmra.mxu1 %vm890_vm0, %v16211_v61 }
 0x3d1   : > { %2302 = vmatpush.msrb.mxu1 %v9797_v45 }
 0x3d3   : > { %2303 = vmatpush.msrb.mxu1 %v9802_v39 }
 0x3d5   : > { %v12359_v39 = vpop.permute.xlu0 %3431 }
 0x3d6   : > { %16231 = vst [vmem:[#allocation89_spill] sm:$0xff] %v12359_v39 }
 0x3d8   : > { %9314 = vmatmul.msk.f32.gmra.mxu1 %vm890_vm0, %v16212_v36  ;;  %v12295_v16 = vpop.f32.mrf.mxu3 }
 0x3d9   : > { %16216 = vst [vmem:[#allocation94_spill] sm:$0xff] %v12295_v16 }
 0x3e0   : > { %9329 = vmatmul.msk.f32.vlgmr.msra.gmra.mxu1 %vm890_vm0, %v16214_v3  ;;  %v12303_v48 = vpop.f32.mrf.mxu3 }
 0x3e1   : > { %2450 = vmatpush.msra.mxu1 %v9807_v0  ;;  %16218 = vst [vmem:[#allocation88_spill] sm:$0xff] %v12303_v48 }
 0x3e2   : > { %v12355_v45 = vpop.f32.mrf.mxu1 }
 0x3e3   : > { %2451 = vmatpush.msra.mxu1 %v9808_v54  ;;  %16230 = vst [vmem:[#allocation87_spill] sm:$0xff] %v12355_v45 }
 0x3e8   : > { %9330 = vmatmul.msk.f32.gmra.mxu1 %vm890_vm0, %v16215_v23  ;;  %v12313_v20 = vpop.f32.mrf.mxu3  ;;  %v12371_v23 = vpop.permute.xlu0 %3316 }
 0x3e9   : > { %16219 = vst [vmem:[#allocation117_spill] sm:$0xff] %v12313_v20 }
 0x3ea   : > { %v12367_v3 = vpop.f32.mrf.mxu1  ;;  %16233 = vst [vmem:[#allocation69_spill] sm:$0xff] %v12371_v23 }
 0x3eb   : > { %16232 = vst [vmem:[#allocation98_spill] sm:$0xff] %v12367_v3 }
 0x3f0   : > { %v12323_v27 = vpop.f32.mrf.mxu3 }
 0x3f1   : > { %16222 = vst [vmem:[#allocation97_spill] sm:$0xff] %v12323_v27 }
 0x3f8   : > { %v12297_v13 = vpop.f32.mrf.mxu2 }
 0x3f9   : > { %16217 = vst [vmem:[#allocation64_spill] sm:$0xff] %v12297_v13 }
 0x3fa   : > { %v12317_v5 = vpop.f32.mrf.mxu0 }
 0x3fb   : > { %16220 = vst [vmem:[#allocation77_spill] sm:$0xff] %v12317_v5  ;;  %v16238_v5 = vld [vmem:[#allocation30_spill] sm:$0xff] }
 0x400   : > { %v12301_v6 = vpop.f32.mrf.mxu2 }
 0x401   : > { %v1939_v62 = vsel %vm890_vm0, %v12301_v6, -inf }
 0x402   : > { %1940 = vmax.xlane.f32.xlu0 %v1939_v62  ;;  %v12325_v9 = vpop.f32.mrf.mxu0 }
 0x403   : > { %16223 = vst [vmem:[#allocation84_spill] sm:$0xff] %v12325_v9 }
 0x408   : > { %v12307_v15 = vpop.f32.mrf.mxu2 }
 0x409   : > { %v1942_v44 = vsel %vm890_vm0, %v12307_v15, -inf }
 0x40a   : > { %1943 = vmax.xlane.f32.xlu2 %v1942_v44  ;;  %v12331_v34 = vpop.f32.mrf.mxu0 }
 0x40b   : > { %v1951_v51 = vsel %vm890_vm0, %v12331_v34, -inf }
 0x410   : > { %v12315_v10 = vpop.f32.mrf.mxu2 }
 0x411   : > { %v1963_v53 = vsel %vm890_vm0, %v12315_v10, -inf }
 0x412   : > { %1964 = vmax.xlane.f32.xlu0 %v1963_v53  ;;  %v12343_v31 = vpop.f32.mrf.mxu0 }
 0x413   : > { %v1954_v53 = vsel %vm890_vm0, %v12343_v31, -inf }
 0x418   : > { %v12347_v35 = vpop.f32.mrf.mxu2 }
 0x419   : > { %v1966_v63 = vsel %vm890_vm0, %v12347_v35, -inf }
 0x41a   : > { %v12357_v61 = vpop.f32.mrf.mxu0 }
 0x41b   : > { %v1975_v17 = vsel %vm890_vm0, %v12357_v61, -inf }
 0x41d   : > { %v12329_v24 = vpop.f32.mrf.mxu3 }
 0x41e   : > { %16225 = vst [vmem:[#allocation81_spill] sm:$0xff] %v12329_v24 }
 0x422   : > { %v12369_v54 = vpop.f32.mrf.mxu0 }
 0x423   : > { %v1978_v44 = vsel %vm890_vm0, %v12369_v54, -inf }
 0x425   : > { %v12333_v55 = vpop.f32.mrf.mxu3 }
 0x426   : > { %16226 = vst [vmem:[#allocation105_spill] sm:$0xff] %v12333_v55  ;;  %v16239_v55 = vld [vmem:[#allocation67_spill] sm:$0xff] }
 0x42d   : > { %v12337_v8 = vpop.f32.mrf.mxu3 }
 0x42e   : > { %v1945_v57 = vsel %vm890_vm0, %v12337_v8, -inf }
 0x42f   : > { %1946 = vmax.xlane.f32.xlu1 %v1945_v57 }
 0x435   : > { %v12349_v7 = vpop.f32.mrf.mxu3 }
 0x436   : > { %v1948_v58 = vsel %vm890_vm0, %v12349_v7, -inf }
 0x437   : > { %1967 = vmax.xlane.f32.xlu1 %v1966_v63  ;;  %1949 = vmax.xlane.f32.xlu2 %v1948_v58  ;;  %v12381_v63 = vpop.f32.mrf.mxu1  ;;  %v12383_v58 = vpop.permute.xlu0 %3476 }
 0x438   : > { %16234 = vst [vmem:[#allocation75_spill] sm:$0xff] %v12381_v63 }
 0x439   : > { %16235 = vst [vmem:[#allocation93_spill] sm:$0xff] %v12383_v58 }
 0x43d   : > { %v12361_v36 = vpop.f32.mrf.mxu3 }
 0x43e   : > { %v1969_v0 = vsel %vm890_vm0, %v12361_v36, -inf }
 0x43f   : > { %1952 = vmax.xlane.f32.xlu1 %v1951_v51  ;;  %1970 = vmax.xlane.f32.xlu0 %v1969_v0  ;;  %v12385_v51 = vpop.f32.mrf.mxu1  ;;  %v12387_v0 = vpop.permute.xlu0 %9830 }
 0x440   : > { %16236 = vst [vmem:[#allocation90_spill] sm:$0xff] %v12385_v51  ;;  %v12405_v51 = vpop.permute.xlu1 %3279 }
 0x445   : > { %v12373_v62 = vpop.f32.mrf.mxu3 }
 0x446   : > { %v1972_v57 = vsel %vm890_vm0, %v12373_v62, -inf }
 0x447   : > { %1979 = vmax.xlane.f32.xlu1 %v1978_v44  ;;  %1955 = vmax.xlane.f32.xlu0 %v1954_v53  ;;  %v12389_v9 = vpop.f32.mrf.mxu1  ;;  %v12395_v24 = vpop.permute.xlu0 %3474 }
 0x448   : > { %1973 = vmax.xlane.f32.xlu2 %v1972_v57  ;;  %16237 = vst [vmem:[#allocation113_spill] sm:$0xff] %v12389_v9  ;;  %v12399_v53 = vpop.permute.xlu2 %3281  ;;  %v12412_v20 = vpop.permute.xlu1 %3320 }
 0x449   : > { %16240 = vst [vmem:[#allocation91_spill] sm:$0xff] %v12395_v24 }
 0x44a   : > { %16244 = vst [vmem:[#allocation112_spill] sm:$0xff] %v12412_v20 }
 0x44f   : > { %v12397_v44 = vpop.f32.mrf.mxu1  ;;  %v12401_v57 = vpop.permute.xlu0 %3470 }
 0x450   : > { %16241 = vst [vmem:[#allocation96_spill] sm:$0xff] %v12397_v44  ;;  %v12407_v9 = vpop.permute.xlu2 %3275 }
 0x451   : > { %16242 = vst [vmem:[#allocation76_spill] sm:$0xff] %v12401_v57 }
 0x452   : > { %16243 = vst [vmem:[#allocation83_spill] sm:$0xff] %v12407_v9 }
 0x457   : > { %v12403_v13 = vpop.f32.mrf.mxu1 }
 0x458   : > { %v12416_v45 = vpop.permute.xlu2 %3433  ;;  %v1957_v57 = vsel %vm890_vm0, %v12403_v13, -inf }
 0x459   : > { %16245 = vst [vmem:[#allocation100_spill] sm:$0xff] %v12416_v45 }
 0x45b   : > { %3359 = vrot.lane.b32.xlu0 %v16238_v5, %s11146_s24 }
 0x45f   : > { %v12410_v27 = vpop.f32.mrf.mxu1 }
 0x460   : > { %9840 = vrot.lane.b32.xlu2 %v16239_v55, %s11145_s11  ;;  %v1960_v45 = vsel %vm890_vm0, %v12410_v27, -inf }
 0x467   : > { %v12420_v16 = vpop.f32.mrf.mxu1 }
 0x46f   : > { %v12432_v39 = vpop.f32.mrf.mxu1 }
 0x475   : > { %v1941_v63 = vpop.xlane.xlu0 %1940 }
 0x476   : > { %v1987_v3 = vsub.f32 %v12301_v6, %v1941_v63 }
 0x478   : > { %v2003_v4 = vmul.f32 1.442695, %v1987_v3  ;;  %v12424_v3 = vpop.permute.xlu1 %3318 }
 0x479   : > { %16246 = vst [vmem:[#allocation115_spill] sm:$0xff] %v12424_v3 }
 0x47a   : > { %10379 = vpow2.f32 %v2003_v4 }
 0x47d   : > { %v1944_v63 = vpop.xlane.xlu2 %1943 }
 0x480   : > { %v12414_v44 = vpop.eup %10379  ;;  %v12436_v24 = vpop.permute.xlu1 %3472 }
 0x481   : > { %v2035_v48 = vsel %vm890_vm0, %v12414_v44, 0.0  ;;  %16247 = vst [vmem:[#allocation123_spill] sm:$0xff] %v12436_v24 }
 0x482   : > { %2036 = vadd.xlane.f32.xlu1 %v2035_v48  ;;  %v1988_v48 = vsub.f32 %v12307_v15, %v1944_v63  ;;  %v1981_v15 = vsel %vm890_vm0, %v12420_v16, -inf }
 0x485   : > { %1958 = vmax.xlane.f32.xlu0 %v1957_v57  ;;  %v1965_v6 = vpop.xlane.xlu0 %1964  ;;  %v2005_v57 = vmul.f32 1.442695, %v1988_v48 }
 0x486   : > { %v1995_v4 = vsub.f32 %v12315_v10, %v1965_v6  ;;  %v1984_v10 = vsel %vm890_vm0, %v12432_v39, -inf }
 0x488   : > { %v2019_v23 = vmul.f32 1.442695, %v1995_v4 }
 0x489   : > { %1976 = vmax.xlane.f32.xlu2 %v1975_v17 }
 0x48a   : > { %10381 = vpow2.f32 %v2019_v23 }
 0x48b   : > { %10383 = vpow2.f32 %v2005_v57 }
 0x48d   : > { %1961 = vmax.xlane.f32.xlu0 %v1960_v45  ;;  %v12446_v45 = vpop.permute.xlu1 %9835 }
 0x490   : > { %v12434_v41 = vpop.eup %10381 }
 0x491   : > { %1985 = vmax.xlane.f32.xlu2 %v1984_v10  ;;  %v2059_v17 = vsel %vm890_vm0, %v12434_v41, 0.0  ;;  %v12444_v23 = vpop.eup %10383  ;;  %v16248_v10 = vld [vmem:[#allocation73_spill] sm:$0xff] }
 0x492   : > { %2060 = vadd.xlane.f32.xlu1 %v2059_v17  ;;  %v2038_v6 = vsel %vm890_vm0, %v12444_v23, 0.0 }
 0x495   : > { %1982 = vmax.xlane.f32.xlu0 %v1981_v15 }
 0x49d   : > { %2039 = vadd.xlane.f32.xlu0 %v2038_v6 }
 0x4a2   : > { %v1947_v4 = vpop.xlane.xlu1 %1946 }
 0x4a3   : > { %v1989_v63 = vsub.f32 %v12337_v8, %v1947_v4 }
 0x4a5   : > { %v2007_v48 = vmul.f32 1.442695, %v1989_v63 }
 0x4a7   : > { %10385 = vpow2.f32 %v2007_v48 }
 0x4a9   : > { %9845 = vrot.lane.b32.xlu2 %v16248_v10, %s11145_s11 }
 0x4aa   : > { %v1968_v57 = vpop.xlane.xlu1 %1967  ;;  %v1950_v17 = vpop.xlane.xlu2 %1949 }
 0x4ab   : > { %v1996_v15 = vsub.f32 %v12347_v35, %v1968_v57  ;;  %v1990_v24 = vsub.f32 %v12349_v7, %v1950_v17 }
 0x4ad   : > { %v12455_v58 = vpop.eup %10385  ;;  %v2021_v9 = vmul.f32 1.442695, %v1996_v15  ;;  %v2009_v18 = vmul.f32 1.442695, %v1990_v24 }
 0x4ae   : > { %v2041_v6 = vsel %vm890_vm0, %v12455_v58, 0.0 }
 0x4af   : > { %10387 = vpow2.f32 %v2021_v9  ;;  %2042 = vadd.xlane.f32.xlu0 %v2041_v6 }
 0x4b0   : > { %10389 = vpow2.f32 %v2009_v18 }
 0x4b2   : > { %v1953_v8 = vpop.xlane.xlu1 %1952  ;;  %v1971_v4 = vpop.xlane.xlu0 %1970 }
 0x4b3   : > { %v1991_v63 = vsub.f32 %v12331_v34, %v1953_v8  ;;  %v1997_v35 = vsub.f32 %v12361_v36, %v1971_v4 }
 0x4b5   : > { %v12460_v48 = vpop.eup %10387  ;;  %v2011_v10 = vmul.f32 1.442695, %v1991_v63  ;;  %v2023_v18 = vmul.f32 1.442695, %v1997_v35 }
 0x4b6   : > { %v12463_v7 = vpop.eup %10389  ;;  %v2062_v24 = vsel %vm890_vm0, %v12460_v48, 0.0 }
 0x4b7   : > { %10391 = vpow2.f32 %v2011_v10  ;;  %2063 = vadd.xlane.f32.xlu0 %v2062_v24  ;;  %v2044_v9 = vsel %vm890_vm0, %v12463_v7, 0.0 }
 0x4b8   : > { %2045 = vadd.xlane.f32.xlu1 %v2044_v9  ;;  %10393 = vpow2.f32 %v2023_v18 }
 0x4ba   : > { %v1956_v15 = vpop.xlane.xlu0 %1955  ;;  %v1980_v9 = vpop.xlane.xlu1 %1979 }
 0x4bb   : > { %v1974_v57 = vpop.xlane.xlu2 %1973  ;;  %v1992_v6 = vsub.f32 %v12343_v31, %v1956_v15  ;;  %v2000_v56 = vsub.f32 %v12369_v54, %v1980_v9 }
 0x4bc   : > { %v1998_v34 = vsub.f32 %v12373_v62, %v1974_v57 }
 0x4bd   : > { %v12469_v17 = vpop.eup %10391  ;;  %v2013_v4 = vmul.f32 1.442695, %v1992_v6 }
 0x4be   : > { %v2047_v36 = vsel %vm890_vm0, %v12469_v17, 0.0  ;;  %v2025_v10 = vmul.f32 1.442695, %v1998_v34  ;;  %v12475_v8 = vpop.eup %10393 }
 0x4bf   : > { %2048 = vadd.xlane.f32.xlu0 %v2047_v36  ;;  %v2065_v63 = vsel %vm890_vm0, %v12475_v8, 0.0 }
 0x4c0   : > { %10395 = vpow2.f32 %v2025_v10 }
 0x4c1   : > { %10397 = vpow2.f32 %v2013_v4 }
 0x4c3   : > { %v12489_v57 = vpop.permute.xlu2 %9840 }
 0x4c6   : > { %v12479_v35 = vpop.eup %10395 }
 0x4c7   : > { %2066 = vadd.xlane.f32.xlu0 %v2065_v63  ;;  %v12481_v62 = vpop.eup %10397  ;;  %v2068_v24 = vsel %vm890_vm0, %v12479_v35, 0.0 }
 0x4c8   : > { %v2050_v31 = vsel %vm890_vm0, %v12481_v62, 0.0 }
 0x4cd   : > { %v12487_v18 = vpop.permute.xlu0 %3359 }
 0x4ce   : > { %16249 = vst [vmem:[#allocation124_spill] sm:$0xff] %v12487_v18 }
 0x4cf   : > { %2069 = vadd.xlane.f32.xlu0 %v2068_v24 }
 0x4d2   : > { %2051 = vadd.xlane.f32.xlu2 %v2050_v31 }
 0x4f5   : > { %v2037_v34 = vpop.xlane.xlu1 %2036 }
 0x4f6   : > { %10399 = vrcp.f32 %v2037_v34 }
 0x4f8   : > { %v1959_v15 = vpop.xlane.xlu0 %1958 }
 0x4f9   : > { %v1993_v36 = vsub.f32 %v12403_v13, %v1959_v15 }
 0x4fb   : > { %v2015_v6 = vmul.f32 1.442695, %v1993_v36 }
 0x4fc   : > { %v10400_v10 = vpop.eup %10399  ;;  %v1977_v4 = vpop.xlane.xlu2 %1976 }
 0x4fd   : > { %v2099_v63 = vmul.f32 %v10400_v10, %v2037_v34  ;;  %10401 = vpow2.f32 %v2015_v6  ;;  %v1999_v24 = vsub.f32 %v12357_v61, %v1977_v4  ;;  %v16250_v61 = vld [vmem:[#allocation74_spill] sm:$0xff] }
 0x4ff   : > { %v2115_v3 = vsub.f32 2.0, %v2099_v63  ;;  %v2027_v33 = vmul.f32 1.442695, %v1999_v24  ;;  %v16252_v24 = vld [vmem:[#allocation28_spill] sm:$0xff] }
 0x500   : > { %v1962_v31 = vpop.xlane.xlu0 %1961 }
 0x501   : > { %v2131_v20 = vmul.f32 %v10400_v10, %v2115_v3  ;;  %10403 = vpow2.f32 %v2027_v33  ;;  %v1994_v55 = vsub.f32 %v12410_v27, %v1962_v31  ;;  %v2029_v27 = vmul.f32 1.442695, %v2000_v56 }
 0x503   : > { %v12494_v18 = vpop.eup %10401  ;;  %v2147_v13 = vmul.f32 %v12414_v44, %v2131_v20  ;;  %v2017_v15 = vmul.f32 1.442695, %v1994_v55  ;;  %v16251_v20 = vld [vmem:[#allocation71_spill] sm:$0xff] }
 0x504   : > { %v2053_v34 = vsel %vm890_vm0, %v12494_v18, 0.0 }
 0x505   : > { %10405 = vpow2.f32 %v2017_v15  ;;  %9331 = vmatmul.msk.f32.vlgmr.msra.gmra.mxu2 %vm890_vm0, %v2147_v13  ;;  %2054 = vadd.xlane.f32.xlu0 %v2053_v34  ;;  %v2061_v9 = vpop.xlane.xlu1 %2060 }
 0x506   : > { %9347 = vmatpush.xpose.msk.msra.mxu2 %vm890_vm0, %v16250_v61  ;;  %10407 = vpow2.f32 %v2029_v27  ;;  %v16253_v27 = vld [vmem:[#allocation53_spill] sm:$0xff] }
 0x507   : > { %v12503_v33 = vpop.eup %10403  ;;  %10409 = vrcp.f32 %v2061_v9 }
 0x508   : > { %v2071_v3 = vsel %vm890_vm0, %v12503_v33, 0.0  ;;  %v12507_v54 = vpop.xlane.xlu0 %1982 }
 0x509   : > { %2072 = vadd.xlane.f32.xlu1 %v2071_v3 }
 0x50a   : > { %9348 = vmatpush.xpose.msk.msra.mxu2 %vm890_vm0, %v16251_v20  ;;  %v16254_v20 = vld [vmem:[#allocation33_spill] sm:$0xff] }
 0x50b   : > { %v12511_v55 = vpop.eup %10405 }
 0x50c   : > { %v2056_v44 = vsel %vm890_vm0, %v12511_v55, 0.0  ;;  %v12515_v56 = vpop.eup %10407 }
 0x50d   : > { %2057 = vadd.xlane.f32.xlu2 %v2056_v44  ;;  %v2074_v6 = vsel %vm890_vm0, %v12515_v56, 0.0  ;;  %v10410_v10 = vpop.eup %10409 }
 0x50e   : > { %v2107_v31 = vmul.f32 %v10410_v10, %v2061_v9 }
 0x510   : > { %v2040_v36 = vpop.xlane.xlu0 %2039  ;;  %v2123_v34 = vsub.f32 2.0, %v2107_v31 }
 0x511   : > { %10411 = vrcp.f32 %v2040_v36 }
 0x512   : > { %v2139_v3 = vmul.f32 %v10410_v10, %v2123_v34 }
 0x515   : > { %2075 = vadd.xlane.f32.xlu2 %v2074_v6  ;;  %v16255_v6 = vld [vmem:[#allocation86_spill] sm:$0xff] }
 0x517   : > { %v10412_v4 = vpop.eup %10411 }
 0x518   : > { %v2100_v63 = vmul.f32 %v10412_v4, %v2040_v36  ;;  %v2155_v36 = vmul.f32 %v12434_v41, %v2139_v3  ;;  %v16259_v41 = vld [vmem:[#allocation27_spill] sm:$0xff] }
 0x519   : > { %3353 = vrot.lane.b32.xlu0 %v16252_v24, %s11146_s24 }
 0x51a   : > { %v2116_v13 = vsub.f32 2.0, %v2100_v63  ;;  %v16257_v63 = vld [vmem:[#allocation59_spill] sm:$0xff] }
 0x51c   : > { %v2132_v15 = vmul.f32 %v10412_v4, %v2116_v13 }
 0x51e   : > { %v2148_v61 = vmul.f32 %v12444_v23, %v2132_v15  ;;  %v16256_v23 = vld [vmem:[#allocation51_spill] sm:$0xff] }
 0x51f   : > { %v16258_v15 = vld [vmem:[#allocation79_spill] sm:$0xff] }
 0x520   : > { %9332 = vmatmul.msk.f32.gmra.mxu2 %vm890_vm0, %v2148_v61 }
 0x521   : > { %3515 = vrot.lane.b32.xlu0 %v16253_v27, %s11146_s24  ;;  %v16261_v27 = vld [vmem:[#allocation78_spill] sm:$0xff] }
 0x522   : > { %3398 = vrot.lane.b32.xlu1 %v16254_v20, %s11146_s24  ;;  %v2043_v44 = vpop.xlane.xlu0 %2042 }
 0x523   : > { %10413 = vrcp.f32 %v2043_v44 }
 0x528   : > { %9339 = vmatmul.msk.f32.vlgmr.msrb.gmra.mxu2 %vm890_vm0, %v2155_v36 }
 0x529   : > { %v10414_v9 = vpop.eup %10413  ;;  %9363 = vmatpush.xpose.msk.msrb.mxu2 %vm890_vm0, %v16255_v6  ;;  %3513 = vrot.lane.b32.xlu0 %v16256_v23, %s11146_s24 }
 0x52a   : > { %v2101_v4 = vmul.f32 %v10414_v9, %v2043_v44  ;;  %3511 = vrot.lane.b32.xlu1 %v16257_v63, %s11146_s24  ;;  %v2064_v10 = vpop.xlane.xlu0 %2063  ;;  %v16260_v44 = vld [vmem:[#allocation54_spill] sm:$0xff] }
 0x52b   : > { %v2046_v31 = vpop.xlane.xlu1 %2045  ;;  %10415 = vrcp.f32 %v2064_v10 }
 0x52c   : > { %v2117_v13 = vsub.f32 2.0, %v2101_v4  ;;  %10417 = vrcp.f32 %v2046_v31  ;;  %v1986_v4 = vpop.xlane.xlu2 %1985 }
 0x52d   : > { %9364 = vmatpush.xpose.msk.msrb.mxu2 %vm890_vm0, %v16258_v15  ;;  %3357 = vrot.lane.b32.xlu2 %v16259_v41, %s11146_s24 }
 0x52e   : > { %v2133_v34 = vmul.f32 %v10414_v9, %v2117_v13  ;;  %v16262_v9 = vld [vmem:[#allocation32_spill] sm:$0xff] }
 0x530   : > { %v2149_v61 = vmul.f32 %v12455_v58, %v2133_v34  ;;  %v16263_v34 = vld [vmem:[#allocation70_spill] sm:$0xff] }
 0x531   : > { %v10416_v3 = vpop.eup %10415  ;;  %3509 = vrot.lane.b32.xlu0 %v16260_v44, %s11146_s24  ;;  %v16264_v44 = vld [vmem:[#allocation60_spill] sm:$0xff] }
 0x532   : > { %v10418_v36 = vpop.eup %10417  ;;  %v2108_v6 = vmul.f32 %v10416_v3, %v2064_v10  ;;  %9333 = vmatmul.msk.f32.vlgmr.msrb.gmra.mxu3 %vm890_vm0, %v2149_v61  ;;  %v2049_v63 = vpop.xlane.xlu0 %2048 }
 0x533   : > { %v2102_v23 = vmul.f32 %v10418_v36, %v2046_v31  ;;  %9351 = vmatpush.xpose.msk.msrb.mxu3 %vm890_vm0, %v16261_v27  ;;  %10419 = vrcp.f32 %v2049_v63 }
 0x534   : > { %v2124_v15 = vsub.f32 2.0, %v2108_v6 }
 0x535   : > { %v2118_v50 = vsub.f32 2.0, %v2102_v23  ;;  %3355 = vrot.lane.b32.xlu2 %v16262_v9, %s11146_s24 }
 0x536   : > { %v2140_v58 = vmul.f32 %v10416_v3, %v2124_v15 }
 0x537   : > { %v2134_v13 = vmul.f32 %v10418_v36, %v2118_v50  ;;  %9352 = vmatpush.xpose.msk.msrb.mxu3 %vm890_vm0, %v16263_v34  ;;  %v12555_v50 = vpop.permute.xlu2 %9845  ;;  %v16265_v36 = vld [vmem:[#allocation34_spill] sm:$0xff] }
 0x538   : > { %v2156_v10 = vmul.f32 %v12460_v48, %v2140_v58  ;;  %v9812_v58 = vunpack.i.l.bf16 %v12257_v21 }
 0x539   : > { %v10420_v61 = vpop.eup %10419  ;;  %3554 = vrot.lane.b32.xlu0 %v16264_v44, %s11146_s24  ;;  %v2150_v31 = vmul.f32 %v12463_v7, %v2134_v13  ;;  %v2002_v7 = vsub.f32 %v12432_v39, %v1986_v4  ;;  %v16266_v13 = vld [vmem:[#allocation57_spill] sm:$0xff] }
 0x53a   : > { %v2103_v27 = vmul.f32 %v10420_v61, %v2049_v63  ;;  %9340 = vmatmul.msk.f32.gmra.mxu2 %vm890_vm0, %v2156_v10  ;;  %v2067_v23 = vpop.xlane.xlu0 %2066  ;;  %v9813_v10 = vunpack.i.h.bf16 %v12257_v21 }
 0x53b   : > { %9334 = vmatmul.msk.f32.gmra.mxu3 %vm890_vm0, %v2150_v31  ;;  %10421 = vrcp.f32 %v2067_v23  ;;  %v16267_v31 = vld [vmem:[#allocation31_spill] sm:$0xff]  ;;  %v2033_v39 = vmul.f32 1.442695, %v2002_v7 }
 0x53c   : > { %v2119_v3 = vsub.f32 2.0, %v2103_v27  ;;  %v16268_v27 = vld [vmem:[#allocation106_spill] sm:$0xff]  ;;  %v16271_v7 = vld [vmem:[#allocation35_spill] sm:$0xff] }
 0x53d   : > { %3396 = vrot.lane.b32.xlu2 %v16265_v36, %s11146_s24 }
 0x53e   : > { %v2135_v48 = vmul.f32 %v10420_v61, %v2119_v3 }
 0x540   : > { %v2151_v6 = vmul.f32 %v12469_v17, %v2135_v48  ;;  %v16270_v48 = vld [vmem:[#allocation107_spill] sm:$0xff] }
 0x541   : > { %v10422_v15 = vpop.eup %10421 }
 0x542   : > { %v2109_v63 = vmul.f32 %v10422_v15, %v2067_v23  ;;  %9335 = vmatmul.msk.f32.vlgmr.msra.gmra.mxu0 %vm890_vm0, %v2151_v6  ;;  %9349 = vmatmul.msk.f32.vlgmr.msra.gmra.mxu2 %vm890_vm0, %v16266_v13  ;;  %v2070_v34 = vpop.xlane.xlu0 %2069 }
 0x543   : > { %9355 = vmatpush.xpose.msk.msra.mxu0 %vm890_vm0, %v12036_v42  ;;  %3021 = vmatpush.msra.mxu2 %v9812_v58  ;;  %10423 = vrcp.f32 %v2070_v34  ;;  %v16269_v42 = vld [vmem:[#allocation68_spill] sm:$0xff] }
 0x544   : > { %v2125_v17 = vsub.f32 2.0, %v2109_v63 }
 0x545   : > { %v2052_v61 = vpop.xlane.xlu2 %2051  ;;  %3022 = vmatpush.msra.mxu2 %v9813_v10  ;;  %3392 = vrot.lane.b32.xlu2 %v16267_v31, %s11146_s24 }
 0x546   : > { %v2141_v4 = vmul.f32 %v10422_v15, %v2125_v17  ;;  %10425 = vrcp.f32 %v2052_v61  ;;  %v9818_v17 = vunpack.i.h.bf16 %v12299_v49 }
 0x547   : > { %9356 = vmatpush.xpose.msk.msra.mxu0 %vm890_vm0, %v16268_v27  ;;  %10427 = vpow2.f32 %v2033_v39  ;;  %v2001_v39 = vsub.f32 %v12420_v16, %v12507_v54  ;;  %v9823_v27 = vunpack.i.h.bf16 %v12261_v19  ;;  %v9817_v16 = vunpack.i.l.bf16 %v12299_v49  ;;  %v16274_v54 = vld [vmem:[#allocation72_spill] sm:$0xff] }
 0x548   : > { %v2157_v23 = vmul.f32 %v12475_v8, %v2141_v4  ;;  %v16272_v8 = vld [vmem:[#allocation102_spill] sm:$0xff]  ;;  %v9827_v49 = vunpack.i.l.bf16 %v12309_v14 }
 0x549   : > { %v10424_v21 = vpop.eup %10423 }
 0x54a   : > { %v2110_v3 = vmul.f32 %v10424_v21, %v2070_v34  ;;  %9341 = vmatmul.msk.f32.vlgmr.msra.gmra.mxu3 %vm890_vm0, %v2157_v23  ;;  %9350 = vmatmul.msk.f32.gmra.mxu2 %vm890_vm0, %v16269_v42  ;;  %v9822_v42 = vunpack.i.l.bf16 %v12261_v19  ;;  %v16278_v19 = vld [vmem:[#allocation99_spill] sm:$0xff] }
 0x54b   : > { %9367 = vmatpush.xpose.msk.msra.mxu3 %vm890_vm0, %v16270_v48 }
 0x54c   : > { %v10426_v6 = vpop.eup %10425  ;;  %v2126_v58 = vsub.f32 2.0, %v2110_v3  ;;  %v16275_v3 = vld [vmem:[#allocation85_spill] sm:$0xff] }
 0x54d   : > { %v2104_v15 = vmul.f32 %v10426_v6, %v2052_v61  ;;  %3394 = vrot.lane.b32.xlu2 %v16271_v7, %s11146_s24  ;;  %v12582_v34 = vpop.eup %10427  ;;  %v16273_v61 = vld [vmem:[#allocation95_spill] sm:$0xff] }
 0x54e   : > { %v2142_v63 = vmul.f32 %v10424_v21, %v2126_v58  ;;  %v2080_v23 = vsel %vm890_vm0, %v12582_v34, 0.0  ;;  %v16277_v58 = vld [vmem:[#allocation111_spill] sm:$0xff] }
 0x54f   : > { %v2120_v13 = vsub.f32 2.0, %v2104_v15  ;;  %9368 = vmatpush.xpose.msk.msra.mxu3 %vm890_vm0, %v16272_v8  ;;  %v9828_v15 = vunpack.i.h.bf16 %v12309_v14 }
 0x550   : > { %v2158_v10 = vmul.f32 %v12479_v35, %v2142_v63  ;;  %v2031_v35 = vmul.f32 1.442695, %v2001_v39 }
 0x551   : > { %v2136_v4 = vmul.f32 %v10426_v6, %v2120_v13 }
 0x552   : > { %9342 = vmatmul.msk.f32.gmra.mxu3 %vm890_vm0, %v2158_v10  ;;  %9365 = vmatmul.msk.f32.vlgmr.msrb.gmra.mxu2 %vm890_vm0, %v16273_v61  ;;  %10429 = vpow2.f32 %v2031_v35 }
 0x553   : > { %3161 = vmatpush.msrb.mxu2 %v9818_v17  ;;  %v2152_v21 = vmul.f32 %v12481_v62, %v2136_v4  ;;  %v16276_v62 = vld [vmem:[#allocation80_spill] sm:$0xff] }
 0x554   : > { %2081 = vadd.xlane.f32.xlu1 %v2080_v23 }
 0x555   : > { %9336 = vmatmul.msk.f32.gmra.mxu0 %vm890_vm0, %v2152_v21  ;;  %3162 = vmatpush.msrb.mxu2 %v9823_v27 }
 0x558   : > { %v12602_v48 = vpop.eup %10429 }
 0x559   : > { %v2077_v6 = vsel %vm890_vm0, %v12602_v48, 0.0 }
 0x55a   : > { %9353 = vmatmul.msk.f32.vlgmr.msrb.gmra.mxu3 %vm890_vm0, %v16274_v54  ;;  %9366 = vmatmul.msk.f32.gmra.mxu2 %vm890_vm0, %v16275_v3  ;;  %v16279_v3 = vld [vmem:[#allocation121_spill] sm:$0xff] }
 0x55b   : > { %3056 = vmatpush.msrb.mxu3 %v9817_v16 }
 0x55d   : > { %3057 = vmatpush.msrb.mxu3 %v9822_v42 }
 0x562   : > { %9354 = vmatmul.msk.f32.gmra.mxu3 %vm890_vm0, %v16276_v62 }
 0x563   : > { %2078 = vadd.xlane.f32.xlu0 %v2077_v6 }
 0x56a   : > { %9369 = vmatmul.msk.f32.vlgmr.msra.gmra.mxu3 %vm890_vm0, %v16277_v58 }
 0x56b   : > { %3196 = vmatpush.msra.mxu3 %v9827_v49  ;;  %v16280_v49 = vld [vmem:[#allocation110_spill] sm:$0xff] }
 0x56d   : > { %3197 = vmatpush.msra.mxu3 %v9828_v15 }
 0x572   : > { %9370 = vmatmul.msk.f32.gmra.mxu3 %vm890_vm0, %v16278_v19  ;;  %v16281_v19 = vld [vmem:[#allocation114_spill] sm:$0xff] }
 0x578   : > { %v2055_v63 = vpop.xlane.xlu0 %2054 }
 0x579   : > { %10431 = vrcp.f32 %v2055_v63 }
 0x57c   : > { %v2073_v13 = vpop.xlane.xlu1 %2072 }
 0x57d   : > { %10433 = vrcp.f32 %v2073_v13 }
 0x57f   : > { %v10432_v8 = vpop.eup %10431 }
 0x580   : > { %v2105_v10 = vmul.f32 %v10432_v8, %v2055_v63  ;;  %v2058_v17 = vpop.xlane.xlu2 %2057 }
 0x581   : > { %10435 = vrcp.f32 %v2058_v17 }
 0x582   : > { %v2121_v39 = vsub.f32 2.0, %v2105_v10  ;;  %v16282_v10 = vld [vmem:[#allocation108_spill] sm:$0xff] }
 0x583   : > { %v10434_v4 = vpop.eup %10433 }
 0x584   : > { %v2137_v61 = vmul.f32 %v10432_v8, %v2121_v39  ;;  %v2111_v27 = vmul.f32 %v10434_v4, %v2073_v13  ;;  %v9832_v8 = vunpack.i.l.bf16 %v12387_v0  ;;  %v16285_v39 = vld [vmem:[#allocation104_spill] sm:$0xff] }
 0x586   : > { %v2153_v23 = vmul.f32 %v12494_v18, %v2137_v61  ;;  %v2127_v14 = vsub.f32 2.0, %v2111_v27  ;;  %v16287_v27 = vld [vmem:[#allocation116_spill] sm:$0xff] }
 0x587   : > { %v10436_v21 = vpop.eup %10435 }
 0x588   : > { %v2143_v35 = vmul.f32 %v10434_v4, %v2127_v14  ;;  %v2106_v16 = vmul.f32 %v10436_v21, %v2058_v17  ;;  %v2076_v54 = vpop.xlane.xlu2 %2075  ;;  %9337 = vmatmul.msk.f32.vlgmr.msrb.gmra.mxu1 %vm890_vm0, %v2153_v23 }
 0x589   : > { %10437 = vrcp.f32 %v2076_v54  ;;  %9359 = vmatpush.xpose.msk.msrb.mxu1 %vm890_vm0, %v16279_v3 }
 0x58a   : > { %v2159_v42 = vmul.f32 %v12503_v33, %v2143_v35  ;;  %v2122_v62 = vsub.f32 2.0, %v2106_v16 }
 0x58b   : > { %v12636_v17 = vpop.permute.xlu0 %3353 }
 0x58c   : > { %v2138_v6 = vmul.f32 %v10436_v21, %v2122_v62  ;;  %9343 = vmatmul.msk.f32.vlgmr.msrb.gmra.mxu0 %vm890_vm0, %v2159_v42  ;;  %16284 = vst [vmem:[#allocation71_spill] sm:$0xff] %v12636_v17 }
 0x58d   : > { %9371 = vmatpush.xpose.msk.msrb.mxu0 %vm890_vm0, %v16280_v49  ;;  %9360 = vmatpush.xpose.msk.msrb.mxu1 %vm890_vm0, %v12088_v60  ;;  %v9833_v60 = vunpack.i.h.bf16 %v12387_v0  ;;  %v9843_v0 = vunpack.i.h.bf16 %v12489_v57 }
 0x58e   : > { %v2154_v18 = vmul.f32 %v12511_v55, %v2138_v6  ;;  %v12634_v55 = vpop.f32.mrf.mxu2 }
 0x58f   : > { %v10438_v58 = vpop.eup %10437  ;;  %16283 = vst [vmem:[#allocation74_spill] sm:$0xff] %v12634_v55 }
 0x590   : > { %v2112_v15 = vmul.f32 %v10438_v58, %v2076_v54  ;;  %9338 = vmatmul.msk.f32.gmra.mxu1 %vm890_vm0, %v2154_v18 }
 0x591   : > { %9372 = vmatpush.xpose.msk.msrb.mxu0 %vm890_vm0, %v16281_v19 }
 0x592   : > { %v2128_v33 = vsub.f32 2.0, %v2112_v15 }
 0x593   : > { %v12643_v61 = vpop.permute.xlu0 %3515 }
 0x594   : > { %v2144_v63 = vmul.f32 %v10438_v58, %v2128_v33  ;;  %v12658_v16 = vpop.permute.xlu1 %3398 }
 0x596   : > { %v2160_v13 = vmul.f32 %v12515_v56, %v2144_v63  ;;  %v9838_v56 = vunpack.i.h.bf16 %v12446_v45 }
 0x598   : > { %9344 = vmatmul.msk.f32.gmra.mxu0 %vm890_vm0, %v2160_v13 }
 0x59b   : > { %v12652_v14 = vpop.permute.xlu0 %3513 }
 0x59c   : > { %v12668_v6 = vpop.permute.xlu1 %3511 }
 0x59d   : > { %16293 = vst [vmem:[#allocation106_spill] sm:$0xff] %v12668_v6 }
 0x5a0   : > { %9357 = vmatmul.msk.f32.vlgmr.msra.gmra.mxu0 %vm890_vm0, %v16282_v10 }
 0x5a1   : > { %3091 = vmatpush.msra.mxu0 %v9832_v8 }
 0x5a3   : > { %3092 = vmatpush.msra.mxu0 %v9833_v60  ;;  %v12640_v4 = vpop.f32.mrf.mxu2  ;;  %v12660_v54 = vpop.permute.xlu0 %3509 }
 0x5a4   : > { %16286 = vst [vmem:[#allocation86_spill] sm:$0xff] %v12640_v4 }
 0x5a5   : > { %16291 = vst [vmem:[#allocation34_spill] sm:$0xff] %v12660_v54 }
 0x5a8   : > { %9358 = vmatmul.msk.f32.gmra.mxu0 %vm890_vm0, %v16285_v39 }
 0x5ab   : > { %v12648_v23 = vpop.f32.mrf.mxu2  ;;  %v12674_v18 = vpop.permute.xlu0 %3554 }
 0x5ac   : > { %16288 = vst [vmem:[#allocation79_spill] sm:$0xff] %v12648_v23 }
 0x5ad   : > { %16295 = vst [vmem:[#allocation107_spill] sm:$0xff] %v12674_v18 }
 0x5b0   : > { %9373 = vmatmul.msk.f32.vlgmr.msrb.gmra.mxu0 %vm890_vm0, %v16287_v27 }
 0x5b1   : > { %3231 = vmatpush.msrb.mxu0 %v9838_v56 }
 0x5b3   : > { %3232 = vmatpush.msrb.mxu0 %v9843_v0 }
 0x5b5   : > { %v12654_v21 = vpop.f32.mrf.mxu3 }
 0x5b6   : > { %16289 = vst [vmem:[#allocation78_spill] sm:$0xff] %v12654_v21 }
 0x5b8   : > { %9374 = vmatmul.msk.f32.gmra.mxu0 %vm890_vm0, %v12104_v43 }
 0x5bd   : > { %v12656_v35 = vpop.f32.mrf.mxu2 }
 0x5be   : > { %16290 = vst [vmem:[#allocation70_spill] sm:$0xff] %v12656_v35  ;;  %v12662_v3 = vpop.f32.mrf.mxu3 }
 0x5bf   : > { %16292 = vst [vmem:[#allocation57_spill] sm:$0xff] %v12662_v3  ;;  %v16314_v3 = vld [vmem:[#allocation55_spill] sm:$0xff] }
 0x5c5   : > { %v12664_v42 = vpop.f32.mrf.mxu2 }
 0x5c6   : > { %v2771_v62 = vsel %vm890_vm0, %v12664_v42, -inf }
 0x5c7   : > { %2772 = vmax.xlane.f32.xlu0 %v2771_v62  ;;  %v2082_v15 = vpop.xlane.xlu1 %2081 }
 0x5c8   : > { %10439 = vrcp.f32 %v2082_v15 }
 0x5cd   : > { %v12670_v43 = vpop.f32.mrf.mxu3  ;;  %v12672_v49 = vpop.f32.mrf.mxu2 }
 0x5ce   : > { %16294 = vst [vmem:[#allocation68_spill] sm:$0xff] %v12670_v43  ;;  %v2774_v58 = vsel %vm890_vm0, %v12672_v49, -inf  ;;  %v10440_v8 = vpop.eup %10439  ;;  %v16298_v43 = vld [vmem:[#allocation120_spill] sm:$0xff] }
 0x5cf   : > { %2775 = vmax.xlane.f32.xlu1 %v2774_v58  ;;  %v2114_v27 = vmul.f32 %v10440_v8, %v2082_v15 }
 0x5d1   : > { %v2130_v35 = vsub.f32 2.0, %v2114_v27 }
 0x5d5   : > { %v12678_v19 = vpop.f32.mrf.mxu3  ;;  %v12680_v33 = vpop.f32.mrf.mxu2 }
 0x5d6   : > { %16296 = vst [vmem:[#allocation102_spill] sm:$0xff] %v12678_v19  ;;  %v2079_v63 = vpop.xlane.xlu0 %2078  ;;  %v2795_v13 = vsel %vm890_vm0, %v12680_v33, -inf  ;;  %v16297_v19 = vld [vmem:[#allocation118_spill] sm:$0xff] }
 0x5d7   : > { %10441 = vrcp.f32 %v2079_v63  ;;  %2796 = vmax.xlane.f32.xlu0 %v2795_v13 }
 0x5dd   : > { %v10442_v10 = vpop.eup %10441  ;;  %v12684_v60 = vpop.f32.mrf.mxu3 }
 0x5de   : > { %v2113_v39 = vmul.f32 %v10442_v10, %v2079_v63  ;;  %v2777_v56 = vsel %vm890_vm0, %v12684_v60, -inf  ;;  %v12688_v58 = vpop.f32.mrf.mxu2  ;;  %v2146_v63 = vmul.f32 %v10440_v8, %v2130_v35  ;;  %v9847_v35 = vunpack.i.l.bf16 %v12555_v50 }
 0x5df   : > { %2778 = vmax.xlane.f32.xlu2 %v2777_v56  ;;  %v2798_v13 = vsel %vm890_vm0, %v12688_v58, -inf }
 0x5e0   : > { %v2129_v0 = vsub.f32 2.0, %v2113_v39  ;;  %v2162_v15 = vmul.f32 %v12582_v34, %v2146_v63  ;;  %v12704_v39 = vpop.f32.mrf.mxu0 }
 0x5e1   : > { %16300 = vst [vmem:[#allocation95_spill] sm:$0xff] %v12704_v39 }
 0x5e2   : > { %v2145_v62 = vmul.f32 %v10442_v10, %v2129_v0  ;;  %v9837_v10 = vunpack.i.l.bf16 %v12446_v45  ;;  %v9848_v45 = vunpack.i.h.bf16 %v12555_v50 }
 0x5e4   : > { %v2161_v23 = vmul.f32 %v12602_v48, %v2145_v62  ;;  %v16299_v48 = vld [vmem:[#allocation122_spill] sm:$0xff] }
 0x5e5   : > { %v12724_v27 = vpop.f32.mrf.mxu3 }
 0x5e6   : > { %9345 = vmatmul.msk.f32.vlgmr.msra.gmra.mxu1 %vm890_vm0, %v2161_v23  ;;  %v9842_v23 = vunpack.i.l.bf16 %v12489_v57  ;;  %v2780_v0 = vsel %vm890_vm0, %v12724_v27, -inf }
 0x5e7   : > { %9375 = vmatpush.xpose.msk.msra.mxu1 %vm890_vm0, %v16297_v19  ;;  %2799 = vmax.xlane.f32.xlu2 %v2798_v13  ;;  %v16301_v19 = vld [vmem:[#allocation119_spill] sm:$0xff] }
 0x5eb   : > { %9376 = vmatpush.xpose.msk.msra.mxu1 %vm890_vm0, %v16298_v43  ;;  %v12709_v43 = vpop.f32.mrf.mxu0 }
 0x5ec   : > { %16302 = vst [vmem:[#allocation72_spill] sm:$0xff] %v12709_v43 }
 0x5ee   : > { %9346 = vmatmul.msk.f32.gmra.mxu1 %vm890_vm0, %v2162_v15 }
 0x5f6   : > { %9361 = vmatmul.msk.f32.vlgmr.msrb.gmra.mxu1 %vm890_vm0, %v16299_v48 }
 0x5f7   : > { %3126 = vmatpush.msrb.mxu1 %v9837_v10 }
 0x5f9   : > { %3127 = vmatpush.msrb.mxu1 %v9842_v23 }
 0x5fe   : > { %9362 = vmatmul.msk.f32.gmra.mxu1 %vm890_vm0, %v16301_v19 }
 0x605   : > { %v12744_v48 = vpop.f32.mrf.mxu1 }
 0x606   : > { %9377 = vmatmul.msk.f32.vlgmr.msra.gmra.mxu1 %vm890_vm0, %v12149_v1  ;;  %16305 = vst [vmem:[#allocation111_spill] sm:$0xff] %v12744_v48 }
 0x607   : > { %3266 = vmatpush.msra.mxu1 %v9847_v35 }
 0x609   : > { %3267 = vmatpush.msra.mxu1 %v9848_v45  ;;  %v12714_v34 = vpop.f32.mrf.mxu0 }
 0x60a   : > { %16303 = vst [vmem:[#allocation85_spill] sm:$0xff] %v12714_v34 }
 0x60d   : > { %v12746_v23 = vpop.f32.mrf.mxu1 }
 0x60e   : > { %9378 = vmatmul.msk.f32.gmra.mxu1 %vm890_vm0, %v12122_v59  ;;  %v12732_v59 = vpop.f32.mrf.mxu3  ;;  %16306 = vst [vmem:[#allocation99_spill] sm:$0xff] %v12746_v23 }
 0x60f   : > { %v2801_v63 = vsel %vm890_vm0, %v12732_v59, -inf }
 0x615   : > { %v12718_v57 = vpop.f32.mrf.mxu0 }
 0x616   : > { %16304 = vst [vmem:[#allocation80_spill] sm:$0xff] %v12718_v57 }
 0x61d   : > { %v12720_v8 = vpop.f32.mrf.mxu0 }
 0x61e   : > { %v2783_v56 = vsel %vm890_vm0, %v12720_v8, -inf }
 0x61f   : > { %2784 = vmax.xlane.f32.xlu1 %v2783_v56 }
 0x625   : > { %v12726_v1 = vpop.f32.mrf.mxu0 }
 0x626   : > { %v2786_v50 = vsel %vm890_vm0, %v12726_v1, -inf }
 0x627   : > { %2787 = vmax.xlane.f32.xlu0 %v2786_v50  ;;  %2781 = vmax.xlane.f32.xlu1 %v2780_v0  ;;  %v12756_v50 = vpop.f32.mrf.mxu3 }
 0x62d   : > { %v12734_v62 = vpop.f32.mrf.mxu0 }
 0x62e   : > { %v2807_v13 = vsel %vm890_vm0, %v12734_v62, -inf }
 0x62f   : > { %2808 = vmax.xlane.f32.xlu2 %v2807_v13  ;;  %2802 = vmax.xlane.f32.xlu0 %v2801_v63  ;;  %v2804_v13 = vsel %vm890_vm0, %v12756_v50, -inf }
 0x635   : > { %v12740_v15 = vpop.f32.mrf.mxu0 }
 0x636   : > { %v2810_v10 = vsel %vm890_vm0, %v12740_v15, -inf }
 0x637   : > { %2811 = vmax.xlane.f32.xlu2 %v2810_v10 }
 0x63a   : > { %v2773_v63 = vpop.xlane.xlu0 %2772 }
 0x63b   : > { %v2819_v10 = vsub.f32 %v12664_v42, %v2773_v63 }
 0x63d   : > { %v2835_v34 = vmul.f32 1.442695, %v2819_v10  ;;  %v16312_v10 = vld [vmem:[#allocation23_spill] sm:$0xff] }
 0x63f   : > { %10443 = vpow2.f32 %v2835_v34  ;;  %v16311_v34 = vld [vmem:[#allocation61_spill] sm:$0xff] }
 0x642   : > { %v2776_v43 = vpop.xlane.xlu1 %2775 }
 0x643   : > { %v2820_v55 = vsub.f32 %v12672_v49, %v2776_v43 }
 0x645   : > { %v12775_v42 = vpop.eup %10443  ;;  %v2837_v54 = vmul.f32 1.442695, %v2820_v55 }
 0x646   : > { %v2867_v48 = vsel %vm890_vm0, %v12775_v42, 0.0 }
 0x663   : > { %v12748_v19 = vpop.f32.mrf.mxu1 }
 0x664   : > { %16307 = vst [vmem:[#allocation121_spill] sm:$0xff] %v12748_v19 }
 0x66b   : > { %v12750_v35 = vpop.f32.mrf.mxu1 }
 0x66c   : > { %16308 = vst [vmem:[#allocation110_spill] sm:$0xff] %v12750_v35 }
 0x673   : > { %v12752_v45 = vpop.f32.mrf.mxu1 }
 0x674   : > { %v2789_v56 = vsel %vm890_vm0, %v12752_v45, -inf }
 0x675   : > { %2790 = vmax.xlane.f32.xlu1 %v2789_v56  ;;  %v12769_v56 = vpop.permute.xlu2 %3357 }
 0x67b   : > { %v12758_v0 = vpop.f32.mrf.mxu1 }
 0x67c   : > { %v2792_v35 = vsel %vm890_vm0, %v12758_v0, -inf }
 0x67d   : > { %2805 = vmax.xlane.f32.xlu1 %v2804_v13  ;;  %v12777_v63 = vpop.permute.xlu2 %3355 }
 0x67e   : > { %16309 = vst [vmem:[#allocation114_spill] sm:$0xff] %v12777_v63 }
 0x683   : > { %v12763_v19 = vpop.f32.mrf.mxu1 }
 0x684   : > { %v2813_v57 = vsel %vm890_vm0, %v12763_v19, -inf }
 0x685   : > { %2793 = vmax.xlane.f32.xlu1 %v2792_v35  ;;  %2814 = vmax.xlane.f32.xlu0 %v2813_v57  ;;  %v16310_v57 = vld [vmem:[#allocation66_spill] sm:$0xff]  ;;  %v12783_v35 = vpop.permute.xlu2 %3396 }
 0x68b   : > { %v12771_v23 = vpop.f32.mrf.mxu1 }
 0x68c   : > { %v2816_v13 = vsel %vm890_vm0, %v12771_v23, -inf }
 0x68d   : > { %2817 = vmax.xlane.f32.xlu2 %v2816_v13  ;;  %v12789_v13 = vpop.permute.xlu2 %3392 }
 0x68e   : > { %16313 = vst [vmem:[#allocation108_spill] sm:$0xff] %v12789_v13 }
 0x692   : > { %v2785_v18 = vpop.xlane.xlu1 %2784 }
 0x693   : > { %v2823_v63 = vsub.f32 %v12720_v8, %v2785_v18 }
 0x695   : > { %2868 = vadd.xlane.f32.xlu2 %v2867_v48  ;;  %v12793_v21 = vpop.permute.xlu2 %3394  ;;  %v2797_v48 = vpop.xlane.xlu0 %2796  ;;  %v2843_v44 = vmul.f32 1.442695, %v2823_v63 }
 0x696   : > { %16315 = vst [vmem:[#allocation104_spill] sm:$0xff] %v12793_v21  ;;  %v2827_v39 = vsub.f32 %v12680_v33, %v2797_v48 }
 0x698   : > { %v2851_v6 = vmul.f32 1.442695, %v2827_v39 }
 0x699   : > { %3550 = vrot.lane.b32.xlu0 %v16310_v57, %s11146_s24 }
 0x69a   : > { %10445 = vpow2.f32 %v2851_v6  ;;  %v2782_v21 = vpop.xlane.xlu1 %2781 }
 0x69b   : > { %10447 = vpow2.f32 %v2837_v54  ;;  %v2822_v49 = vsub.f32 %v12724_v27, %v2782_v21 }
 0x69c   : > { %10449 = vpow2.f32 %v2843_v44 }
 0x69d   : > { %v2779_v4 = vpop.xlane.xlu2 %2778  ;;  %v2788_v17 = vpop.xlane.xlu0 %2787  ;;  %v2841_v18 = vmul.f32 1.442695, %v2822_v49 }
 0x69e   : > { %3548 = vrot.lane.b32.xlu1 %v16311_v34, %s11146_s24  ;;  %v2821_v13 = vsub.f32 %v12684_v60, %v2779_v4  ;;  %v2824_v33 = vsub.f32 %v12726_v1, %v2788_v17 }
 0x6a0   : > { %v12799_v34 = vpop.eup %10445  ;;  %v2839_v48 = vmul.f32 1.442695, %v2821_v13  ;;  %v2845_v54 = vmul.f32 1.442695, %v2824_v33 }
 0x6a1   : > { %9850 = vrot.lane.b32.xlu0 %v16312_v10, %s11146_s24  ;;  %v12803_v39 = vpop.eup %10447  ;;  %v2891_v55 = vsel %vm890_vm0, %v12799_v34, 0.0 }
 0x6a2   : > { %10451 = vpow2.f32 %v2839_v48  ;;  %v2870_v60 = vsel %vm890_vm0, %v12803_v39, 0.0  ;;  %v12810_v17 = vpop.eup %10449 }
 0x6a3   : > { %10453 = vpow2.f32 %v2845_v54  ;;  %v2879_v27 = vsel %vm890_vm0, %v12810_v17, 0.0 }
 0x6a4   : > { %10455 = vpow2.f32 %v2841_v18 }
 0x6a5   : > { %v2800_v57 = vpop.xlane.xlu2 %2799  ;;  %v2803_v43 = vpop.xlane.xlu0 %2802 }
 0x6a6   : > { %v2828_v4 = vsub.f32 %v12688_v58, %v2800_v57  ;;  %v2829_v1 = vsub.f32 %v12732_v59, %v2803_v43 }
 0x6a8   : > { %v2853_v21 = vmul.f32 1.442695, %v2828_v4  ;;  %v12813_v8 = vpop.eup %10451  ;;  %v2855_v13 = vmul.f32 1.442695, %v2829_v1 }
 0x6a9   : > { %v12818_v63 = vpop.eup %10453  ;;  %v2873_v57 = vsel %vm890_vm0, %v12813_v8, 0.0 }
 0x6aa   : > { %10457 = vpow2.f32 %v2853_v21  ;;  %v2882_v33 = vsel %vm890_vm0, %v12818_v63, 0.0 }
 0x6ad   : > { %3552 = vrot.lane.b32.xlu2 %v16314_v3, %s11146_s24  ;;  %v2809_v6 = vpop.xlane.xlu2 %2808 }
 0x6ae   : > { %v2831_v44 = vsub.f32 %v12734_v62, %v2809_v6  ;;  %v12822_v62 = vpop.eup %10455 }
 0x6af   : > { %v2876_v49 = vsel %vm890_vm0, %v12822_v62, 0.0 }
 0x6b0   : > { %v2859_v58 = vmul.f32 1.442695, %v2831_v44  ;;  %v12826_v48 = vpop.eup %10457 }
 0x6b2   : > { %10459 = vpow2.f32 %v2859_v58 }
 0x6b3   : > { %10461 = vpow2.f32 %v2855_v13 }
 0x6b8   : > { %v12830_v59 = vpop.eup %10459 }
 0x6b9   : > { %v2903_v54 = vsel %vm890_vm0, %v12830_v59, 0.0  ;;  %v12836_v4 = vpop.eup %10461 }
 0x6ba   : > { %v2897_v6 = vsel %vm890_vm0, %v12836_v4, 0.0 }
 0x6c8   : > { %2892 = vadd.xlane.f32.xlu1 %v2891_v55  ;;  %v2894_v55 = vsel %vm890_vm0, %v12826_v48, 0.0 }
 0x6cb   : > { %2871 = vadd.xlane.f32.xlu0 %v2870_v60 }
 0x6d0   : > { %2880 = vadd.xlane.f32.xlu1 %v2879_v27 }
 0x6d3   : > { %2874 = vadd.xlane.f32.xlu0 %v2873_v57  ;;  %v12848_v57 = vpop.xlane.xlu2 %2811 }
 0x6d6   : > { %2883 = vadd.xlane.f32.xlu2 %v2882_v33 }
 0x6d8   : > { %2877 = vadd.xlane.f32.xlu1 %v2876_v49 }
 0x6db   : > { %2895 = vadd.xlane.f32.xlu0 %v2894_v55 }
 0x6de   : > { %2904 = vadd.xlane.f32.xlu2 %v2903_v54 }
 0x6e3   : > { %2898 = vadd.xlane.f32.xlu0 %v2897_v6 }
 0x6e8   : > { %v2791_v18 = vpop.xlane.xlu1 %2790 }
 0x6e9   : > { %v2825_v60 = vsub.f32 %v12752_v45, %v2791_v18 }
 0x6eb   : > { %v2847_v44 = vmul.f32 1.442695, %v2825_v60 }
 0x6ed   : > { %10463 = vpow2.f32 %v2847_v44  ;;  %v16317_v44 = vld [vmem:[#allocation19_spill] sm:$0xff] }
 0x6f0   : > { %v2806_v21 = vpop.xlane.xlu1 %2805 }
 0x6f1   : > { %v2830_v43 = vsub.f32 %v12756_v50, %v2806_v21  ;;  %v16318_v21 = vld [vmem:[#allocation40_spill] sm:$0xff] }
 0x6f3   : > { %v12842_v27 = vpop.eup %10463  ;;  %v2857_v58 = vmul.f32 1.442695, %v2830_v43 }
 0x6f4   : > { %v2885_v1 = vsel %vm890_vm0, %v12842_v27, 0.0 }
 0x6f5   : > { %10465 = vpow2.f32 %v2857_v58  ;;  %2886 = vadd.xlane.f32.xlu1 %v2885_v1 }
 0x6f7   : > { %4097 = vrot.lane.b32.xlu0 %v11458_v25, %s11147_s0 }
 0x6f8   : > { %v12882_v60 = vpop.xlane.xlu0 %2814 }
 0x6fb   : > { %v12850_v45 = vpop.eup %10465 }
 0x6fc   : > { %v2900_v13 = vsel %vm890_vm0, %v12850_v45, 0.0 }
 0x6fd   : > { %2901 = vadd.xlane.f32.xlu2 %v2900_v13 }
 0x6ff   : > { %4136 = vrot.lane.b32.xlu0 %v11492_v37, %s11147_s0 }
 0x700   : > { %v12856_v50 = vpop.xlane.xlu2 %2817 }
 0x707   : > { %4251 = vrot.lane.b32.xlu0 %v11576_v2, %s11147_s0 }
 0x708   : > { %v2869_v33 = vpop.xlane.xlu2 %2868 }
 0x709   : > { %10467 = vrcp.f32 %v2869_v33 }
 0x70e   : > { %9860 = vrot.lane.b32.xlu1 %v11772_v47, %s11146_s24 }
 0x70f   : > { %v10468_v49 = vpop.eup %10467  ;;  %4130 = vrot.lane.b32.xlu0 %v11508_v40, %s11147_s0 }
 0x710   : > { %v2931_v55 = vmul.f32 %v10468_v49, %v2869_v33  ;;  %v12916_v33 = vpop.permute.xlu2 %3552 }
 0x711   : > { %16321 = vst [vmem:[#allocation120_spill] sm:$0xff] %v12916_v33 }
 0x712   : > { %v2947_v54 = vsub.f32 2.0, %v2931_v55 }
 0x714   : > { %v2963_v6 = vmul.f32 %v10468_v49, %v2947_v54 }
 0x715   : > { %9855 = vrot.lane.b32.xlu2 %v11642_v26, %s11146_s24 }
 0x716   : > { %v2979_v18 = vmul.f32 %v12775_v42, %v2963_v6  ;;  %4095 = vrot.lane.b32.xlu1 %v11449_v22, %s11147_s0  ;;  %v16316_v42 = vld [vmem:[#allocation39_spill] sm:$0xff] }
 0x717   : > { %4247 = vrot.lane.b32.xlu0 %v11613_v12, %s11147_s0 }
 0x718   : > { %9379 = vmatmul.msk.f32.vlgmr.msra.gmra.mxu2 %vm890_vm0, %v2979_v18  ;;  %v16322_v18 = vld [vmem:[#allocation43_spill] sm:$0xff] }
 0x719   : > { %9395 = vmatpush.xpose.msk.msra.mxu2 %vm890_vm0, %v12399_v53  ;;  %v12892_v53 = vpop.permute.xlu0 %3550 }
 0x71a   : > { %16319 = vst [vmem:[#allocation116_spill] sm:$0xff] %v12892_v53 }
 0x71d   : > { %9396 = vmatpush.xpose.msk.msra.mxu2 %vm890_vm0, %v12405_v51  ;;  %9865 = vrot.lane.b32.xlu2 %v11686_v52, %s11146_s24  ;;  %v12890_v51 = vpop.xlane.xlu1 %2793 }
 0x71e   : > { %4093 = vrot.lane.b32.xlu1 %v11469_v28, %s11147_s0 }
 0x71f   : > { %4249 = vrot.lane.b32.xlu0 %v16316_v42, %s11147_s0 }
 0x721   : > { %v12904_v58 = vpop.permute.xlu0 %9850 }
 0x725   : > { %4091 = vrot.lane.b32.xlu2 %v16317_v44, %s11147_s0  ;;  %v12900_v43 = vpop.permute.xlu1 %3548 }
 0x726   : > { %4253 = vrot.lane.b32.xlu1 %v16318_v21, %s11147_s0  ;;  %16320 = vst [vmem:[#allocation118_spill] sm:$0xff] %v12900_v43 }
 0x727   : > { %4175 = vrot.lane.b32.xlu0 %v16238_v5, %s11147_s0 }
 0x72d   : > { %9870 = vrot.lane.b32.xlu2 %v11610_v11, %s11146_s24 }
 0x72e   : > { %4134 = vrot.lane.b32.xlu1 %v11495_v38, %s11147_s0 }
 0x72f   : > { %4173 = vrot.lane.b32.xlu0 %v16259_v41, %s11147_s0 }
 0x735   : > { %9875 = vrot.lane.b32.xlu2 %v11750_v29, %s11146_s24 }
 0x736   : > { %4132 = vrot.lane.b32.xlu1 %v11529_v46, %s11147_s0 }
 0x737   : > { %4169 = vrot.lane.b32.xlu0 %v16252_v24, %s11147_s0 }
 0x73b   : > { %v2893_v1 = vpop.xlane.xlu1 %2892 }
 0x73d   : > { %4288 = vrot.lane.b32.xlu2 %v11648_v32, %s11147_s0 }
 0x73e   : > { %4292 = vrot.lane.b32.xlu1 %v11645_v30, %s11147_s0  ;;  %v2872_v13 = vpop.xlane.xlu0 %2871 }
 0x73f   : > { %10469 = vrcp.f32 %v2872_v13  ;;  %4214 = vrot.lane.b32.xlu0 %v16254_v20, %s11147_s0 }
 0x740   : > { %10471 = vrcp.f32 %v2893_v1 }
 0x743   : > { %v2881_v49 = vpop.xlane.xlu1 %2880 }
 0x744   : > { %10473 = vrcp.f32 %v2881_v49 }
 0x745   : > { %v10470_v55 = vpop.eup %10469  ;;  %4171 = vrot.lane.b32.xlu2 %v16262_v9, %s11147_s0 }
 0x746   : > { %v10472_v54 = vpop.eup %10471  ;;  %v2932_v6 = vmul.f32 %v10470_v55, %v2872_v13  ;;  %4290 = vrot.lane.b32.xlu1 %v16322_v18, %s11147_s0  ;;  %v2875_v24 = vpop.xlane.xlu0 %2874  ;;  %v16323_v18 = vld [vmem:[#allocation50_spill] sm:$0xff] }
 0x747   : > { %10475 = vrcp.f32 %v2875_v24  ;;  %v2939_v5 = vmul.f32 %v10472_v54, %v2893_v1 }
 0x748   : > { %v2948_v41 = vsub.f32 2.0, %v2932_v6 }
 0x749   : > { %v2884_v32 = vpop.xlane.xlu2 %2883  ;;  %v2955_v9 = vsub.f32 2.0, %v2939_v5 }
 0x74a   : > { %v10474_v20 = vpop.eup %10473  ;;  %v2964_v29 = vmul.f32 %v10470_v55, %v2948_v41  ;;  %10477 = vrcp.f32 %v2884_v32 }
 0x74b   : > { %v2935_v30 = vmul.f32 %v10474_v20, %v2881_v49  ;;  %v2878_v53 = vpop.xlane.xlu1 %2877  ;;  %v2971_v6 = vmul.f32 %v10472_v54, %v2955_v9 }
 0x74c   : > { %10479 = vrcp.f32 %v2878_v53  ;;  %v2980_v43 = vmul.f32 %v12803_v39, %v2964_v29 }
 0x74d   : > { %v10476_v33 = vpop.eup %10475  ;;  %v2951_v12 = vsub.f32 2.0, %v2935_v30  ;;  %4210 = vrot.lane.b32.xlu2 %v16271_v7, %s11147_s0 }
 0x74e   : > { %v2933_v13 = vmul.f32 %v10476_v33, %v2875_v24  ;;  %4286 = vrot.lane.b32.xlu1 %v16323_v18, %s11147_s0  ;;  %9380 = vmatmul.msk.f32.gmra.mxu2 %vm890_vm0, %v2980_v43  ;;  %v2896_v1 = vpop.xlane.xlu0 %2895  ;;  %v16324_v43 = vld [vmem:[#allocation124_spill] sm:$0xff] }
 0x74f   : > { %v2967_v41 = vmul.f32 %v10474_v20, %v2951_v12  ;;  %10481 = vrcp.f32 %v2896_v1  ;;  %v2987_v20 = vmul.f32 %v12799_v34, %v2971_v6 }
 0x750   : > { %v10478_v49 = vpop.eup %10477  ;;  %v2949_v55 = vsub.f32 2.0, %v2933_v13  ;;  %v16327_v13 = vld [vmem:[#allocation82_spill] sm:$0xff] }
 0x751   : > { %v2983_v29 = vmul.f32 %v12810_v17, %v2967_v41  ;;  %v2936_v39 = vmul.f32 %v10478_v49, %v2884_v32  ;;  %v2905_v5 = vpop.xlane.xlu2 %2904  ;;  %v16325_v17 = vld [vmem:[#allocation67_spill] sm:$0xff] }
 0x752   : > { %v10480_v30 = vpop.eup %10479  ;;  %v2965_v40 = vmul.f32 %v10476_v33, %v2949_v55  ;;  %10483 = vrcp.f32 %v2905_v5  ;;  %v16329_v55 = vld [vmem:[#allocation101_spill] sm:$0xff] }
 0x753   : > { %v2952_v7 = vsub.f32 2.0, %v2936_v39  ;;  %v2934_v24 = vmul.f32 %v10480_v30, %v2878_v53  ;;  %9383 = vmatmul.msk.f32.vlgmr.msra.gmra.mxu0 %vm890_vm0, %v2983_v29 }
 0x754   : > { %v2981_v18 = vmul.f32 %v12813_v8, %v2965_v40  ;;  %9403 = vmatpush.xpose.msk.msra.mxu0 %vm890_vm0, %v16324_v43  ;;  %v2832_v40 = vsub.f32 %v12740_v15, %v12848_v57  ;;  %v16326_v8 = vld [vmem:[#allocation112_spill] sm:$0xff] }
 0x755   : > { %v10482_v12 = vpop.eup %10481  ;;  %v2968_v9 = vmul.f32 %v10478_v49, %v2952_v7  ;;  %v2950_v54 = vsub.f32 2.0, %v2934_v24  ;;  %4368 = vrot.lane.b32.xlu2 %v16314_v3, %s11147_s0  ;;  %v16328_v49 = vld [vmem:[#allocation115_spill] sm:$0xff] }
 0x756   : > { %v2940_v32 = vmul.f32 %v10482_v12, %v2896_v1  ;;  %9880 = vrot.lane.b32.xlu1 %v16325_v17, %s11146_s24  ;;  %v2899_v53 = vpop.xlane.xlu0 %2898  ;;  %9381 = vmatmul.msk.f32.vlgmr.msrb.gmra.mxu3 %vm890_vm0, %v2981_v18  ;;  %v2861_v15 = vmul.f32 1.442695, %v2832_v40  ;;  %v16335_v40 = vld [vmem:[#allocation92_spill] sm:$0xff] }
 0x757   : > { %10485 = vrcp.f32 %v2899_v53  ;;  %9387 = vmatmul.msk.f32.vlgmr.msrb.gmra.mxu2 %vm890_vm0, %v2987_v20  ;;  %9399 = vmatpush.xpose.msk.msrb.mxu3 %vm890_vm0, %v16326_v8  ;;  %v2966_v34 = vmul.f32 %v10480_v30, %v2950_v54  ;;  %v2984_v18 = vmul.f32 %v12818_v63, %v2968_v9  ;;  %v16331_v20 = vld [vmem:[#allocation53_spill] sm:$0xff] }
 0x758   : > { %v10484_v7 = vpop.eup %10483  ;;  %v2956_v33 = vsub.f32 2.0, %v2940_v32  ;;  %9411 = vmatpush.xpose.msk.msrb.mxu2 %vm890_vm0, %v16327_v13  ;;  %9404 = vmatpush.xpose.msk.msra.mxu0 %vm890_vm0, %v12769_v56  ;;  %10487 = vpow2.f32 %v2861_v15  ;;  %v16334_v32 = vld [vmem:[#allocation91_spill] sm:$0xff]  ;;  %v16336_v13 = vld [vmem:[#allocation89_spill] sm:$0xff] }
 0x759   : > { %v2943_v1 = vmul.f32 %v10484_v7, %v2905_v5  ;;  %v2982_v6 = vmul.f32 %v12822_v62, %v2966_v34  ;;  %v16330_v5 = vld [vmem:[#allocation73_spill] sm:$0xff] }
 0x75a   : > { %v2972_v41 = vmul.f32 %v10482_v12, %v2956_v33  ;;  %v9852_v12 = vunpack.i.l.bf16 %v12904_v58 }
 0x75b   : > { %v2959_v57 = vsub.f32 2.0, %v2943_v1  ;;  %9400 = vmatpush.xpose.msk.msrb.mxu3 %vm890_vm0, %v16328_v49  ;;  %9384 = vmatmul.msk.f32.gmra.mxu0 %vm890_vm0, %v2984_v18 }
 0x75c   : > { %9412 = vmatpush.xpose.msk.msrb.mxu2 %vm890_vm0, %v16329_v55  ;;  %v2988_v29 = vmul.f32 %v12826_v48, %v2972_v41 }
 0x75d   : > { %v10486_v39 = vpop.eup %10485  ;;  %v2975_v56 = vmul.f32 %v10484_v7, %v2959_v57  ;;  %9890 = vrot.lane.b32.xlu2 %v16312_v10, %s11147_s0 }
 0x75e   : > { %v2941_v63 = vmul.f32 %v10486_v39, %v2899_v53  ;;  %9885 = vrot.lane.b32.xlu1 %v16330_v5, %s11146_s24  ;;  %9382 = vmatmul.msk.f32.gmra.mxu3 %vm890_vm0, %v2982_v6  ;;  %v12967_v43 = vpop.eup %10487  ;;  %v16337_v6 = vld [vmem:[#allocation100_spill] sm:$0xff] }
 0x75f   : > { %9388 = vmatmul.msk.f32.gmra.mxu2 %vm890_vm0, %v2988_v29  ;;  %v2991_v24 = vmul.f32 %v12830_v59, %v2975_v56  ;;  %v16332_v59 = vld [vmem:[#allocation83_spill] sm:$0xff]  ;;  %v2906_v54 = vsel %vm890_vm0, %v12967_v43, 0.0 }
 0x760   : > { %v2957_v30 = vsub.f32 2.0, %v2941_v63  ;;  %v16338_v63 = vld [vmem:[#allocation103_spill] sm:$0xff] }
 0x762   : > { %v2973_v62 = vmul.f32 %v10486_v39, %v2957_v30 }
 0x763   : > { %9391 = vmatmul.msk.f32.vlgmr.msrb.gmra.mxu0 %vm890_vm0, %v2991_v24  ;;  %v16339_v24 = vld [vmem:[#allocation69_spill] sm:$0xff] }
 0x764   : > { %v2989_v48 = vmul.f32 %v12836_v4, %v2973_v62  ;;  %9419 = vmatpush.xpose.msk.msrb.mxu0 %vm890_vm0, %v12643_v61  ;;  %v16333_v4 = vld [vmem:[#allocation93_spill] sm:$0xff]  ;;  %v9853_v61 = vunpack.i.h.bf16 %v12904_v58 }
 0x765   : > { %4913 = vrot.lane.b32.xlu2 %v11458_v25, %s11148_s3 }
 0x766   : > { %4331 = vrot.lane.b32.xlu1 %v16331_v20, %s11147_s0  ;;  %9389 = vmatmul.msk.f32.vlgmr.msra.gmra.mxu3 %vm890_vm0, %v2989_v48  ;;  %v2834_v48 = vsub.f32 %v12771_v23, %v12856_v50 }
 0x767   : > { %9397 = vmatmul.msk.f32.vlgmr.msra.gmra.mxu2 %vm890_vm0, %v16332_v59  ;;  %9415 = vmatpush.xpose.msk.msra.mxu3 %vm890_vm0, %v16333_v4 }
 0x768   : > { %3837 = vmatpush.msra.mxu2 %v9852_v12  ;;  %9420 = vmatpush.xpose.msk.msrb.mxu0 %vm890_vm0, %v12652_v14  ;;  %v2887_v9 = vpop.xlane.xlu1 %2886 }
 0x769   : > { %10489 = vrcp.f32 %v2887_v9  ;;  %2907 = vadd.xlane.f32.xlu0 %v2906_v54  ;;  %v12998_v15 = vpop.permute.xlu0 %4097 }
 0x76a   : > { %3838 = vmatpush.msra.mxu2 %v9853_v61  ;;  %v16340_v61 = vld [vmem:[#allocation76_spill] sm:$0xff] }
 0x76b   : > { %9416 = vmatpush.xpose.msk.msra.mxu3 %vm890_vm0, %v16334_v32  ;;  %v16341_v32 = vld [vmem:[#allocation123_spill] sm:$0xff] }
 0x76d   : > { %9905 = vrot.lane.b32.xlu2 %v11686_v52, %s11147_s0 }
 0x76f   : > { %v10490_v53 = vpop.eup %10489  ;;  %9398 = vmatmul.msk.f32.gmra.mxu2 %vm890_vm0, %v16335_v40 }
 0x770   : > { %v2937_v58 = vmul.f32 %v10490_v53, %v2887_v9  ;;  %v2902_v8 = vpop.xlane.xlu2 %2901  ;;  %v2865_v9 = vmul.f32 1.442695, %v2834_v48 }
 0x771   : > { %10491 = vrcp.f32 %v2902_v8  ;;  %v13010_v56 = vpop.permute.xlu0 %4136 }
 0x772   : > { %v2953_v14 = vsub.f32 2.0, %v2937_v58  ;;  %v16342_v58 = vld [vmem:[#allocation51_spill] sm:$0xff] }
 0x774   : > { %v2969_v7 = vmul.f32 %v10490_v53, %v2953_v14 }
 0x775   : > { %5067 = vrot.lane.b32.xlu2 %v11576_v2, %s11148_s3 }
 0x776   : > { %v2985_v34 = vmul.f32 %v12842_v27, %v2969_v7  ;;  %v2826_v27 = vsub.f32 %v12758_v0, %v12890_v51 }
 0x777   : > { %v10492_v33 = vpop.eup %10491  ;;  %9413 = vmatmul.msk.f32.vlgmr.msrb.gmra.mxu2 %vm890_vm0, %v16336_v13 }
 0x778   : > { %v2942_v1 = vmul.f32 %v10492_v33, %v2902_v8  ;;  %9385 = vmatmul.msk.f32.vlgmr.msrb.gmra.mxu1 %vm890_vm0, %v2985_v34  ;;  %v9856_v18 = vpop.permute.xlu2 %9855  ;;  %v2849_v39 = vmul.f32 1.442695, %v2826_v27 }
 0x779   : > { %9407 = vmatpush.xpose.msk.msrb.mxu1 %vm890_vm0, %v12658_v16  ;;  %v9858_v41 = vunpack.i.h.bf16 %v9856_v18 }
 0x77a   : > { %v2958_v57 = vsub.f32 2.0, %v2942_v1  ;;  %10493 = vpow2.f32 %v2849_v39  ;;  %v2833_v1 = vsub.f32 %v12763_v19, %v12882_v60 }
 0x77b   : > { %3977 = vmatpush.msrb.mxu2 %v9858_v41  ;;  %10495 = vpow2.f32 %v2865_v9 }
 0x77c   : > { %v2974_v49 = vmul.f32 %v10492_v33, %v2958_v57  ;;  %v2863_v41 = vmul.f32 1.442695, %v2833_v1 }
 0x77d   : > { %9408 = vmatpush.xpose.msk.msrb.mxu1 %vm890_vm0, %v12783_v35  ;;  %4212 = vrot.lane.b32.xlu0 %v16265_v36, %s11147_s0  ;;  %v9857_v35 = vunpack.i.l.bf16 %v9856_v18  ;;  %v16343_v18 = vld [vmem:[#allocation59_spill] sm:$0xff] }
 0x77e   : > { %v2990_v55 = vmul.f32 %v12850_v45, %v2974_v49  ;;  %v13016_v45 = vpop.permute.xlu0 %4251  ;;  %10497 = vpow2.f32 %v2863_v41 }
 0x77f   : > { %9414 = vmatmul.msk.f32.gmra.mxu2 %vm890_vm0, %v16337_v6 }
 0x780   : > { %v9861_v16 = vpop.permute.xlu1 %9860  ;;  %9390 = vmatmul.msk.f32.gmra.mxu3 %vm890_vm0, %v2990_v55  ;;  %v13014_v0 = vpop.eup %10493  ;;  %v16345_v55 = vld [vmem:[#allocation61_spill] sm:$0xff] }
 0x781   : > { %v9863_v29 = vunpack.i.h.bf16 %v9861_v16  ;;  %v9862_v30 = vunpack.i.l.bf16 %v9861_v16  ;;  %v2888_v51 = vsel %vm890_vm0, %v13014_v0, 0.0  ;;  %v9866_v62 = vpop.permute.xlu2 %9865  ;;  %v13036_v23 = vpop.eup %10495 }
 0x782   : > { %v9867_v12 = vunpack.i.l.bf16 %v9866_v62  ;;  %v9868_v54 = vunpack.i.h.bf16 %v9866_v62  ;;  %v2912_v50 = vsel %vm890_vm0, %v13036_v23, 0.0 }
 0x783   : > { %3978 = vmatpush.msrb.mxu2 %v9863_v29 }
 0x784   : > { %v13068_v6 = vpop.eup %10497 }
 0x785   : > { %v2909_v19 = vsel %vm890_vm0, %v13068_v6, 0.0 }
 0x786   : > { %v13026_v4 = vpop.permute.xlu0 %4130 }
 0x788   : > { %9401 = vmatmul.msk.f32.vlgmr.msrb.gmra.mxu3 %vm890_vm0, %v16338_v63  ;;  %v13024_v59 = vpop.permute.xlu1 %4095 }
 0x789   : > { %3872 = vmatpush.msrb.mxu3 %v9857_v35  ;;  %v13090_v48 = vpop.permute.xlu2 %4091 }
 0x78b   : > { %3873 = vmatpush.msrb.mxu3 %v9862_v30 }
 0x78e   : > { %v13034_v40 = vpop.permute.xlu0 %4247 }
 0x790   : > { %2889 = vadd.xlane.f32.xlu1 %v2888_v51  ;;  %9402 = vmatmul.msk.f32.gmra.mxu3 %vm890_vm0, %v16339_v24  ;;  %v13032_v53 = vpop.permute.xlu1 %4093 }
 0x791   : > { %v9871_v1 = vpop.permute.xlu2 %9870 }
 0x796   : > { %v13044_v14 = vpop.permute.xlu0 %4249 }
 0x798   : > { %9417 = vmatmul.msk.f32.vlgmr.msra.gmra.mxu3 %vm890_vm0, %v16340_v61  ;;  %v13042_v8 = vpop.permute.xlu1 %4253 }
 0x799   : > { %4012 = vmatpush.msra.mxu3 %v9867_v12 }
 0x79b   : > { %4013 = vmatpush.msra.mxu3 %v9868_v54  ;;  %v13060_v57 = vpop.f32.mrf.mxu2 }
 0x79c   : > { %16344 = vst [vmem:[#allocation122_spill] sm:$0xff] %v13060_v57  ;;  %v16356_v57 = vld [vmem:[#allocation106_spill] sm:$0xff] }
 0x79e   : > { %v13048_v34 = vpop.permute.xlu0 %4175 }
 0x7a0   : > { %9418 = vmatmul.msk.f32.gmra.mxu3 %vm890_vm0, %v16341_v32  ;;  %v13046_v7 = vpop.permute.xlu1 %4134 }
 0x7a6   : > { %v13054_v13 = vpop.permute.xlu0 %4173 }
 0x7a7   : > { %2913 = vadd.xlane.f32.xlu0 %v2912_v50  ;;  %v16350_v50 = vld [vmem:[#allocation54_spill] sm:$0xff] }
 0x7a8   : > { %v13052_v33 = vpop.permute.xlu1 %4132 }
 0x7a9   : > { %4329 = vrot.lane.b32.xlu1 %v16342_v58, %s11147_s0 }
 0x7ae   : > { %v13064_v27 = vpop.permute.xlu0 %4169 }
 0x7b0   : > { %v13062_v49 = vpop.permute.xlu1 %4292 }
 0x7b6   : > { %v13078_v29 = vpop.permute.xlu0 %4214 }
 0x7b8   : > { %v13074_v60 = vpop.permute.xlu1 %4290 }
 0x7bb   : > { %4208 = vrot.lane.b32.xlu0 %v16267_v31, %s11147_s0 }
 0x7c0   : > { %v13084_v63 = vpop.permute.xlu1 %4286 }
 0x7c1   : > { %16348 = vst [vmem:[#allocation112_spill] sm:$0xff] %v13084_v63 }
 0x7c3   : > { %4327 = vrot.lane.b32.xlu0 %v16343_v18, %s11147_s0 }
 0x7c8   : > { %v13092_v12 = vpop.permute.xlu1 %9880 }
 0x7cb   : > { %4364 = vrot.lane.b32.xlu0 %v16345_v55, %s11147_s0 }
 0x7d0   : > { %v13104_v41 = vpop.permute.xlu1 %9885 }
 0x7d1   : > { %v13070_v16 = vpop.f32.mrf.mxu2 }
 0x7d2   : > { %16346 = vst [vmem:[#allocation119_spill] sm:$0xff] %v13070_v16 }
 0x7d3   : > { %9900 = vrot.lane.b32.xlu0 %v11772_v47, %s11147_s0  ;;  %2910 = vadd.xlane.f32.xlu1 %v2909_v19 }
 0x7da   : > { %v13080_v39 = vpop.f32.mrf.mxu2 }
 0x7db   : > { %16347 = vst [vmem:[#allocation124_spill] sm:$0xff] %v13080_v39  ;;  %4907 = vrot.lane.b32.xlu0 %v16317_v44, %s11148_s3  ;;  %v9876_v39 = vpop.permute.xlu2 %9875 }
 0x7dc   : > { %v2908_v35 = vpop.xlane.xlu0 %2907 }
 0x7dd   : > { %10499 = vrcp.f32 %v2908_v35 }
 0x7e2   : > { %v13086_v30 = vpop.f32.mrf.mxu2 }
 0x7e3   : > { %16349 = vst [vmem:[#allocation82_spill] sm:$0xff] %v13086_v30  ;;  %v10500_v51 = vpop.eup %10499  ;;  %4952 = vrot.lane.b32.xlu0 %v11492_v37, %s11148_s3  ;;  %v16354_v30 = vld [vmem:[#allocation114_spill] sm:$0xff] }
 0x7e4   : > { %v2944_v24 = vmul.f32 %v10500_v51, %v2908_v35  ;;  %v16351_v35 = vld [vmem:[#allocation60_spill] sm:$0xff] }
 0x7e6   : > { %v2960_v62 = vsub.f32 2.0, %v2944_v24  ;;  %v9873_v24 = vunpack.i.h.bf16 %v9871_v1 }
 0x7e8   : > { %v2976_v61 = vmul.f32 %v10500_v51, %v2960_v62  ;;  %v16352_v51 = vld [vmem:[#allocation71_spill] sm:$0xff] }
 0x7ea   : > { %v13094_v9 = vpop.f32.mrf.mxu2  ;;  %v2992_v54 = vmul.f32 %v12967_v43, %v2976_v61  ;;  %v9872_v43 = vunpack.i.l.bf16 %v9871_v1  ;;  %v13116_v61 = vpop.permute.xlu1 %4331  ;;  %v16355_v1 = vld [vmem:[#allocation34_spill] sm:$0xff] }
 0x7eb   : > { %4948 = vrot.lane.b32.xlu0 %v11529_v46, %s11148_s3  ;;  %v3587_v32 = vsel %vm890_vm0, %v13094_v9, -inf }
 0x7ec   : > { %3588 = vmax.xlane.f32.xlu2 %v3587_v32  ;;  %4325 = vrot.lane.b32.xlu1 %v16350_v50, %s11147_s0  ;;  %v16353_v32 = vld [vmem:[#allocation66_spill] sm:$0xff] }
 0x7ed   : > { %9392 = vmatmul.msk.f32.gmra.mxu0 %vm890_vm0, %v2992_v54 }
 0x7f2   : > { %v13106_v19 = vpop.f32.mrf.mxu2 }
 0x7f3   : > { %5065 = vrot.lane.b32.xlu0 %v16316_v42, %s11148_s3 }
 0x7f4   : > { %4370 = vrot.lane.b32.xlu1 %v16351_v35, %s11147_s0 }
 0x7f5   : > { %9405 = vmatmul.msk.f32.vlgmr.msra.gmra.mxu0 %vm890_vm0, %v16352_v51  ;;  %v9878_v51 = vunpack.i.h.bf16 %v9876_v39  ;;  %v13254_v55 = vpop.f32.mrf.mxu1 }
 0x7f6   : > { %3907 = vmatpush.msra.mxu0 %v9872_v43  ;;  %v9883_v43 = vunpack.i.h.bf16 %v13092_v12  ;;  %16388 = vst [vmem:[#allocation126_spill] sm:$0xff] %v13254_v55 }
 0x7f8   : > { %3908 = vmatpush.msra.mxu0 %v9873_v24 }
 0x7fa   : > { %v13114_v62 = vpop.f32.mrf.mxu2 }
 0x7fb   : > { %v3611_v54 = vsel %vm890_vm0, %v13114_v62, -inf }
 0x7fc   : > { %3612 = vmax.xlane.f32.xlu2 %v3611_v54  ;;  %4366 = vrot.lane.b32.xlu1 %v16353_v32, %s11147_s0 }
 0x7fd   : > { %9406 = vmatmul.msk.f32.gmra.mxu0 %vm890_vm0, %v16354_v30 }
 0x803   : > { %v2890_v16 = vpop.xlane.xlu1 %2889 }
 0x804   : > { %10501 = vrcp.f32 %v2890_v16  ;;  %9895 = vrot.lane.b32.xlu1 %v11642_v26, %s11147_s0 }
 0x805   : > { %9421 = vmatmul.msk.f32.vlgmr.msrb.gmra.mxu0 %vm890_vm0, %v16355_v1 }
 0x806   : > { %4047 = vmatpush.msrb.mxu0 %v9878_v51 }
 0x808   : > { %4048 = vmatpush.msrb.mxu0 %v9883_v43 }
 0x80a   : > { %v10502_v24 = vpop.eup %10501 }
 0x80b   : > { %v2938_v54 = vmul.f32 %v10502_v24, %v2890_v16  ;;  %v16357_v16 = vld [vmem:[#allocation26_spill] sm:$0xff] }
 0x80c   : > { %4911 = vrot.lane.b32.xlu1 %v11449_v22, %s11148_s3 }
 0x80d   : > { %v2954_v30 = vsub.f32 2.0, %v2938_v54  ;;  %9422 = vmatmul.msk.f32.gmra.mxu0 %vm890_vm0, %v16356_v57  ;;  %v13145_v57 = vpop.f32.mrf.mxu3 }
 0x80e   : > { %16358 = vst [vmem:[#allocation115_spill] sm:$0xff] %v13145_v57 }
 0x80f   : > { %v2970_v46 = vmul.f32 %v10502_v24, %v2954_v30  ;;  %v13155_v30 = vpop.f32.mrf.mxu0 }
 0x810   : > { %16361 = vst [vmem:[#allocation83_spill] sm:$0xff] %v13155_v30  ;;  %v16366_v30 = vld [vmem:[#allocation120_spill] sm:$0xff] }
 0x811   : > { %v2986_v37 = vmul.f32 %v13014_v0, %v2970_v46  ;;  %v13147_v46 = vpop.permute.xlu0 %4212 }
 0x813   : > { %9386 = vmatmul.msk.f32.gmra.mxu1 %vm890_vm0, %v2986_v37  ;;  %v16359_v37 = vld [vmem:[#allocation42_spill] sm:$0xff] }
 0x814   : > { %4909 = vrot.lane.b32.xlu1 %v11469_v28, %s11148_s3 }
 0x815   : > { %v13153_v1 = vpop.f32.mrf.mxu3 }
 0x816   : > { %16360 = vst [vmem:[#allocation101_spill] sm:$0xff] %v13153_v1  ;;  %v16364_v1 = vld [vmem:[#allocation107_spill] sm:$0xff] }
 0x81a   : > { %v2914_v51 = vpop.xlane.xlu0 %2913 }
 0x81b   : > { %v13151_v0 = vpop.permute.xlu1 %4329  ;;  %10503 = vrcp.f32 %v2914_v51 }
 0x81c   : > { %5069 = vrot.lane.b32.xlu1 %v16318_v21, %s11148_s3 }
 0x81d   : > { %v13157_v42 = vpop.f32.mrf.mxu3 }
 0x81e   : > { %16362 = vst [vmem:[#allocation93_spill] sm:$0xff] %v13157_v42 }
 0x821   : > { %v10504_v24 = vpop.eup %10503 }
 0x822   : > { %v2946_v25 = vmul.f32 %v10504_v24, %v2914_v51 }
 0x824   : > { %4950 = vrot.lane.b32.xlu1 %v11495_v38, %s11148_s3  ;;  %v2962_v21 = vsub.f32 2.0, %v2946_v25 }
 0x825   : > { %v13160_v28 = vpop.f32.mrf.mxu3 }
 0x826   : > { %16363 = vst [vmem:[#allocation91_spill] sm:$0xff] %v13160_v28  ;;  %v2978_v44 = vmul.f32 %v10504_v24, %v2962_v21  ;;  %v9882_v21 = vunpack.i.l.bf16 %v13092_v12  ;;  %v9887_v12 = vunpack.i.l.bf16 %v13104_v41  ;;  %v16371_v24 = vld [vmem:[#allocation118_spill] sm:$0xff] }
 0x828   : > { %v2994_v51 = vmul.f32 %v13036_v23, %v2978_v44 }
 0x82c   : > { %9910 = vrot.lane.b32.xlu1 %v11610_v11, %s11147_s0 }
 0x82d   : > { %v13171_v25 = vpop.f32.mrf.mxu3 }
 0x834   : > { %4946 = vrot.lane.b32.xlu1 %v16357_v16, %s11148_s3 }
 0x83c   : > { %5063 = vrot.lane.b32.xlu1 %v16359_v37, %s11148_s3  ;;  %v13165_v37 = vpop.f32.mrf.mxu0 }
 0x83d   : > { %16365 = vst [vmem:[#allocation92_spill] sm:$0xff] %v13165_v37 }
 0x846   : > { %v2911_v43 = vpop.xlane.xlu1 %2910 }
 0x847   : > { %10505 = vrcp.f32 %v2911_v43 }
 0x84d   : > { %v10506_v54 = vpop.eup %10505 }
 0x84e   : > { %v2945_v57 = vmul.f32 %v10506_v54, %v2911_v43 }
 0x850   : > { %v2961_v16 = vsub.f32 2.0, %v2945_v57  ;;  %v13180_v57 = vpop.f32.mrf.mxu3 }
 0x851   : > { %v3596_v23 = vsel %vm890_vm0, %v13180_v57, -inf }
 0x852   : > { %v2977_v10 = vmul.f32 %v10506_v54, %v2961_v16  ;;  %v16368_v16 = vld [vmem:[#allocation108_spill] sm:$0xff]  ;;  %v9888_v54 = vunpack.i.h.bf16 %v13104_v41 }
 0x854   : > { %v2993_v11 = vmul.f32 %v13068_v6, %v2977_v10  ;;  %v13173_v10 = vpop.f32.mrf.mxu0  ;;  %v9877_v6 = vunpack.i.l.bf16 %v9876_v39 }
 0x855   : > { %16367 = vst [vmem:[#allocation89_spill] sm:$0xff] %v13173_v10 }
 0x856   : > { %9393 = vmatmul.msk.f32.vlgmr.msra.gmra.mxu1 %vm890_vm0, %v2993_v11  ;;  %v3590_v11 = vsel %vm890_vm0, %v13106_v19, -inf }
 0x857   : > { %9423 = vmatpush.xpose.msk.msra.mxu1 %vm890_vm0, %v16364_v1  ;;  %v16370_v1 = vld [vmem:[#allocation104_spill] sm:$0xff] }
 0x858   : > { %v13208_v41 = vpop.f32.mrf.mxu3 }
 0x85b   : > { %9424 = vmatpush.xpose.msk.msra.mxu1 %vm890_vm0, %v16366_v30 }
 0x85e   : > { %9394 = vmatmul.msk.f32.gmra.mxu1 %vm890_vm0, %v2994_v51  ;;  %v13196_v30 = vpop.permute.xlu1 %4325 }
 0x85f   : > { %16372 = vst [vmem:[#allocation103_spill] sm:$0xff] %v13196_v30 }
 0x866   : > { %9409 = vmatmul.msk.f32.vlgmr.msrb.gmra.mxu1 %vm890_vm0, %v16368_v16  ;;  %3591 = vmax.xlane.f32.xlu1 %v3590_v11  ;;  %v3593_v11 = vsel %vm890_vm0, %v13171_v25, -inf  ;;  %v16373_v16 = vld [vmem:[#allocation116_spill] sm:$0xff] }
 0x867   : > { %3942 = vmatpush.msrb.mxu1 %v9877_v6 }
 0x869   : > { %3943 = vmatpush.msrb.mxu1 %v9882_v21  ;;  %v13206_v21 = vpop.f32.mrf.mxu2 }
 0x86a   : > { %v13182_v44 = vpop.f32.mrf.mxu0 }
 0x86b   : > { %16369 = vst [vmem:[#allocation100_spill] sm:$0xff] %v13182_v44 }
 0x86e   : > { %9410 = vmatmul.msk.f32.gmra.mxu1 %vm890_vm0, %v16370_v1  ;;  %3597 = vmax.xlane.f32.xlu1 %v3596_v23  ;;  %v3614_v23 = vsel %vm890_vm0, %v13206_v21, -inf  ;;  %v3617_v1 = vsel %vm890_vm0, %v13208_v41, -inf }
 0x872   : > { %v13188_v39 = vpop.f32.mrf.mxu0 }
 0x873   : > { %v3599_v43 = vsel %vm890_vm0, %v13188_v39, -inf }
 0x874   : > { %3600 = vmax.xlane.f32.xlu0 %v3599_v43  ;;  %v13214_v43 = vpop.permute.xlu1 %4370 }
 0x875   : > { %16374 = vst [vmem:[#allocation69_spill] sm:$0xff] %v13214_v43 }
 0x876   : > { %9425 = vmatmul.msk.f32.vlgmr.msra.gmra.mxu1 %vm890_vm0, %v16371_v24 }
 0x877   : > { %4082 = vmatpush.msra.mxu1 %v9887_v12 }
 0x879   : > { %4083 = vmatpush.msra.mxu1 %v9888_v54 }
 0x87a   : > { %v13198_v51 = vpop.f32.mrf.mxu0 }
 0x87b   : > { %v3602_v6 = vsel %vm890_vm0, %v13198_v51, -inf }
 0x87c   : > { %3603 = vmax.xlane.f32.xlu2 %v3602_v6  ;;  %3594 = vmax.xlane.f32.xlu0 %v3593_v11  ;;  %v13220_v54 = vpop.permute.xlu1 %4366  ;;  %v13222_v6 = vpop.permute.xlu2 %4288 }
 0x87d   : > { %16375 = vst [vmem:[#allocation76_spill] sm:$0xff] %v13220_v54 }
 0x87e   : > { %9426 = vmatmul.msk.f32.gmra.mxu1 %vm890_vm0, %v16373_v16  ;;  %16376 = vst [vmem:[#allocation123_spill] sm:$0xff] %v13222_v6  ;;  %v13226_v16 = vpop.permute.xlu0 %4208 }
 0x87f   : > { %16377 = vst [vmem:[#allocation71_spill] sm:$0xff] %v13226_v16 }
 0x882   : > { %v13216_v12 = vpop.f32.mrf.mxu0 }
 0x883   : > { %v3623_v24 = vsel %vm890_vm0, %v13216_v12, -inf }
 0x884   : > { %3615 = vmax.xlane.f32.xlu2 %v3614_v23  ;;  %3618 = vmax.xlane.f32.xlu0 %v3617_v1  ;;  %v13224_v11 = vpop.permute.xlu1 %9895  ;;  %v13228_v44 = vpop.permute.xlu2 %4171 }
 0x886   : > { %v13232_v23 = vpop.permute.xlu0 %4327 }
 0x887   : > { %16379 = vst [vmem:[#allocation34_spill] sm:$0xff] %v13232_v23 }
 0x88c   : > { %3624 = vmax.xlane.f32.xlu2 %v3623_v24  ;;  %v13230_v10 = vpop.permute.xlu1 %4911  ;;  %v13234_v1 = vpop.permute.xlu2 %4210 }
 0x88d   : > { %16378 = vst [vmem:[#allocation114_spill] sm:$0xff] %v13230_v10 }
 0x88e   : > { %16380 = vst [vmem:[#allocation106_spill] sm:$0xff] %v13234_v1  ;;  %v13238_v42 = vpop.permute.xlu0 %4364 }
 0x88f   : > { %16382 = vst [vmem:[#allocation120_spill] sm:$0xff] %v13238_v42 }
 0x890   : > { %v13260_v18 = vpop.f32.mrf.mxu1 }
 0x891   : > { %16390 = vst [vmem:[#allocation128_spill] sm:$0xff] %v13260_v18 }
 0x894   : > { %v13236_v28 = vpop.permute.xlu1 %4909  ;;  %v13240_v24 = vpop.permute.xlu2 %4368 }
 0x895   : > { %16381 = vst [vmem:[#allocation107_spill] sm:$0xff] %v13236_v28 }
 0x896   : > { %16383 = vst [vmem:[#allocation108_spill] sm:$0xff] %v13240_v24  ;;  %v13244_v2 = vpop.permute.xlu0 %9900 }
 0x89c   : > { %v13242_v37 = vpop.permute.xlu1 %5069  ;;  %v13246_v52 = vpop.permute.xlu2 %9890 }
 0x89d   : > { %16384 = vst [vmem:[#allocation104_spill] sm:$0xff] %v13242_v37 }
 0x89e   : > { %v13250_v47 = vpop.permute.xlu0 %4907 }
 0x89f   : > { %16386 = vst [vmem:[#allocation116_spill] sm:$0xff] %v13250_v47 }
 0x8a4   : > { %v13248_v38 = vpop.permute.xlu1 %4950  ;;  %v13252_v22 = vpop.permute.xlu2 %4913 }
 0x8a5   : > { %16385 = vst [vmem:[#allocation118_spill] sm:$0xff] %v13248_v38 }
 0x8a6   : > { %16387 = vst [vmem:[#allocation125_spill] sm:$0xff] %v13252_v22  ;;  %v13258_v28 = vpop.permute.xlu0 %4952 }
 0x8a7   : > { %16389 = vst [vmem:[#allocation127_spill] sm:$0xff] %v13258_v28 }
 0x8ac   : > { %v13256_v26 = vpop.permute.xlu1 %9910  ;;  %v13262_v32 = vpop.permute.xlu2 %9905 }
 0x8ad   : > { %16391 = vst [vmem:[#allocation129_spill] sm:$0xff] %v13262_v32 }
 0x8ae   : > { %v13268_v37 = vpop.permute.xlu0 %4948 }
 0x8af   : > { %16394 = vst [vmem:[#allocation132_spill] sm:$0xff] %v13268_v37 }
 0x8b4   : > { %v13266_v35 = vpop.permute.xlu1 %4946  ;;  %v13270_v38 = vpop.permute.xlu2 %5067 }
 0x8b5   : > { %16393 = vst [vmem:[#allocation131_spill] sm:$0xff] %v13266_v35 }
 0x8b6   : > { %16395 = vst [vmem:[#allocation133_spill] sm:$0xff] %v13270_v38  ;;  %v13276_v22 = vpop.permute.xlu0 %5065  ;;  %v13283_v38 = vpop.f32.mrf.mxu0 }
 0x8b7   : > { %16398 = vst [vmem:[#allocation136_spill] sm:$0xff] %v13276_v22 }
 0x8bc   : > { %v13274_v10 = vpop.permute.xlu1 %5063  ;;  %v3589_v55 = vpop.xlane.xlu2 %3588 }
 0x8bd   : > { %16397 = vst [vmem:[#allocation135_spill] sm:$0xff] %v13274_v10  ;;  %v3635_v28 = vsub.f32 %v13094_v9, %v3589_v55  ;;  %v3626_v9 = vsel %vm890_vm0, %v13283_v38, -inf }
 0x8bf   : > { %v3651_v3 = vmul.f32 1.442695, %v3635_v28 }
 0x8c1   : > { %10507 = vpow2.f32 %v3651_v3 }
 0x8c4   : > { %v3613_v37 = vpop.xlane.xlu2 %3612 }
 0x8c7   : > { %v13293_v42 = vpop.eup %10507 }
 0x8d3   : > { %v13264_v50 = vpop.f32.mrf.mxu1 }
 0x8d4   : > { %16392 = vst [vmem:[#allocation130_spill] sm:$0xff] %v13264_v50 }
 0x8d9   : > { %v3592_v35 = vpop.xlane.xlu1 %3591 }
 0x8da   : > { %v3636_v22 = vsub.f32 %v13106_v19, %v3592_v35 }
 0x8db   : > { %v13272_v47 = vpop.f32.mrf.mxu1 }
 0x8dc   : > { %16396 = vst [vmem:[#allocation134_spill] sm:$0xff] %v13272_v47  ;;  %v3653_v58 = vmul.f32 1.442695, %v3636_v22 }
 0x8e1   : > { %v3598_v54 = vpop.xlane.xlu1 %3597 }
 0x8e2   : > { %v3638_v19 = vsub.f32 %v13180_v57, %v3598_v54 }
 0x8e3   : > { %v13279_v18 = vpop.f32.mrf.mxu1 }
 0x8e4   : > { %v3605_v50 = vsel %vm890_vm0, %v13279_v18, -inf }
 0x8e5   : > { %3606 = vmax.xlane.f32.xlu1 %v3605_v50 }
 0x8e7   : > { %v3601_v31 = vpop.xlane.xlu0 %3600 }
 0x8e8   : > { %v3639_v47 = vsub.f32 %v13188_v39, %v3601_v31  ;;  %v13295_v31 = vpop.f32.mrf.mxu3  ;;  %v3643_v39 = vsub.f32 %v13114_v62, %v3613_v37  ;;  %v3657_v37 = vmul.f32 1.442695, %v3638_v19 }
 0x8ea   : > { %v3659_v28 = vmul.f32 1.442695, %v3639_v47  ;;  %v3683_v47 = vsel %vm890_vm0, %v13293_v42, 0.0  ;;  %v3667_v62 = vmul.f32 1.442695, %v3643_v39 }
 0x8eb   : > { %v13286_v10 = vpop.f32.mrf.mxu1 }
 0x8ec   : > { %v3608_v55 = vsel %vm890_vm0, %v13286_v10, -inf  ;;  %10509 = vpow2.f32 %v3659_v28 }
 0x8ed   : > { %3609 = vmax.xlane.f32.xlu2 %v3608_v55  ;;  %3627 = vmax.xlane.f32.xlu1 %v3626_v9  ;;  %10511 = vpow2.f32 %v3653_v58  ;;  %v3620_v9 = vsel %vm890_vm0, %v13295_v31, -inf }
 0x8ee   : > { %10513 = vpow2.f32 %v3667_v62 }
 0x8ef   : > { %v3604_v50 = vpop.xlane.xlu2 %3603  ;;  %v3595_v3 = vpop.xlane.xlu0 %3594  ;;  %10515 = vpow2.f32 %v3657_v37 }
 0x8f0   : > { %v3637_v55 = vsub.f32 %v13171_v25, %v3595_v3  ;;  %v3640_v25 = vsub.f32 %v13198_v51, %v3604_v50 }
 0x8f2   : > { %v3655_v54 = vmul.f32 1.442695, %v3637_v55  ;;  %v13308_v28 = vpop.eup %10509  ;;  %v3661_v55 = vmul.f32 1.442695, %v3640_v25 }
 0x8f3   : > { %v13299_v35 = vpop.f32.mrf.mxu1  ;;  %v13310_v58 = vpop.eup %10511 }
 0x8f4   : > { %v3629_v22 = vsel %vm890_vm0, %v13299_v35, -inf  ;;  %10517 = vpow2.f32 %v3655_v54  ;;  %v3686_v19 = vsel %vm890_vm0, %v13310_v58, 0.0 }
 0x8f5   : > { %3684 = vadd.xlane.f32.xlu2 %v3683_v47  ;;  %3630 = vmax.xlane.f32.xlu0 %v3629_v22  ;;  %v3695_v47 = vsel %vm890_vm0, %v13308_v28, 0.0  ;;  %10519 = vpow2.f32 %v3661_v55 }
 0x8f6   : > { %3621 = vmax.xlane.f32.xlu1 %v3620_v9  ;;  %v13321_v9 = vpop.eup %10513 }
 0x8f7   : > { %v3616_v57 = vpop.xlane.xlu2 %3615  ;;  %v3619_v51 = vpop.xlane.xlu0 %3618  ;;  %v3707_v25 = vsel %vm890_vm0, %v13321_v9, 0.0 }
 0x8f8   : > { %v13324_v62 = vpop.eup %10515 }
 0x8fa   : > { %v13326_v37 = vpop.eup %10517 }
 0x8fb   : > { %v13313_v3 = vpop.f32.mrf.mxu1  ;;  %v13336_v55 = vpop.eup %10519 }
 0x8fc   : > { %v3632_v39 = vsel %vm890_vm0, %v13313_v3, -inf }
 0x8fd   : > { %3696 = vadd.xlane.f32.xlu2 %v3695_v47  ;;  %3633 = vmax.xlane.f32.xlu0 %v3632_v39  ;;  %v3645_v47 = vsub.f32 %v13208_v41, %v3619_v51  ;;  %v3644_v39 = vsub.f32 %v13206_v21, %v3616_v57  ;;  %v3698_v57 = vsel %vm890_vm0, %v13336_v55, 0.0 }
 0x8fe   : > { %3687 = vadd.xlane.f32.xlu1 %v3686_v19  ;;  %v3692_v19 = vsel %vm890_vm0, %v13324_v62, 0.0 }
 0x8ff   : > { %v3625_v22 = vpop.xlane.xlu2 %3624 }
 0x900   : > { %v3647_v50 = vsub.f32 %v13216_v12, %v3625_v22  ;;  %v3689_v12 = vsel %vm890_vm0, %v13326_v37, 0.0  ;;  %v3671_v22 = vmul.f32 1.442695, %v3645_v47 }
 0x902   : > { %v3675_v54 = vmul.f32 1.442695, %v3647_v50  ;;  %v3669_v50 = vmul.f32 1.442695, %v3644_v39 }
 0x904   : > { %10521 = vpow2.f32 %v3675_v54 }
 0x905   : > { %3708 = vadd.xlane.f32.xlu2 %v3707_v25  ;;  %3693 = vadd.xlane.f32.xlu0 %v3692_v19  ;;  %10523 = vpow2.f32 %v3671_v22  ;;  %v16399_v25 = vld [vmem:[#allocation48_spill] sm:$0xff] }
 0x906   : > { %3690 = vadd.xlane.f32.xlu1 %v3689_v12  ;;  %10525 = vpow2.f32 %v3669_v50 }
 0x90a   : > { %v13338_v41 = vpop.eup %10521 }
 0x90b   : > { %v3719_v21 = vsel %vm890_vm0, %v13338_v41, 0.0  ;;  %v13344_v51 = vpop.eup %10523 }
 0x90c   : > { %v13346_v54 = vpop.eup %10525  ;;  %v3713_v47 = vsel %vm890_vm0, %v13344_v51, 0.0 }
 0x90d   : > { %3720 = vadd.xlane.f32.xlu2 %v3719_v21  ;;  %v3710_v39 = vsel %vm890_vm0, %v13346_v54, 0.0 }
 0x90e   : > { %3699 = vadd.xlane.f32.xlu1 %v3698_v57 }
 0x915   : > { %3714 = vadd.xlane.f32.xlu2 %v3713_v47 }
 0x916   : > { %3711 = vadd.xlane.f32.xlu1 %v3710_v39 }
 0x919   : > { %5108 = vrot.lane.b32.xlu0 %v16399_v25, %s11148_s3 }
 0x958   : > { %v3607_v19 = vpop.xlane.xlu1 %3606 }
 0x959   : > { %v3641_v12 = vsub.f32 %v13279_v18, %v3607_v19 }
 0x95b   : > { %v3663_v22 = vmul.f32 1.442695, %v3641_v12 }
 0x95d   : > { %10527 = vpow2.f32 %v3663_v22 }
 0x960   : > { %v3610_v50 = vpop.xlane.xlu2 %3609  ;;  %v3628_v21 = vpop.xlane.xlu1 %3627 }
 0x961   : > { %v3642_v57 = vsub.f32 %v13286_v10, %v3610_v50  ;;  %v3648_v1 = vsub.f32 %v13283_v38, %v3628_v21 }
 0x963   : > { %v13357_v16 = vpop.eup %10527  ;;  %v3665_v47 = vmul.f32 1.442695, %v3642_v57  ;;  %v3677_v24 = vmul.f32 1.442695, %v3648_v1 }
 0x964   : > { %v3701_v39 = vsel %vm890_vm0, %v13357_v16, 0.0 }
 0x965   : > { %10529 = vpow2.f32 %v3665_v47  ;;  %3702 = vadd.xlane.f32.xlu0 %v3701_v39 }
 0x966   : > { %10531 = vpow2.f32 %v3677_v24 }
 0x968   : > { %v3685_v25 = vpop.xlane.xlu2 %3684  ;;  %v13361_v18 = vpop.xlane.xlu0 %3630 }
 0x969   : > { %10533 = vrcp.f32 %v3685_v25  ;;  %v3622_v19 = vpop.xlane.xlu1 %3621 }
 0x96a   : > { %v3646_v12 = vsub.f32 %v13295_v31, %v3622_v19 }
 0x96b   : > { %v13364_v10 = vpop.eup %10529 }
 0x96c   : > { %v13366_v38 = vpop.eup %10531  ;;  %v3673_v22 = vmul.f32 1.442695, %v3646_v12  ;;  %v3704_v1 = vsel %vm890_vm0, %v13364_v10, 0.0 }
 0x96d   : > { %v3722_v50 = vsel %vm890_vm0, %v13366_v38, 0.0  ;;  %3705 = vadd.xlane.f32.xlu2 %v3704_v1 }
 0x96e   : > { %10535 = vpow2.f32 %v3673_v22  ;;  %3723 = vadd.xlane.f32.xlu0 %v3722_v50 }
 0x96f   : > { %v10534_v24 = vpop.eup %10533 }
 0x970   : > { %v3747_v21 = vmul.f32 %v10534_v24, %v3685_v25  ;;  %v3697_v57 = vpop.xlane.xlu2 %3696  ;;  %v13372_v47 = vpop.xlane.xlu0 %3633 }
 0x971   : > { %10537 = vrcp.f32 %v3697_v57  ;;  %v3688_v31 = vpop.xlane.xlu1 %3687 }
 0x972   : > { %v3763_v39 = vsub.f32 2.0, %v3747_v21  ;;  %10539 = vrcp.f32 %v3688_v31 }
 0x974   : > { %v13374_v19 = vpop.eup %10535  ;;  %v3779_v12 = vmul.f32 %v10534_v24, %v3763_v39 }
 0x975   : > { %v3716_v43 = vsel %vm890_vm0, %v13374_v19, 0.0 }
 0x976   : > { %v3795_v6 = vmul.f32 %v13293_v42, %v3779_v12  ;;  %3717 = vadd.xlane.f32.xlu1 %v3716_v43 }
 0x977   : > { %v10538_v22 = vpop.eup %10537 }
 0x978   : > { %v10540_v1 = vpop.eup %10539  ;;  %v3751_v50 = vmul.f32 %v10538_v22, %v3697_v57  ;;  %9427 = vmatmul.msk.f32.vlgmr.msra.gmra.mxu2 %vm890_vm0, %v3795_v6  ;;  %v3709_v25 = vpop.xlane.xlu2 %3708 }
 0x979   : > { %v3694_v23 = vpop.xlane.xlu0 %3693  ;;  %v3748_v63 = vmul.f32 %v10540_v1, %v3688_v31  ;;  %9443 = vmatpush.xpose.msk.msra.mxu2 %vm890_vm0, %v12998_v15  ;;  %10541 = vrcp.f32 %v3709_v25  ;;  %v3691_v21 = vpop.xlane.xlu1 %3690 }
 0x97a   : > { %v3767_v24 = vsub.f32 2.0, %v3751_v50  ;;  %10543 = vrcp.f32 %v3694_v23 }
 0x97b   : > { %v3764_v39 = vsub.f32 2.0, %v3748_v63  ;;  %10545 = vrcp.f32 %v3691_v21 }
 0x97c   : > { %v3783_v32 = vmul.f32 %v10538_v22, %v3767_v24 }
 0x97d   : > { %v3780_v42 = vmul.f32 %v10540_v1, %v3764_v39  ;;  %9444 = vmatpush.xpose.msk.msra.mxu2 %vm890_vm0, %v13024_v59  ;;  %v16400_v1 = vld [vmem:[#allocation62_spill] sm:$0xff] }
 0x97e   : > { %v3799_v43 = vmul.f32 %v13308_v28, %v3783_v32 }
 0x97f   : > { %v10542_v6 = vpop.eup %10541  ;;  %v3796_v57 = vmul.f32 %v13310_v58, %v3780_v42 }
 0x980   : > { %v10544_v31 = vpop.eup %10543  ;;  %v3755_v12 = vmul.f32 %v10542_v6, %v3709_v25  ;;  %9431 = vmatmul.msk.f32.vlgmr.msra.gmra.mxu0 %vm890_vm0, %v3799_v43  ;;  %v3721_v15 = vpop.xlane.xlu2 %3720 }
 0x981   : > { %v10546_v30 = vpop.eup %10545  ;;  %9451 = vmatpush.xpose.msk.msra.mxu0 %vm890_vm0, %v13048_v34  ;;  %10547 = vrcp.f32 %v3721_v15  ;;  %9428 = vmatmul.msk.f32.gmra.mxu2 %vm890_vm0, %v3796_v57  ;;  %v3700_v63 = vpop.xlane.xlu1 %3699  ;;  %v3750_v28 = vmul.f32 %v10544_v31, %v3694_v23 }
 0x982   : > { %v3771_v22 = vsub.f32 2.0, %v3755_v12  ;;  %v3749_v59 = vmul.f32 %v10546_v30, %v3691_v21  ;;  %10549 = vrcp.f32 %v3700_v63  ;;  %9925 = vrot.lane.b32.xlu0 %v16330_v5, %s11147_s0 }
 0x983   : > { %v3766_v39 = vsub.f32 2.0, %v3750_v28 }
 0x984   : > { %v3787_v32 = vmul.f32 %v10542_v6, %v3771_v22  ;;  %v3765_v58 = vsub.f32 2.0, %v3749_v59 }
 0x985   : > { %9452 = vmatpush.xpose.msk.msra.mxu0 %vm890_vm0, %v13054_v13  ;;  %9915 = vrot.lane.b32.xlu2 %v16400_v1, %s11147_s0 }
 0x986   : > { %v3803_v34 = vmul.f32 %v13321_v9, %v3787_v32  ;;  %v3781_v50 = vmul.f32 %v10546_v30, %v3765_v58  ;;  %v16401_v30 = vld [vmem:[#allocation32_spill] sm:$0xff]  ;;  %v16403_v58 = vld [vmem:[#allocation49_spill] sm:$0xff] }
 0x987   : > { %v10548_v25 = vpop.eup %10547 }
 0x988   : > { %v10550_v24 = vpop.eup %10549  ;;  %v3797_v21 = vmul.f32 %v13326_v37, %v3781_v50  ;;  %v3715_v42 = vpop.xlane.xlu2 %3714  ;;  %v3759_v13 = vmul.f32 %v10548_v25, %v3721_v15  ;;  %v3782_v37 = vmul.f32 %v10544_v31, %v3766_v39 }
 0x989   : > { %v3752_v43 = vmul.f32 %v10550_v24, %v3700_v63  ;;  %10551 = vrcp.f32 %v3715_v42  ;;  %9435 = vmatmul.msk.f32.vlgmr.msrb.gmra.mxu2 %vm890_vm0, %v3803_v34  ;;  %v3712_v23 = vpop.xlane.xlu1 %3711 }
 0x98a   : > { %9429 = vmatmul.msk.f32.vlgmr.msrb.gmra.mxu3 %vm890_vm0, %v3797_v21  ;;  %9459 = vmatpush.xpose.msk.msrb.mxu2 %vm890_vm0, %v13042_v8  ;;  %10553 = vrcp.f32 %v3712_v23  ;;  %v3775_v12 = vsub.f32 2.0, %v3759_v13  ;;  %v16402_v8 = vld [vmem:[#allocation43_spill] sm:$0xff]  ;;  %v3798_v31 = vmul.f32 %v13324_v62, %v3782_v37  ;;  %v16407_v13 = vld [vmem:[#allocation28_spill] sm:$0xff] }
 0x98b   : > { %v3768_v9 = vsub.f32 2.0, %v3752_v43  ;;  %9447 = vmatpush.xpose.msk.msrb.mxu3 %vm890_vm0, %v13010_v56  ;;  %4987 = vrot.lane.b32.xlu0 %v16401_v30, %s11148_s3 }
 0x98d   : > { %v3784_v6 = vmul.f32 %v10550_v24, %v3768_v9  ;;  %9920 = vrot.lane.b32.xlu2 %v16325_v17, %s11147_s0 }
 0x98e   : > { %9460 = vmatpush.xpose.msk.msrb.mxu2 %vm890_vm0, %v13016_v45  ;;  %v3791_v45 = vmul.f32 %v10548_v25, %v3775_v12 }
 0x98f   : > { %v10552_v57 = vpop.eup %10551  ;;  %9448 = vmatpush.xpose.msk.msrb.mxu3 %vm890_vm0, %v13046_v7  ;;  %5106 = vrot.lane.b32.xlu1 %v16402_v8, %s11148_s3  ;;  %v3800_v56 = vmul.f32 %v13336_v55, %v3784_v6 }
 0x990   : > { %v10554_v15 = vpop.eup %10553  ;;  %v3757_v63 = vmul.f32 %v10552_v57, %v3715_v42  ;;  %v3807_v62 = vmul.f32 %v13338_v41, %v3791_v45  ;;  %v9892_v41 = vunpack.i.l.bf16 %v13246_v52 }
 0x991   : > { %v3756_v22 = vmul.f32 %v10554_v15, %v3712_v23  ;;  %9432 = vmatmul.msk.f32.gmra.mxu0 %vm890_vm0, %v3800_v56 }
 0x992   : > { %v3773_v59 = vsub.f32 2.0, %v3757_v63  ;;  %9430 = vmatmul.msk.f32.gmra.mxu3 %vm890_vm0, %v3798_v31 }
 0x993   : > { %v3772_v32 = vsub.f32 2.0, %v3756_v22  ;;  %5147 = vrot.lane.b32.xlu0 %v16331_v20, %s11148_s3 }
 0x994   : > { %v3789_v7 = vmul.f32 %v10552_v57, %v3773_v59 }
 0x995   : > { %v3788_v28 = vmul.f32 %v10554_v15, %v3772_v32  ;;  %5104 = vrot.lane.b32.xlu2 %v16403_v58, %s11148_s3 }
 0x996   : > { %v3805_v55 = vmul.f32 %v13344_v51, %v3789_v7  ;;  %v9893_v51 = vunpack.i.h.bf16 %v13246_v52  ;;  %v9903_v52 = vunpack.i.h.bf16 %v13244_v2 }
 0x997   : > { %v3804_v34 = vmul.f32 %v13346_v54, %v3788_v28 }
 0x999   : > { %9436 = vmatmul.msk.f32.gmra.mxu2 %vm890_vm0, %v3804_v34  ;;  %9439 = vmatmul.msk.f32.vlgmr.msrb.gmra.mxu0 %vm890_vm0, %v3807_v62 }
 0x99a   : > { %9437 = vmatmul.msk.f32.vlgmr.msra.gmra.mxu3 %vm890_vm0, %v3805_v55  ;;  %9467 = vmatpush.xpose.msk.msrb.mxu0 %vm890_vm0, %v13116_v61  ;;  %v3649_v61 = vsub.f32 %v13299_v35, %v13361_v18  ;;  %v16404_v18 = vld [vmem:[#allocation50_spill] sm:$0xff]  ;;  %v9912_v55 = vunpack.i.l.bf16 %v13256_v26 }
 0x99b   : > { %9463 = vmatpush.xpose.msk.msra.mxu3 %vm890_vm0, %v13062_v49 }
 0x99c   : > { %v3679_v49 = vmul.f32 1.442695, %v3649_v61 }
 0x99e   : > { %9468 = vmatpush.xpose.msk.msrb.mxu0 %vm890_vm0, %v13151_v0  ;;  %v3650_v0 = vsub.f32 %v13313_v3, %v13372_v47  ;;  %10555 = vpow2.f32 %v3679_v49  ;;  %v16405_v47 = vld [vmem:[#allocation30_spill] sm:$0xff]  ;;  %v16416_v49 = vld [vmem:[#allocation123_spill] sm:$0xff] }
 0x99f   : > { %9464 = vmatpush.xpose.msk.msra.mxu3 %vm890_vm0, %v13074_v60  ;;  %v9898_v60 = vunpack.i.h.bf16 %v13224_v11 }
 0x9a0   : > { %v3681_v54 = vmul.f32 1.442695, %v3650_v0 }
 0x9a1   : > { %9445 = vmatmul.msk.f32.vlgmr.msra.gmra.mxu2 %vm890_vm0, %v13090_v48 }
 0x9a2   : > { %4653 = vmatpush.msra.mxu2 %v9892_v41  ;;  %10557 = vpow2.f32 %v3681_v54 }
 0x9a4   : > { %4654 = vmatpush.msra.mxu2 %v9893_v51  ;;  %v13450_v48 = vpop.eup %10555 }
 0x9a8   : > { %v13456_v35 = vpop.eup %10557 }
 0x9a9   : > { %9446 = vmatmul.msk.f32.gmra.mxu2 %vm890_vm0, %v13032_v53  ;;  %v3725_v53 = vsel %vm890_vm0, %v13450_v48, 0.0  ;;  %v3728_v3 = vsel %vm890_vm0, %v13456_v35, 0.0 }
 0x9b1   : > { %9461 = vmatmul.msk.f32.vlgmr.msrb.gmra.mxu2 %vm890_vm0, %v13034_v40  ;;  %v13460_v40 = vpop.permute.xlu0 %5108 }
 0x9b2   : > { %4793 = vmatpush.msrb.mxu2 %v9898_v60 }
 0x9b4   : > { %4794 = vmatpush.msrb.mxu2 %v9903_v52 }
 0x9b9   : > { %3726 = vadd.xlane.f32.xlu1 %v3725_v53  ;;  %9462 = vmatmul.msk.f32.gmra.mxu2 %vm890_vm0, %v13044_v14  ;;  %v16406_v14 = vld [vmem:[#allocation27_spill] sm:$0xff] }
 0x9be   : > { %3729 = vadd.xlane.f32.xlu2 %v3728_v3 }
 0x9d2   : > { %5102 = vrot.lane.b32.xlu1 %v16404_v18, %s11148_s3 }
 0x9d6   : > { %4991 = vrot.lane.b32.xlu2 %v16405_v47, %s11148_s3 }
 0x9d8   : > { %v3703_v50 = vpop.xlane.xlu0 %3702 }
 0x9d9   : > { %10559 = vrcp.f32 %v3703_v50 }
 0x9da   : > { %5028 = vrot.lane.b32.xlu1 %v16265_v36, %s11148_s3 }
 0x9de   : > { %4989 = vrot.lane.b32.xlu2 %v16406_v14, %s11148_s3 }
 0x9df   : > { %v10560_v25 = vpop.eup %10559 }
 0x9e0   : > { %v3753_v24 = vmul.f32 %v10560_v25, %v3703_v50  ;;  %v3706_v39 = vpop.xlane.xlu2 %3705 }
 0x9e1   : > { %10561 = vrcp.f32 %v3706_v39  ;;  %v3724_v21 = vpop.xlane.xlu0 %3723 }
 0x9e2   : > { %v3769_v42 = vsub.f32 2.0, %v3753_v24  ;;  %10563 = vrcp.f32 %v3724_v21 }
 0x9e4   : > { %v3785_v43 = vmul.f32 %v10560_v25, %v3769_v42 }
 0x9e6   : > { %v3801_v23 = vmul.f32 %v13357_v16, %v3785_v43  ;;  %4985 = vrot.lane.b32.xlu2 %v16407_v13, %s11148_s3  ;;  %v16408_v16 = vld [vmem:[#allocation33_spill] sm:$0xff] }
 0x9e7   : > { %v10562_v9 = vpop.eup %10561 }
 0x9e8   : > { %v10564_v37 = vpop.eup %10563  ;;  %v3754_v6 = vmul.f32 %v10562_v9, %v3706_v39  ;;  %9433 = vmatmul.msk.f32.vlgmr.msrb.gmra.mxu1 %vm890_vm0, %v3801_v23 }
 0x9e9   : > { %v3760_v57 = vmul.f32 %v10564_v37, %v3724_v21  ;;  %9455 = vmatpush.xpose.msk.msrb.mxu1 %vm890_vm0, %v13078_v29  ;;  %v3718_v12 = vpop.xlane.xlu1 %3717 }
 0x9ea   : > { %v3770_v56 = vsub.f32 2.0, %v3754_v6  ;;  %10565 = vrcp.f32 %v3718_v12 }
 0x9eb   : > { %v3776_v15 = vsub.f32 2.0, %v3760_v57 }
 0x9ec   : > { %v3786_v63 = vmul.f32 %v10562_v9, %v3770_v56  ;;  %v16418_v56 = vld [vmem:[#allocation69_spill] sm:$0xff] }
 0x9ed   : > { %v3792_v31 = vmul.f32 %v10564_v37, %v3776_v15  ;;  %9456 = vmatpush.xpose.msk.msrb.mxu1 %vm890_vm0, %v13147_v46  ;;  %v9913_v46 = vunpack.i.h.bf16 %v13256_v26  ;;  %v16410_v26 = vld [vmem:[#allocation103_spill] sm:$0xff] }
 0x9ee   : > { %5030 = vrot.lane.b32.xlu2 %v16408_v16, %s11148_s3  ;;  %v3802_v22 = vmul.f32 %v13364_v10, %v3786_v63  ;;  %v9916_v10 = vpop.permute.xlu2 %9915  ;;  %v16419_v63 = vld [vmem:[#allocation108_spill] sm:$0xff] }
 0x9ef   : > { %v3808_v59 = vmul.f32 %v13366_v38, %v3792_v31  ;;  %v9897_v38 = vunpack.i.l.bf16 %v13224_v11  ;;  %v9918_v34 = vunpack.i.h.bf16 %v9916_v10 }
 0x9f0   : > { %v10566_v45 = vpop.eup %10565  ;;  %9434 = vmatmul.msk.f32.gmra.mxu1 %vm890_vm0, %v3802_v22  ;;  %v9917_v22 = vunpack.i.l.bf16 %v9916_v10  ;;  %v16426_v10 = vld [vmem:[#allocation76_spill] sm:$0xff] }
 0x9f1   : > { %v3758_v29 = vmul.f32 %v10566_v45, %v3718_v12  ;;  %9440 = vmatmul.msk.f32.gmra.mxu0 %vm890_vm0, %v3808_v59  ;;  %v16420_v59 = vld [vmem:[#allocation71_spill] sm:$0xff] }
 0x9f3   : > { %v3774_v32 = vsub.f32 2.0, %v3758_v29  ;;  %v16422_v29 = vld [vmem:[#allocation106_spill] sm:$0xff] }
 0x9f5   : > { %v3790_v7 = vmul.f32 %v10566_v45, %v3774_v32  ;;  %v9926_v32 = vpop.permute.xlu0 %9925 }
 0x9f7   : > { %v3806_v28 = vmul.f32 %v13374_v19, %v3790_v7  ;;  %v9902_v19 = vunpack.i.l.bf16 %v13244_v2  ;;  %v16414_v2 = vld [vmem:[#allocation34_spill] sm:$0xff]  ;;  %v9927_v7 = vunpack.i.l.bf16 %v9926_v32 }
 0x9f9   : > { %9438 = vmatmul.msk.f32.gmra.mxu3 %vm890_vm0, %v3806_v28  ;;  %9453 = vmatmul.msk.f32.vlgmr.msra.gmra.mxu0 %vm890_vm0, %v13064_v27  ;;  %v9921_v27 = vpop.permute.xlu2 %9920 }
 0x9fa   : > { %4723 = vmatpush.msra.mxu0 %v9912_v55  ;;  %v9923_v11 = vunpack.i.h.bf16 %v9921_v27  ;;  %v9922_v45 = vunpack.i.l.bf16 %v9921_v27  ;;  %v16424_v55 = vld [vmem:[#allocation120_spill] sm:$0xff] }
 0x9fb   : > { %v13491_v62 = vpop.f32.mrf.mxu2 }
 0x9fc   : > { %4724 = vmatpush.msra.mxu0 %v9913_v46  ;;  %16409 = vst [vmem:[#allocation137_spill] sm:$0xff] %v13491_v62 }
 0xa01   : > { %9449 = vmatmul.msk.f32.vlgmr.msrb.gmra.mxu3 %vm890_vm0, %v13026_v4  ;;  %9454 = vmatmul.msk.f32.gmra.mxu0 %vm890_vm0, %v13228_v44  ;;  %v16412_v4 = vld [vmem:[#allocation129_spill] sm:$0xff]  ;;  %v16413_v44 = vld [vmem:[#allocation112_spill] sm:$0xff]  ;;  %v13516_v60 = vpop.permute.xlu1 %5106  ;;  %v13522_v53 = vpop.permute.xlu2 %5104 }
 0xa02   : > { %4688 = vmatpush.msrb.mxu3 %v9897_v38  ;;  %v9907_v51 = vunpack.i.l.bf16 %v16412_v4  ;;  %v9908_v61 = vunpack.i.h.bf16 %v16412_v4 }
 0xa04   : > { %4689 = vmatpush.msrb.mxu3 %v9902_v19  ;;  %v13502_v41 = vpop.f32.mrf.mxu2 }
 0xa05   : > { %16411 = vst [vmem:[#allocation103_spill] sm:$0xff] %v13502_v41  ;;  %v16448_v41 = vld [vmem:[#allocation118_spill] sm:$0xff] }
 0xa09   : > { %9450 = vmatmul.msk.f32.gmra.mxu3 %vm890_vm0, %v13052_v33  ;;  %9469 = vmatmul.msk.f32.vlgmr.msrb.gmra.mxu0 %vm890_vm0, %v16410_v26 }
 0xa0a   : > { %4863 = vmatpush.msrb.mxu0 %v9918_v34 }
 0xa0c   : > { %4864 = vmatpush.msrb.mxu0 %v9923_v11  ;;  %v13510_v33 = vpop.f32.mrf.mxu2 }
 0xa0d   : > { %16415 = vst [vmem:[#allocation129_spill] sm:$0xff] %v13510_v33  ;;  %v13550_v46 = vpop.f32.mrf.mxu3 }
 0xa0e   : > { %16425 = vst [vmem:[#allocation69_spill] sm:$0xff] %v13550_v46 }
 0xa11   : > { %9465 = vmatmul.msk.f32.vlgmr.msra.gmra.mxu3 %vm890_vm0, %v16413_v44  ;;  %9470 = vmatmul.msk.f32.gmra.mxu0 %vm890_vm0, %v16414_v2 }
 0xa12   : > { %4828 = vmatpush.msra.mxu3 %v9907_v51 }
 0xa14   : > { %4829 = vmatpush.msra.mxu3 %v9908_v61 }
 0xa15   : > { %v13556_v19 = vpop.f32.mrf.mxu3 }
 0xa16   : > { %16428 = vst [vmem:[#allocation71_spill] sm:$0xff] %v13556_v19 }
 0xa19   : > { %9466 = vmatmul.msk.f32.gmra.mxu3 %vm890_vm0, %v16416_v49 }
 0xa1c   : > { %v13514_v0 = vpop.f32.mrf.mxu2 }
 0xa1d   : > { %16417 = vst [vmem:[#allocation112_spill] sm:$0xff] %v13514_v0  ;;  %v13560_v34 = vpop.f32.mrf.mxu3 }
 0xa1e   : > { %16430 = vst [vmem:[#allocation120_spill] sm:$0xff] %v13560_v34 }
 0xa24   : > { %v13518_v54 = vpop.f32.mrf.mxu2 }
 0xa25   : > { %v4403_v52 = vsel %vm890_vm0, %v13518_v54, -inf }
 0xa26   : > { %4404 = vmax.xlane.f32.xlu2 %v4403_v52 }
 0xa2c   : > { %v13524_v3 = vpop.f32.mrf.mxu2  ;;  %v3727_v50 = vpop.xlane.xlu1 %3726 }
 0xa2d   : > { %10567 = vrcp.f32 %v3727_v50  ;;  %v4406_v25 = vsel %vm890_vm0, %v13524_v3, -inf }
 0xa2e   : > { %4407 = vmax.xlane.f32.xlu0 %v4406_v25 }
 0xa31   : > { %v3730_v24 = vpop.xlane.xlu2 %3729 }
 0xa32   : > { %10569 = vrcp.f32 %v3730_v24 }
 0xa33   : > { %v10568_v39 = vpop.eup %10567 }
 0xa34   : > { %v3761_v21 = vmul.f32 %v10568_v39, %v3727_v50  ;;  %v13528_v42 = vpop.f32.mrf.mxu2 }
 0xa35   : > { %v4427_v43 = vsel %vm890_vm0, %v13528_v42, -inf }
 0xa36   : > { %v3777_v23 = vsub.f32 2.0, %v3761_v21  ;;  %4428 = vmax.xlane.f32.xlu2 %v4427_v43  ;;  %v13585_v21 = vpop.permute.xlu0 %4987 }
 0xa38   : > { %v10570_v9 = vpop.eup %10569  ;;  %v3793_v37 = vmul.f32 %v10568_v39, %v3777_v23 }
 0xa39   : > { %v3762_v6 = vmul.f32 %v10570_v9, %v3730_v24  ;;  %v13566_v4 = vpop.permute.xlu2 %4991 }
 0xa3a   : > { %v3809_v57 = vmul.f32 %v13450_v48, %v3793_v37  ;;  %v13542_v48 = vpop.f32.mrf.mxu0 }
 0xa3b   : > { %v3778_v12 = vsub.f32 2.0, %v3762_v6  ;;  %16421 = vst [vmem:[#allocation34_spill] sm:$0xff] %v13542_v48 }
 0xa3c   : > { %9441 = vmatmul.msk.f32.vlgmr.msra.gmra.mxu1 %vm890_vm0, %v3809_v57  ;;  %v13580_v50 = vpop.f32.mrf.mxu2 }
 0xa3d   : > { %9471 = vmatpush.xpose.msk.msra.mxu1 %vm890_vm0, %v16418_v56  ;;  %v3794_v15 = vmul.f32 %v10570_v9, %v3778_v12  ;;  %v4430_v24 = vsel %vm890_vm0, %v13580_v50, -inf }
 0xa3e   : > { %v13597_v57 = vpop.permute.xlu0 %5147 }
 0xa3f   : > { %v3810_v31 = vmul.f32 %v13456_v35, %v3794_v15  ;;  %v9928_v35 = vunpack.i.h.bf16 %v9926_v32 }
 0xa41   : > { %9472 = vmatpush.xpose.msk.msra.mxu1 %vm890_vm0, %v16419_v63  ;;  %v13576_v49 = vpop.permute.xlu2 %4989 }
 0xa42   : > { %v13546_v28 = vpop.f32.mrf.mxu0 }
 0xa43   : > { %16423 = vst [vmem:[#allocation123_spill] sm:$0xff] %v13546_v28 }
 0xa44   : > { %9442 = vmatmul.msk.f32.gmra.mxu1 %vm890_vm0, %v3810_v31 }
 0xa49   : > { %v13587_v43 = vpop.permute.xlu2 %4985 }
 0xa4a   : > { %v13554_v38 = vpop.f32.mrf.mxu0 }
 0xa4b   : > { %16427 = vst [vmem:[#allocation108_spill] sm:$0xff] %v13554_v38 }
 0xa4c   : > { %9457 = vmatmul.msk.f32.vlgmr.msrb.gmra.mxu1 %vm890_vm0, %v16420_v59 }
 0xa4d   : > { %4758 = vmatpush.msrb.mxu1 %v9917_v22 }
 0xa4f   : > { %4759 = vmatpush.msrb.mxu1 %v9922_v45 }
 0xa51   : > { %v13599_v12 = vpop.permute.xlu2 %5030 }
 0xa54   : > { %9458 = vmatmul.msk.f32.gmra.mxu1 %vm890_vm0, %v16422_v29 }
 0xa5c   : > { %9473 = vmatmul.msk.f32.vlgmr.msra.gmra.mxu1 %vm890_vm0, %v16424_v55 }
 0xa5d   : > { %4898 = vmatpush.msra.mxu1 %v9927_v7 }
 0xa5f   : > { %4899 = vmatpush.msra.mxu1 %v9928_v35 }
 0xa64   : > { %9474 = vmatmul.msk.f32.gmra.mxu1 %vm890_vm0, %v16426_v10  ;;  %v16433_v10 = vld [vmem:[#allocation51_spill] sm:$0xff] }
 0xa65   : > { %v13606_v45 = vpop.f32.mrf.mxu1 }
 0xa66   : > { %16432 = vst [vmem:[#allocation138_spill] sm:$0xff] %v13606_v45 }
 0xa6e   : > { %v13558_v27 = vpop.f32.mrf.mxu0 }
 0xa6f   : > { %16429 = vst [vmem:[#allocation106_spill] sm:$0xff] %v13558_v27 }
 0xa76   : > { %v13562_v26 = vpop.f32.mrf.mxu0 }
 0xa77   : > { %v4415_v11 = vsel %vm890_vm0, %v13562_v26, -inf }
 0xa78   : > { %4416 = vmax.xlane.f32.xlu1 %v4415_v11  ;;  %v13615_v11 = vpop.f32.mrf.mxu1 }
 0xa79   : > { %16434 = vst [vmem:[#allocation51_spill] sm:$0xff] %v13615_v11 }
 0xa7c   : > { %v13568_v51 = vpop.f32.mrf.mxu3 }
 0xa7d   : > { %16431 = vst [vmem:[#allocation76_spill] sm:$0xff] %v13568_v51 }
 0xa7e   : > { %v13570_v44 = vpop.f32.mrf.mxu0 }
 0xa7f   : > { %v4418_v2 = vsel %vm890_vm0, %v13570_v44, -inf }
 0xa80   : > { %4419 = vmax.xlane.f32.xlu0 %v4418_v2 }
 0xa84   : > { %v13574_v61 = vpop.f32.mrf.mxu3 }
 0xa85   : > { %v4409_v52 = vsel %vm890_vm0, %v13574_v61, -inf }
 0xa86   : > { %4410 = vmax.xlane.f32.xlu1 %v4409_v52  ;;  %v13589_v23 = vpop.f32.mrf.mxu0 }
 0xa87   : > { %v4439_v37 = vsel %vm890_vm0, %v13589_v23, -inf }
 0xa8c   : > { %v4166_v25 = vpop.f32.mrf.mxu3 }
 0xa8d   : > { %v4412_v39 = vsel %vm890_vm0, %v4166_v25, -inf }
 0xa8e   : > { %4431 = vmax.xlane.f32.xlu1 %v4430_v24  ;;  %4413 = vmax.xlane.f32.xlu0 %v4412_v39  ;;  %v13601_v56 = vpop.f32.mrf.mxu0 }
 0xa8f   : > { %v4442_v15 = vsel %vm890_vm0, %v13601_v56, -inf }
 0xa94   : > { %v13591_v9 = vpop.f32.mrf.mxu3 }
 0xa95   : > { %v4433_v6 = vsel %vm890_vm0, %v13591_v9, -inf }
 0xa96   : > { %4440 = vmax.xlane.f32.xlu1 %v4439_v37  ;;  %4434 = vmax.xlane.f32.xlu2 %v4433_v6 }
 0xa99   : > { %v4405_v63 = vpop.xlane.xlu2 %4404 }
 0xa9a   : > { %v4451_v24 = vsub.f32 %v13518_v54, %v4405_v63 }
 0xa9c   : > { %v4467_v39 = vmul.f32 1.442695, %v4451_v24  ;;  %v13652_v38 = vpop.f32.mrf.mxu3 }
 0xa9e   : > { %4443 = vmax.xlane.f32.xlu1 %v4442_v15 }
 0xaa1   : > { %v4408_v31 = vpop.xlane.xlu0 %4407 }
 0xaa2   : > { %v4452_v22 = vsub.f32 %v13524_v3, %v4408_v31 }
 0xaa4   : > { %v4469_v59 = vmul.f32 1.442695, %v4452_v22  ;;  %v13634_v22 = vpop.permute.xlu1 %5102 }
 0xaa6   : > { %10571 = vpow2.f32 %v4469_v59  ;;  %v16437_v59 = vld [vmem:[#allocation31_spill] sm:$0xff] }
 0xaa9   : > { %v4429_v29 = vpop.xlane.xlu2 %4428 }
 0xaaa   : > { %v4459_v32 = vsub.f32 %v13528_v42, %v4429_v29 }
 0xaac   : > { %v13609_v7 = vpop.eup %10571  ;;  %v4483_v55 = vmul.f32 1.442695, %v4459_v32  ;;  %v13638_v54 = vpop.permute.xlu1 %5028 }
 0xaad   : > { %v4502_v35 = vsel %vm890_vm0, %v13609_v7, 0.0 }
 0xaae   : > { %10573 = vpow2.f32 %v4483_v55  ;;  %4503 = vadd.xlane.f32.xlu1 %v4502_v35  ;;  %5145 = vrot.lane.b32.xlu2 %v16433_v10, %s11148_s3 }
 0xaaf   : > { %10575 = vpow2.f32 %v4467_v39 }
 0xab4   : > { %v13617_v3 = vpop.eup %10573 }
 0xab5   : > { %v4523_v2 = vsel %vm890_vm0, %v13617_v3, 0.0  ;;  %v13630_v15 = vpop.eup %10575 }
 0xab6   : > { %4524 = vadd.xlane.f32.xlu1 %v4523_v2  ;;  %v4499_v31 = vsel %vm890_vm0, %v13630_v15, 0.0 }
 0xab9   : > { %v13621_v42 = vpop.f32.mrf.mxu1 }
 0xaba   : > { %16435 = vst [vmem:[#allocation139_spill] sm:$0xff] %v13621_v42 }
 0xac1   : > { %v13623_v52 = vpop.f32.mrf.mxu1 }
 0xac2   : > { %16436 = vst [vmem:[#allocation140_spill] sm:$0xff] %v13623_v52 }
 0xac9   : > { %v13626_v37 = vpop.f32.mrf.mxu1 }
 0xaca   : > { %v4421_v6 = vsel %vm890_vm0, %v13626_v37, -inf }
 0xacb   : > { %4422 = vmax.xlane.f32.xlu0 %v4421_v6 }
 0xad1   : > { %v13645_v42 = vpop.f32.mrf.mxu1 }
 0xad7   : > { %4500 = vadd.xlane.f32.xlu2 %v4499_v31 }
 0xadf   : > { %5024 = vrot.lane.b32.xlu0 %v16437_v59, %s11148_s3 }
 0xaeb   : > { %v4417_v63 = vpop.xlane.xlu1 %4416 }
 0xaec   : > { %v4455_v29 = vsub.f32 %v13562_v26, %v4417_v63  ;;  %v4424_v26 = vsel %vm890_vm0, %v13645_v42, -inf }
 0xaee   : > { %v4475_v32 = vmul.f32 1.442695, %v4455_v29 }
 0xaf0   : > { %10577 = vpow2.f32 %v4475_v32 }
 0xaf3   : > { %v4420_v2 = vpop.xlane.xlu0 %4419 }
 0xaf6   : > { %v13641_v55 = vpop.eup %10577 }
 0xaf7   : > { %v4511_v35 = vsel %vm890_vm0, %v13641_v55, 0.0 }
 0xaf8   : > { %4512 = vadd.xlane.f32.xlu2 %v4511_v35 }
 0xaf9   : > { %v4411_v24 = vpop.xlane.xlu1 %4410 }
 0xb01   : > { %v4414_v39 = vpop.xlane.xlu0 %4413  ;;  %v4432_v6 = vpop.xlane.xlu1 %4431 }
 0xb02   : > { %v4454_v31 = vsub.f32 %v4166_v25, %v4414_v39 }
 0xb04   : > { %v4473_v52 = vmul.f32 1.442695, %v4454_v31  ;;  %v13659_v31 = vpop.f32.mrf.mxu1 }
 0xb06   : > { %10579 = vpow2.f32 %v4473_v52  ;;  %v4436_v52 = vsel %vm890_vm0, %v13652_v38, -inf }
 0xb09   : > { %4425 = vmax.xlane.f32.xlu0 %v4424_v26  ;;  %v4441_v63 = vpop.xlane.xlu1 %4440  ;;  %v4435_v29 = vpop.xlane.xlu2 %4434 }
 0xb0a   : > { %v4463_v32 = vsub.f32 %v13589_v23, %v4441_v63  ;;  %v4461_v51 = vsub.f32 %v13591_v9, %v4435_v29  ;;  %v4453_v9 = vsub.f32 %v13574_v61, %v4411_v24  ;;  %v4445_v63 = vsel %vm890_vm0, %v13659_v31, -inf }
 0xb0c   : > { %v13650_v27 = vpop.eup %10579  ;;  %v4491_v35 = vmul.f32 1.442695, %v4463_v32  ;;  %v4487_v39 = vmul.f32 1.442695, %v4461_v51  ;;  %v4471_v32 = vmul.f32 1.442695, %v4453_v9  ;;  %v13670_v51 = vpop.f32.mrf.mxu1 }
 0xb0d   : > { %v4508_v25 = vsel %vm890_vm0, %v13650_v27, 0.0  ;;  %v4448_v61 = vsel %vm890_vm0, %v13670_v51, -inf }
 0xb0e   : > { %4509 = vadd.xlane.f32.xlu2 %v4508_v25  ;;  %10581 = vpow2.f32 %v4491_v35  ;;  %v4456_v25 = vsub.f32 %v13570_v44, %v4420_v2 }
 0xb0f   : > { %10583 = vpow2.f32 %v4487_v39  ;;  %v4460_v39 = vsub.f32 %v13580_v50, %v4432_v6 }
 0xb10   : > { %10585 = vpow2.f32 %v4471_v32  ;;  %v4477_v24 = vmul.f32 1.442695, %v4456_v25  ;;  %v16438_v32 = vld [vmem:[#allocation55_spill] sm:$0xff] }
 0xb11   : > { %4437 = vmax.xlane.f32.xlu0 %v4436_v52  ;;  %v4485_v9 = vmul.f32 1.442695, %v4460_v39  ;;  %v4444_v6 = vpop.xlane.xlu1 %4443  ;;  %v13694_v39 = vpop.permute.xlu2 %5145 }
 0xb12   : > { %10587 = vpow2.f32 %v4477_v24 }
 0xb13   : > { %10589 = vpow2.f32 %v4485_v9 }
 0xb14   : > { %v13661_v23 = vpop.eup %10581 }
 0xb15   : > { %v4535_v26 = vsel %vm890_vm0, %v13661_v23, 0.0  ;;  %v13668_v29 = vpop.eup %10583 }
 0xb16   : > { %4536 = vadd.xlane.f32.xlu1 %v4535_v26  ;;  %v4529_v35 = vsel %vm890_vm0, %v13668_v29, 0.0  ;;  %v13677_v52 = vpop.eup %10585 }
 0xb17   : > { %v4505_v26 = vsel %vm890_vm0, %v13677_v52, 0.0 }
 0xb19   : > { %4446 = vmax.xlane.f32.xlu0 %v4445_v63  ;;  %v13682_v63 = vpop.eup %10587 }
 0xb1a   : > { %v4514_v44 = vsel %vm890_vm0, %v13682_v63, 0.0  ;;  %v13686_v2 = vpop.eup %10589 }
 0xb1b   : > { %v4526_v50 = vsel %vm890_vm0, %v13686_v2, 0.0 }
 0xb1e   : > { %4530 = vadd.xlane.f32.xlu1 %v4529_v35 }
 0xb21   : > { %4449 = vmax.xlane.f32.xlu0 %v4448_v61  ;;  %v4464_v61 = vsub.f32 %v13601_v56, %v4444_v6  ;;  %v4504_v9 = vpop.xlane.xlu1 %4503 }
 0xb29   : > { %4506 = vadd.xlane.f32.xlu0 %v4505_v26  ;;  %v4493_v26 = vmul.f32 1.442695, %v4464_v61  ;;  %v4525_v56 = vpop.xlane.xlu1 %4524 }
 0xb31   : > { %4515 = vadd.xlane.f32.xlu0 %v4514_v44 }
 0xb37   : > { %5184 = vrot.lane.b32.xlu1 %v16438_v32, %s11148_s3 }
 0xb39   : > { %4527 = vadd.xlane.f32.xlu0 %v4526_v50 }
 0xb3e   : > { %v4423_v35 = vpop.xlane.xlu0 %4422 }
 0xb3f   : > { %v4457_v25 = vsub.f32 %v13626_v37, %v4423_v35 }
 0xb41   : > { %v4479_v24 = vmul.f32 1.442695, %v4457_v25 }
 0xb43   : > { %10591 = vpow2.f32 %v4479_v24 }
 0xb44   : > { %10593 = vpow2.f32 %v4493_v26 }
 0xb45   : > { %10595 = vrcp.f32 %v4504_v9 }
 0xb49   : > { %v13696_v44 = vpop.eup %10591 }
 0xb4a   : > { %v4501_v34 = vpop.xlane.xlu2 %4500  ;;  %v4517_v50 = vsel %vm890_vm0, %v13696_v44, 0.0  ;;  %v13700_v0 = vpop.eup %10593 }
 0xb4b   : > { %10597 = vrcp.f32 %v4501_v34  ;;  %4518 = vadd.xlane.f32.xlu2 %v4517_v50  ;;  %v10596_v37 = vpop.eup %10595  ;;  %v4538_v25 = vsel %vm890_vm0, %v13700_v0, 0.0  ;;  %v16439_v50 = vld [vmem:[#allocation125_spill] sm:$0xff] }
 0xb4c   : > { %10599 = vrcp.f32 %v4525_v56  ;;  %v4564_v61 = vmul.f32 %v10596_v37, %v4504_v9 }
 0xb4e   : > { %v4580_v33 = vsub.f32 2.0, %v4564_v61 }
 0xb50   : > { %v4596_v28 = vmul.f32 %v10596_v37, %v4580_v33  ;;  %v16442_v33 = vld [vmem:[#allocation133_spill] sm:$0xff] }
 0xb51   : > { %v10598_v6 = vpop.eup %10597 }
 0xb52   : > { %v4563_v35 = vmul.f32 %v10598_v6, %v4501_v34  ;;  %v10600_v45 = vpop.eup %10599  ;;  %v16440_v34 = vld [vmem:[#allocation114_spill] sm:$0xff] }
 0xb53   : > { %4539 = vadd.xlane.f32.xlu2 %v4538_v25  ;;  %v4571_v48 = vmul.f32 %v10600_v45, %v4525_v56  ;;  %v4612_v25 = vmul.f32 %v13609_v7, %v4596_v28 }
 0xb54   : > { %v4579_v24 = vsub.f32 2.0, %v4563_v35 }
 0xb55   : > { %v4587_v19 = vsub.f32 2.0, %v4571_v48  ;;  %v13718_v48 = vpop.permute.xlu0 %5024 }
 0xb56   : > { %v4595_v26 = vmul.f32 %v10598_v6, %v4579_v24 }
 0xb57   : > { %v4603_v9 = vmul.f32 %v10600_v45, %v4587_v19 }
 0xb58   : > { %v4611_v11 = vmul.f32 %v13630_v15, %v4595_v26  ;;  %v16441_v15 = vld [vmem:[#allocation104_spill] sm:$0xff] }
 0xb59   : > { %v4619_v6 = vmul.f32 %v13617_v3, %v4603_v9 }
 0xb5a   : > { %9475 = vmatmul.msk.f32.vlgmr.msra.gmra.mxu2 %vm890_vm0, %v4611_v11 }
 0xb5b   : > { %9491 = vmatpush.xpose.msk.msra.mxu2 %vm890_vm0, %v16439_v50 }
 0xb5f   : > { %9492 = vmatpush.xpose.msk.msra.mxu2 %vm890_vm0, %v16440_v34 }
 0xb62   : > { %9476 = vmatmul.msk.f32.gmra.mxu2 %vm890_vm0, %v4612_v25 }
 0xb6a   : > { %9483 = vmatmul.msk.f32.vlgmr.msrb.gmra.mxu2 %vm890_vm0, %v4619_v6 }
 0xb6b   : > { %9507 = vmatpush.xpose.msk.msrb.mxu2 %vm890_vm0, %v16441_v15  ;;  %v4513_v11 = vpop.xlane.xlu2 %4512 }
 0xb6c   : > { %10601 = vrcp.f32 %v4513_v11 }
 0xb6f   : > { %9508 = vmatpush.xpose.msk.msrb.mxu2 %vm890_vm0, %v16442_v33  ;;  %v16443_v33 = vld [vmem:[#allocation35_spill] sm:$0xff] }
 0xb72   : > { %v10602_v37 = vpop.eup %10601 }
 0xb73   : > { %v4567_v56 = vmul.f32 %v10602_v37, %v4513_v11 }
 0xb75   : > { %v4583_v28 = vsub.f32 2.0, %v4567_v56 }
 0xb77   : > { %v4599_v7 = vmul.f32 %v10602_v37, %v4583_v28 }
 0xb79   : > { %v4615_v19 = vmul.f32 %v13641_v55, %v4599_v7 }
 0xb7b   : > { %9479 = vmatmul.msk.f32.vlgmr.msra.gmra.mxu0 %vm890_vm0, %v4615_v19 }
 0xb7c   : > { %9499 = vmatpush.xpose.msk.msra.mxu0 %vm890_vm0, %v13566_v4  ;;  %v4426_v45 = vpop.xlane.xlu0 %4425 }
 0xb7d   : > { %v4458_v3 = vsub.f32 %v13645_v42, %v4426_v45  ;;  %v16444_v45 = vld [vmem:[#allocation60_spill] sm:$0xff] }
 0xb7f   : > { %v4481_v35 = vmul.f32 1.442695, %v4458_v3 }
 0xb80   : > { %9500 = vmatpush.xpose.msk.msra.mxu0 %vm890_vm0, %v13576_v49 }
 0xb81   : > { %10603 = vpow2.f32 %v4481_v35  ;;  %v4510_v11 = vpop.xlane.xlu2 %4509 }
 0xb84   : > { %v4438_v61 = vpop.xlane.xlu0 %4437 }
 0xb85   : > { %v4462_v24 = vsub.f32 %v13652_v38, %v4438_v61 }
 0xb87   : > { %v13728_v26 = vpop.eup %10603  ;;  %v4489_v50 = vmul.f32 1.442695, %v4462_v24  ;;  %v16445_v24 = vld [vmem:[#allocation54_spill] sm:$0xff] }
 0xb88   : > { %v4520_v55 = vsel %vm890_vm0, %v13728_v26, 0.0 }
 0xb89   : > { %10605 = vpow2.f32 %v4489_v50  ;;  %4521 = vadd.xlane.f32.xlu0 %v4520_v55  ;;  %v4537_v6 = vpop.xlane.xlu1 %4536 }
 0xb8c   : > { %v4447_v4 = vpop.xlane.xlu0 %4446 }
 0xb8d   : > { %v4465_v34 = vsub.f32 %v13659_v31, %v4447_v4 }
 0xb8f   : > { %v13733_v42 = vpop.eup %10605  ;;  %v4495_v25 = vmul.f32 1.442695, %v4465_v34 }
 0xb90   : > { %v4532_v49 = vsel %vm890_vm0, %v13733_v42, 0.0 }
 0xb91   : > { %10607 = vpow2.f32 %v4495_v25  ;;  %4533 = vadd.xlane.f32.xlu2 %v4532_v49  ;;  %v4531_v37 = vpop.xlane.xlu1 %4530 }
 0xb92   : > { %10609 = vrcp.f32 %v4510_v11 }
 0xb94   : > { %v13737_v38 = vpop.xlane.xlu0 %4449 }
 0xb97   : > { %v13739_v9 = vpop.eup %10607 }
 0xb98   : > { %v4541_v15 = vsel %vm890_vm0, %v13739_v9, 0.0  ;;  %v10610_v56 = vpop.eup %10609 }
 0xb99   : > { %4542 = vadd.xlane.f32.xlu1 %v4541_v15  ;;  %v4566_v3 = vmul.f32 %v10610_v56, %v4510_v11  ;;  %v16447_v11 = vld [vmem:[#allocation66_spill] sm:$0xff] }
 0xb9b   : > { %v4582_v55 = vsub.f32 2.0, %v4566_v3 }
 0xb9c   : > { %v4507_v31 = vpop.xlane.xlu0 %4506 }
 0xb9d   : > { %10611 = vrcp.f32 %v4507_v31  ;;  %5026 = vrot.lane.b32.xlu0 %v16443_v33, %s11148_s3 }
 0xb9e   : > { %10613 = vrcp.f32 %v4531_v37 }
 0xba3   : > { %v10612_v28 = vpop.eup %10611 }
 0xba4   : > { %v4565_v7 = vmul.f32 %v10612_v28, %v4507_v31  ;;  %v4516_v19 = vpop.xlane.xlu0 %4515  ;;  %v10614_v50 = vpop.eup %10613  ;;  %v16446_v31 = vld [vmem:[#allocation127_spill] sm:$0xff] }
 0xba5   : > { %10615 = vrcp.f32 %v4516_v19  ;;  %5186 = vrot.lane.b32.xlu0 %v16444_v45, %s11148_s3 }
 0xba6   : > { %10617 = vrcp.f32 %v4537_v6  ;;  %v4581_v35 = vsub.f32 2.0, %v4565_v7  ;;  %v4573_v7 = vmul.f32 %v10614_v50, %v4531_v37 }
 0xba8   : > { %v4597_v61 = vmul.f32 %v10612_v28, %v4581_v35  ;;  %v4598_v28 = vmul.f32 %v10610_v56, %v4582_v55 }
 0xba9   : > { %5141 = vrot.lane.b32.xlu2 %v16445_v24, %s11148_s3 }
 0xbaa   : > { %v4613_v4 = vmul.f32 %v13677_v52, %v4597_v61  ;;  %v16449_v52 = vld [vmem:[#allocation59_spill] sm:$0xff] }
 0xbab   : > { %v10616_v34 = vpop.eup %10615  ;;  %v16450_v61 = vld [vmem:[#allocation47_spill] sm:$0xff] }
 0xbac   : > { %v10618_v25 = vpop.eup %10617  ;;  %v4568_v49 = vmul.f32 %v10616_v34, %v4516_v19  ;;  %9477 = vmatmul.msk.f32.vlgmr.msrb.gmra.mxu3 %vm890_vm0, %v4613_v4  ;;  %v4528_v15 = vpop.xlane.xlu0 %4527  ;;  %v4589_v19 = vsub.f32 2.0, %v4573_v7  ;;  %v4614_v4 = vmul.f32 %v13650_v27, %v4598_v28  ;;  %v16452_v27 = vld [vmem:[#allocation20_spill] sm:$0xff] }
 0xbad   : > { %9495 = vmatpush.xpose.msk.msrb.mxu3 %vm890_vm0, %v16446_v31  ;;  %10619 = vrcp.f32 %v4528_v15  ;;  %5182 = vrot.lane.b32.xlu0 %v16447_v11, %s11148_s3  ;;  %v4575_v46 = vmul.f32 %v10618_v25, %v4537_v6  ;;  %v16456_v28 = vld [vmem:[#allocation52_spill] sm:$0xff] }
 0xbae   : > { %v4584_v35 = vsub.f32 2.0, %v4568_v49  ;;  %v4605_v6 = vmul.f32 %v10614_v50, %v4589_v19  ;;  %v16451_v49 = vld [vmem:[#allocation61_spill] sm:$0xff]  ;;  %v16458_v19 = vld [vmem:[#allocation107_spill] sm:$0xff] }
 0xbaf   : > { %v4591_v56 = vsub.f32 2.0, %v4575_v46 }
 0xbb0   : > { %v4600_v3 = vmul.f32 %v10616_v34, %v4584_v35  ;;  %v4621_v7 = vmul.f32 %v13668_v29, %v4605_v6  ;;  %v16453_v29 = vld [vmem:[#allocation65_spill] sm:$0xff]  ;;  %v16461_v6 = vld [vmem:[#allocation135_spill] sm:$0xff] }
 0xbb1   : > { %9496 = vmatpush.xpose.msk.msrb.mxu3 %vm890_vm0, %v16448_v41  ;;  %5143 = vrot.lane.b32.xlu2 %v16449_v52, %s11148_s3  ;;  %v4607_v55 = vmul.f32 %v10618_v25, %v4591_v56 }
 0xbb2   : > { %9935 = vrot.lane.b32.xlu1 %v16450_v61, %s11148_s3  ;;  %v4616_v31 = vmul.f32 %v13682_v63, %v4600_v3 }
 0xbb3   : > { %v10620_v62 = vpop.eup %10619  ;;  %v4623_v63 = vmul.f32 %v13661_v23, %v4607_v55  ;;  %v16454_v23 = vld [vmem:[#allocation25_spill] sm:$0xff]  ;;  %v16462_v55 = vld [vmem:[#allocation22_spill] sm:$0xff] }
 0xbb4   : > { %v4572_v37 = vmul.f32 %v10620_v62, %v4528_v15  ;;  %9478 = vmatmul.msk.f32.gmra.mxu3 %vm890_vm0, %v4614_v4  ;;  %9480 = vmatmul.msk.f32.gmra.mxu0 %vm890_vm0, %v4616_v31  ;;  %v16459_v31 = vld [vmem:[#allocation19_spill] sm:$0xff] }
 0xbb6   : > { %v4588_v41 = vsub.f32 2.0, %v4572_v37  ;;  %v16460_v37 = vld [vmem:[#allocation42_spill] sm:$0xff] }
 0xbb8   : > { %v4604_v34 = vmul.f32 %v10620_v62, %v4588_v41 }
 0xbb9   : > { %5180 = vrot.lane.b32.xlu2 %v16451_v49, %s11148_s3 }
 0xbba   : > { %5727 = vrot.lane.b32.xlu1 %v16452_v27, %s11149_s12  ;;  %v4620_v46 = vmul.f32 %v13686_v2, %v4604_v34  ;;  %v16455_v2 = vld [vmem:[#allocation116_spill] sm:$0xff] }
 0xbbb   : > { %v16463_v34 = vld [vmem:[#allocation136_spill] sm:$0xff] }
 0xbbc   : > { %9484 = vmatmul.msk.f32.gmra.mxu2 %vm890_vm0, %v4620_v46  ;;  %9485 = vmatmul.msk.f32.vlgmr.msra.gmra.mxu3 %vm890_vm0, %v4621_v7  ;;  %v16466_v7 = vld [vmem:[#allocation23_spill] sm:$0xff]  ;;  %v16468_v46 = vld [vmem:[#allocation21_spill] sm:$0xff] }
 0xbbd   : > { %9487 = vmatmul.msk.f32.vlgmr.msrb.gmra.mxu0 %vm890_vm0, %v4623_v63  ;;  %9511 = vmatpush.xpose.msk.msra.mxu3 %vm890_vm0, %v13460_v40  ;;  %v16470_v63 = vld [vmem:[#allocation24_spill] sm:$0xff] }
 0xbbe   : > { %9515 = vmatpush.xpose.msk.msrb.mxu0 %vm890_vm0, %v13597_v57  ;;  %v4519_v62 = vpop.xlane.xlu2 %4518  ;;  %v4466_v57 = vsub.f32 %v13670_v51, %v13737_v38 }
 0xbbf   : > { %10621 = vrcp.f32 %v4519_v62 }
 0xbc0   : > { %v4497_v15 = vmul.f32 1.442695, %v4466_v57  ;;  %v5185_v57 = vpop.permute.xlu1 %5184 }
 0xbc1   : > { %9512 = vmatpush.xpose.msk.msra.mxu3 %vm890_vm0, %v13516_v60  ;;  %9940 = vrot.lane.b32.xlu2 %v16453_v29, %s11148_s3 }
 0xbc2   : > { %9516 = vmatpush.xpose.msk.msrb.mxu0 %vm890_vm0, %v13694_v39  ;;  %5766 = vrot.lane.b32.xlu1 %v16454_v23, %s11149_s12  ;;  %v16457_v39 = vld [vmem:[#allocation36_spill] sm:$0xff] }
 0xbc4   : > { %9493 = vmatmul.msk.f32.vlgmr.msra.gmra.mxu2 %vm890_vm0, %v16455_v2 }
 0xbc5   : > { %v10622_v40 = vpop.eup %10621 }
 0xbc6   : > { %v4569_v50 = vmul.f32 %v10622_v40, %v4519_v62  ;;  %v4540_v25 = vpop.xlane.xlu2 %4539 }
 0xbc7   : > { %10623 = vrcp.f32 %v4540_v25 }
 0xbc8   : > { %v4585_v60 = vsub.f32 2.0, %v4569_v50  ;;  %10625 = vpow2.f32 %v4497_v15 }
 0xbc9   : > { %9945 = vrot.lane.b32.xlu2 %v16456_v28, %s11148_s3 }
 0xbca   : > { %v4601_v35 = vmul.f32 %v10622_v40, %v4585_v60  ;;  %5883 = vrot.lane.b32.xlu1 %v16457_v39, %s11149_s12  ;;  %v16471_v40 = vld [vmem:[#allocation29_spill] sm:$0xff] }
 0xbcc   : > { %v4617_v3 = vmul.f32 %v13696_v44, %v4601_v35  ;;  %9494 = vmatmul.msk.f32.gmra.mxu2 %vm890_vm0, %v16458_v19  ;;  %v16472_v19 = vld [vmem:[#allocation48_spill] sm:$0xff] }
 0xbcd   : > { %v10624_v4 = vpop.eup %10623 }
 0xbce   : > { %v4576_v51 = vmul.f32 %v10624_v4, %v4540_v25  ;;  %9481 = vmatmul.msk.f32.vlgmr.msrb.gmra.mxu1 %vm890_vm0, %v4617_v3  ;;  %v13805_v44 = vpop.eup %10625 }
 0xbcf   : > { %9503 = vmatpush.xpose.msk.msrb.mxu1 %vm890_vm0, %v13599_v12  ;;  %v4544_v12 = vsel %vm890_vm0, %v13805_v44, 0.0 }
 0xbd0   : > { %v4592_v38 = vsub.f32 2.0, %v4576_v51 }
 0xbd1   : > { %5723 = vrot.lane.b32.xlu2 %v16459_v31, %s11149_s12 }
 0xbd2   : > { %v4608_v56 = vmul.f32 %v10624_v4, %v4592_v38  ;;  %5879 = vrot.lane.b32.xlu1 %v16460_v37, %s11149_s12 }
 0xbd3   : > { %9504 = vmatpush.xpose.msk.msrb.mxu1 %vm890_vm0, %v13638_v54  ;;  %v16465_v54 = vld [vmem:[#allocation40_spill] sm:$0xff] }
 0xbd4   : > { %9509 = vmatmul.msk.f32.vlgmr.msrb.gmra.mxu2 %vm890_vm0, %v16461_v6  ;;  %v4624_v41 = vmul.f32 %v13700_v0, %v4608_v56  ;;  %v16464_v0 = vld [vmem:[#allocation41_spill] sm:$0xff] }
 0xbd6   : > { %9488 = vmatmul.msk.f32.gmra.mxu0 %vm890_vm0, %v4624_v41 }
 0xbd7   : > { %4545 = vadd.xlane.f32.xlu0 %v4544_v12 }
 0xbd9   : > { %5725 = vrot.lane.b32.xlu2 %v16462_v55, %s11149_s12 }
 0xbda   : > { %5918 = vrot.lane.b32.xlu1 %v16404_v18, %s11149_s12 }
 0xbdc   : > { %9510 = vmatmul.msk.f32.gmra.mxu2 %vm890_vm0, %v16463_v34 }
 0xbde   : > { %9501 = vmatmul.msk.f32.vlgmr.msra.gmra.mxu0 %vm890_vm0, %v13587_v43  ;;  %v16467_v43 = vld [vmem:[#allocation26_spill] sm:$0xff] }
 0xbe1   : > { %9950 = vrot.lane.b32.xlu2 %v16464_v0, %s11148_s3 }
 0xbe2   : > { %5807 = vrot.lane.b32.xlu1 %v16405_v47, %s11149_s12 }
 0xbe6   : > { %9502 = vmatmul.msk.f32.gmra.mxu0 %vm890_vm0, %v13585_v21  ;;  %v16469_v21 = vld [vmem:[#allocation39_spill] sm:$0xff] }
 0xbe9   : > { %5885 = vrot.lane.b32.xlu2 %v16465_v54, %s11149_s12 }
 0xbea   : > { %9965 = vrot.lane.b32.xlu1 %v16330_v5, %s11148_s3 }
 0xbeb   : > { %9930 = vrot.lane.b32.xlu0 %v16466_v7, %s11148_s3 }
 0xbf1   : > { %5762 = vrot.lane.b32.xlu2 %v16467_v43, %s11149_s12 }
 0xbf2   : > { %5805 = vrot.lane.b32.xlu1 %v16406_v14, %s11149_s12 }
 0xbf3   : > { %5729 = vrot.lane.b32.xlu0 %v16468_v46, %s11149_s12 }
 0xbf9   : > { %5881 = vrot.lane.b32.xlu2 %v16469_v21, %s11149_s12 }
 0xbfa   : > { %5803 = vrot.lane.b32.xlu1 %v16401_v30, %s11149_s12 }
 0xbfb   : > { %5768 = vrot.lane.b32.xlu0 %v16470_v63, %s11149_s12 }
 0xbfc   : > { %v4522_v62 = vpop.xlane.xlu0 %4521 }
 0xbfd   : > { %10627 = vrcp.f32 %v4522_v62 }
 0xc01   : > { %9955 = vrot.lane.b32.xlu2 %v16400_v1, %s11148_s3 }
 0xc03   : > { %v10628_v2 = vpop.eup %10627  ;;  %5764 = vrot.lane.b32.xlu0 %v16471_v40, %s11149_s12 }
 0xc04   : > { %v4570_v50 = vmul.f32 %v10628_v2, %v4522_v62  ;;  %v4534_v25 = vpop.xlane.xlu2 %4533 }
 0xc05   : > { %10629 = vrcp.f32 %v4534_v25 }
 0xc06   : > { %v4586_v60 = vsub.f32 2.0, %v4570_v50 }
 0xc08   : > { %v4602_v15 = vmul.f32 %v10628_v2, %v4586_v60 }
 0xc09   : > { %9960 = vrot.lane.b32.xlu2 %v16325_v17, %s11148_s3 }
 0xc0a   : > { %v4618_v35 = vmul.f32 %v13728_v26, %v4602_v15 }
 0xc0b   : > { %v10630_v3 = vpop.eup %10629  ;;  %5924 = vrot.lane.b32.xlu0 %v16472_v19, %s11149_s12 }
 0xc0c   : > { %v4574_v4 = vmul.f32 %v10630_v3, %v4534_v25  ;;  %9482 = vmatmul.msk.f32.gmra.mxu1 %vm890_vm0, %v4618_v35  ;;  %v5142_v51 = vpop.permute.xlu2 %5141  ;;  %v4543_v38 = vpop.xlane.xlu1 %4542 }
 0xc0d   : > { %10631 = vrcp.f32 %v4543_v38  ;;  %9517 = vmatmul.msk.f32.vlgmr.msrb.gmra.mxu0 %vm890_vm0, %v5142_v51  ;;  %v13877_v35 = vpop.f32.mrf.mxu2 }
 0xc0e   : > { %v4590_v56 = vsub.f32 2.0, %v4574_v4  ;;  %16474 = vst [vmem:[#allocation31_spill] sm:$0xff] %v13877_v35  ;;  %v16475_v4 = vld [vmem:[#allocation132_spill] sm:$0xff] }
 0xc0f   : > { %v13860_v41 = vpop.permute.xlu0 %5026 }
 0xc10   : > { %v4606_v6 = vmul.f32 %v10630_v3, %v4590_v56 }
 0xc11   : > { %5922 = vrot.lane.b32.xlu2 %v16402_v8, %s11149_s12 }
 0xc12   : > { %v4622_v26 = vmul.f32 %v13733_v42, %v4606_v6  ;;  %v16473_v42 = vld [vmem:[#allocation131_spill] sm:$0xff] }
 0xc13   : > { %v10632_v12 = vpop.eup %10631  ;;  %5920 = vrot.lane.b32.xlu0 %v16403_v58, %s11149_s12 }
 0xc14   : > { %v4577_v34 = vmul.f32 %v10632_v12, %v4543_v38  ;;  %v5144_v62 = vpop.permute.xlu2 %5143  ;;  %9486 = vmatmul.msk.f32.gmra.mxu3 %vm890_vm0, %v4622_v26 }
 0xc15   : > { %9518 = vmatmul.msk.f32.gmra.mxu0 %vm890_vm0, %v5144_v62  ;;  %v13886_v6 = vpop.f32.mrf.mxu2 }
 0xc16   : > { %v4593_v2 = vsub.f32 2.0, %v4577_v34  ;;  %16476 = vst [vmem:[#allocation55_spill] sm:$0xff] %v13886_v6 }
 0xc17   : > { %v5187_v60 = vpop.permute.xlu0 %5186 }
 0xc18   : > { %v4609_v50 = vmul.f32 %v10632_v12, %v4593_v2  ;;  %v13896_v2 = vpop.f32.mrf.mxu0 }
 0xc19   : > { %5801 = vrot.lane.b32.xlu2 %v16407_v13, %s11149_s12  ;;  %16478 = vst [vmem:[#allocation114_spill] sm:$0xff] %v13896_v2 }
 0xc1a   : > { %v4625_v25 = vmul.f32 %v13739_v9, %v4609_v50 }
 0xc1c   : > { %v13870_v15 = vpop.permute.xlu2 %5180  ;;  %9489 = vmatmul.msk.f32.vlgmr.msra.gmra.mxu1 %vm890_vm0, %v4625_v25  ;;  %9497 = vmatmul.msk.f32.vlgmr.msrb.gmra.mxu3 %vm890_vm0, %v16473_v42 }
 0xc1d   : > { %9519 = vmatpush.xpose.msk.msra.mxu1 %vm890_vm0, %v5187_v60  ;;  %v13894_v62 = vpop.f32.mrf.mxu2 }
 0xc1e   : > { %16477 = vst [vmem:[#allocation125_spill] sm:$0xff] %v13894_v62 }
 0xc1f   : > { %v13906_v42 = vpop.permute.xlu0 %5182 }
 0xc21   : > { %9520 = vmatpush.xpose.msk.msra.mxu1 %vm890_vm0, %v5185_v57 }
 0xc24   : > { %v13879_v3 = vpop.permute.xlu2 %9940  ;;  %9498 = vmatmul.msk.f32.gmra.mxu3 %vm890_vm0, %v16475_v4  ;;  %v9936_v9 = vpop.permute.xlu1 %9935 }
 0xc25   : > { %v9937_v51 = vunpack.i.l.bf16 %v9936_v9  ;;  %v9942_v38 = vunpack.i.l.bf16 %v13879_v3  ;;  %v9938_v37 = vunpack.i.h.bf16 %v9936_v9 }
 0xc27   : > { %5504 = vmatpush.msrb.mxu3 %v9937_v51 }
 0xc29   : > { %5505 = vmatpush.msrb.mxu3 %v9942_v38 }
 0xc2c   : > { %v9946_v56 = vpop.permute.xlu2 %9945  ;;  %9513 = vmatmul.msk.f32.vlgmr.msra.gmra.mxu3 %vm890_vm0, %v13634_v22  ;;  %v13888_v12 = vpop.permute.xlu1 %5727 }
 0xc2d   : > { %v9947_v57 = vunpack.i.l.bf16 %v9946_v56  ;;  %v9948_v26 = vunpack.i.h.bf16 %v9946_v56 }
 0xc2f   : > { %5644 = vmatpush.msra.mxu3 %v9947_v57 }
 0xc31   : > { %5645 = vmatpush.msra.mxu3 %v9948_v26  ;;  %v13904_v60 = vpop.f32.mrf.mxu0 }
 0xc32   : > { %16480 = vst [vmem:[#allocation133_spill] sm:$0xff] %v13904_v60 }
 0xc34   : > { %v13890_v34 = vpop.permute.xlu2 %5723  ;;  %9514 = vmatmul.msk.f32.gmra.mxu3 %vm890_vm0, %v13522_v53  ;;  %v13898_v50 = vpop.permute.xlu1 %5766 }
 0xc3a   : > { %v13914_v62 = vpop.f32.mrf.mxu0 }
 0xc3b   : > { %16481 = vst [vmem:[#allocation35_spill] sm:$0xff] %v13914_v62 }
 0xc3c   : > { %v13900_v22 = vpop.permute.xlu2 %5725  ;;  %v13908_v38 = vpop.permute.xlu1 %5883 }
 0xc3f   : > { %v13902_v25 = vpop.f32.mrf.mxu2 }
 0xc40   : > { %16479 = vst [vmem:[#allocation104_spill] sm:$0xff] %v13902_v25 }
 0xc44   : > { %v9951_v4 = vpop.permute.xlu2 %9950  ;;  %v13920_v2 = vpop.permute.xlu1 %5879 }
 0xc45   : > { %v9952_v51 = vunpack.i.l.bf16 %v9951_v4  ;;  %v9953_v56 = vunpack.i.h.bf16 %v9951_v4  ;;  %16482 = vst [vmem:[#allocation60_spill] sm:$0xff] %v13920_v2 }
 0xc47   : > { %v13910_v53 = vpop.f32.mrf.mxu2  ;;  %5539 = vmatpush.msra.mxu0 %v9952_v51 }
 0xc48   : > { %v5219_v57 = vsel %vm890_vm0, %v13910_v53, -inf }
 0xc49   : > { %5220 = vmax.xlane.f32.xlu1 %v5219_v57  ;;  %5540 = vmatpush.msra.mxu0 %v9953_v56 }
 0xc4a   : > { %v4546_v26 = vpop.xlane.xlu0 %4545 }
 0xc4b   : > { %10633 = vrcp.f32 %v4546_v26  ;;  %v13996_v30 = vpop.f32.mrf.mxu1 }
 0xc4c   : > { %v13916_v25 = vpop.permute.xlu2 %5885  ;;  %v13929_v58 = vpop.permute.xlu1 %5918  ;;  %16491 = vst [vmem:[#allocation25_spill] sm:$0xff] %v13996_v30 }
 0xc4d   : > { %16485 = vst [vmem:[#allocation66_spill] sm:$0xff] %v13929_v58 }
 0xc4f   : > { %v13918_v60 = vpop.f32.mrf.mxu2 }
 0xc50   : > { %v5222_v4 = vsel %vm890_vm0, %v13918_v60, -inf }
 0xc51   : > { %v10634_v6 = vpop.eup %10633  ;;  %5223 = vmax.xlane.f32.xlu2 %v5222_v4 }
 0xc52   : > { %v4578_v51 = vmul.f32 %v10634_v6, %v4546_v26 }
 0xc53   : > { %v13924_v35 = vpop.f32.mrf.mxu0 }
 0xc54   : > { %16483 = vst [vmem:[#allocation54_spill] sm:$0xff] %v13924_v35  ;;  %v4594_v57 = vsub.f32 2.0, %v4578_v51  ;;  %v13926_v56 = vpop.permute.xlu2 %5762 }
 0xc55   : > { %16484 = vst [vmem:[#allocation127_spill] sm:$0xff] %v13926_v56 }
 0xc56   : > { %v4610_v8 = vmul.f32 %v10634_v6, %v4594_v57  ;;  %v13943_v6 = vpop.permute.xlu1 %5807 }
 0xc58   : > { %v4626_v62 = vmul.f32 %v13805_v44, %v4610_v8  ;;  %v9943_v8 = vunpack.i.h.bf16 %v13879_v3 }
 0xc5a   : > { %9490 = vmatmul.msk.f32.gmra.mxu1 %vm890_vm0, %v4626_v62 }
 0xc5b   : > { %v13932_v19 = vpop.f32.mrf.mxu0 }
 0xc5c   : > { %v13934_v39 = vpop.permute.xlu2 %5881  ;;  %v5231_v4 = vsel %vm890_vm0, %v13932_v19, -inf }
 0xc5d   : > { %16486 = vst [vmem:[#allocation118_spill] sm:$0xff] %v13934_v39  ;;  %v9931_v26 = vpop.permute.xlu0 %9930  ;;  %5232 = vmax.xlane.f32.xlu0 %v5231_v4 }
 0xc5e   : > { %v9932_v35 = vunpack.i.l.bf16 %v9931_v26  ;;  %v9933_v51 = vunpack.i.h.bf16 %v9931_v26  ;;  %v9966_v26 = vpop.permute.xlu1 %9965 }
 0xc60   : > { %5469 = vmatpush.msra.mxu2 %v9932_v35  ;;  %v13947_v35 = vpop.f32.mrf.mxu2 }
 0xc62   : > { %9505 = vmatmul.msk.f32.vlgmr.msrb.gmra.mxu1 %vm890_vm0, %v13718_v48  ;;  %5470 = vmatpush.msra.mxu2 %v9933_v51  ;;  %v9967_v51 = vunpack.i.l.bf16 %v9966_v26 }
 0xc63   : > { %v13941_v44 = vpop.f32.mrf.mxu0 }
 0xc64   : > { %5609 = vmatpush.msrb.mxu2 %v9938_v37  ;;  %v9956_v62 = vpop.permute.xlu2 %9955  ;;  %v5234_v57 = vsel %vm890_vm0, %v13941_v44, -inf  ;;  %v5243_v37 = vsel %vm890_vm0, %v13947_v35, -inf }
 0xc65   : > { %v9958_v4 = vunpack.i.h.bf16 %v9956_v62  ;;  %v9957_v54 = vunpack.i.l.bf16 %v9956_v62  ;;  %5235 = vmax.xlane.f32.xlu1 %v5234_v57 }
 0xc66   : > { %5610 = vmatpush.msrb.mxu2 %v9943_v8 }
 0xc67   : > { %5574 = vmatpush.msrb.mxu1 %v9957_v54  ;;  %5679 = vmatpush.msrb.mxu0 %v9958_v4  ;;  %v9968_v54 = vunpack.i.h.bf16 %v9966_v26 }
 0xc6a   : > { %9506 = vmatmul.msk.f32.gmra.mxu1 %vm890_vm0, %v13860_v41  ;;  %v13957_v41 = vpop.f32.mrf.mxu3 }
 0xc6b   : > { %16487 = vst [vmem:[#allocation59_spill] sm:$0xff] %v13957_v41 }
 0xc6c   : > { %v9961_v48 = vpop.permute.xlu2 %9960 }
 0xc6d   : > { %v9963_v3 = vunpack.i.h.bf16 %v9961_v48  ;;  %v9962_v9 = vunpack.i.l.bf16 %v9961_v48  ;;  %5244 = vmax.xlane.f32.xlu1 %v5243_v37 }
 0xc6f   : > { %5575 = vmatpush.msrb.mxu1 %v9962_v9  ;;  %5680 = vmatpush.msrb.mxu0 %v9963_v3  ;;  %v13977_v9 = vpop.permute.xlu1 %5805 }
 0xc72   : > { %9521 = vmatmul.msk.f32.vlgmr.msra.gmra.mxu1 %vm890_vm0, %v13870_v15  ;;  %v13959_v8 = vpop.f32.mrf.mxu3 }
 0xc73   : > { %5714 = vmatpush.msra.mxu1 %v9967_v51  ;;  %16488 = vst [vmem:[#allocation47_spill] sm:$0xff] %v13959_v8 }
 0xc75   : > { %5715 = vmatpush.msra.mxu1 %v9968_v54 }
 0xc7a   : > { %9522 = vmatmul.msk.f32.gmra.mxu1 %vm890_vm0, %v13906_v42  ;;  %v13965_v4 = vpop.f32.mrf.mxu3 }
 0xc7b   : > { %16489 = vst [vmem:[#allocation61_spill] sm:$0xff] %v13965_v4 }
 0xc89   : > { %v14001_v14 = vpop.f32.mrf.mxu1 }
 0xc8a   : > { %v13961_v62 = vpop.f32.mrf.mxu0  ;;  %16492 = vst [vmem:[#allocation116_spill] sm:$0xff] %v14001_v14 }
 0xc8b   : > { %v5255_v57 = vsel %vm890_vm0, %v13961_v62, -inf }
 0xc8c   : > { %5256 = vmax.xlane.f32.xlu1 %v5255_v57  ;;  %v13985_v57 = vpop.permute.xlu2 %5922 }
 0xc92   : > { %v13979_v26 = vpop.f32.mrf.mxu0 }
 0xc93   : > { %v5258_v54 = vsel %vm890_vm0, %v13979_v26, -inf }
 0xc97   : > { %v13967_v48 = vpop.f32.mrf.mxu3 }
 0xc98   : > { %16490 = vst [vmem:[#allocation65_spill] sm:$0xff] %v13967_v48  ;;  %v13987_v48 = vpop.permute.xlu1 %5803 }
 0xc9f   : > { %v13969_v15 = vpop.f32.mrf.mxu3 }
 0xca0   : > { %v5225_v37 = vsel %vm890_vm0, %v13969_v15, -inf }
 0xca1   : > { %5226 = vmax.xlane.f32.xlu0 %v5225_v37 }
 0xca7   : > { %v13973_v42 = vpop.f32.mrf.mxu3 }
 0xca8   : > { %v5228_v3 = vsel %vm890_vm0, %v13973_v42, -inf }
 0xca9   : > { %5229 = vmax.xlane.f32.xlu2 %v5228_v3  ;;  %v13993_v3 = vpop.permute.xlu2 %5801 }
 0xcaf   : > { %v13981_v51 = vpop.f32.mrf.mxu3 }
 0xcb1   : > { %5259 = vmax.xlane.f32.xlu2 %v5258_v54 }
 0xcb7   : > { %v13989_v37 = vpop.f32.mrf.mxu3 }
 0xcb8   : > { %v5252_v4 = vsel %vm890_vm0, %v13989_v37, -inf }
 0xcb9   : > { %5253 = vmax.xlane.f32.xlu2 %v5252_v4 }
 0xcbc   : > { %v5221_v8 = vpop.xlane.xlu1 %5220 }
 0xcbd   : > { %v5267_v41 = vsub.f32 %v13910_v53, %v5221_v8  ;;  %v14007_v53 = vpop.f32.mrf.mxu1 }
 0xcbe   : > { %16493 = vst [vmem:[#allocation52_spill] sm:$0xff] %v14007_v53  ;;  %v14020_v53 = vpop.f32.mrf.mxu2 }
 0xcbf   : > { %v5283_v18 = vmul.f32 1.442695, %v5267_v41 }
 0xcc1   : > { %10635 = vpow2.f32 %v5283_v18 }
 0xcc4   : > { %v5224_v54 = vpop.xlane.xlu2 %5223 }
 0xcc5   : > { %v5268_v13 = vsub.f32 %v13918_v60, %v5224_v54 }
 0xcc7   : > { %v13999_v21 = vpop.eup %10635  ;;  %v5285_v47 = vmul.f32 1.442695, %v5268_v13 }
 0xcc8   : > { %v5315_v4 = vsel %vm890_vm0, %v13999_v21, 0.0 }
 0xcc9   : > { %10637 = vpow2.f32 %v5285_v47  ;;  %5316 = vadd.xlane.f32.xlu2 %v5315_v4  ;;  %v14018_v4 = vpop.permute.xlu0 %5729 }
 0xccf   : > { %v14005_v5 = vpop.eup %10637 }
 0xcd0   : > { %v5318_v18 = vsel %vm890_vm0, %v14005_v5, 0.0 }
 0xcd1   : > { %5319 = vadd.xlane.f32.xlu2 %v5318_v18  ;;  %v5246_v18 = vsel %vm890_vm0, %v14020_v53, -inf }
 0xcd7   : > { %v14011_v41 = vpop.f32.mrf.mxu1 }
 0xcd8   : > { %16494 = vst [vmem:[#allocation107_spill] sm:$0xff] %v14011_v41  ;;  %v5236_v60 = vpop.xlane.xlu1 %5235 }
 0xcdf   : > { %v14013_v8 = vpop.f32.mrf.mxu1 }
 0xce0   : > { %v5245_v54 = vpop.xlane.xlu1 %5244  ;;  %v5237_v13 = vsel %vm890_vm0, %v14013_v8, -inf }
 0xce1   : > { %v5275_v47 = vsub.f32 %v13947_v35, %v5245_v54  ;;  %5238 = vmax.xlane.f32.xlu0 %v5237_v13  ;;  %v14030_v35 = vpop.permute.xlu0 %5768 }
 0xce3   : > { %v5299_v14 = vmul.f32 1.442695, %v5275_v47 }
 0xce5   : > { %10639 = vpow2.f32 %v5299_v14  ;;  %v5249_v14 = vsel %vm890_vm0, %v13981_v51, -inf }
 0xce7   : > { %v14022_v30 = vpop.f32.mrf.mxu1 }
 0xce8   : > { %v5240_v41 = vsel %vm890_vm0, %v14022_v30, -inf }
 0xce9   : > { %5247 = vmax.xlane.f32.xlu0 %v5246_v18  ;;  %5241 = vmax.xlane.f32.xlu1 %v5240_v41  ;;  %v14036_v13 = vpop.permute.xlu0 %5764 }
 0xcea   : > { %16495 = vst [vmem:[#allocation135_spill] sm:$0xff] %v14036_v13 }
 0xceb   : > { %v14028_v43 = vpop.eup %10639 }
 0xcec   : > { %v5339_v54 = vsel %vm890_vm0, %v14028_v43, 0.0 }
 0xced   : > { %5340 = vadd.xlane.f32.xlu2 %v5339_v54 }
 0xcf1   : > { %5250 = vmax.xlane.f32.xlu1 %v5249_v14  ;;  %v14040_v47 = vpop.permute.xlu0 %5924 }
 0xcf9   : > { %v14042_v41 = vpop.permute.xlu0 %5920 }
 0xcfa   : > { %16496 = vst [vmem:[#allocation22_spill] sm:$0xff] %v14042_v41 }
 0xcfd   : > { %5846 = vrot.lane.b32.xlu0 %v16408_v16, %s11149_s12 }
 0xcff   : > { %v5257_v17 = vpop.xlane.xlu1 %5256 }
 0xd00   : > { %v5279_v14 = vsub.f32 %v13961_v62, %v5257_v17  ;;  %v5272_v17 = vsub.f32 %v13941_v44, %v5236_v60 }
 0xd01   : > { %v5233_v18 = vpop.xlane.xlu0 %5232 }
 0xd02   : > { %v5271_v40 = vsub.f32 %v13932_v19, %v5233_v18  ;;  %v5307_v58 = vmul.f32 1.442695, %v5279_v14 }
 0xd04   : > { %v5291_v54 = vmul.f32 1.442695, %v5271_v40 }
 0xd06   : > { %10641 = vpow2.f32 %v5291_v54 }
 0xd07   : > { %10643 = vpow2.f32 %v5307_v58  ;;  %v5293_v58 = vmul.f32 1.442695, %v5272_v17 }
 0xd09   : > { %10645 = vpow2.f32 %v5293_v58 }
 0xd0a   : > { %5963 = vrot.lane.b32.xlu1 %v16331_v20, %s11149_s12  ;;  %v14054_v20 = vpop.f32.mrf.mxu1 }
 0xd0b   : > { %v5261_v19 = vsel %vm890_vm0, %v14054_v20, -inf }
 0xd0c   : > { %v14048_v13 = vpop.eup %10641 }
 0xd0d   : > { %v5327_v16 = vsel %vm890_vm0, %v14048_v13, 0.0  ;;  %v14052_v56 = vpop.eup %10643 }
 0xd0e   : > { %v5351_v40 = vsel %vm890_vm0, %v14052_v56, 0.0 }
 0xd0f   : > { %v14068_v60 = vpop.eup %10645 }
 0xd10   : > { %v5330_v17 = vsel %vm890_vm0, %v14068_v60, 0.0 }
 0xd14   : > { %v5227_v18 = vpop.xlane.xlu0 %5226 }
 0xd15   : > { %v5269_v54 = vsub.f32 %v13969_v15, %v5227_v18 }
 0xd17   : > { %v5287_v44 = vmul.f32 1.442695, %v5269_v54 }
 0xd1c   : > { %v5230_v1 = vpop.xlane.xlu2 %5229 }
 0xd24   : > { %v5260_v41 = vpop.xlane.xlu2 %5259 }
 0xd25   : > { %v5280_v39 = vsub.f32 %v13979_v26, %v5260_v41 }
 0xd27   : > { %5328 = vadd.xlane.f32.xlu0 %v5327_v16  ;;  %v14063_v16 = vpop.f32.mrf.mxu1  ;;  %v5309_v15 = vmul.f32 1.442695, %v5280_v39 }
 0xd28   : > { %v5264_v14 = vsel %vm890_vm0, %v14063_v16, -inf }
 0xd2c   : > { %v14061_v62 = vpop.xlane.xlu2 %5253 }
 0xd2f   : > { %5352 = vadd.xlane.f32.xlu0 %v5351_v40 }
 0xd34   : > { %5262 = vmax.xlane.f32.xlu1 %v5261_v19 }
 0xd3c   : > { %5265 = vmax.xlane.f32.xlu1 %v5264_v14  ;;  %v5317_v40 = vpop.xlane.xlu2 %5316 }
 0xd3d   : > { %10647 = vrcp.f32 %v5317_v40 }
 0xd3e   : > { %10649 = vpow2.f32 %v5287_v44 }
 0xd43   : > { %v10648_v19 = vpop.eup %10647 }
 0xd44   : > { %v5379_v31 = vmul.f32 %v10648_v19, %v5317_v40  ;;  %v5320_v58 = vpop.xlane.xlu2 %5319  ;;  %5331 = vadd.xlane.f32.xlu1 %v5330_v17  ;;  %v14073_v2 = vpop.eup %10649 }
 0xd45   : > { %10651 = vrcp.f32 %v5320_v58  ;;  %v5321_v26 = vsel %vm890_vm0, %v14073_v2, 0.0 }
 0xd46   : > { %v5395_v18 = vsub.f32 2.0, %v5379_v31  ;;  %10653 = vpow2.f32 %v5309_v15 }
 0xd48   : > { %v5411_v14 = vmul.f32 %v10648_v19, %v5395_v18 }
 0xd4a   : > { %v5427_v54 = vmul.f32 %v13999_v21, %v5411_v14 }
 0xd4b   : > { %v10652_v27 = vpop.eup %10651 }
 0xd4c   : > { %v5380_v41 = vmul.f32 %v10652_v27, %v5320_v58  ;;  %9523 = vmatmul.msk.f32.vlgmr.msra.gmra.mxu2 %vm890_vm0, %v5427_v54  ;;  %5322 = vadd.xlane.f32.xlu1 %v5321_v26  ;;  %v14081_v39 = vpop.eup %10653 }
 0xd4d   : > { %9539 = vmatpush.xpose.msk.msra.mxu2 %vm890_vm0, %v14018_v4  ;;  %v5354_v44 = vsel %vm890_vm0, %v14081_v39, 0.0  ;;  %v5270_v4 = vsub.f32 %v13973_v42, %v5230_v1 }
 0xd4e   : > { %v5396_v40 = vsub.f32 2.0, %v5380_v41 }
 0xd4f   : > { %v5289_v15 = vmul.f32 1.442695, %v5270_v4 }
 0xd50   : > { %v5412_v31 = vmul.f32 %v10652_v27, %v5396_v40 }
 0xd51   : > { %9540 = vmatpush.xpose.msk.msra.mxu2 %vm890_vm0, %v13888_v12 }
 0xd52   : > { %v5428_v21 = vmul.f32 %v14005_v5, %v5412_v31 }
 0xd54   : > { %v5239_v19 = vpop.xlane.xlu0 %5238  ;;  %9524 = vmatmul.msk.f32.gmra.mxu2 %vm890_vm0, %v5428_v21  ;;  %5355 = vadd.xlane.f32.xlu1 %v5354_v44 }
 0xd55   : > { %v5273_v17 = vsub.f32 %v14013_v8, %v5239_v19 }
 0xd57   : > { %v5295_v58 = vmul.f32 1.442695, %v5273_v17 }
 0xd59   : > { %10655 = vpow2.f32 %v5295_v58 }
 0xd5a   : > { %10657 = vpow2.f32 %v5289_v15 }
 0xd5c   : > { %v5248_v27 = vpop.xlane.xlu0 %5247  ;;  %v5242_v18 = vpop.xlane.xlu1 %5241 }
 0xd5d   : > { %v5276_v12 = vsub.f32 %v14020_v53, %v5248_v27  ;;  %v5274_v54 = vsub.f32 %v14022_v30, %v5242_v18 }
 0xd5f   : > { %v14092_v14 = vpop.eup %10655  ;;  %v5301_v5 = vmul.f32 1.442695, %v5276_v12  ;;  %v5297_v1 = vmul.f32 1.442695, %v5274_v54 }
 0xd60   : > { %v5341_v26 = vpop.xlane.xlu2 %5340  ;;  %v5333_v41 = vsel %vm890_vm0, %v14092_v14, 0.0  ;;  %v14097_v8 = vpop.eup %10657 }
 0xd61   : > { %10659 = vpow2.f32 %v5301_v5  ;;  %5334 = vadd.xlane.f32.xlu2 %v5333_v41  ;;  %v5324_v30 = vsel %vm890_vm0, %v14097_v8, 0.0 }
 0xd62   : > { %10661 = vrcp.f32 %v5341_v26 }
 0xd63   : > { %10663 = vpow2.f32 %v5297_v1 }
 0xd64   : > { %v5251_v42 = vpop.xlane.xlu1 %5250 }
 0xd65   : > { %v5277_v40 = vsub.f32 %v13981_v51, %v5251_v42 }
 0xd67   : > { %v14100_v53 = vpop.eup %10659  ;;  %v5303_v31 = vmul.f32 1.442695, %v5277_v40 }
 0xd68   : > { %v5342_v21 = vsel %vm890_vm0, %v14100_v53, 0.0  ;;  %v10662_v44 = vpop.eup %10661 }
 0xd69   : > { %10665 = vpow2.f32 %v5303_v31  ;;  %5325 = vadd.xlane.f32.xlu2 %v5324_v30  ;;  %5343 = vadd.xlane.f32.xlu0 %v5342_v21  ;;  %v5387_v19 = vmul.f32 %v10662_v44, %v5341_v26  ;;  %v14106_v4 = vpop.eup %10663 }
 0xd6a   : > { %v5336_v27 = vsel %vm890_vm0, %v14106_v4, 0.0 }
 0xd6b   : > { %v5403_v17 = vsub.f32 2.0, %v5387_v19 }
 0xd6d   : > { %5961 = vrot.lane.b32.xlu1 %v16433_v10, %s11149_s12  ;;  %v5419_v51 = vmul.f32 %v10662_v44, %v5403_v17 }
 0xd6f   : > { %v14110_v58 = vpop.eup %10665  ;;  %v5435_v15 = vmul.f32 %v14028_v43, %v5419_v51  ;;  %v14132_v43 = vpop.permute.xlu0 %5846 }
 0xd70   : > { %v5345_v18 = vsel %vm890_vm0, %v14110_v58, 0.0 }
 0xd71   : > { %5337 = vadd.xlane.f32.xlu0 %v5336_v27  ;;  %5346 = vadd.xlane.f32.xlu2 %v5345_v18 }
 0xd72   : > { %9531 = vmatmul.msk.f32.vlgmr.msrb.gmra.mxu2 %vm890_vm0, %v5435_v15 }
 0xd73   : > { %9555 = vmatpush.xpose.msk.msrb.mxu2 %vm890_vm0, %v13916_v25 }
 0xd75   : > { %5842 = vrot.lane.b32.xlu1 %v16443_v33, %s11149_s12 }
 0xd77   : > { %9556 = vmatpush.xpose.msk.msrb.mxu2 %vm890_vm0, %v13908_v38 }
 0xd7c   : > { %v5964_v38 = vpop.permute.xlu1 %5963 }
 0xd7d   : > { %6000 = vrot.lane.b32.xlu1 %v16438_v32, %s11149_s12 }
 0xd85   : > { %9975 = vrot.lane.b32.xlu1 %v16450_v61, %s11149_s12 }
 0xd89   : > { %5957 = vrot.lane.b32.xlu2 %v16445_v24, %s11149_s12 }
 0xd8d   : > { %9990 = vrot.lane.b32.xlu1 %v16464_v0, %s11149_s12 }
 0xd95   : > { %6541 = vrot.lane.b32.xlu1 %v16462_v55, %s11150_s20  ;;  %v5278_v55 = vsub.f32 %v13989_v37, %v14061_v62 }
 0xd9a   : > { %v5329_v25 = vpop.xlane.xlu0 %5328 }
 0xd9b   : > { %10667 = vrcp.f32 %v5329_v25 }
 0xd9d   : > { %6584 = vrot.lane.b32.xlu1 %v16470_v63, %s11150_s20  ;;  %v5305_v63 = vmul.f32 1.442695, %v5278_v55 }
 0xda1   : > { %v10668_v12 = vpop.eup %10667 }
 0xda2   : > { %v5383_v61 = vmul.f32 %v10668_v12, %v5329_v25  ;;  %v5353_v62 = vpop.xlane.xlu0 %5352 }
 0xda4   : > { %v5399_v5 = vsub.f32 2.0, %v5383_v61 }
 0xda5   : > { %6582 = vrot.lane.b32.xlu1 %v16454_v23, %s11150_s20 }
 0xda6   : > { %v5415_v54 = vmul.f32 %v10668_v12, %v5399_v5 }
 0xda7   : > { %v5263_v26 = vpop.xlane.xlu1 %5262 }
 0xda8   : > { %v5431_v41 = vmul.f32 %v14048_v13, %v5415_v54  ;;  %v5281_v1 = vsub.f32 %v14054_v20, %v5263_v26 }
 0xdaa   : > { %v5311_v42 = vmul.f32 1.442695, %v5281_v1  ;;  %9527 = vmatmul.msk.f32.vlgmr.msra.gmra.mxu0 %vm890_vm0, %v5431_v41 }
 0xdab   : > { %9547 = vmatpush.xpose.msk.msra.mxu0 %vm890_vm0, %v13943_v6 }
 0xdac   : > { %10669 = vpow2.f32 %v5311_v42 }
 0xdad   : > { %10671 = vpow2.f32 %v5305_v63 }
 0xdaf   : > { %9548 = vmatpush.xpose.msk.msra.mxu0 %vm890_vm0, %v13977_v9  ;;  %v5266_v23 = vpop.xlane.xlu1 %5265 }
 0xdb0   : > { %v5282_v40 = vsub.f32 %v14063_v16, %v5266_v23 }
 0xdb2   : > { %v14150_v13 = vpop.eup %10669  ;;  %v5313_v20 = vmul.f32 1.442695, %v5282_v40 }
 0xdb3   : > { %v5357_v37 = vsel %vm890_vm0, %v14150_v13, 0.0  ;;  %v14154_v31 = vpop.eup %10671 }
 0xdb4   : > { %10673 = vpow2.f32 %v5313_v20  ;;  %5358 = vadd.xlane.f32.xlu0 %v5357_v37  ;;  %v5348_v9 = vsel %vm890_vm0, %v14154_v31, 0.0 }
 0xdb5   : > { %10675 = vrcp.f32 %v5353_v62 }
 0xdb7   : > { %v5332_v6 = vpop.xlane.xlu1 %5331 }
 0xdb8   : > { %10677 = vrcp.f32 %v5332_v6 }
 0xdba   : > { %v14156_v30 = vpop.eup %10673 }
 0xdbb   : > { %v5360_v16 = vsel %vm890_vm0, %v14156_v30, 0.0  ;;  %v10676_v21 = vpop.eup %10675 }
 0xdbc   : > { %5349 = vadd.xlane.f32.xlu0 %v5348_v9  ;;  %5361 = vadd.xlane.f32.xlu2 %v5360_v16  ;;  %v5391_v51 = vmul.f32 %v10676_v21, %v5353_v62 }
 0xdbe   : > { %v10678_v44 = vpop.eup %10677  ;;  %v5407_v18 = vsub.f32 2.0, %v5391_v51 }
 0xdbf   : > { %v5384_v19 = vmul.f32 %v10678_v44, %v5332_v6  ;;  %v5323_v17 = vpop.xlane.xlu1 %5322 }
 0xdc0   : > { %10679 = vrcp.f32 %v5323_v17  ;;  %v5423_v54 = vmul.f32 %v10676_v21, %v5407_v18 }
 0xdc1   : > { %v5400_v15 = vsub.f32 2.0, %v5384_v19 }
 0xdc2   : > { %v5439_v1 = vmul.f32 %v14052_v56, %v5423_v54 }
 0xdc3   : > { %v5416_v27 = vmul.f32 %v10678_v44, %v5400_v15 }
 0xdc5   : > { %v5432_v25 = vmul.f32 %v14068_v60, %v5416_v27 }
 0xdc6   : > { %v10680_v12 = vpop.eup %10679 }
 0xdc7   : > { %v5381_v61 = vmul.f32 %v10680_v12, %v5323_v17  ;;  %9528 = vmatmul.msk.f32.gmra.mxu0 %vm890_vm0, %v5432_v25  ;;  %v5356_v5 = vpop.xlane.xlu1 %5355 }
 0xdc8   : > { %10681 = vrcp.f32 %v5356_v5 }
 0xdc9   : > { %v5397_v26 = vsub.f32 2.0, %v5381_v61 }
 0xdcb   : > { %v5413_v41 = vmul.f32 %v10680_v12, %v5397_v26 }
 0xdcd   : > { %v5429_v55 = vmul.f32 %v14073_v2, %v5413_v41 }
 0xdce   : > { %v10682_v42 = vpop.eup %10681 }
 0xdcf   : > { %v5392_v63 = vmul.f32 %v10682_v42, %v5356_v5  ;;  %9525 = vmatmul.msk.f32.vlgmr.msrb.gmra.mxu3 %vm890_vm0, %v5429_v55  ;;  %9535 = vmatmul.msk.f32.vlgmr.msrb.gmra.mxu0 %vm890_vm0, %v5439_v1  ;;  %v16497_v55 = vld [vmem:[#allocation20_spill] sm:$0xff] }
 0xdd0   : > { %9543 = vmatpush.xpose.msk.msrb.mxu3 %vm890_vm0, %v14030_v35  ;;  %9563 = vmatpush.xpose.msk.msrb.mxu0 %vm890_vm0, %v5964_v38 }
 0xdd1   : > { %v5408_v60 = vsub.f32 2.0, %v5392_v63  ;;  %5844 = vrot.lane.b32.xlu0 %v16265_v36, %s11149_s12 }
 0xdd3   : > { %v5424_v23 = vmul.f32 %v10682_v42, %v5408_v60  ;;  %v16499_v42 = vld [vmem:[#allocation19_spill] sm:$0xff] }
 0xdd4   : > { %9544 = vmatpush.xpose.msk.msrb.mxu3 %vm890_vm0, %v13898_v50  ;;  %v5335_v2 = vpop.xlane.xlu2 %5334  ;;  %6002 = vrot.lane.b32.xlu2 %v16444_v45, %s11149_s12 }
 0xdd5   : > { %10683 = vrcp.f32 %v5335_v2  ;;  %v5440_v56 = vmul.f32 %v14081_v39, %v5424_v23 }
 0xdd7   : > { %9536 = vmatmul.msk.f32.gmra.mxu0 %vm890_vm0, %v5440_v56 }
 0xdd9   : > { %5840 = vrot.lane.b32.xlu0 %v16437_v59, %s11149_s12 }
 0xddb   : > { %v10684_v35 = vpop.eup %10683 }
 0xddc   : > { %v5385_v38 = vmul.f32 %v10684_v35, %v5335_v2  ;;  %v5326_v40 = vpop.xlane.xlu2 %5325  ;;  %v5344_v20 = vpop.xlane.xlu0 %5343  ;;  %5998 = vrot.lane.b32.xlu2 %v16447_v11, %s11149_s12 }
 0xddd   : > { %10685 = vrcp.f32 %v5326_v40 }
 0xdde   : > { %v5401_v50 = vsub.f32 2.0, %v5385_v38  ;;  %10687 = vrcp.f32 %v5344_v20 }
 0xddf   : > { %9549 = vmatmul.msk.f32.vlgmr.msra.gmra.mxu0 %vm890_vm0, %v13993_v3  ;;  %v5962_v37 = vpop.permute.xlu1 %5961 }
 0xde0   : > { %v5417_v39 = vmul.f32 %v10684_v35, %v5401_v50  ;;  %9564 = vmatpush.xpose.msk.msrb.mxu0 %vm890_vm0, %v5962_v37 }
 0xde1   : > { %5959 = vrot.lane.b32.xlu0 %v16449_v52, %s11149_s12 }
 0xde2   : > { %v5433_v62 = vmul.f32 %v14092_v14, %v5417_v39 }
 0xde3   : > { %v10686_v6 = vpop.eup %10685 }
 0xde4   : > { %v10688_v9 = vpop.eup %10687  ;;  %v5382_v16 = vmul.f32 %v10686_v6, %v5326_v40  ;;  %9529 = vmatmul.msk.f32.vlgmr.msrb.gmra.mxu1 %vm890_vm0, %v5433_v62  ;;  %v5338_v21 = vpop.xlane.xlu0 %5337  ;;  %9980 = vrot.lane.b32.xlu2 %v16453_v29, %s11149_s12 }
 0xde5   : > { %v5347_v44 = vpop.xlane.xlu2 %5346  ;;  %v5388_v3 = vmul.f32 %v10688_v9, %v5344_v20  ;;  %10689 = vrcp.f32 %v5338_v21  ;;  %9551 = vmatpush.xpose.msk.msrb.mxu1 %vm890_vm0, %v14132_v43 }
 0xde6   : > { %v5398_v19 = vsub.f32 2.0, %v5382_v16  ;;  %10691 = vrcp.f32 %v5347_v44 }
 0xde7   : > { %v5404_v17 = vsub.f32 2.0, %v5388_v3  ;;  %9550 = vmatmul.msk.f32.gmra.mxu0 %vm890_vm0, %v13987_v48  ;;  %v14196_v14 = vpop.permute.xlu1 %5842 }
 0xde8   : > { %v5414_v51 = vmul.f32 %v10686_v6, %v5398_v19 }
 0xde9   : > { %v5420_v15 = vmul.f32 %v10688_v9, %v5404_v17  ;;  %5996 = vrot.lane.b32.xlu0 %v16451_v49, %s11149_s12 }
 0xdea   : > { %v5430_v29 = vmul.f32 %v14097_v8, %v5414_v51 }
 0xdeb   : > { %v10690_v27 = vpop.eup %10689  ;;  %v5436_v18 = vmul.f32 %v14100_v53, %v5420_v15  ;;  %v16501_v15 = vld [vmem:[#allocation127_spill] sm:$0xff] }
 0xdec   : > { %v10692_v25 = vpop.eup %10691  ;;  %v5386_v43 = vmul.f32 %v10690_v27, %v5338_v21  ;;  %9985 = vrot.lane.b32.xlu2 %v16456_v28, %s11149_s12  ;;  %9526 = vmatmul.msk.f32.gmra.mxu3 %vm890_vm0, %v5430_v29 }
 0xded   : > { %v5389_v48 = vmul.f32 %v10692_v25, %v5347_v44  ;;  %9532 = vmatmul.msk.f32.gmra.mxu2 %vm890_vm0, %v5436_v18  ;;  %v5958_v61 = vpop.permute.xlu2 %5957 }
 0xdee   : > { %v5402_v12 = vsub.f32 2.0, %v5386_v43 }
 0xdef   : > { %v5405_v5 = vsub.f32 2.0, %v5389_v48  ;;  %9565 = vmatmul.msk.f32.vlgmr.msrb.gmra.mxu0 %vm890_vm0, %v5958_v61  ;;  %v6001_v54 = vpop.permute.xlu1 %6000  ;;  %v14259_v48 = vpop.f32.mrf.mxu2  ;;  %v16505_v61 = vld [vmem:[#allocation66_spill] sm:$0xff] }
 0xdf0   : > { %v5418_v8 = vmul.f32 %v10690_v27, %v5402_v12  ;;  %v16503_v27 = vld [vmem:[#allocation135_spill] sm:$0xff] }
 0xdf1   : > { %v5421_v26 = vmul.f32 %v10692_v25, %v5405_v5  ;;  %9970 = vrot.lane.b32.xlu0 %v16466_v7, %s11149_s12 }
 0xdf2   : > { %v5434_v53 = vmul.f32 %v14106_v4, %v5418_v8 }
 0xdf3   : > { %v5437_v41 = vmul.f32 %v14110_v58, %v5421_v26  ;;  %v16506_v26 = vld [vmem:[#allocation22_spill] sm:$0xff] }
 0xdf4   : > { %9530 = vmatmul.msk.f32.gmra.mxu1 %vm890_vm0, %v5434_v53 }
 0xdf5   : > { %9533 = vmatmul.msk.f32.vlgmr.msra.gmra.mxu3 %vm890_vm0, %v5437_v41  ;;  %9541 = vmatmul.msk.f32.vlgmr.msra.gmra.mxu2 %vm890_vm0, %v13890_v34 }
 0xdf6   : > { %9559 = vmatpush.xpose.msk.msra.mxu3 %vm890_vm0, %v14040_v47  ;;  %v16498_v47 = vld [vmem:[#allocation60_spill] sm:$0xff] }
 0xdf7   : > { %v14217_v1 = vpop.permute.xlu1 %9975  ;;  %v14270_v53 = vpop.f32.mrf.mxu2 }
 0xdf8   : > { %v9977_v17 = vunpack.i.l.bf16 %v14217_v1 }
 0xdf9   : > { %6545 = vrot.lane.b32.xlu0 %v16468_v46, %s11150_s20  ;;  %v16500_v46 = vld [vmem:[#allocation118_spill] sm:$0xff] }
 0xdfa   : > { %9560 = vmatpush.xpose.msk.msra.mxu3 %vm890_vm0, %v13985_v57 }
 0xdfd   : > { %9542 = vmatmul.msk.f32.gmra.mxu2 %vm890_vm0, %v13900_v22 }
 0xdff   : > { %v9991_v4 = vpop.permute.xlu1 %9990 }
 0xe00   : > { %v9992_v58 = vunpack.i.l.bf16 %v9991_v4  ;;  %v9993_v34 = vunpack.i.h.bf16 %v9991_v4 }
 0xe01   : > { %6543 = vrot.lane.b32.xlu0 %v16497_v55, %s11150_s20  ;;  %v9978_v55 = vunpack.i.h.bf16 %v14217_v1 }
 0xe02   : > { %6355 = vmatpush.msra.mxu0 %v9992_v58 }
 0xe04   : > { %6356 = vmatpush.msra.mxu0 %v9993_v34  ;;  %v14274_v34 = vpop.f32.mrf.mxu2 }
 0xe05   : > { %9557 = vmatmul.msk.f32.vlgmr.msrb.gmra.mxu2 %vm890_vm0, %v16498_v47 }
 0xe09   : > { %6539 = vrot.lane.b32.xlu0 %v16499_v42, %s11150_s20 }
 0xe0d   : > { %9558 = vmatmul.msk.f32.gmra.mxu2 %vm890_vm0, %v16500_v46 }
 0xe27   : > { %v5359_v57 = vpop.xlane.xlu0 %5358  ;;  %v14235_v9 = vpop.f32.mrf.mxu0 }
 0xe28   : > { %10693 = vrcp.f32 %v5359_v57 }
 0xe2e   : > { %v10694_v22 = vpop.eup %10693 }
 0xe2f   : > { %v5393_v63 = vmul.f32 %v10694_v22, %v5359_v57  ;;  %v5350_v60 = vpop.xlane.xlu0 %5349  ;;  %v5362_v23 = vpop.xlane.xlu2 %5361 }
 0xe30   : > { %10695 = vrcp.f32 %v5350_v60 }
 0xe31   : > { %v5409_v2 = vsub.f32 2.0, %v5393_v63  ;;  %10697 = vrcp.f32 %v5362_v23 }
 0xe33   : > { %v5425_v56 = vmul.f32 %v10694_v22, %v5409_v2 }
 0xe35   : > { %v5441_v35 = vmul.f32 %v14150_v13, %v5425_v56 }
 0xe36   : > { %v10696_v38 = vpop.eup %10695 }
 0xe37   : > { %v10698_v40 = vpop.eup %10697  ;;  %v5390_v20 = vmul.f32 %v10696_v38, %v5350_v60  ;;  %v6003_v50 = vpop.permute.xlu2 %6002  ;;  %9537 = vmatmul.msk.f32.vlgmr.msra.gmra.mxu1 %vm890_vm0, %v5441_v35 }
 0xe38   : > { %v5394_v37 = vmul.f32 %v10698_v40, %v5362_v23 }
 0xe39   : > { %v5406_v39 = vsub.f32 2.0, %v5390_v20 }
 0xe3a   : > { %v5410_v62 = vsub.f32 2.0, %v5394_v37 }
 0xe3b   : > { %v5422_v6 = vmul.f32 %v10696_v38, %v5406_v39 }
 0xe3c   : > { %v5426_v16 = vmul.f32 %v10698_v40, %v5410_v62 }
 0xe3d   : > { %v5438_v21 = vmul.f32 %v14154_v31, %v5422_v6 }
 0xe3e   : > { %v5442_v44 = vmul.f32 %v14156_v30, %v5426_v16 }
 0xe3f   : > { %v5999_v3 = vpop.permute.xlu2 %5998  ;;  %9534 = vmatmul.msk.f32.gmra.mxu3 %vm890_vm0, %v5438_v21 }
 0xe40   : > { %9538 = vmatmul.msk.f32.gmra.mxu1 %vm890_vm0, %v5442_v44 }
 0xe43   : > { %v5845_v13 = vpop.permute.xlu0 %5844 }
 0xe44   : > { %9552 = vmatpush.xpose.msk.msrb.mxu1 %vm890_vm0, %v5845_v13  ;;  %v14242_v19 = vpop.f32.mrf.mxu0  ;;  %v14319_v13 = vpop.permute.xlu1 %6541 }
 0xe47   : > { %v9981_v51 = vpop.permute.xlu2 %9980  ;;  %9545 = vmatmul.msk.f32.vlgmr.msrb.gmra.mxu3 %vm890_vm0, %v16501_v15 }
 0xe48   : > { %9567 = vmatpush.xpose.msk.msra.mxu1 %vm890_vm0, %v6003_v50  ;;  %v9982_v31 = vunpack.i.l.bf16 %v9981_v51  ;;  %6320 = vmatpush.msrb.mxu3 %v9977_v17  ;;  %v9983_v47 = vunpack.i.h.bf16 %v9981_v51 }
 0xe4a   : > { %6321 = vmatpush.msrb.mxu3 %v9982_v31 }
 0xe4b   : > { %v5841_v30 = vpop.permute.xlu0 %5840 }
 0xe4c   : > { %9568 = vmatpush.xpose.msk.msra.mxu1 %vm890_vm0, %v6001_v54  ;;  %v14250_v29 = vpop.f32.mrf.mxu0 }
 0xe4d   : > { %9553 = vmatmul.msk.f32.vlgmr.msrb.gmra.mxu1 %vm890_vm0, %v5841_v30  ;;  %16502 = vst [vmem:[#allocation136_spill] sm:$0xff] %v14250_v29 }
 0xe4f   : > { %9546 = vmatmul.msk.f32.gmra.mxu3 %vm890_vm0, %v16503_v27  ;;  %v9986_v18 = vpop.permute.xlu2 %9985 }
 0xe50   : > { %v9987_v12 = vunpack.i.l.bf16 %v9986_v18  ;;  %v9988_v5 = vunpack.i.h.bf16 %v9986_v18 }
 0xe52   : > { %v14297_v40 = vpop.f32.mrf.mxu3 }
 0xe53   : > { %v5960_v25 = vpop.permute.xlu0 %5959 }
 0xe54   : > { %9566 = vmatmul.msk.f32.gmra.mxu0 %vm890_vm0, %v5960_v25  ;;  %v14257_v43 = vpop.f32.mrf.mxu0 }
 0xe55   : > { %9554 = vmatmul.msk.f32.gmra.mxu1 %vm890_vm0, %v14196_v14  ;;  %16504 = vst [vmem:[#allocation41_spill] sm:$0xff] %v14257_v43  ;;  %v16516_v43 = vld [vmem:[#allocation29_spill] sm:$0xff] }
 0xe57   : > { %9561 = vmatmul.msk.f32.vlgmr.msra.gmra.mxu3 %vm890_vm0, %v16505_v61 }
 0xe58   : > { %6460 = vmatpush.msra.mxu3 %v9987_v12 }
 0xe5a   : > { %6461 = vmatpush.msra.mxu3 %v9988_v5  ;;  %v14341_v5 = vpop.permute.xlu1 %6584 }
 0xe5b   : > { %v5997_v54 = vpop.permute.xlu0 %5996 }
 0xe5c   : > { %v14264_v8 = vpop.f32.mrf.mxu0 }
 0xe5d   : > { %9569 = vmatmul.msk.f32.vlgmr.msra.gmra.mxu1 %vm890_vm0, %v5997_v54  ;;  %v6047_v14 = vsel %vm890_vm0, %v14264_v8, -inf }
 0xe5e   : > { %6048 = vmax.xlane.f32.xlu0 %v6047_v14 }
 0xe5f   : > { %9562 = vmatmul.msk.f32.gmra.mxu3 %vm890_vm0, %v16506_v26 }
 0xe61   : > { %v14295_v38 = vpop.f32.mrf.mxu1 }
 0xe62   : > { %16508 = vst [vmem:[#allocation21_spill] sm:$0xff] %v14295_v38 }
 0xe63   : > { %v9971_v41 = vpop.permute.xlu0 %9970 }
 0xe64   : > { %v9972_v4 = vunpack.i.l.bf16 %v9971_v41  ;;  %v9973_v58 = vunpack.i.h.bf16 %v9971_v41  ;;  %v14279_v22 = vpop.f32.mrf.mxu0 }
 0xe65   : > { %9570 = vmatmul.msk.f32.gmra.mxu1 %vm890_vm0, %v5999_v3  ;;  %v6050_v60 = vsel %vm890_vm0, %v14279_v22, -inf }
 0xe66   : > { %6285 = vmatpush.msra.mxu2 %v9972_v4 }
 0xe68   : > { %6286 = vmatpush.msra.mxu2 %v9973_v58 }
 0xe6a   : > { %6425 = vmatpush.msrb.mxu2 %v9978_v55  ;;  %v14355_v55 = vpop.permute.xlu1 %6582 }
 0xe6b   : > { %v14313_v21 = vpop.permute.xlu0 %6545 }
 0xe6c   : > { %6426 = vmatpush.msrb.mxu2 %v9983_v47  ;;  %v14287_v23 = vpop.f32.mrf.mxu0 }
 0xe6d   : > { %v6071_v2 = vsel %vm890_vm0, %v14287_v23, -inf }
 0xe6f   : > { %v14301_v50 = vpop.f32.mrf.mxu3 }
 0xe70   : > { %v14276_v42 = vpop.f32.mrf.mxu2 }
 0xe71   : > { %16507 = vst [vmem:[#allocation23_spill] sm:$0xff] %v14276_v42  ;;  %v14299_v20 = vpop.f32.mrf.mxu1 }
 0xe72   : > { %16509 = vst [vmem:[#allocation24_spill] sm:$0xff] %v14299_v20  ;;  %v16517_v20 = vld [vmem:[#allocation26_spill] sm:$0xff] }
 0xe73   : > { %v14333_v18 = vpop.permute.xlu0 %6543 }
 0xe78   : > { %v5756_v46 = vpop.f32.mrf.mxu2  ;;  %v14305_v39 = vpop.f32.mrf.mxu3 }
 0xe79   : > { %v6035_v57 = vsel %vm890_vm0, %v5756_v46, -inf  ;;  %16511 = vst [vmem:[#allocation132_spill] sm:$0xff] %v14305_v39 }
 0xe7a   : > { %6036 = vmax.xlane.f32.xlu1 %v6035_v57 }
 0xe7b   : > { %v14345_v14 = vpop.permute.xlu0 %6539 }
 0xe80   : > { %v14281_v63 = vpop.f32.mrf.mxu2 }
 0xe81   : > { %v6038_v1 = vsel %vm890_vm0, %v14281_v63, -inf }
 0xe82   : > { %6051 = vmax.xlane.f32.xlu1 %v6050_v60  ;;  %6039 = vmax.xlane.f32.xlu0 %v6038_v1 }
 0xe88   : > { %v14291_v56 = vpop.f32.mrf.mxu2 }
 0xe89   : > { %v6059_v35 = vsel %vm890_vm0, %v14291_v56, -inf }
 0xe8a   : > { %6072 = vmax.xlane.f32.xlu1 %v6071_v2 }
 0xe90   : > { %v14347_v26 = vpop.f32.mrf.mxu2 }
 0xe91   : > { %v6062_v4 = vsel %vm890_vm0, %v14347_v26, -inf }
 0xe92   : > { %6060 = vmax.xlane.f32.xlu1 %v6059_v35 }
 0xeb4   : > { %v14303_v37 = vpop.f32.mrf.mxu1 }
 0xeb5   : > { %16510 = vst [vmem:[#allocation131_spill] sm:$0xff] %v14303_v37 }
 0xebd   : > { %v14307_v62 = vpop.f32.mrf.mxu1 }
 0xebe   : > { %16512 = vst [vmem:[#allocation20_spill] sm:$0xff] %v14307_v62 }
 0xec2   : > { %v14309_v6 = vpop.f32.mrf.mxu3 }
 0xec3   : > { %16513 = vst [vmem:[#allocation60_spill] sm:$0xff] %v14309_v6 }
 0xeca   : > { %v14311_v16 = vpop.f32.mrf.mxu1  ;;  %v14317_v3 = vpop.f32.mrf.mxu3 }
 0xecb   : > { %v6053_v44 = vsel %vm890_vm0, %v14311_v16, -inf  ;;  %v6041_v31 = vsel %vm890_vm0, %v14317_v3, -inf }
 0xecc   : > { %6054 = vmax.xlane.f32.xlu2 %v6053_v44 }
 0xed1   : > { %v14323_v51 = vpop.f32.mrf.mxu0  ;;  %v6049_v47 = vpop.xlane.xlu0 %6048 }
 0xed2   : > { %v14321_v17 = vpop.f32.mrf.mxu1  ;;  %v6074_v15 = vsel %vm890_vm0, %v14323_v51, -inf  ;;  %v14329_v30 = vpop.f32.mrf.mxu3  ;;  %v6087_v57 = vsub.f32 %v14264_v8, %v6049_v47 }
 0xed3   : > { %6075 = vmax.xlane.f32.xlu1 %v6074_v15  ;;  %v6044_v27 = vsel %vm890_vm0, %v14329_v30, -inf  ;;  %v6056_v12 = vsel %vm890_vm0, %v14321_v17, -inf }
 0xed4   : > { %6042 = vmax.xlane.f32.xlu2 %v6041_v31  ;;  %6045 = vmax.xlane.f32.xlu0 %v6044_v27  ;;  %v6107_v1 = vmul.f32 1.442695, %v6087_v57 }
 0xed6   : > { %10699 = vpow2.f32 %v6107_v1 }
 0xeda   : > { %v14335_v25 = vpop.f32.mrf.mxu1  ;;  %v14339_v61 = vpop.f32.mrf.mxu3 }
 0xedb   : > { %v6065_v54 = vsel %vm890_vm0, %v14339_v61, -inf  ;;  %v6077_v60 = vsel %vm890_vm0, %v14335_v25, -inf }
 0xedc   : > { %6057 = vmax.xlane.f32.xlu2 %v6056_v12  ;;  %6066 = vmax.xlane.f32.xlu1 %v6065_v54 }
 0xee2   : > { %v14349_v41 = vpop.f32.mrf.mxu1  ;;  %v14360_v44 = vpop.f32.mrf.mxu3 }
 0xee3   : > { %v6080_v58 = vsel %vm890_vm0, %v14349_v41, -inf  ;;  %v6068_v31 = vsel %vm890_vm0, %v14360_v44, -inf }
 0xee4   : > { %6063 = vmax.xlane.f32.xlu2 %v6062_v4  ;;  %6081 = vmax.xlane.f32.xlu0 %v6080_v58  ;;  %v14366_v4 = vpop.eup %10699 }
 0xeec   : > { %6078 = vmax.xlane.f32.xlu2 %v6077_v60  ;;  %v6143_v60 = vsel %vm890_vm0, %v14366_v4, 0.0 }
 0xeed   : > { %v6037_v2 = vpop.xlane.xlu1 %6036 }
 0xeee   : > { %v6083_v35 = vsub.f32 %v5756_v46, %v6037_v2 }
 0xef0   : > { %v6099_v15 = vmul.f32 1.442695, %v6083_v35 }
 0xef2   : > { %10701 = vpow2.f32 %v6099_v15 }
 0xef4   : > { %6069 = vmax.xlane.f32.xlu2 %v6068_v31 }
 0xef5   : > { %v6052_v27 = vpop.xlane.xlu1 %6051  ;;  %v6040_v12 = vpop.xlane.xlu0 %6039 }
 0xef6   : > { %v6088_v8 = vsub.f32 %v14279_v22, %v6052_v27  ;;  %v6084_v54 = vsub.f32 %v14281_v63, %v6040_v12 }
 0xef8   : > { %v14368_v58 = vpop.eup %10701  ;;  %v6109_v46 = vmul.f32 1.442695, %v6088_v8  ;;  %v6101_v47 = vmul.f32 1.442695, %v6084_v54 }
 0xef9   : > { %v6131_v57 = vsel %vm890_vm0, %v14368_v58, 0.0 }
 0xefa   : > { %10703 = vpow2.f32 %v6109_v46  ;;  %6132 = vadd.xlane.f32.xlu0 %v6131_v57 }
 0xefb   : > { %10705 = vpow2.f32 %v6101_v47 }
 0xefc   : > { %6144 = vadd.xlane.f32.xlu2 %v6143_v60 }
 0xefd   : > { %v6073_v1 = vpop.xlane.xlu1 %6072 }
 0xefe   : > { %v6095_v22 = vsub.f32 %v14287_v23, %v6073_v1 }
 0xf00   : > { %v14375_v63 = vpop.eup %10703  ;;  %v6123_v2 = vmul.f32 1.442695, %v6095_v22 }
 0xf01   : > { %v14377_v35 = vpop.eup %10705  ;;  %v6146_v15 = vsel %vm890_vm0, %v14375_v63, 0.0 }
 0xf02   : > { %10707 = vpow2.f32 %v6123_v2  ;;  %v6134_v31 = vsel %vm890_vm0, %v14377_v35, 0.0  ;;  %6147 = vadd.xlane.f32.xlu1 %v6146_v15 }
 0xf03   : > { %6135 = vadd.xlane.f32.xlu0 %v6134_v31 }
 0xf05   : > { %v6061_v27 = vpop.xlane.xlu1 %6060 }
 0xf06   : > { %v6091_v12 = vsub.f32 %v14291_v56, %v6061_v27 }
 0xf08   : > { %v14384_v8 = vpop.eup %10707  ;;  %v6115_v23 = vmul.f32 1.442695, %v6091_v12 }
 0xf09   : > { %v6167_v54 = vsel %vm890_vm0, %v14384_v8, 0.0 }
 0xf0a   : > { %10709 = vpow2.f32 %v6115_v23  ;;  %6168 = vadd.xlane.f32.xlu2 %v6167_v54 }
 0xf10   : > { %v14388_v46 = vpop.eup %10709 }
 0xf11   : > { %v6155_v47 = vsel %vm890_vm0, %v14388_v46, 0.0 }
 0xf12   : > { %6156 = vadd.xlane.f32.xlu1 %v6155_v47 }
 0xf3f   : > { %v6055_v57 = vpop.xlane.xlu2 %6054 }
 0xf40   : > { %v6089_v60 = vsub.f32 %v14311_v16, %v6055_v57 }
 0xf42   : > { %v6111_v1 = vmul.f32 1.442695, %v6089_v60 }
 0xf44   : > { %10711 = vpow2.f32 %v6111_v1 }
 0xf46   : > { %v6076_v56 = vpop.xlane.xlu1 %6075 }
 0xf47   : > { %v6043_v22 = vpop.xlane.xlu2 %6042  ;;  %v6096_v2 = vsub.f32 %v14323_v51, %v6076_v56  ;;  %v6046_v54 = vpop.xlane.xlu0 %6045 }
 0xf48   : > { %v6085_v15 = vsub.f32 %v14317_v3, %v6043_v22  ;;  %v6086_v51 = vsub.f32 %v14329_v30, %v6046_v54 }
 0xf49   : > { %v6125_v27 = vmul.f32 1.442695, %v6096_v2 }
 0xf4a   : > { %v14395_v31 = vpop.eup %10711  ;;  %v6103_v12 = vmul.f32 1.442695, %v6085_v15  ;;  %v6105_v22 = vmul.f32 1.442695, %v6086_v51 }
 0xf4b   : > { %v6149_v23 = vsel %vm890_vm0, %v14395_v31, 0.0  ;;  %10713 = vpow2.f32 %v6125_v27 }
 0xf4c   : > { %6150 = vadd.xlane.f32.xlu0 %v6149_v23  ;;  %10715 = vpow2.f32 %v6103_v12 }
 0xf4f   : > { %v6058_v16 = vpop.xlane.xlu2 %6057 }
 0xf50   : > { %v6090_v47 = vsub.f32 %v14321_v17, %v6058_v16 }
 0xf51   : > { %v14400_v57 = vpop.eup %10713 }
 0xf52   : > { %v6113_v60 = vmul.f32 1.442695, %v6090_v47  ;;  %v14403_v3 = vpop.eup %10715  ;;  %v6170_v1 = vsel %vm890_vm0, %v14400_v57, 0.0 }
 0xf53   : > { %v6137_v56 = vsel %vm890_vm0, %v14403_v3, 0.0 }
 0xf54   : > { %10717 = vpow2.f32 %v6113_v60  ;;  %6171 = vadd.xlane.f32.xlu0 %v6170_v1  ;;  %6138 = vadd.xlane.f32.xlu2 %v6137_v56  ;;  %v16514_v60 = vld [vmem:[#allocation62_spill] sm:$0xff]  ;;  %v6067_v1 = vpop.xlane.xlu1 %6066 }
 0xf55   : > { %10719 = vpow2.f32 %v6105_v22 }
 0xf57   : > { %v6064_v2 = vpop.xlane.xlu2 %6063  ;;  %v6082_v47 = vpop.xlane.xlu0 %6081 }
 0xf58   : > { %v6092_v17 = vsub.f32 %v14347_v26, %v6064_v2  ;;  %v16515_v2 = vld [vmem:[#allocation67_spill] sm:$0xff] }
 0xf5a   : > { %v14410_v15 = vpop.eup %10717  ;;  %v6117_v30 = vmul.f32 1.442695, %v6092_v17 }
 0xf5b   : > { %v6152_v27 = vsel %vm890_vm0, %v14410_v15, 0.0  ;;  %v14414_v23 = vpop.eup %10719 }
 0xf5c   : > { %10721 = vpow2.f32 %v6117_v30  ;;  %6153 = vadd.xlane.f32.xlu1 %v6152_v27  ;;  %v6140_v16 = vsel %vm890_vm0, %v14414_v23, 0.0 }
 0xf5f   : > { %v6079_v12 = vpop.xlane.xlu2 %6078 }
 0xf62   : > { %v14416_v54 = vpop.eup %10721 }
 0xf63   : > { %v6158_v26 = vsel %vm890_vm0, %v14416_v54, 0.0 }
 0xf64   : > { %6141 = vadd.xlane.f32.xlu1 %v6140_v16  ;;  %6159 = vadd.xlane.f32.xlu2 %v6158_v26 }
 0xf67   : > { %v6070_v51 = vpop.xlane.xlu2 %6069 }
 0xf68   : > { %9995 = vrot.lane.b32.xlu0 %v16514_v60, %s11149_s12 }
 0xf6d   : > { %v6133_v56 = vpop.xlane.xlu0 %6132 }
 0xf6e   : > { %10723 = vrcp.f32 %v6133_v56 }
 0xf6f   : > { %v6145_v22 = vpop.xlane.xlu2 %6144 }
 0xf70   : > { %10725 = vrcp.f32 %v6145_v22  ;;  %10000 = vrot.lane.b32.xlu0 %v16515_v2, %s11149_s12 }
 0xf74   : > { %v10724_v17 = vpop.eup %10723 }
 0xf75   : > { %v6195_v27 = vmul.f32 %v10724_v17, %v6133_v56  ;;  %v6148_v62 = vpop.xlane.xlu1 %6147 }
 0xf76   : > { %v10726_v30 = vpop.eup %10725  ;;  %v6136_v16 = vpop.xlane.xlu0 %6135  ;;  %10727 = vrcp.f32 %v6148_v62 }
 0xf77   : > { %v6199_v37 = vmul.f32 %v10726_v30, %v6145_v22  ;;  %v6211_v26 = vsub.f32 2.0, %v6195_v27  ;;  %10729 = vrcp.f32 %v6136_v16  ;;  %v16518_v22 = vld [vmem:[#allocation73_spill] sm:$0xff] }
 0xf78   : > { %6580 = vrot.lane.b32.xlu0 %v16516_v43, %s11150_s20  ;;  %v16519_v43 = vld [vmem:[#allocation30_spill] sm:$0xff] }
 0xf79   : > { %v6215_v60 = vsub.f32 2.0, %v6199_v37  ;;  %v6227_v29 = vmul.f32 %v10724_v17, %v6211_v26  ;;  %v6098_v26 = vsub.f32 %v14349_v41, %v6082_v47 }
 0xf7b   : > { %v6231_v6 = vmul.f32 %v10726_v30, %v6215_v60  ;;  %v6243_v39 = vmul.f32 %v14368_v58, %v6227_v29  ;;  %v6097_v30 = vsub.f32 %v14335_v25, %v6079_v12  ;;  %v6094_v60 = vsub.f32 %v14360_v44, %v6070_v51  ;;  %v16521_v51 = vld [vmem:[#allocation33_spill] sm:$0xff] }
 0xf7c   : > { %6578 = vrot.lane.b32.xlu2 %v16517_v20, %s11150_s20  ;;  %v10728_v2 = vpop.eup %10727 }
 0xf7d   : > { %v6247_v56 = vmul.f32 %v14366_v4, %v6231_v6  ;;  %10005 = vrot.lane.b32.xlu1 %v16518_v22, %s11149_s12  ;;  %v10730_v38 = vpop.eup %10729  ;;  %v6200_v27 = vmul.f32 %v10728_v2, %v6148_v62  ;;  %9571 = vmatmul.msk.f32.vlgmr.msra.gmra.mxu2 %vm890_vm0, %v6243_v39  ;;  %v6121_v25 = vmul.f32 1.442695, %v6094_v60 }
 0xf7e   : > { %v6196_v42 = vmul.f32 %v10730_v38, %v6136_v16  ;;  %9587 = vmatpush.xpose.msk.msra.mxu2 %vm890_vm0, %v14313_v21  ;;  %v16520_v21 = vld [vmem:[#allocation27_spill] sm:$0xff] }
 0xf7f   : > { %9575 = vmatmul.msk.f32.vlgmr.msra.gmra.mxu0 %vm890_vm0, %v6247_v56  ;;  %v6216_v29 = vsub.f32 2.0, %v6200_v27  ;;  %v6129_v56 = vmul.f32 1.442695, %v6098_v26 }
 0xf80   : > { %6623 = vrot.lane.b32.xlu0 %v16519_v43, %s11150_s20  ;;  %v6212_v20 = vsub.f32 2.0, %v6196_v42  ;;  %v16523_v43 = vld [vmem:[#allocation28_spill] sm:$0xff] }
 0xf81   : > { %v6232_v37 = vmul.f32 %v10728_v2, %v6216_v29  ;;  %v16522_v29 = vld [vmem:[#allocation39_spill] sm:$0xff] }
 0xf82   : > { %v6228_v6 = vmul.f32 %v10730_v38, %v6212_v20  ;;  %9588 = vmatpush.xpose.msk.msra.mxu2 %vm890_vm0, %v14333_v18 }
 0xf83   : > { %v6248_v62 = vmul.f32 %v14375_v63, %v6232_v37  ;;  %v6093_v63 = vsub.f32 %v14339_v61, %v6067_v1  ;;  %v6169_v1 = vpop.xlane.xlu2 %6168 }
 0xf84   : > { %v6244_v39 = vmul.f32 %v14377_v35, %v6228_v6  ;;  %v6127_v35 = vmul.f32 1.442695, %v6097_v30  ;;  %v16524_v6 = vld [vmem:[#allocation50_spill] sm:$0xff] }
 0xf85   : > { %v6157_v4 = vpop.xlane.xlu1 %6156  ;;  %v6119_v16 = vmul.f32 1.442695, %v6093_v63 }
 0xf86   : > { %9572 = vmatmul.msk.f32.gmra.mxu2 %vm890_vm0, %v6244_v39  ;;  %10731 = vrcp.f32 %v6157_v4 }
 0xf87   : > { %9576 = vmatmul.msk.f32.gmra.mxu0 %vm890_vm0, %v6248_v62  ;;  %10733 = vpow2.f32 %v6127_v35  ;;  %v16525_v62 = vld [vmem:[#allocation32_spill] sm:$0xff] }
 0xf88   : > { %6621 = vrot.lane.b32.xlu0 %v16520_v21, %s11150_s20  ;;  %10735 = vpow2.f32 %v6119_v16 }
 0xf89   : > { %10737 = vpow2.f32 %v6129_v56 }
 0xf8a   : > { %10739 = vpow2.f32 %v6121_v25 }
 0xf8c   : > { %v10732_v58 = vpop.eup %10731 }
 0xf8d   : > { %v6203_v42 = vmul.f32 %v10732_v58, %v6157_v4  ;;  %v14454_v2 = vpop.eup %10733 }
 0xf8e   : > { %v14456_v27 = vpop.eup %10735 }
 0xf8f   : > { %v6219_v17 = vsub.f32 2.0, %v6203_v42  ;;  %v6161_v61 = vsel %vm890_vm0, %v14456_v27, 0.0  ;;  %v14462_v12 = vpop.eup %10737 }
 0xf90   : > { %v14464_v41 = vpop.eup %10739  ;;  %v6176_v44 = vsel %vm890_vm0, %v14462_v12, 0.0 }
 0xf91   : > { %v6235_v38 = vmul.f32 %v10732_v58, %v6219_v17  ;;  %v6164_v47 = vsel %vm890_vm0, %v14464_v41, 0.0 }
 0xf93   : > { %v6251_v18 = vmul.f32 %v14388_v46, %v6235_v38  ;;  %v6173_v46 = vsel %vm890_vm0, %v14454_v2, 0.0 }
 0xf95   : > { %9579 = vmatmul.msk.f32.vlgmr.msrb.gmra.mxu2 %vm890_vm0, %v6251_v18  ;;  %v16526_v18 = vld [vmem:[#allocation40_spill] sm:$0xff] }
 0xfa5   : > { %6174 = vadd.xlane.f32.xlu2 %v6173_v46 }
 0xfa7   : > { %6162 = vadd.xlane.f32.xlu1 %v6161_v61 }
 0xfaf   : > { %6177 = vadd.xlane.f32.xlu1 %v6176_v44 }
 0xfb2   : > { %6165 = vadd.xlane.f32.xlu0 %v6164_v47 }
 0xfbd   : > { %6662 = vrot.lane.b32.xlu2 %v16521_v51, %s11150_s20 }
 0xfbf   : > { %v6151_v20 = vpop.xlane.xlu0 %6150 }
 0xfc5   : > { %6697 = vrot.lane.b32.xlu2 %v16522_v29, %s11150_s20 }
 0xfc6   : > { %6617 = vrot.lane.b32.xlu0 %v16523_v43, %s11150_s20 }
 0xfc7   : > { %v6139_v37 = vpop.xlane.xlu2 %6138  ;;  %v6172_v58 = vpop.xlane.xlu0 %6171 }
 0xfc8   : > { %6660 = vrot.lane.b32.xlu1 %v16265_v36, %s11150_s20  ;;  %10741 = vrcp.f32 %v6139_v37 }
 0xfc9   : > { %10743 = vrcp.f32 %v6151_v20 }
 0xfca   : > { %10745 = vrcp.f32 %v6169_v1 }
 0xfcb   : > { %10747 = vrcp.f32 %v6172_v58 }
 0xfcd   : > { %6734 = vrot.lane.b32.xlu2 %v16524_v6, %s11150_s20 }
 0xfce   : > { %6619 = vrot.lane.b32.xlu0 %v16525_v62, %s11150_s20  ;;  %v10742_v39 = vpop.eup %10741 }
 0xfcf   : > { %v6154_v4 = vpop.xlane.xlu1 %6153  ;;  %v6197_v21 = vmul.f32 %v10742_v39, %v6139_v37  ;;  %v10744_v38 = vpop.eup %10743 }
 0xfd0   : > { %6656 = vrot.lane.b32.xlu1 %v16437_v59, %s11150_s20  ;;  %v10746_v36 = vpop.eup %10745  ;;  %10749 = vrcp.f32 %v6154_v4  ;;  %v6201_v16 = vmul.f32 %v10744_v38, %v6151_v20  ;;  %v16527_v59 = vld [vmem:[#allocation42_spill] sm:$0xff]  ;;  %v16529_v20 = vld [vmem:[#allocation48_spill] sm:$0xff] }
 0xfd1   : > { %v6213_v42 = vsub.f32 2.0, %v6197_v21  ;;  %v6207_v26 = vmul.f32 %v10746_v36, %v6169_v1  ;;  %v10748_v56 = vpop.eup %10747 }
 0xfd2   : > { %v6217_v25 = vsub.f32 2.0, %v6201_v16  ;;  %v6208_v6 = vmul.f32 %v10748_v56, %v6172_v58 }
 0xfd3   : > { %v6229_v17 = vmul.f32 %v10742_v39, %v6213_v42  ;;  %v6223_v61 = vsub.f32 2.0, %v6207_v26 }
 0xfd4   : > { %v6233_v1 = vmul.f32 %v10744_v38, %v6217_v25  ;;  %v6224_v38 = vsub.f32 2.0, %v6208_v6 }
 0xfd5   : > { %6777 = vrot.lane.b32.xlu2 %v16433_v10, %s11150_s20  ;;  %v6245_v30 = vmul.f32 %v14403_v3, %v6229_v17  ;;  %v6239_v37 = vmul.f32 %v10746_v36, %v6223_v61 }
 0xfd6   : > { %6701 = vrot.lane.b32.xlu0 %v16526_v18, %s11150_s20  ;;  %v10750_v46 = vpop.eup %10749 }
 0xfd7   : > { %v6142_v63 = vpop.xlane.xlu1 %6141  ;;  %v6160_v35 = vpop.xlane.xlu2 %6159  ;;  %9573 = vmatmul.msk.f32.vlgmr.msrb.gmra.mxu3 %vm890_vm0, %v6245_v30  ;;  %v6202_v29 = vmul.f32 %v10750_v46, %v6154_v4 }
 0xfd8   : > { %10751 = vrcp.f32 %v6142_v63  ;;  %6695 = vrot.lane.b32.xlu1 %v16527_v59, %s11150_s20  ;;  %9591 = vmatpush.xpose.msk.msrb.mxu3 %vm890_vm0, %v14341_v5  ;;  %v16528_v5 = vld [vmem:[#allocation36_spill] sm:$0xff] }
 0xfd9   : > { %10753 = vrcp.f32 %v6160_v35  ;;  %v6218_v30 = vsub.f32 2.0, %v6202_v29 }
 0xfda   : > { %v9996_v10 = vpop.permute.xlu0 %9995 }
 0xfdb   : > { %v9998_v3 = vunpack.i.h.bf16 %v9996_v10  ;;  %v9997_v60 = vunpack.i.l.bf16 %v9996_v10 }
 0xfdc   : > { %9592 = vmatpush.xpose.msk.msrb.mxu3 %vm890_vm0, %v14355_v55 }
 0xfdd   : > { %6390 = vmatpush.msrb.mxu1 %v9997_v60  ;;  %6495 = vmatpush.msrb.mxu0 %v9998_v3 }
 0xfde   : > { %v10752_v44 = vpop.eup %10751  ;;  %6818 = vrot.lane.b32.xlu2 %v16444_v45, %s11150_s20  ;;  %6699 = vrot.lane.b32.xlu0 %v16528_v5, %s11150_s20  ;;  %v6249_v45 = vmul.f32 %v14395_v31, %v6233_v1  ;;  %v6234_v31 = vmul.f32 %v10750_v46, %v6218_v30 }
 0xfdf   : > { %v10754_v47 = vpop.eup %10753  ;;  %v6198_v51 = vmul.f32 %v10752_v44, %v6142_v63  ;;  %v6255_v63 = vmul.f32 %v14384_v8, %v6239_v37  ;;  %v6240_v8 = vmul.f32 %v10748_v56, %v6224_v38 }
 0xfe0   : > { %v6204_v43 = vmul.f32 %v10754_v47, %v6160_v35  ;;  %6740 = vrot.lane.b32.xlu1 %v16529_v20, %s11150_s20 }
 0xfe1   : > { %v6214_v55 = vsub.f32 2.0, %v6198_v51 }
 0xfe2   : > { %v6220_v62 = vsub.f32 2.0, %v6204_v43  ;;  %v10001_v39 = vpop.permute.xlu0 %10000 }
 0xfe3   : > { %v6230_v21 = vmul.f32 %v10752_v44, %v6214_v55  ;;  %v10003_v42 = vunpack.i.h.bf16 %v10001_v39  ;;  %v10002_v17 = vunpack.i.l.bf16 %v10001_v39 }
 0xfe4   : > { %v6236_v18 = vmul.f32 %v10754_v47, %v6220_v62 }
 0xfe5   : > { %6391 = vmatpush.msrb.mxu1 %v10002_v17  ;;  %6496 = vmatpush.msrb.mxu0 %v10003_v42  ;;  %v6246_v4 = vmul.f32 %v14414_v23, %v6230_v21  ;;  %v16530_v23 = vld [vmem:[#allocation49_spill] sm:$0xff] }
 0xfe6   : > { %6814 = vrot.lane.b32.xlu2 %v16447_v11, %s11150_s20  ;;  %9577 = vmatmul.msk.f32.vlgmr.msrb.gmra.mxu1 %vm890_vm0, %v6249_v45  ;;  %v6252_v58 = vmul.f32 %v14416_v54, %v6236_v18  ;;  %v6250_v11 = vmul.f32 %v14410_v15, %v6234_v31  ;;  %v6256_v54 = vmul.f32 %v14400_v57, %v6240_v8  ;;  %v16532_v57 = vld [vmem:[#allocation53_spill] sm:$0xff] }
 0xfe7   : > { %6658 = vrot.lane.b32.xlu0 %v16443_v33, %s11150_s20  ;;  %9583 = vmatmul.msk.f32.vlgmr.msrb.gmra.mxu0 %vm890_vm0, %v6255_v63  ;;  %v16531_v33 = vld [vmem:[#allocation43_spill] sm:$0xff] }
 0xfe8   : > { %9574 = vmatmul.msk.f32.gmra.mxu3 %vm890_vm0, %v6246_v4  ;;  %9580 = vmatmul.msk.f32.gmra.mxu2 %vm890_vm0, %v6252_v58 }
 0xfe9   : > { %6736 = vrot.lane.b32.xlu1 %v16530_v23, %s11150_s20 }
 0xfea   : > { %v14516_v36 = vpop.permute.xlu0 %6580 }
 0xfee   : > { %9578 = vmatmul.msk.f32.gmra.mxu1 %vm890_vm0, %v6250_v11 }
 0xfef   : > { %6738 = vrot.lane.b32.xlu0 %v16531_v33, %s11150_s20  ;;  %9584 = vmatmul.msk.f32.gmra.mxu0 %vm890_vm0, %v6256_v54  ;;  %v10006_v35 = vpop.permute.xlu1 %10005 }
 0xff0   : > { %v10007_v16 = vunpack.i.l.bf16 %v10006_v35  ;;  %9589 = vmatmul.msk.f32.vlgmr.msra.gmra.mxu2 %vm890_vm0, %v14345_v14  ;;  %v10008_v59 = vunpack.i.h.bf16 %v10006_v35 }
 0xff1   : > { %6773 = vrot.lane.b32.xlu1 %v16445_v24, %s11150_s20  ;;  %v6579_v24 = vpop.permute.xlu2 %6578 }
 0xff2   : > { %v6624_v26 = vpop.permute.xlu0 %6623  ;;  %6530 = vmatpush.msra.mxu1 %v10007_v16 }
 0xff3   : > { %9595 = vmatpush.xpose.msk.msra.mxu0 %vm890_vm0, %v6624_v26 }
 0xff4   : > { %6531 = vmatpush.msra.mxu1 %v10008_v59 }
 0xff7   : > { %6779 = vrot.lane.b32.xlu0 %v16532_v57, %s11150_s20 }
 0xff8   : > { %9590 = vmatmul.msk.f32.gmra.mxu2 %vm890_vm0, %v14319_v13 }
 0xff9   : > { %6816 = vrot.lane.b32.xlu1 %v16438_v32, %s11150_s20 }
 0xffa   : > { %v6622_v15 = vpop.permute.xlu0 %6621 }
 0xffb   : > { %9596 = vmatpush.xpose.msk.msra.mxu0 %vm890_vm0, %v6622_v15 }
 0xfff   : > { %6775 = vrot.lane.b32.xlu0 %v16449_v52, %s11150_s20 }
0x1000   : > { %v14558_v38 = vpop.f32.mrf.mxu2 }
0x1007   : > { %6812 = vrot.lane.b32.xlu0 %v16451_v49, %s11150_s20 }
0x1009   : > { %v14564_v8 = vpop.f32.mrf.mxu2 }
0x1018   : > { %v6175_v14 = vpop.xlane.xlu2 %6174  ;;  %v14568_v11 = vpop.f32.mrf.mxu2 }
0x1019   : > { %10755 = vrcp.f32 %v6175_v14 }
0x101a   : > { %v6163_v10 = vpop.xlane.xlu1 %6162 }
0x101b   : > { %10757 = vrcp.f32 %v6163_v10 }
0x101f   : > { %v10756_v3 = vpop.eup %10755 }
0x1020   : > { %v6209_v60 = vmul.f32 %v10756_v3, %v6175_v14  ;;  %v6663_v13 = vpop.permute.xlu2 %6662 }
0x1021   : > { %v10758_v56 = vpop.eup %10757  ;;  %9599 = vmatpush.xpose.msk.msrb.mxu1 %vm890_vm0, %v6663_v13 }
0x1022   : > { %v6225_v32 = vsub.f32 2.0, %v6209_v60  ;;  %v6205_v25 = vmul.f32 %v10758_v56, %v6163_v10  ;;  %v6178_v46 = vpop.xlane.xlu1 %6177 }
0x1023   : > { %10759 = vrcp.f32 %v6178_v46 }
0x1024   : > { %v6241_v61 = vmul.f32 %v10756_v3, %v6225_v32  ;;  %v6221_v52 = vsub.f32 2.0, %v6205_v25 }
0x1025   : > { %v6166_v44 = vpop.xlane.xlu0 %6165 }
0x1026   : > { %v6257_v49 = vmul.f32 %v14454_v2, %v6241_v61  ;;  %v6237_v47 = vmul.f32 %v10758_v56, %v6221_v52  ;;  %10761 = vrcp.f32 %v6166_v44 }
0x1028   : > { %v6253_v51 = vmul.f32 %v14456_v27, %v6237_v47  ;;  %9585 = vmatmul.msk.f32.vlgmr.msra.gmra.mxu1 %vm890_vm0, %v6257_v49  ;;  %v6698_v5 = vpop.permute.xlu2 %6697 }
0x1029   : > { %v10760_v1 = vpop.eup %10759 }
0x102a   : > { %v6210_v29 = vmul.f32 %v10760_v1, %v6178_v46  ;;  %9581 = vmatmul.msk.f32.vlgmr.msra.gmra.mxu3 %vm890_vm0, %v6253_v51 }
0x102c   : > { %v10762_v43 = vpop.eup %10761  ;;  %v6226_v20 = vsub.f32 2.0, %v6210_v29 }
0x102d   : > { %v6206_v37 = vmul.f32 %v10762_v43, %v6166_v44 }
0x102e   : > { %v6242_v6 = vmul.f32 %v10760_v1, %v6226_v20 }
0x102f   : > { %v6222_v55 = vsub.f32 2.0, %v6206_v37 }
0x1030   : > { %v6735_v62 = vpop.permute.xlu2 %6734  ;;  %v6258_v39 = vmul.f32 %v14462_v12, %v6242_v6 }
0x1031   : > { %v6238_v2 = vmul.f32 %v10762_v43, %v6222_v55  ;;  %v16533_v55 = vld [vmem:[#allocation45_spill] sm:$0xff] }
0x1032   : > { %9586 = vmatmul.msk.f32.gmra.mxu1 %vm890_vm0, %v6258_v39 }
0x1033   : > { %v6254_v27 = vmul.f32 %v14464_v41, %v6238_v2 }
0x1035   : > { %9582 = vmatmul.msk.f32.gmra.mxu3 %vm890_vm0, %v6254_v27 }
0x1038   : > { %v6618_v21 = vpop.permute.xlu0 %6617  ;;  %v6778_v42 = vpop.permute.xlu2 %6777 }
0x1039   : > { %9597 = vmatmul.msk.f32.vlgmr.msra.gmra.mxu0 %vm890_vm0, %v6618_v21 }
0x103a   : > { %v6661_v17 = vpop.permute.xlu1 %6660 }
0x103b   : > { %9600 = vmatpush.xpose.msk.msrb.mxu1 %vm890_vm0, %v6661_v17 }
0x103d   : > { %9593 = vmatmul.msk.f32.vlgmr.msrb.gmra.mxu3 %vm890_vm0, %v6579_v24  ;;  %v14585_v24 = vpop.f32.mrf.mxu0 }
0x1040   : > { %v6620_v45 = vpop.permute.xlu0 %6619  ;;  %v6819_v30 = vpop.permute.xlu2 %6818 }
0x1041   : > { %9598 = vmatmul.msk.f32.gmra.mxu0 %vm890_vm0, %v6620_v45  ;;  %9615 = vmatpush.xpose.msk.msra.mxu1 %vm890_vm0, %v6819_v30 }
0x1042   : > { %v6657_v12 = vpop.permute.xlu1 %6656 }
0x1043   : > { %9601 = vmatmul.msk.f32.vlgmr.msrb.gmra.mxu1 %vm890_vm0, %v6657_v12 }
0x1045   : > { %9594 = vmatmul.msk.f32.gmra.mxu3 %vm890_vm0, %v14516_v36  ;;  %v14587_v14 = vpop.f32.mrf.mxu0 }
0x1048   : > { %v6702_v41 = vpop.permute.xlu0 %6701  ;;  %v6815_v15 = vpop.permute.xlu2 %6814 }
0x1049   : > { %9603 = vmatpush.xpose.msk.msrb.mxu2 %vm890_vm0, %v6702_v41 }
0x104a   : > { %v6696_v18 = vpop.permute.xlu1 %6695 }
0x1050   : > { %v6700_v63 = vpop.permute.xlu0 %6699 }
0x1051   : > { %9604 = vmatpush.xpose.msk.msrb.mxu2 %vm890_vm0, %v6700_v63 }
0x1052   : > { %v6741_v4 = vpop.permute.xlu1 %6740 }
0x1053   : > { %9607 = vmatpush.xpose.msk.msra.mxu3 %vm890_vm0, %v6741_v4 }
0x1054   : > { %9605 = vmatmul.msk.f32.vlgmr.msrb.gmra.mxu2 %vm890_vm0, %v6696_v18 }
0x1059   : > { %v6659_v58 = vpop.permute.xlu0 %6658 }
0x105a   : > { %9602 = vmatmul.msk.f32.gmra.mxu1 %vm890_vm0, %v6659_v58  ;;  %v14599_v32 = vpop.f32.mrf.mxu3 }
0x105b   : > { %v6737_v31 = vpop.permute.xlu1 %6736 }
0x105c   : > { %9606 = vmatmul.msk.f32.gmra.mxu2 %vm890_vm0, %v6698_v5 }
0x1061   : > { %v6739_v23 = vpop.permute.xlu0 %6738 }
0x1062   : > { %9608 = vmatpush.xpose.msk.msra.mxu3 %vm890_vm0, %v6739_v23 }
0x1063   : > { %v6774_v36 = vpop.permute.xlu1 %6773  ;;  %v14589_v10 = vpop.f32.mrf.mxu1 }
0x1064   : > { %v14591_v3 = vpop.f32.mrf.mxu0 }
0x1065   : > { %9609 = vmatmul.msk.f32.vlgmr.msra.gmra.mxu3 %vm890_vm0, %v6735_v62  ;;  %v16534_v62 = vld [vmem:[#allocation63_spill] sm:$0xff] }
0x1066   : > { %v10014_v39 = vpack.i.bf16 %v16534_v62, %v16533_v55 }
0x1069   : > { %v6780_v54 = vpop.permute.xlu0 %6779 }
0x106a   : > { %9611 = vmatpush.xpose.msk.msrb.mxu0 %vm890_vm0, %v6780_v54 }
0x106b   : > { %v6817_v33 = vpop.permute.xlu1 %6816  ;;  %v14572_v35 = vpop.f32.mrf.mxu2 }
0x106c   : > { %9616 = vmatpush.xpose.msk.msra.mxu1 %vm890_vm0, %v6817_v33  ;;  %v14593_v60 = vpop.f32.mrf.mxu1  ;;  %v14595_v13 = vpop.f32.mrf.mxu0 }
0x106d   : > { %9610 = vmatmul.msk.f32.gmra.mxu3 %vm890_vm0, %v6737_v31  ;;  %v14606_v44 = vpop.f32.mrf.mxu3 }
0x106e   : > { %9612 = vmatpush.xpose.msk.msrb.mxu0 %vm890_vm0, %v6778_v42 }
0x1071   : > { %v6776_v16 = vpop.permute.xlu0 %6775  ;;  %9613 = vmatmul.msk.f32.vlgmr.msrb.gmra.mxu0 %vm890_vm0, %v6774_v36 }
0x1073   : > { %v14578_v59 = vpop.f32.mrf.mxu2 }
0x1074   : > { %v6851_v26 = vsel %vm890_vm0, %v14578_v59, -inf }
0x1075   : > { %6852 = vmax.xlane.f32.xlu1 %v6851_v26 }
0x1079   : > { %v6813_v57 = vpop.permute.xlu0 %6812  ;;  %9614 = vmatmul.msk.f32.gmra.mxu0 %vm890_vm0, %v6776_v16 }
0x107a   : > { %9617 = vmatmul.msk.f32.vlgmr.msra.gmra.mxu1 %vm890_vm0, %v6813_v57 }
0x107b   : > { %v14604_v52 = vpop.f32.mrf.mxu2 }
0x107c   : > { %v6854_v51 = vsel %vm890_vm0, %v14604_v52, -inf }
0x1082   : > { %9618 = vmatmul.msk.f32.gmra.mxu1 %vm890_vm0, %v6815_v15 }
0x10a5   : > { %v14597_v56 = vpop.f32.mrf.mxu1 }
0x10ad   : > { %v14612_v29 = vpop.f32.mrf.mxu3 }
0x10af   : > { %v14602_v61 = vpop.f32.mrf.mxu1 }
0x10b6   : > { %v6650_v25 = vpop.f32.mrf.mxu0 }
0x10b7   : > { %v6863_v46 = vsel %vm890_vm0, %v6650_v25, -inf }
0x10b8   : > { %6864 = vmax.xlane.f32.xlu0 %v6863_v46  ;;  %v14614_v43 = vpop.f32.mrf.mxu3 }
0x10be   : > { %v6653_v49 = vpop.f32.mrf.mxu0 }
0x10bf   : > { %v6866_v47 = vsel %vm890_vm0, %v6653_v49, -inf }
0x10c0   : > { %6867 = vmax.xlane.f32.xlu2 %v6866_v47  ;;  %6855 = vmax.xlane.f32.xlu0 %v6854_v51  ;;  %v6689_v5 = vpop.f32.mrf.mxu1  ;;  %v14618_v37 = vpop.f32.mrf.mxu3 }
0x10c1   : > { %v6869_v1 = vsel %vm890_vm0, %v6689_v5, -inf  ;;  %v6857_v2 = vsel %vm890_vm0, %v14618_v37, -inf }
0x10c2   : > { %6870 = vmax.xlane.f32.xlu1 %v6869_v1 }
0x10c8   : > { %v14627_v27 = vpop.f32.mrf.mxu3 }
0x10c9   : > { %v6860_v18 = vsel %vm890_vm0, %v14627_v27, -inf }
0x10d7   : > { %v14616_v20 = vpop.f32.mrf.mxu1  ;;  %v14641_v12 = vpop.f32.mrf.mxu2 }
0x10d8   : > { %v6872_v6 = vsel %vm890_vm0, %v14616_v20, -inf  ;;  %v6875_v41 = vsel %vm890_vm0, %v14641_v12, -inf }
0x10d9   : > { %6873 = vmax.xlane.f32.xlu2 %v6872_v6 }
0x10db   : > { %10015 = vrot.lane.b32.xlu1 %v10014_v39, %s11150_s20 }
0x10df   : > { %v14671_v39 = vpop.f32.mrf.mxu2 }
0x10e1   : > { %6858 = vmax.xlane.f32.xlu2 %v6857_v2 }
0x10e8   : > { %v14629_v21 = vpop.f32.mrf.mxu3  ;;  %v6853_v36 = vpop.xlane.xlu1 %6852 }
0x10e9   : > { %v6899_v26 = vsub.f32 %v14578_v59, %v6853_v36 }
0x10eb   : > { %v6915_v15 = vmul.f32 1.442695, %v6899_v26 }
0x10ee   : > { %v14631_v42 = vpop.f32.mrf.mxu0 }
0x10ef   : > { %v6887_v17 = vsel %vm890_vm0, %v14631_v42, -inf }
0x10f0   : > { %6888 = vmax.xlane.f32.xlu0 %v6887_v17  ;;  %v14635_v45 = vpop.f32.mrf.mxu3 }
0x10f1   : > { %v6884_v30 = vsel %vm890_vm0, %v14635_v45, -inf }
0x10f6   : > { %v14687_v26 = vpop.f32.mrf.mxu0 }
0x10f7   : > { %v14647_v63 = vpop.f32.mrf.mxu1 }
0x10f8   : > { %6885 = vmax.xlane.f32.xlu0 %v6884_v30  ;;  %v6893_v4 = vsel %vm890_vm0, %v14647_v63, -inf }
0x10f9   : > { %10010 = vrot.lane.b32.xlu2 %v16466_v7, %s11150_s20 }
0x10ff   : > { %v14658_v46 = vpop.f32.mrf.mxu1 }
0x1105   : > { %6876 = vmax.xlane.f32.xlu1 %v6875_v41 }
0x110d   : > { %6861 = vmax.xlane.f32.xlu1 %v6860_v18 }
0x1122   : > { %6894 = vmax.xlane.f32.xlu2 %v6893_v4  ;;  %v6878_v4 = vsel %vm890_vm0, %v14671_v39, -inf }
0x1126   : > { %10020 = vrot.lane.b32.xlu1 %v16464_v0, %s11150_s20 }
0x112b   : > { %v6865_v7 = vpop.xlane.xlu0 %6864 }
0x112c   : > { %v6903_v58 = vsub.f32 %v6650_v25, %v6865_v7 }
0x112e   : > { %v6923_v31 = vmul.f32 1.442695, %v6903_v58 }
0x1130   : > { %10763 = vpow2.f32 %v6923_v31 }
0x1133   : > { %v6868_v23 = vpop.xlane.xlu2 %6867  ;;  %v6856_v1 = vpop.xlane.xlu0 %6855 }
0x1134   : > { %v6904_v54 = vsub.f32 %v6653_v49, %v6868_v23  ;;  %v6896_v49 = vsel %vm890_vm0, %v14658_v46, -inf  ;;  %v6900_v55 = vsub.f32 %v14604_v52, %v6856_v1 }
0x1135   : > { %v6871_v0 = vpop.xlane.xlu1 %6870 }
0x1136   : > { %v14653_v33 = vpop.eup %10763  ;;  %v6925_v16 = vmul.f32 1.442695, %v6904_v54  ;;  %v6905_v47 = vsub.f32 %v6689_v5, %v6871_v0  ;;  %v6917_v5 = vmul.f32 1.442695, %v6900_v55 }
0x1137   : > { %v6959_v57 = vsel %vm890_vm0, %v14653_v33, 0.0 }
0x1138   : > { %6960 = vadd.xlane.f32.xlu2 %v6959_v57  ;;  %10765 = vpow2.f32 %v6925_v16  ;;  %v6927_v51 = vmul.f32 1.442695, %v6905_v47 }
0x1139   : > { %10767 = vpow2.f32 %v6915_v15 }
0x113a   : > { %10769 = vpow2.f32 %v6927_v51 }
0x113b   : > { %10771 = vpow2.f32 %v6917_v5 }
0x113e   : > { %v14660_v25 = vpop.eup %10765 }
0x113f   : > { %v6962_v59 = vsel %vm890_vm0, %v14660_v25, 0.0  ;;  %v14666_v6 = vpop.eup %10767 }
0x1140   : > { %6897 = vmax.xlane.f32.xlu2 %v6896_v49  ;;  %6963 = vadd.xlane.f32.xlu0 %v6962_v59  ;;  %v6947_v62 = vsel %vm890_vm0, %v14666_v6, 0.0  ;;  %v14673_v17 = vpop.eup %10769 }
0x1141   : > { %v6965_v7 = vsel %vm890_vm0, %v14673_v17, 0.0  ;;  %v14680_v23 = vpop.eup %10771 }
0x1142   : > { %v6950_v54 = vsel %vm890_vm0, %v14680_v23, 0.0 }
0x1148   : > { %6948 = vadd.xlane.f32.xlu0 %v6947_v62 }
0x114c   : > { %v6874_v2 = vpop.xlane.xlu2 %6873 }
0x114d   : > { %v10016_v30 = vpop.permute.xlu1 %10015  ;;  %v6906_v18 = vsub.f32 %v14616_v20, %v6874_v2  ;;  %v6881_v20 = vsel %vm890_vm0, %v14629_v21, -inf }
0x114e   : > { %v10017_v41 = vunpack.i.l.bf16 %v10016_v30  ;;  %v10018_v52 = vunpack.i.h.bf16 %v10016_v30 }
0x114f   : > { %v6929_v58 = vmul.f32 1.442695, %v6906_v18 }
0x1150   : > { %7136 = vmatpush.msrb.mxu3 %v10017_v41  ;;  %6879 = vmax.xlane.f32.xlu1 %v6878_v4 }
0x1151   : > { %6966 = vadd.xlane.f32.xlu0 %v6965_v7  ;;  %10773 = vpow2.f32 %v6929_v58 }
0x1152   : > { %7137 = vmatpush.msrb.mxu3 %v10018_v52 }
0x1154   : > { %v6859_v31 = vpop.xlane.xlu2 %6858 }
0x1155   : > { %v6901_v36 = vsub.f32 %v14618_v37, %v6859_v31  ;;  %v6890_v37 = vsel %vm890_vm0, %v14687_v26, -inf }
0x1157   : > { %v6919_v16 = vmul.f32 1.442695, %v6901_v36  ;;  %v14689_v15 = vpop.eup %10773 }
0x1158   : > { %6882 = vmax.xlane.f32.xlu1 %v6881_v20  ;;  %v6968_v49 = vsel %vm890_vm0, %v14689_v15, 0.0 }
0x1159   : > { %6951 = vadd.xlane.f32.xlu0 %v6950_v54  ;;  %10775 = vpow2.f32 %v6919_v16  ;;  %v16535_v16 = vld [vmem:[#allocation37_spill] sm:$0xff] }
0x115c   : > { %v10011_v57 = vpop.permute.xlu2 %10010 }
0x115d   : > { %v10012_v0 = vunpack.i.l.bf16 %v10011_v57  ;;  %v10013_v47 = vunpack.i.h.bf16 %v10011_v57  ;;  %v16536_v57 = vld [vmem:[#allocation38_spill] sm:$0xff] }
0x115f   : > { %7101 = vmatpush.msra.mxu2 %v10012_v0  ;;  %v14697_v51 = vpop.eup %10775  ;;  %v16537_v0 = vpack.i.bf16 %v16535_v16, %v16536_v57 }
0x1160   : > { %6891 = vmax.xlane.f32.xlu1 %v6890_v37  ;;  %v6953_v1 = vsel %vm890_vm0, %v14697_v51, 0.0 }
0x1161   : > { %6969 = vadd.xlane.f32.xlu0 %v6968_v49  ;;  %7102 = vmatpush.msra.mxu2 %v10013_v47 }
0x1163   : > { %v14695_v59 = vpop.xlane.xlu0 %6888 }
0x1169   : > { %6954 = vadd.xlane.f32.xlu0 %v6953_v1 }
0x116b   : > { %v6886_v55 = vpop.xlane.xlu0 %6885 }
0x116c   : > { %v6910_v62 = vsub.f32 %v14635_v45, %v6886_v55 }
0x116e   : > { %v6937_v5 = vmul.f32 1.442695, %v6910_v62 }
0x1170   : > { %10777 = vpow2.f32 %v6937_v5 }
0x1176   : > { %v14702_v2 = vpop.eup %10777 }
0x1177   : > { %v6980_v30 = vsel %vm890_vm0, %v14702_v2, 0.0 }
0x1178   : > { %6981 = vadd.xlane.f32.xlu1 %v6980_v30  ;;  %v6877_v41 = vpop.xlane.xlu1 %6876 }
0x1179   : > { %v6907_v18 = vsub.f32 %v14641_v12, %v6877_v41 }
0x117b   : > { %v6931_v4 = vmul.f32 1.442695, %v6907_v18 }
0x117d   : > { %10779 = vpow2.f32 %v6931_v4 }
0x1180   : > { %v6862_v52 = vpop.xlane.xlu1 %6861 }
0x1181   : > { %v6902_v7 = vsub.f32 %v14627_v27, %v6862_v52 }
0x1183   : > { %v14708_v58 = vpop.eup %10779  ;;  %v6921_v31 = vmul.f32 1.442695, %v6902_v7 }
0x1184   : > { %v6971_v45 = vsel %vm890_vm0, %v14708_v58, 0.0 }
0x1185   : > { %10781 = vpow2.f32 %v6921_v31  ;;  %6972 = vadd.xlane.f32.xlu0 %v6971_v45 }
0x118b   : > { %v14712_v36 = vpop.eup %10781 }
0x118c   : > { %v6956_v20 = vsel %vm890_vm0, %v14712_v36, 0.0 }
0x118d   : > { %6957 = vadd.xlane.f32.xlu0 %v6956_v20 }
0x1191   : > { %10035 = vrot.lane.b32.xlu1 %v16456_v28, %s11150_s20 }
0x1195   : > { %v14722_v47 = vpop.xlane.xlu2 %6894 }
0x1198   : > { %v10021_v12 = vpop.permute.xlu1 %10020 }
0x1199   : > { %v10022_v54 = vunpack.i.l.bf16 %v10021_v12  ;;  %v10023_v27 = vunpack.i.h.bf16 %v10021_v12 }
0x119b   : > { %7171 = vmatpush.msra.mxu0 %v10022_v54 }
0x119d   : > { %7172 = vmatpush.msra.mxu0 %v10023_v27 }
0x11a1   : > { %10025 = vrot.lane.b32.xlu0 %v16537_v0, %s11150_s20 }
0x11ab   : > { %v6961_v37 = vpop.xlane.xlu2 %6960 }
0x11ac   : > { %10783 = vrcp.f32 %v6961_v37 }
0x11b2   : > { %v10784_v49 = vpop.eup %10783 }
0x11b3   : > { %v7015_v1 = vmul.f32 %v10784_v49, %v6961_v37  ;;  %v6964_v55 = vpop.xlane.xlu0 %6963 }
0x11b4   : > { %10785 = vrcp.f32 %v6964_v55 }
0x11b5   : > { %v7031_v62 = vsub.f32 2.0, %v7015_v1 }
0x11b7   : > { %v7047_v28 = vmul.f32 %v10784_v49, %v7031_v62 }
0x11b9   : > { %v7063_v5 = vmul.f32 %v14653_v33, %v7047_v28 }
0x11ba   : > { %v10786_v30 = vpop.eup %10785 }
0x11bb   : > { %9623 = vmatmul.msk.f32.vlgmr.msra.gmra.mxu0 %vm890_vm0, %v7063_v5  ;;  %v7016_v41 = vmul.f32 %v10786_v30, %v6964_v55  ;;  %v6949_v18 = vpop.xlane.xlu0 %6948 }
0x11bc   : > { %10787 = vrcp.f32 %v6949_v18 }
0x11bd   : > { %v7032_v4 = vsub.f32 2.0, %v7016_v41 }
0x11bf   : > { %v7048_v52 = vmul.f32 %v10786_v30, %v7032_v4 }
0x11c1   : > { %v7064_v7 = vmul.f32 %v14660_v25, %v7048_v52 }
0x11c2   : > { %v10788_v31 = vpop.eup %10787 }
0x11c3   : > { %v6880_v45 = vpop.xlane.xlu1 %6879  ;;  %v7011_v20 = vmul.f32 %v10788_v31, %v6949_v18  ;;  %9624 = vmatmul.msk.f32.gmra.mxu0 %vm890_vm0, %v7064_v7 }
0x11c4   : > { %v6908_v12 = vsub.f32 %v14671_v39, %v6880_v45  ;;  %v14728_v54 = vpop.xlane.xlu0 %6966 }
0x11c5   : > { %v7027_v33 = vsub.f32 2.0, %v7011_v20 }
0x11c6   : > { %v6933_v27 = vmul.f32 1.442695, %v6908_v12 }
0x11c7   : > { %v7043_v16 = vmul.f32 %v10788_v31, %v7027_v33  ;;  %v16538_v33 = vld [vmem:[#allocation44_spill] sm:$0xff] }
0x11c8   : > { %10789 = vpow2.f32 %v6933_v27  ;;  %v16539_v27 = vld [vmem:[#allocation46_spill] sm:$0xff] }
0x11c9   : > { %v7059_v57 = vmul.f32 %v14666_v6, %v7043_v16  ;;  %v10029_v16 = vpack.i.bf16 %v16539_v27, %v16538_v33 }
0x11cb   : > { %v6883_v0 = vpop.xlane.xlu1 %6882  ;;  %9619 = vmatmul.msk.f32.vlgmr.msra.gmra.mxu2 %vm890_vm0, %v7059_v57 }
0x11cc   : > { %v6909_v37 = vsub.f32 %v14629_v21, %v6883_v0  ;;  %v6952_v49 = vpop.xlane.xlu0 %6951  ;;  %v16540_v0 = vld [vmem:[#allocation56_spill] sm:$0xff] }
0x11cd   : > { %10791 = vrcp.f32 %v6952_v49 }
0x11ce   : > { %v14734_v25 = vpop.eup %10789  ;;  %v6935_v39 = vmul.f32 1.442695, %v6909_v37  ;;  %v16541_v37 = vld [vmem:[#allocation58_spill] sm:$0xff] }
0x11cf   : > { %v6974_v1 = vsel %vm890_vm0, %v14734_v25, 0.0 }
0x11d0   : > { %10793 = vpow2.f32 %v6935_v39  ;;  %6975 = vadd.xlane.f32.xlu2 %v6974_v1  ;;  %v16542_v39 = vld [vmem:[#allocation74_spill] sm:$0xff] }
0x11d1   : > { %v16543_v1 = vld [vmem:[#allocation86_spill] sm:$0xff] }
0x11d3   : > { %v10792_v55 = vpop.eup %10791  ;;  %v6892_v62 = vpop.xlane.xlu1 %6891 }
0x11d4   : > { %v7012_v28 = vmul.f32 %v10792_v55, %v6952_v49  ;;  %v6912_v6 = vsub.f32 %v14687_v26, %v6892_v62  ;;  %v14739_v5 = vpop.xlane.xlu0 %6969  ;;  %v10039_v49 = vpack.i.bf16 %v16541_v37, %v16540_v0  ;;  %v10099_v0 = vpack.i.bf16 %v14301_v50, %v14297_v40 }
0x11d6   : > { %v14741_v21 = vpop.eup %10793  ;;  %v7028_v30 = vsub.f32 2.0, %v7012_v28  ;;  %v6941_v41 = vmul.f32 1.442695, %v6912_v6  ;;  %v10069_v6 = vpack.i.bf16 %v14270_v53, %v14259_v48  ;;  %v16544_v48 = vld [vmem:[#allocation115_spill] sm:$0xff]  ;;  %v16545_v53 = vld [vmem:[#allocation101_spill] sm:$0xff] }
0x11d7   : > { %v6977_v18 = vsel %vm890_vm0, %v14741_v21, 0.0 }
0x11d8   : > { %v7044_v4 = vmul.f32 %v10792_v55, %v7028_v30  ;;  %10795 = vpow2.f32 %v6941_v41  ;;  %6978 = vadd.xlane.f32.xlu0 %v6977_v18  ;;  %v10049_v55 = vpack.i.bf16 %v16543_v1, %v16542_v39 }
0x11da   : > { %v7060_v52 = vmul.f32 %v14680_v23, %v7044_v4  ;;  %v6913_v4 = vsub.f32 %v14647_v63, %v14722_v47 }
0x11dc   : > { %v6955_v7 = vpop.xlane.xlu0 %6954  ;;  %9620 = vmatmul.msk.f32.gmra.mxu2 %vm890_vm0, %v7060_v52 }
0x11dd   : > { %10797 = vrcp.f32 %v6955_v7 }
0x11de   : > { %v14747_v31 = vpop.eup %10795 }
0x11df   : > { %v6986_v26 = vsel %vm890_vm0, %v14747_v31, 0.0 }
0x11e0   : > { %6987 = vadd.xlane.f32.xlu1 %v6986_v26 }
0x11e3   : > { %v10798_v45 = vpop.eup %10797 }
0x11e4   : > { %v7013_v20 = vmul.f32 %v10798_v45, %v6955_v7  ;;  %v6898_v7 = vpop.xlane.xlu2 %6897 }
0x11e6   : > { %v7029_v12 = vsub.f32 2.0, %v7013_v20  ;;  %v10084_v20 = vpack.i.bf16 %v16545_v53, %v16544_v48  ;;  %v16551_v53 = vld [vmem:[#allocation71_spill] sm:$0xff] }
0x11e8   : > { %v7045_v57 = vmul.f32 %v10798_v45, %v7029_v12  ;;  %10030 = vrot.lane.b32.xlu2 %v10029_v16, %s11150_s20  ;;  %v6914_v12 = vsub.f32 %v14658_v46, %v6898_v7 }
0x11ea   : > { %v7061_v23 = vmul.f32 %v14697_v51, %v7045_v57  ;;  %v6911_v51 = vsub.f32 %v14631_v42, %v14695_v59  ;;  %v6943_v59 = vmul.f32 1.442695, %v6913_v4  ;;  %v6945_v27 = vmul.f32 1.442695, %v6914_v12 }
0x11eb   : > { %v14764_v28 = vpop.xlane.xlu1 %6981 }
0x11ec   : > { %9621 = vmatmul.msk.f32.vlgmr.msrb.gmra.mxu3 %vm890_vm0, %v7061_v23  ;;  %10040 = vrot.lane.b32.xlu0 %v10039_v49, %s11150_s20  ;;  %v6939_v41 = vmul.f32 1.442695, %v6911_v51  ;;  %v16546_v51 = vld [vmem:[#allocation95_spill] sm:$0xff] }
0x11f8   : > { %v14761_v62 = vpop.xlane.xlu0 %6972 }
0x11f9   : > { %10050 = vrot.lane.b32.xlu1 %v10049_v55, %s11150_s20 }
0x1200   : > { %v6958_v30 = vpop.xlane.xlu0 %6957 }
0x1201   : > { %10799 = vrcp.f32 %v6958_v30  ;;  %10070 = vrot.lane.b32.xlu1 %v10069_v6, %s11146_s24 }
0x1202   : > { %10801 = vrcp.f32 %v14728_v54 }
0x1203   : > { %v10036_v18 = vpop.permute.xlu1 %10035  ;;  %10803 = vpow2.f32 %v6939_v41 }
0x1204   : > { %v10037_v52 = vunpack.i.l.bf16 %v10036_v18  ;;  %v10038_v26 = vunpack.i.h.bf16 %v10036_v18  ;;  %10805 = vrcp.f32 %v14739_v5 }
0x1205   : > { %10807 = vpow2.f32 %v6943_v59  ;;  %v16553_v59 = vld [vmem:[#allocation119_spill] sm:$0xff] }
0x1206   : > { %7276 = vmatpush.msra.mxu3 %v10037_v52  ;;  %10809 = vpow2.f32 %v6945_v27 }
0x1207   : > { %v10800_v45 = vpop.eup %10799  ;;  %10811 = vrcp.f32 %v14761_v62 }
0x1208   : > { %v10802_v42 = vpop.eup %10801  ;;  %v7014_v33 = vmul.f32 %v10800_v45, %v6958_v30  ;;  %7277 = vmatpush.msra.mxu3 %v10038_v26  ;;  %v16547_v30 = vld [vmem:[#allocation72_spill] sm:$0xff]  ;;  %v16548_v26 = vld [vmem:[#allocation137_spill] sm:$0xff] }
0x1209   : > { %10085 = vrot.lane.b32.xlu1 %v10084_v20, %s11149_s12  ;;  %v7017_v47 = vmul.f32 %v10802_v42, %v14728_v54  ;;  %v14780_v57 = vpop.eup %10803  ;;  %v10109_v41 = vpack.i.bf16 %v16547_v30, %v16546_v51  ;;  %v16560_v51 = vld [vmem:[#allocation111_spill] sm:$0xff] }
0x120a   : > { %v7030_v63 = vsub.f32 2.0, %v7014_v33  ;;  %v10806_v37 = vpop.eup %10805  ;;  %v6983_v49 = vsel %vm890_vm0, %v14780_v57, 0.0  ;;  %v16561_v30 = vld [vmem:[#allocation99_spill] sm:$0xff] }
0x120b   : > { %v7033_v46 = vsub.f32 2.0, %v7017_v47  ;;  %v14789_v54 = vpop.eup %10807  ;;  %v7018_v1 = vmul.f32 %v10806_v37, %v14739_v5  ;;  %v16555_v47 = vld [vmem:[#allocation92_spill] sm:$0xff] }
0x120c   : > { %v7046_v16 = vmul.f32 %v10800_v45, %v7030_v63  ;;  %v6989_v40 = vsel %vm890_vm0, %v14789_v54, 0.0  ;;  %v14794_v50 = vpop.eup %10809  ;;  %v16549_v45 = vld [vmem:[#allocation103_spill] sm:$0xff] }
0x120d   : > { %v7049_v39 = vmul.f32 %v10802_v42, %v7033_v46  ;;  %v7034_v4 = vsub.f32 2.0, %v7018_v1  ;;  %v6992_v5 = vsel %vm890_vm0, %v14794_v50, 0.0  ;;  %v10059_v48 = vpack.i.bf16 %v16549_v45, %v16548_v26  ;;  %v16552_v42 = vld [vmem:[#allocation122_spill] sm:$0xff]  ;;  %v10812_v33 = vpop.eup %10811  ;;  %v16554_v63 = vld [vmem:[#allocation83_spill] sm:$0xff] }
0x120e   : > { %v7062_v23 = vmul.f32 %v14712_v36, %v7046_v16  ;;  %v10054_v12 = vpack.i.bf16 %v16553_v59, %v16552_v42  ;;  %v10114_v27 = vpack.i.bf16 %v16555_v47, %v16554_v63  ;;  %v16556_v16 = vld [vmem:[#allocation31_spill] sm:$0xff]  ;;  %v10134_v46 = vpack.i.bf16 %v14242_v19, %v14235_v9  ;;  %v16564_v42 = vld [vmem:[#allocation25_spill] sm:$0xff]  ;;  %v16565_v59 = vld [vmem:[#allocation116_spill] sm:$0xff] }
0x120f   : > { %v7065_v18 = vmul.f32 %v14673_v17, %v7049_v39  ;;  %v7050_v52 = vmul.f32 %v10806_v37, %v7034_v4  ;;  %v16550_v17 = vld [vmem:[#allocation69_spill] sm:$0xff]  ;;  %v10074_v37 = vpack.i.bf16 %v14564_v8, %v14558_v38 }
0x1210   : > { %9622 = vmatmul.msk.f32.gmra.mxu3 %vm890_vm0, %v7062_v23  ;;  %v10089_v20 = vpack.i.bf16 %v16551_v53, %v16550_v17  ;;  %v16559_v38 = vld [vmem:[#allocation57_spill] sm:$0xff]  ;;  %v16562_v17 = vld [vmem:[#allocation59_spill] sm:$0xff] }
0x1211   : > { %10100 = vrot.lane.b32.xlu1 %v10099_v0, %s11146_s24  ;;  %6984 = vadd.xlane.f32.xlu2 %v6983_v49  ;;  %v7066_v7 = vmul.f32 %v14689_v15, %v7050_v52  ;;  %v10104_v15 = vpack.i.bf16 %v14606_v44, %v14599_v32  ;;  %v7019_v0 = vmul.f32 %v10812_v33, %v14761_v62  ;;  %v16563_v53 = vld [vmem:[#allocation47_spill] sm:$0xff] }
0x1213   : > { %v10026_v36 = vpop.permute.xlu0 %10025  ;;  %v7035_v44 = vsub.f32 2.0, %v7019_v0 }
0x1214   : > { %v10027_v55 = vunpack.i.l.bf16 %v10026_v36  ;;  %v10028_v6 = vunpack.i.h.bf16 %v10026_v36 }
0x1215   : > { %v7051_v39 = vmul.f32 %v10812_v33, %v7035_v44  ;;  %v16568_v44 = vld [vmem:[#allocation114_spill] sm:$0xff] }
0x1216   : > { %7206 = vmatpush.msrb.mxu1 %v10027_v55  ;;  %6990 = vadd.xlane.f32.xlu0 %v6989_v40 }
0x1217   : > { %v7067_v9 = vmul.f32 %v14708_v58, %v7051_v39 }
0x1218   : > { %7207 = vmatpush.msrb.mxu1 %v10028_v6  ;;  %v16558_v6 = vld [vmem:[#allocation78_spill] sm:$0xff] }
0x1219   : > { %10110 = vrot.lane.b32.xlu1 %v10109_v41, %s11150_s20  ;;  %9625 = vmatmul.msk.f32.vlgmr.msrb.gmra.mxu1 %vm890_vm0, %v7065_v18  ;;  %v10079_v8 = vpack.i.bf16 %v16559_v38, %v16558_v6  ;;  %v10149_v41 = vpack.i.bf16 %v16561_v30, %v16560_v51 }
0x121a   : > { %6993 = vadd.xlane.f32.xlu2 %v6992_v5 }
0x1221   : > { %9626 = vmatmul.msk.f32.gmra.mxu1 %vm890_vm0, %v7066_v7 }
0x122a   : > { %10060 = vrot.lane.b32.xlu0 %v10059_v48, %s11148_s3 }
0x1232   : > { %10045 = vrot.lane.b32.xlu2 %v16518_v22, %s11150_s20  ;;  %10090 = vrot.lane.b32.xlu0 %v10089_v20, %s11148_s3  ;;  %v16557_v22 = vld [vmem:[#allocation55_spill] sm:$0xff]  ;;  %v10094_v20 = vpack.i.bf16 %v16563_v53, %v16562_v17 }
0x1233   : > { %v10064_v23 = vpack.i.bf16 %v16557_v22, %v16556_v16  ;;  %v16567_v16 = vld [vmem:[#allocation123_spill] sm:$0xff] }
0x123a   : > { %10055 = vrot.lane.b32.xlu2 %v10054_v12, %s11149_s12  ;;  %10105 = vrot.lane.b32.xlu0 %v10104_v15, %s11145_s11  ;;  %v10169_v12 = vpack.i.bf16 %v16565_v59, %v16564_v42 }
0x1242   : > { %10065 = vrot.lane.b32.xlu2 %v10064_v23, %s11147_s0  ;;  %10115 = vrot.lane.b32.xlu0 %v10114_v27, %s11149_s12  ;;  %v16566_v27 = vld [vmem:[#allocation34_spill] sm:$0xff] }
0x1243   : > { %v6976_v32 = vpop.xlane.xlu2 %6975  ;;  %v10119_v22 = vpack.i.bf16 %v16567_v16, %v16566_v27  ;;  %v576_v27 = vld [vmem:[%s11368_s19 + $0x78] sm:$0xff] }
0x1244   : > { %10813 = vrcp.f32 %v6976_v32  ;;  %9647 = vmatpush.msrb.mxu3 %v576_v27 }
0x1245   : > { %10815 = vrcp.f32 %v14764_v28 }
0x124a   : > { %v10814_v49 = vpop.eup %10813  ;;  %10075 = vrot.lane.b32.xlu2 %v10074_v37, %s11145_s11  ;;  %10135 = vrot.lane.b32.xlu0 %v10134_v46, %s11146_s24  ;;  %v16569_v46 = vld [vmem:[#allocation133_spill] sm:$0xff] }
0x124b   : > { %v7020_v1 = vmul.f32 %v10814_v49, %v6976_v32  ;;  %v6979_v36 = vpop.xlane.xlu0 %6978  ;;  %v10031_v62 = vpop.permute.xlu2 %10030  ;;  %v10129_v37 = vpack.i.bf16 %v16569_v46, %v16568_v44  ;;  %v573_v46 = vld [vmem:[%s11368_s19 + $0x60] sm:$0xff] }
0x124c   : > { %10817 = vrcp.f32 %v6979_v36  ;;  %v10032_v55 = vunpack.i.l.bf16 %v10031_v62  ;;  %v10033_v40 = vunpack.i.h.bf16 %v10031_v62  ;;  %v10816_v18 = vpop.eup %10815 }
0x124d   : > { %v7036_v19 = vsub.f32 2.0, %v7020_v1  ;;  %v7022_v58 = vmul.f32 %v10816_v18, %v14764_v28  ;;  %v16570_v1 = vld [vmem:[#allocation138_spill] sm:$0xff] }
0x124e   : > { %7241 = vmatpush.msrb.mxu2 %v10032_v55  ;;  %v7104_v48 = vpop.f32.mrf.mxu2  ;;  %v10179_v55 = vpack.i.bf16 %v14593_v60, %v14589_v10 }
0x124f   : > { %v7052_v5 = vmul.f32 %v10814_v49, %v7036_v19  ;;  %v7038_v15 = vsub.f32 2.0, %v7022_v58  ;;  %v10139_v49 = vpack.i.bf16 %v14587_v14, %v14585_v24  ;;  %v16572_v14 = vld [vmem:[#allocation124_spill] sm:$0xff] }
0x1250   : > { %7242 = vmatpush.msrb.mxu2 %v10033_v40 }
0x1251   : > { %9627 = vmatmul.msk.f32.vlgmr.msrb.gmra.mxu2 %vm890_vm0, %v7067_v9  ;;  %v7068_v26 = vmul.f32 %v14734_v25, %v7052_v5  ;;  %v7054_v25 = vmul.f32 %v10816_v18, %v7038_v15  ;;  %v16573_v9 = vld [vmem:[#allocation82_spill] sm:$0xff] }
0x1252   : > { %v10818_v4 = vpop.eup %10817  ;;  %10080 = vrot.lane.b32.xlu2 %v10079_v8, %s11150_s20  ;;  %10150 = vrot.lane.b32.xlu0 %v10149_v41, %s11150_s20  ;;  %v10194_v19 = vpack.i.bf16 %v16573_v9, %v16572_v14  ;;  %v570_v14 = vld [vmem:[%s11368_s19 + $0x48] sm:$0xff]  ;;  %v16583_v9 = vld [vmem:[#allocation129_spill] sm:$0xff] }
0x1253   : > { %v7021_v52 = vmul.f32 %v10818_v4, %v6979_v36  ;;  %v7070_v0 = vmul.f32 %v14702_v2, %v7054_v25  ;;  %v16571_v36 = vld [vmem:[#allocation51_spill] sm:$0xff]  ;;  %v6988_v40 = vpop.xlane.xlu1 %6987  ;;  %v16576_v25 = vld [vmem:[#allocation102_spill] sm:$0xff]  ;;  %9646 = vmatpush.msra.mxu2 %v576_v27 }
0x1254   : > { %v10164_v62 = vpack.i.bf16 %v16571_v36, %v16570_v1  ;;  %10819 = vrcp.f32 %v6988_v40  ;;  %v571_v36 = vld [vmem:[%s11368_s19 + $0x50] sm:$0xff] }
0x1255   : > { %v7037_v7 = vsub.f32 2.0, %v7021_v52 }
0x1257   : > { %v7053_v45 = vmul.f32 %v10818_v4, %v7037_v7  ;;  %v16574_v4 = vld [vmem:[#allocation23_spill] sm:$0xff] }
0x1258   : > { %v10209_v5 = vpack.i.bf16 %v16574_v4, %v14274_v34  ;;  %v565_v4 = vld [vmem:[%s11368_s19 + $0x20] sm:$0xff] }
0x1259   : > { %v7069_v33 = vmul.f32 %v14741_v21, %v7053_v45  ;;  %9628 = vmatmul.msk.f32.gmra.mxu2 %vm890_vm0, %v7068_v26  ;;  %v7174_v21 = vpop.f32.mrf.mxu0 }
0x125a   : > { %10095 = vrot.lane.b32.xlu2 %v10094_v20, %s11147_s0  ;;  %10170 = vrot.lane.b32.xlu0 %v10169_v12, %s11147_s0  ;;  %v10820_v38 = vpop.eup %10819 }
0x125b   : > { %9629 = vmatmul.msk.f32.vlgmr.msra.gmra.mxu3 %vm890_vm0, %v7069_v33  ;;  %v7024_v18 = vmul.f32 %v10820_v38, %v6988_v40  ;;  %v16575_v33 = vld [vmem:[#allocation68_spill] sm:$0xff] }
0x125d   : > { %v7040_v7 = vsub.f32 2.0, %v7024_v18 }
0x125e   : > { %v10041_v28 = vpop.permute.xlu0 %10040 }
0x125f   : > { %v10042_v63 = vunpack.i.l.bf16 %v10041_v28  ;;  %v7107_v47 = vpop.f32.mrf.mxu2  ;;  %v10043_v32 = vunpack.i.h.bf16 %v10041_v28  ;;  %v7056_v12 = vmul.f32 %v10820_v38, %v7040_v7  ;;  %v10219_v28 = vpack.i.bf16 %v16576_v25, %v16575_v33  ;;  %v569_v38 = vld [vmem:[%s11368_s19 + $0x40] sm:$0xff]  ;;  %v563_v7 = vld [vmem:[%s11368_s19 + $0x10] sm:$0xff]  ;;  %v16593_v33 = vld [vmem:[#allocation132_spill] sm:$0xff] }
0x1260   : > { %v10124_v23 = vpack.i.bf16 %v7107_v47, %v7104_v48  ;;  %v16594_v25 = vld [vmem:[#allocation60_spill] sm:$0xff] }
0x1261   : > { %7311 = vmatpush.msrb.mxu0 %v10042_v63  ;;  %v7177_v2 = vpop.f32.mrf.mxu0  ;;  %v7072_v16 = vmul.f32 %v14747_v31, %v7056_v12 }
0x1262   : > { %10120 = vrot.lane.b32.xlu2 %v10119_v22, %s11148_s3  ;;  %10125 = vrot.lane.b32.xlu1 %v10124_v23, %s11144_s16  ;;  %v10144_v39 = vpack.i.bf16 %v7177_v2, %v7174_v21  ;;  %v575_v22 = vld [vmem:[%s11368_s19 + $0x70] sm:$0xff]  ;;  %v16577_v23 = vld [vmem:[#allocation126_spill] sm:$0xff]  ;;  %v574_v21 = vld [vmem:[%s11368_s19 + $0x68] sm:$0xff] }
0x1263   : > { %9630 = vmatmul.msk.f32.gmra.mxu3 %vm890_vm0, %v7070_v0  ;;  %7312 = vmatpush.msrb.mxu0 %v10043_v32 }
0x1264   : > { %9648 = vmatpush.msra.mxu2 %v575_v22  ;;  %9649 = vmatpush.msrb.mxu3 %v575_v22 }
0x1265   : > { %7922 = vmatpush.msra.mxu0 %v576_v27 }
0x1266   : > { %9650 = vmatpush.msra.mxu2 %v574_v21  ;;  %9651 = vmatpush.msrb.mxu3 %v574_v21 }
0x1267   : > { %7923 = vmatpush.msra.mxu0 %v575_v22  ;;  %v16596_v22 = vld [vmem:[#allocation80_spill] sm:$0xff] }
0x1268   : > { %9652 = vmatpush.msra.mxu2 %v573_v46  ;;  %9653 = vmatpush.msrb.mxu3 %v573_v46 }
0x1269   : > { %7924 = vmatpush.msra.mxu0 %v574_v21 }
0x126a   : > { %10140 = vrot.lane.b32.xlu2 %v10139_v49, %s11145_s11  ;;  %10130 = vrot.lane.b32.xlu1 %v10129_v37, %s11147_s0  ;;  %v16579_v37 = vld [vmem:[#allocation61_spill] sm:$0xff] }
0x126b   : > { %v16580_v49 = vld [vmem:[#allocation65_spill] sm:$0xff]  ;;  %7925 = vmatpush.msra.mxu0 %v573_v46 }
0x126c   : > { %v10234_v2 = vpack.i.bf16 %v16580_v49, %v16579_v37 }
0x126f   : > { %v7139_v51 = vpop.f32.mrf.mxu3 }
0x1272   : > { %10145 = vrot.lane.b32.xlu1 %v10144_v39, %s11144_s16  ;;  %v572_v39 = vld [vmem:[%s11368_s19 + $0x58] sm:$0xff] }
0x1273   : > { %7926 = vmatpush.msra.mxu0 %v572_v39  ;;  %9654 = vmatpush.msra.mxu2 %v572_v39 }
0x1274   : > { %9655 = vmatpush.msrb.mxu3 %v572_v39  ;;  %v16598_v39 = vld [vmem:[#allocation35_spill] sm:$0xff] }
0x1275   : > { %7927 = vmatpush.msra.mxu0 %v571_v36  ;;  %9656 = vmatpush.msra.mxu2 %v571_v36 }
0x1276   : > { %9657 = vmatpush.msrb.mxu3 %v571_v36 }
0x1277   : > { %7928 = vmatpush.msra.mxu0 %v570_v14  ;;  %9658 = vmatpush.msra.mxu2 %v570_v14 }
0x1278   : > { %9659 = vmatpush.msrb.mxu3 %v570_v14 }
0x1279   : > { %7929 = vmatpush.msra.mxu0 %v569_v38  ;;  %9660 = vmatpush.msra.mxu2 %v569_v38 }
0x127a   : > { %10165 = vrot.lane.b32.xlu1 %v10164_v62, %s11148_s3  ;;  %v16581_v62 = vld [vmem:[#allocation21_spill] sm:$0xff]  ;;  %9661 = vmatpush.msrb.mxu3 %v569_v38 }
0x1282   : > { %10180 = vrot.lane.b32.xlu1 %v10179_v55, %s11145_s11  ;;  %v16582_v55 = vld [vmem:[#allocation24_spill] sm:$0xff] }
0x1283   : > { %v10174_v40 = vpack.i.bf16 %v16582_v55, %v16581_v62 }
0x1284   : > { %v6985_v24 = vpop.xlane.xlu2 %6984 }
0x1285   : > { %10821 = vrcp.f32 %v6985_v24 }
0x1289   : > { %v6991_v6 = vpop.xlane.xlu0 %6990 }
0x128a   : > { %10823 = vrcp.f32 %v6991_v6  ;;  %10195 = vrot.lane.b32.xlu1 %v10194_v19, %s11149_s12  ;;  %v16584_v19 = vld [vmem:[#allocation112_spill] sm:$0xff] }
0x128b   : > { %v10822_v8 = vpop.eup %10821 }
0x128c   : > { %v7023_v30 = vmul.f32 %v10822_v8, %v6985_v24  ;;  %v14905_v24 = vpop.permute.xlu1 %10050 }
0x128d   : > { %v6994_v41 = vpop.xlane.xlu2 %6993  ;;  %v10053_v62 = vunpack.i.h.bf16 %v14905_v24 }
0x128e   : > { %v7039_v10 = vsub.f32 2.0, %v7023_v30  ;;  %10825 = vrcp.f32 %v6994_v41  ;;  %v16585_v30 = vld [vmem:[#allocation79_spill] sm:$0xff] }
0x1290   : > { %v10824_v60 = vpop.eup %10823  ;;  %v7055_v52 = vmul.f32 %v10822_v8, %v7039_v10  ;;  %v568_v8 = vld [vmem:[%s11368_s19 + $0x38] sm:$0xff]  ;;  %v566_v10 = vld [vmem:[%s11368_s19 + $0x28] sm:$0xff] }
0x1291   : > { %v7025_v58 = vmul.f32 %v10824_v60, %v6991_v6  ;;  %v10199_v6 = vpack.i.bf16 %v16584_v19, %v16583_v9  ;;  %7930 = vmatpush.msra.mxu0 %v568_v8  ;;  %9662 = vmatpush.msra.mxu2 %v568_v8 }
0x1292   : > { %v7071_v26 = vmul.f32 %v14780_v57, %v7055_v52  ;;  %10210 = vrot.lane.b32.xlu1 %v10209_v5, %s11146_s24  ;;  %v10214_v5 = vpack.i.bf16 %v14572_v35, %v14568_v11  ;;  %9663 = vmatpush.msrb.mxu3 %v568_v8  ;;  %v562_v35 = vld [vmem:[%s11368_s19 + $0x8] sm:$0xff] }
0x1293   : > { %v7041_v45 = vsub.f32 2.0, %v7025_v58  ;;  %v7142_v48 = vpop.f32.mrf.mxu3  ;;  %v564_v58 = vld [vmem:[%s11368_s19 + $0x18] sm:$0xff] }
0x1294   : > { %v10826_v17 = vpop.eup %10825  ;;  %v10154_v53 = vpack.i.bf16 %v7142_v48, %v7139_v51  ;;  %9631 = vmatmul.msk.f32.vlgmr.msrb.gmra.mxu0 %vm890_vm0, %v7071_v26  ;;  %v567_v51 = vld [vmem:[%s11368_s19 + $0x30] sm:$0xff] }
0x1295   : > { %v7057_v20 = vmul.f32 %v10824_v60, %v7041_v45  ;;  %v7026_v42 = vmul.f32 %v10826_v17, %v6994_v41  ;;  %v10046_v59 = vpop.permute.xlu2 %10045  ;;  %v16586_v41 = vld [vmem:[#allocation70_spill] sm:$0xff]  ;;  %7931 = vmatpush.msra.mxu0 %v567_v51  ;;  %v14920_v60 = vpop.permute.xlu1 %10070  ;;  %9664 = vmatpush.msra.mxu2 %v567_v51  ;;  %v16587_v26 = vld [vmem:[#allocation125_spill] sm:$0xff]  ;;  %v16588_v45 = vld [vmem:[#allocation104_spill] sm:$0xff] }
0x1296   : > { %v10047_v34 = vunpack.i.l.bf16 %v10046_v59  ;;  %v7209_v15 = vpop.f32.mrf.mxu1  ;;  %10155 = vrot.lane.b32.xlu2 %v10154_v53, %s11144_s16  ;;  %v10048_v63 = vunpack.i.h.bf16 %v10046_v59  ;;  %v10189_v18 = vpack.i.bf16 %v16586_v41, %v16585_v30  ;;  %v10204_v48 = vpack.i.bf16 %v16588_v45, %v16587_v26  ;;  %v16589_v53 = vld [vmem:[#allocation93_spill] sm:$0xff]  ;;  %9665 = vmatpush.msrb.mxu3 %v567_v51 }
0x1297   : > { %v7073_v57 = vmul.f32 %v14789_v54, %v7057_v20  ;;  %v7042_v47 = vsub.f32 2.0, %v7026_v42  ;;  %v16578_v54 = vld [vmem:[#allocation128_spill] sm:$0xff]  ;;  %7932 = vmatpush.msra.mxu0 %v566_v10  ;;  %9666 = vmatpush.msra.mxu2 %v566_v10  ;;  %v16590_v20 = vld [vmem:[#allocation91_spill] sm:$0xff]  ;;  %v10072_v19 = vunpack.i.l.bf16 %v14920_v60 }
0x1298   : > { %7346 = vmatpush.msra.mxu1 %v10047_v34  ;;  %v10159_v0 = vpack.i.bf16 %v16578_v54, %v16577_v23  ;;  %v10224_v42 = vpack.i.bf16 %v16590_v20, %v16589_v53  ;;  %9667 = vmatpush.msrb.mxu3 %v566_v10  ;;  %v16591_v34 = vld [vmem:[#allocation120_spill] sm:$0xff]  ;;  %v10052_v54 = vunpack.i.l.bf16 %v14905_v24 }
0x1299   : > { %v7058_v32 = vmul.f32 %v10826_v17, %v7042_v47  ;;  %7933 = vmatpush.msra.mxu0 %v565_v4  ;;  %9668 = vmatpush.msra.mxu2 %v565_v4  ;;  %v561_v17 = vld [vmem:[%s11368_s19] sm:$0xff]  ;;  %v16600_v24 = vld [vmem:[#allocation88_spill] sm:$0xff] }
0x129a   : > { %7347 = vmatpush.msra.mxu1 %v10048_v63  ;;  %10220 = vrot.lane.b32.xlu1 %v10219_v28, %s11150_s20  ;;  %v10239_v28 = vpack.i.bf16 %v16594_v25, %v16593_v33  ;;  %v7804_v51 = vsel %vm890_vm0, %v16600_v24, %v10053_v62 }
0x129b   : > { %9633 = vmatmul.msk.f32.vlgmr.msra.gmra.mxu1 %vm890_vm0, %v7073_v57  ;;  %v7074_v1 = vmul.f32 %v14794_v50, %v7058_v32  ;;  %7934 = vmatpush.msra.mxu0 %v564_v58 }
0x129c   : > { %9632 = vmatmul.msk.f32.gmra.mxu0 %vm890_vm0, %v7072_v16  ;;  %9670 = vmatpush.msra.mxu2 %v564_v58  ;;  %v14933_v11 = vpop.permute.xlu0 %10060  ;;  %v16595_v16 = vld [vmem:[#allocation85_spill] sm:$0xff] }
0x129d   : > { %v14907_v50 = vpop.permute.xlu2 %10055  ;;  %7935 = vmatpush.msra.mxu0 %v563_v7  ;;  %v14940_v59 = vpop.permute.xlu1 %10085  ;;  %9669 = vmatpush.msrb.mxu3 %v565_v4  ;;  %v10254_v23 = vpack.i.bf16 %v16596_v22, %v16595_v16  ;;  %v10062_v46 = vunpack.i.l.bf16 %v14933_v11  ;;  %v10063_v30 = vunpack.i.h.bf16 %v14933_v11 }
0x129e   : > { %v7212_v31 = vpop.f32.mrf.mxu1  ;;  %10160 = vrot.lane.b32.xlu2 %v10159_v0, %s11149_s12  ;;  %9672 = vmatpush.msra.mxu2 %v563_v7  ;;  %v10057_v32 = vunpack.i.l.bf16 %v14907_v50  ;;  %v10087_v62 = vunpack.i.l.bf16 %v14940_v59 }
0x129f   : > { %v10184_v44 = vpack.i.bf16 %v7212_v31, %v7209_v15  ;;  %7936 = vmatpush.msra.mxu0 %v562_v35  ;;  %v16592_v15 = vld [vmem:[#allocation76_spill] sm:$0xff]  ;;  %9671 = vmatpush.msrb.mxu3 %v564_v58  ;;  %v16597_v31 = vld [vmem:[#allocation94_spill] sm:$0xff] }
0x12a0   : > { %9674 = vmatpush.msra.mxu2 %v562_v35  ;;  %v10229_v57 = vpack.i.bf16 %v16592_v15, %v16591_v34 }
0x12a1   : > { %10185 = vrot.lane.b32.xlu0 %v10184_v44, %s11144_s16  ;;  %7937 = vmatpush.msra.mxu0 %v561_v17  ;;  %v7803_v44 = vsel %vm890_vm0, %v16597_v31, %v10052_v54 }
0x12a2   : > { %10235 = vrot.lane.b32.xlu1 %v10234_v2, %s11147_s0  ;;  %9676 = vmatpush.msra.mxu2 %v561_v17  ;;  %v7820_v49 = vsel %vm7819_vm1, %v7803_v44, %v10057_v32 }
0x12a3   : > { %9634 = vmatmul.msk.f32.gmra.mxu1 %vm890_vm0, %v7074_v1  ;;  %9673 = vmatpush.msrb.mxu3 %v563_v7  ;;  %v16599_v1 = vld [vmem:[#allocation54_spill] sm:$0xff]  ;;  %v7837_v55 = vsel %vm7836_vm2, %v7820_v49, %v10062_v46 }
0x12a4   : > { %v14950_v63 = vpop.permute.xlu0 %10090  ;;  %v10274_v36 = vpack.i.bf16 %v16599_v1, %v16598_v39  ;;  %v16602_v39 = vld [vmem:[#allocation117_spill] sm:$0xff] }
0x12a5   : > { %v14926_v52 = vpop.permute.xlu2 %10065  ;;  %v14953_v47 = vpop.permute.xlu1 %10100  ;;  %9675 = vmatpush.msrb.mxu3 %v562_v35  ;;  %v10073_v35 = vunpack.i.h.bf16 %v14920_v60 }
0x12a6   : > { %10175 = vrot.lane.b32.xlu2 %v10174_v40, %s11146_s24  ;;  %v10067_v2 = vunpack.i.l.bf16 %v14926_v52  ;;  %v10058_v40 = vunpack.i.h.bf16 %v14907_v50  ;;  %v10068_v10 = vunpack.i.h.bf16 %v14926_v52 }
0x12a7   : > { %9677 = vmatpush.msrb.mxu3 %v561_v17 }
0x12a8   : > { %v7854_v14 = vsel %vm7853_vm3, %v7837_v55, %v10067_v2  ;;  %v10249_v2 = vpack.i.bf16 %v14614_v43, %v14612_v29  ;;  %v10092_v29 = vunpack.i.l.bf16 %v14950_v63 }
0x12a9   : > { %10200 = vrot.lane.b32.xlu0 %v10199_v6, %s11148_s3  ;;  %v7871_v50 = vsel %vm7870_vm4, %v7854_v14, %v10072_v19 }
0x12ac   : > { %v14960_v0 = vpop.permute.xlu0 %10105 }
0x12ad   : > { %v14942_v12 = vpop.permute.xlu2 %10075  ;;  %v14964_v21 = vpop.permute.xlu1 %10110 }
0x12ae   : > { %10190 = vrot.lane.b32.xlu2 %v10189_v18, %s11150_s20  ;;  %v10077_v9 = vunpack.i.l.bf16 %v14942_v12  ;;  %v7821_v18 = vsel %vm7819_vm1, %v7804_v51, %v10058_v40  ;;  %v10113_v7 = vunpack.i.h.bf16 %v14964_v21  ;;  %v16603_v51 = vld [vmem:[#allocation89_spill] sm:$0xff] }
0x12af   : > { %v7838_v26 = vsel %vm7836_vm2, %v7821_v18, %v10063_v30  ;;  %v16604_v30 = vld [vmem:[#allocation100_spill] sm:$0xff]  ;;  %v16605_v18 = vld [vmem:[#allocation97_spill] sm:$0xff] }
0x12b0   : > { %v7888_v4 = vsel %vm7887_vm5, %v7871_v50, %v10077_v9  ;;  %v7855_v45 = vsel %vm7853_vm3, %v7838_v26, %v10068_v10  ;;  %v10259_v50 = vpack.i.bf16 %v16604_v30, %v16603_v51 }
0x12b1   : > { %10215 = vrot.lane.b32.xlu0 %v10214_v5, %s11145_s11  ;;  %v7872_v33 = vsel %vm7870_vm4, %v7855_v45, %v10073_v35  ;;  %v10107_v45 = vunpack.i.l.bf16 %v14960_v0 }
0x12b4   : > { %v14982_v6 = vpop.permute.xlu0 %10115 }
0x12b5   : > { %v14955_v27 = vpop.permute.xlu2 %10080  ;;  %v10118_v11 = vunpack.i.h.bf16 %v14982_v6 }
0x12b6   : > { %10205 = vrot.lane.b32.xlu2 %v10204_v48, %s11147_s0  ;;  %v10078_v48 = vunpack.i.h.bf16 %v14942_v12  ;;  %v10082_v54 = vunpack.i.l.bf16 %v14955_v27  ;;  %v10083_v43 = vunpack.i.h.bf16 %v14955_v27 }
0x12b8   : > { %v7889_v60 = vsel %vm7887_vm5, %v7872_v33, %v10078_v48  ;;  %v7805_v1 = vsel %vm890_vm0, %v16602_v39, %v10082_v54  ;;  %v7806_v10 = vsel %vm890_vm0, %v16605_v18, %v10083_v43  ;;  %v16614_v39 = vld [vmem:[#allocation134_spill] sm:$0xff] }
0x12b9   : > { %10225 = vrot.lane.b32.xlu0 %v10224_v42, %s11149_s12  ;;  %v16601_v42 = vld [vmem:[#allocation87_spill] sm:$0xff]  ;;  %v7822_v19 = vsel %vm7819_vm1, %v7805_v1, %v10087_v62 }
0x12ba   : > { %v7808_v34 = vsel %vm890_vm0, %v16601_v42, %v10113_v7  ;;  %v16607_v7 = vld [vmem:[#allocation106_spill] sm:$0xff] }
0x12bb   : > { %v7825_v12 = vsel %vm7819_vm1, %v7808_v34, %v10118_v11 }
0x12bc   : > { %v15008_v25 = vpop.permute.xlu0 %10135 }
0x12bd   : > { %v14969_v37 = vpop.permute.xlu2 %10095  ;;  %v10138_v32 = vunpack.i.h.bf16 %v15008_v25 }
0x12be   : > { %10230 = vrot.lane.b32.xlu2 %v10229_v57, %s11148_s3  ;;  %v10098_v11 = vunpack.i.h.bf16 %v14969_v37 }
0x12c1   : > { %10240 = vrot.lane.b32.xlu0 %v10239_v28, %s11146_s24 }
0x12c5   : > { %v14991_v5 = vpop.permute.xlu2 %10120 }
0x12c6   : > { %v10123_v52 = vunpack.i.h.bf16 %v14991_v5 }
0x12c8   : > { %v7842_v16 = vsel %vm7836_vm2, %v7825_v12, %v10123_v52  ;;  %v10093_v52 = vunpack.i.h.bf16 %v14950_v63  ;;  %v10112_v12 = vunpack.i.l.bf16 %v14964_v21  ;;  %v10117_v63 = vunpack.i.l.bf16 %v14982_v6 }
0x12c9   : > { %10255 = vrot.lane.b32.xlu0 %v10254_v23, %s11150_s20 }
0x12cd   : > { %v15017_v31 = vpop.permute.xlu2 %10140 }
0x12ce   : > { %v10143_v46 = vunpack.i.h.bf16 %v15017_v31 }
0x12d1   : > { %10275 = vrot.lane.b32.xlu0 %v10274_v36, %s11147_s0 }
0x12d4   : > { %v10126_v38 = vpop.permute.xlu1 %10125  ;;  %v7244_v8 = vpop.f32.mrf.mxu2 }
0x12d5   : > { %v10127_v41 = vunpack.i.l.bf16 %v10126_v38  ;;  %v10128_v17 = vunpack.i.h.bf16 %v10126_v38  ;;  %v10097_v38 = vunpack.i.l.bf16 %v14969_v37  ;;  %v10103_v37 = vunpack.i.h.bf16 %v14953_v47 }
0x12d7   : > { %v7905_v58 = vsel %vm7904_vm6, %v7888_v4, %v10127_v41  ;;  %v7906_v22 = vsel %vm7904_vm6, %v7889_v60, %v10128_v17  ;;  %v10102_v41 = vunpack.i.l.bf16 %v14953_v47  ;;  %v10088_v4 = vunpack.i.h.bf16 %v14940_v59 }
0x12d8   : > { %7938 = vmatmul.f32.vlgmr.msra.gmra.mxu0 %v7905_v58  ;;  %v16606_v58 = vld [vmem:[#allocation108_spill] sm:$0xff]  ;;  %v10122_v60 = vunpack.i.l.bf16 %v14991_v5 }
0x12d9   : > { %v10269_v26 = vpack.i.bf16 %v16607_v7, %v16606_v58  ;;  %v7823_v48 = vsel %vm7819_vm1, %v7806_v10, %v10088_v4 }
0x12dc   : > { %v15001_v53 = vpop.permute.xlu1 %10130  ;;  %v7247_v20 = vpop.f32.mrf.mxu2 }
0x12dd   : > { %v10133_v15 = vunpack.i.h.bf16 %v15001_v53  ;;  %v10244_v57 = vpack.i.bf16 %v7247_v20, %v7244_v8  ;;  %v7839_v8 = vsel %vm7836_vm2, %v7822_v19, %v10092_v29  ;;  %v7840_v20 = vsel %vm7836_vm2, %v7823_v48, %v10093_v52  ;;  %v16619_v48 = vld [vmem:[#allocation20_spill] sm:$0xff] }
0x12de   : > { %v7279_v28 = vpop.f32.mrf.mxu3  ;;  %v7856_v24 = vsel %vm7853_vm3, %v7839_v8, %v10097_v38  ;;  %v7857_v34 = vsel %vm7853_vm3, %v7840_v20, %v10098_v11  ;;  %v10132_v54 = vunpack.i.l.bf16 %v15001_v53  ;;  %v10137_v53 = vunpack.i.l.bf16 %v15008_v25  ;;  %v16615_v25 = vld [vmem:[#allocation52_spill] sm:$0xff]  ;;  %v16616_v38 = vld [vmem:[#allocation107_spill] sm:$0xff] }
0x12df   : > { %10245 = vrot.lane.b32.xlu2 %v10244_v57, %s11144_s16  ;;  %v7859_v23 = vsel %vm7853_vm3, %v7842_v16, %v10133_v15  ;;  %v7873_v27 = vsel %vm7870_vm4, %v7856_v24, %v10102_v41  ;;  %v16608_v15 = vld [vmem:[#allocation136_spill] sm:$0xff]  ;;  %v16609_v57 = vld [vmem:[#allocation41_spill] sm:$0xff]  ;;  %v10309_v29 = vpack.i.bf16 %v16616_v38, %v16615_v25  ;;  %v16617_v24 = vld [vmem:[#allocation131_spill] sm:$0xff] }
0x12e0   : > { %7941 = vmatmul.f32.gmra.mxu0 %v7906_v22  ;;  %v7876_v44 = vsel %vm7870_vm4, %v7859_v23, %v10138_v32  ;;  %v7890_v59 = vsel %vm7887_vm5, %v7873_v27, %v10107_v45  ;;  %v10279_v33 = vpack.i.bf16 %v16609_v57, %v16608_v15  ;;  %v7874_v22 = vsel %vm7870_vm4, %v7857_v34, %v10103_v37  ;;  %v16610_v32 = vld [vmem:[#allocation109_spill] sm:$0xff] }
0x12e1   : > { %v7893_v40 = vsel %vm7887_vm5, %v7876_v44, %v10143_v46  ;;  %v10108_v23 = vunpack.i.h.bf16 %v14960_v0  ;;  %v7807_v47 = vsel %vm890_vm0, %v16610_v32, %v10112_v12  ;;  %v16611_v44 = vld [vmem:[#allocation121_spill] sm:$0xff]  ;;  %v16612_v0 = vld [vmem:[#allocation110_spill] sm:$0xff] }
0x12e2   : > { %v7824_v21 = vsel %vm7819_vm1, %v7807_v47, %v10117_v63  ;;  %v10294_v46 = vpack.i.bf16 %v16612_v0, %v16611_v44 }
0x12e4   : > { %v15021_v49 = vpop.permute.xlu1 %10145 }
0x12e5   : > { %v10148_v36 = vunpack.i.h.bf16 %v15021_v49 }
0x12e6   : > { %v7282_v55 = vpop.f32.mrf.mxu3 }
0x12e7   : > { %v10264_v14 = vpack.i.bf16 %v7282_v55, %v7279_v28  ;;  %v7910_v9 = vsel %vm7904_vm6, %v7893_v40, %v10148_v36  ;;  %10250 = vrot.lane.b32.xlu2 %v10249_v2, %s11145_s11  ;;  %v10284_v28 = vpack.i.bf16 %v14595_v13, %v14591_v3  ;;  %v7891_v3 = vsel %vm7887_vm5, %v7874_v22, %v10108_v23  ;;  %v16613_v2 = vld [vmem:[#allocation130_spill] sm:$0xff]  ;;  %v10151_v40 = vpop.permute.xlu0 %10150 }
0x12e8   : > { %7953 = vmatmul.f32.vlgmr.msra.gmra.mxu2 %v7910_v9  ;;  %v7841_v13 = vsel %vm7836_vm2, %v7824_v21, %v10122_v60  ;;  %v10299_v1 = vpack.i.bf16 %v16614_v39, %v16613_v2  ;;  %v10147_v36 = vunpack.i.l.bf16 %v15021_v49  ;;  %v10142_v55 = vunpack.i.l.bf16 %v15017_v31  ;;  %v16618_v31 = vld [vmem:[#allocation98_spill] sm:$0xff] }
0x12e9   : > { %10265 = vrot.lane.b32.xlu1 %v10264_v14, %s11144_s16  ;;  %v7858_v5 = vsel %vm7853_vm3, %v7841_v13, %v10132_v54  ;;  %v10152_v43 = vunpack.i.l.bf16 %v10151_v40  ;;  %v10153_v10 = vunpack.i.h.bf16 %v10151_v40  ;;  %v16623_v39 = vld [vmem:[#allocation90_spill] sm:$0xff] }
0x12ea   : > { %v7875_v62 = vsel %vm7870_vm4, %v7858_v5, %v10137_v53  ;;  %v16622_v5 = vld [vmem:[#allocation140_spill] sm:$0xff] }
0x12eb   : > { %v7892_v9 = vsel %vm7887_vm5, %v7875_v62, %v10142_v55  ;;  %v7809_v51 = vsel %vm890_vm0, %v16618_v31, %v10152_v43 }
0x12ec   : > { %v7909_v19 = vsel %vm7904_vm6, %v7892_v9, %v10147_v36  ;;  %v10166_v49 = vpop.permute.xlu1 %10165 }
0x12ed   : > { %v10167_v18 = vunpack.i.l.bf16 %v10166_v49  ;;  %v10168_v34 = vunpack.i.h.bf16 %v10166_v49  ;;  %v16624_v49 = vld [vmem:[#allocation64_spill] sm:$0xff] }
0x12ef   : > { %10260 = vrot.lane.b32.xlu2 %v10259_v50, %s11149_s12  ;;  %v10171_v30 = vpop.permute.xlu0 %10170 }
0x12f0   : > { %v10156_v35 = vpop.permute.xlu2 %10155  ;;  %v10172_v7 = vunpack.i.l.bf16 %v10171_v30  ;;  %v10173_v63 = vunpack.i.h.bf16 %v10171_v30 }
0x12f1   : > { %v10157_v17 = vunpack.i.l.bf16 %v10156_v35  ;;  %10270 = vrot.lane.b32.xlu1 %v10269_v26, %s11148_s3  ;;  %v10158_v16 = vunpack.i.h.bf16 %v10156_v35  ;;  %v16620_v35 = vld [vmem:[#allocation75_spill] sm:$0xff] }
0x12f2   : > { %v7810_v52 = vsel %vm890_vm0, %v16620_v35, %v10153_v10 }
0x12f3   : > { %v7907_v42 = vsel %vm7904_vm6, %v7890_v59, %v10157_v17  ;;  %v7908_v6 = vsel %vm7904_vm6, %v7891_v3, %v10158_v16 }
0x12f4   : > { %7944 = vmatmul.f32.gmra.mxu0 %v7907_v42  ;;  %v10181_v27 = vpop.permute.xlu1 %10180 }
0x12f5   : > { %v10182_v59 = vunpack.i.l.bf16 %v10181_v27  ;;  %v10183_v32 = vunpack.i.h.bf16 %v10181_v27 }
0x12f7   : > { %10280 = vrot.lane.b32.xlu2 %v10279_v33, %s11146_s24 }
0x12f8   : > { %v10161_v14 = vpop.permute.xlu2 %10160 }
0x12f9   : > { %10285 = vrot.lane.b32.xlu1 %v10284_v28, %s11145_s11  ;;  %v10162_v8 = vunpack.i.l.bf16 %v10161_v14  ;;  %v10163_v26 = vunpack.i.h.bf16 %v10161_v14 }
0x12fb   : > { %v7826_v50 = vsel %vm7819_vm1, %v7809_v51, %v10162_v8  ;;  %v7827_v20 = vsel %vm7819_vm1, %v7810_v52, %v10163_v26 }
0x12fc   : > { %7947 = vmatmul.f32.gmra.mxu0 %v7908_v6  ;;  %v7843_v4 = vsel %vm7836_vm2, %v7826_v50, %v10167_v18  ;;  %v7844_v33 = vsel %vm7836_vm2, %v7827_v20, %v10168_v34  ;;  %v16621_v6 = vld [vmem:[#allocation139_spill] sm:$0xff]  ;;  %v10196_v53 = vpop.permute.xlu1 %10195 }
0x12fd   : > { %v7860_v11 = vsel %vm7853_vm3, %v7843_v4, %v10172_v7  ;;  %v7861_v16 = vsel %vm7853_vm3, %v7844_v33, %v10173_v63  ;;  %v10304_v44 = vpack.i.bf16 %v16622_v5, %v16621_v6  ;;  %v10197_v62 = vunpack.i.l.bf16 %v10196_v53  ;;  %v15140_v34 = vld [vmem:[%s11381_s9] sm:$0xff]  ;;  %v10894_v5 = vld [vmem:[#allocation2 + $0x30] sm:$0xff] }
0x12fe   : > { %v10198_v31 = vunpack.i.h.bf16 %v10196_v53 }
0x12ff   : > { %10295 = vrot.lane.b32.xlu2 %v10294_v46, %s11150_s20 }
0x1300   : > { %v10176_v41 = vpop.permute.xlu2 %10175 }
0x1301   : > { %10300 = vrot.lane.b32.xlu1 %v10299_v1, %s11149_s12  ;;  %v10177_v58 = vunpack.i.l.bf16 %v10176_v41  ;;  %v10178_v37 = vunpack.i.h.bf16 %v10176_v41 }
0x1303   : > { %v7877_v17 = vsel %vm7870_vm4, %v7860_v11, %v10177_v58  ;;  %v7878_v54 = vsel %vm7870_vm4, %v7861_v16, %v10178_v37 }
0x1304   : > { %7950 = vmatmul.f32.gmra.mxu0 %v7909_v19  ;;  %v7894_v57 = vsel %vm7887_vm5, %v7877_v17, %v10182_v59  ;;  %v7895_v21 = vsel %vm7887_vm5, %v7878_v54, %v10183_v32  ;;  %v10211_v25 = vpop.permute.xlu1 %10210 }
0x1305   : > { %v10212_v43 = vunpack.i.l.bf16 %v10211_v25  ;;  %v10213_v26 = vunpack.i.h.bf16 %v10211_v25 }
0x1307   : > { %10310 = vrot.lane.b32.xlu2 %v10309_v29, %s11147_s0 }
0x1308   : > { %v10191_v47 = vpop.permute.xlu2 %10190 }
0x1309   : > { %7655 = vrot.lane.b32.xlu1 %v16617_v24, %s11146_s24  ;;  %v10192_v2 = vunpack.i.l.bf16 %v10191_v47  ;;  %v10193_v14 = vunpack.i.h.bf16 %v10191_v47 }
0x130b   : > { %v7811_v1 = vsel %vm890_vm0, %v16623_v39, %v10192_v2  ;;  %v7812_v8 = vsel %vm890_vm0, %v16624_v49, %v10193_v14 }
0x130c   : > { %v7828_v40 = vsel %vm7819_vm1, %v7811_v1, %v10197_v62  ;;  %v7829_v41 = vsel %vm7819_vm1, %v7812_v8, %v10198_v31  ;;  %v10221_v35 = vpop.permute.xlu1 %10220  ;;  %v10896_v31 = vld [vmem:[#allocation2 + $0x58] sm:$0xff] }
0x130d   : > { %v10222_v17 = vunpack.i.l.bf16 %v10221_v35  ;;  %v10223_v59 = vunpack.i.h.bf16 %v10221_v35 }
0x1310   : > { %v10206_v0 = vpop.permute.xlu2 %10205 }
0x1311   : > { %v7314_v45 = vpop.f32.mrf.mxu0  ;;  %7657 = vrot.lane.b32.xlu1 %v16619_v48, %s11146_s24  ;;  %v10207_v38 = vunpack.i.l.bf16 %v10206_v0  ;;  %v10208_v4 = vunpack.i.h.bf16 %v10206_v0 }
0x1313   : > { %v10186_v42 = vpop.permute.xlu0 %10185 }
0x1314   : > { %v10187_v15 = vunpack.i.l.bf16 %v10186_v42  ;;  %v10188_v22 = vunpack.i.h.bf16 %v10186_v42  ;;  %v10236_v37 = vpop.permute.xlu1 %10235 }
0x1315   : > { %v10238_v0 = vunpack.i.h.bf16 %v10236_v37 }
0x1316   : > { %v7911_v12 = vsel %vm7904_vm6, %v7894_v57, %v10187_v15  ;;  %v7912_v3 = vsel %vm7904_vm6, %v7895_v21, %v10188_v22  ;;  %v15143_v15 = vperm.slane %v15140_v34, 3  ;;  %v16625_v57 = vld [vmem:[#allocation81_spill] sm:$0xff] }
0x1317   : > { %7956 = vmatmul.f32.gmra.mxu2 %v7911_v12  ;;  %v7813_v33 = vsel %vm890_vm0, %v16625_v57, %v10222_v17  ;;  %v16626_v12 = vld [vmem:[#allocation105_spill] sm:$0xff] }
0x1318   : > { %v7349_v28 = vpop.f32.mrf.mxu1  ;;  %v10231_v55 = vpop.permute.xlu2 %10230  ;;  %v7814_v63 = vsel %vm890_vm0, %v16626_v12, %v10223_v59  ;;  %v10899_v17 = vld [vmem:[#allocation2 + $0x50] sm:$0xff] }
0x1319   : > { %7783 = vrot.lane.b32.xlu2 %v7349_v28, %s11144_s16  ;;  %v7317_v60 = vpop.f32.mrf.mxu0  ;;  %v10233_v54 = vunpack.i.h.bf16 %v10231_v55  ;;  %v16627_v57 = vld [vmem:[#allocation77_spill] sm:$0xff] }
0x131a   : > { %v10289_v23 = vpack.i.bf16 %v7317_v60, %v7314_v45  ;;  %v10232_v60 = vunpack.i.l.bf16 %v10231_v55 }
0x131b   : > { %v10201_v46 = vpop.permute.xlu0 %10200 }
0x131c   : > { %10290 = vrot.lane.b32.xlu0 %v10289_v23, %s11144_s16  ;;  %v10202_v36 = vunpack.i.l.bf16 %v10201_v46  ;;  %v10203_v24 = vunpack.i.h.bf16 %v10201_v46  ;;  %v10237_v46 = vunpack.i.l.bf16 %v10236_v37 }
0x131e   : > { %v7845_v9 = vsel %vm7836_vm2, %v7828_v40, %v10202_v36 }
0x131f   : > { %7959 = vmatmul.f32.gmra.mxu2 %v7912_v3 }
0x1320   : > { %v7352_v13 = vpop.f32.mrf.mxu1 }
0x1321   : > { %7785 = vrot.lane.b32.xlu2 %v7352_v13, %s11144_s16 }
0x1323   : > { %v10216_v19 = vpop.permute.xlu0 %10215 }
0x1324   : > { %10305 = vrot.lane.b32.xlu0 %v10304_v44, %s11148_s3  ;;  %v10217_v29 = vunpack.i.l.bf16 %v10216_v19  ;;  %v10218_v58 = vunpack.i.h.bf16 %v10216_v19 }
0x132b   : > { %v10226_v52 = vpop.permute.xlu0 %10225 }
0x132c   : > { %7719 = vrot.lane.b32.xlu0 %v14597_v56, %s11145_s11  ;;  %v7862_v56 = vsel %vm7853_vm3, %v7845_v9, %v10207_v38  ;;  %v10227_v20 = vunpack.i.l.bf16 %v10226_v52  ;;  %v10228_v42 = vunpack.i.h.bf16 %v10226_v52 }
0x132d   : > { %v7879_v50 = vsel %vm7870_vm4, %v7862_v56, %v10212_v43  ;;  %v10895_v43 = vld [vmem:[#allocation2] sm:$0xff] }
0x132e   : > { %v7896_v18 = vsel %vm7887_vm5, %v7879_v50, %v10217_v29  ;;  %v7830_v28 = vsel %vm7819_vm1, %v7813_v33, %v10227_v20  ;;  %v7831_v16 = vsel %vm7819_vm1, %v7814_v63, %v10228_v42 }
0x132f   : > { %v7847_v21 = vsel %vm7836_vm2, %v7830_v28, %v10232_v60  ;;  %v7848_v3 = vsel %vm7836_vm2, %v7831_v16, %v10233_v54 }
0x1330   : > { %v7865_v39 = vsel %vm7853_vm3, %v7848_v3, %v10238_v0  ;;  %v7864_v36 = vsel %vm7853_vm3, %v7847_v21, %v10237_v46  ;;  %v16628_v3 = vld [vmem:[#allocation84_spill] sm:$0xff] }
0x1333   : > { %v10241_v22 = vpop.permute.xlu0 %10240 }
0x1334   : > { %7721 = vrot.lane.b32.xlu0 %v14602_v61, %s11145_s11  ;;  %v7846_v61 = vsel %vm7836_vm2, %v7829_v41, %v10203_v24  ;;  %v10243_v13 = vunpack.i.h.bf16 %v10241_v22  ;;  %v10242_v6 = vunpack.i.l.bf16 %v10241_v22 }
0x1335   : > { %v7863_v7 = vsel %vm7853_vm3, %v7846_v61, %v10208_v4  ;;  %v10897_v4 = vld [vmem:[#allocation2 + $0x68] sm:$0xff] }
0x1336   : > { %v7880_v45 = vsel %vm7870_vm4, %v7863_v7, %v10213_v26  ;;  %v7882_v62 = vsel %vm7870_vm4, %v7865_v39, %v10243_v13  ;;  %v7881_v14 = vsel %vm7870_vm4, %v7864_v36, %v10242_v6  ;;  %v10898_v7 = vld [vmem:[#allocation2 + $0x18] sm:$0xff] }
0x1337   : > { %v7897_v48 = vsel %vm7887_vm5, %v7880_v45, %v10218_v58 }
0x1339   : > { %v10246_v51 = vpop.permute.xlu2 %10245 }
0x133a   : > { %v10247_v30 = vunpack.i.l.bf16 %v10246_v51  ;;  %v10248_v27 = vunpack.i.h.bf16 %v10246_v51 }
0x133c   : > { %v7913_v10 = vsel %vm7904_vm6, %v7896_v18, %v10247_v30  ;;  %v7914_v11 = vsel %vm7904_vm6, %v7897_v48, %v10248_v27 }
0x133d   : > { %7962 = vmatmul.f32.gmra.mxu2 %v7913_v10  ;;  %v10256_v10 = vpop.permute.xlu0 %10255 }
0x133e   : > { %v10257_v35 = vunpack.i.l.bf16 %v10256_v10  ;;  %v10258_v60 = vunpack.i.h.bf16 %v10256_v10 }
0x1340   : > { %v7815_v33 = vsel %vm890_vm0, %v16627_v57, %v10257_v35  ;;  %v7816_v13 = vsel %vm890_vm0, %v16628_v3, %v10258_v60  ;;  %v16630_v35 = vld [vmem:[#allocation96_spill] sm:$0xff] }
0x1341   : > { %v10251_v32 = vpop.permute.xlu2 %10250 }
0x1342   : > { %v10253_v53 = vunpack.i.h.bf16 %v10251_v32  ;;  %v10252_v2 = vunpack.i.l.bf16 %v10251_v32 }
0x1344   : > { %v7899_v9 = vsel %vm7887_vm5, %v7882_v62, %v10253_v53  ;;  %v7898_v25 = vsel %vm7887_vm5, %v7881_v14, %v10252_v2 }
0x1345   : > { %7965 = vmatmul.f32.gmra.mxu2 %v7914_v11  ;;  %v10276_v42 = vpop.permute.xlu0 %10275 }
0x1346   : > { %v10277_v28 = vunpack.i.l.bf16 %v10276_v42 }
0x1349   : > { %v10261_v50 = vpop.permute.xlu2 %10260 }
0x134a   : > { %v10262_v52 = vunpack.i.l.bf16 %v10261_v50  ;;  %v10263_v22 = vunpack.i.h.bf16 %v10261_v50 }
0x134c   : > { %v7832_v12 = vsel %vm7819_vm1, %v7815_v33, %v10262_v52  ;;  %v7833_v0 = vsel %vm7819_vm1, %v7816_v13, %v10263_v22 }
0x1351   : > { %v10281_v45 = vpop.permute.xlu2 %10280 }
0x1352   : > { %v10282_v32 = vunpack.i.l.bf16 %v10281_v45  ;;  %v10283_v14 = vunpack.i.h.bf16 %v10281_v45 }
0x1355   : > { %v7939_v23 = vpop.f32.mrf.mxu0 }
0x1356   : > { %v7940_v47 = vadd.f32 %v7939_v23, %v15143_v15 }
0x1358   : > { %v15154_v44 = vadd.f32 %v10894_v5, %v7940_v47 }
0x1359   : > { %v10296_v16 = vpop.permute.xlu2 %10295 }
0x135a   : > { %8003 = vadd.xlane.f32.xlu1 %v15154_v44  ;;  %v10297_v36 = vunpack.i.l.bf16 %v10296_v16 }
0x135b   : > { %v10266_v1 = vpop.permute.xlu1 %10265 }
0x135c   : > { %v10268_v55 = vunpack.i.h.bf16 %v10266_v1  ;;  %v10267_v40 = vunpack.i.l.bf16 %v10266_v1  ;;  %v10278_v1 = vunpack.i.h.bf16 %v10276_v42 }
0x135d   : > { %v7942_v19 = vpop.f32.mrf.mxu0 }
0x135e   : > { %v7943_v38 = vadd.f32 %v7942_v19, %v15143_v15  ;;  %v7915_v29 = vsel %vm7904_vm6, %v7898_v25, %v10267_v40  ;;  %v7916_v56 = vsel %vm7904_vm6, %v7899_v9, %v10268_v55 }
0x135f   : > { %7968 = vmatmul.f32.gmra.mxu2 %v7915_v29  ;;  %7971 = vmatmul.f32.vlgmr.msrb.gmra.mxu3 %v7916_v56 }
0x1360   : > { %v15166_v49 = vadd.f32 %v10895_v43, %v7943_v38  ;;  %v16629_v38 = vld [vmem:[#allocation113_spill] sm:$0xff] }
0x1361   : > { %v10311_v9 = vpop.permute.xlu2 %10310  ;;  %v7817_v29 = vsel %vm890_vm0, %v16629_v38, %v10297_v36 }
0x1362   : > { %8005 = vadd.xlane.f32.xlu0 %v15166_v49 }
0x1363   : > { %v10271_v27 = vpop.permute.xlu1 %10270 }
0x1364   : > { %v10272_v20 = vunpack.i.l.bf16 %v10271_v27  ;;  %v10273_v47 = vunpack.i.h.bf16 %v10271_v27 }
0x1366   : > { %v7849_v63 = vsel %vm7836_vm2, %v7832_v12, %v10272_v20  ;;  %v7850_v53 = vsel %vm7836_vm2, %v7833_v0, %v10273_v47  ;;  %v10313_v12 = vunpack.i.h.bf16 %v10311_v9 }
0x1367   : > { %v7866_v54 = vsel %vm7853_vm3, %v7849_v63, %v10277_v28  ;;  %v7867_v40 = vsel %vm7853_vm3, %v7850_v53, %v10278_v1 }
0x1368   : > { %v7883_v5 = vsel %vm7870_vm4, %v7866_v54, %v10282_v32  ;;  %v7884_v43 = vsel %vm7870_vm4, %v7867_v40, %v10283_v14  ;;  %v11151_v32 = vmov 128.0   ;;  %v10901_v40 = vld [vmem:[#allocation2 + $0x48] sm:$0xff] }
0x1369   : > { %10827 = vrcp.f32 %v11151_v32  ;;  %v10906_v32 = vld [vmem:[#allocation2 + $0x60] sm:$0xff] }
0x136b   : > { %v7954_v30 = vpop.f32.mrf.mxu2  ;;  %v10286_v37 = vpop.permute.xlu1 %10285 }
0x136c   : > { %v7955_v41 = vadd.f32 %v7954_v30, %v15143_v15  ;;  %v10287_v23 = vunpack.i.l.bf16 %v10286_v37  ;;  %v10288_v62 = vunpack.i.h.bf16 %v10286_v37 }
0x136e   : > { %v15175_v58 = vadd.f32 %v10897_v4, %v7955_v41  ;;  %v7900_v46 = vsel %vm7887_vm5, %v7883_v5, %v10287_v23  ;;  %v10298_v41 = vunpack.i.h.bf16 %v10296_v16 }
0x136f   : > { %v10828_v47 = vpop.eup %10827 }
0x1370   : > { %v7818_v52 = vsel %vm890_vm0, %v16630_v35, %v10298_v41  ;;  %vm8040_vm7 = vweird.f32 %v10828_v47  ;;  %v10904_v35 = vld [vmem:[#allocation2 + $0x10] sm:$0xff] }
0x1371   : > { %v7945_v8 = vpop.f32.mrf.mxu0 }
0x1372   : > { %v7946_v24 = vadd.f32 %v7945_v8, %v15143_v15 }
0x1373   : > { %v10301_v2 = vpop.permute.xlu1 %10300  ;;  %v7784_v45 = vpop.permute.xlu2 %7783 }
0x1374   : > { %v15170_v51 = vadd.f32 %v10896_v31, %v7946_v24  ;;  %v10302_v55 = vunpack.i.l.bf16 %v10301_v2  ;;  %v7901_v24 = vsel %vm7887_vm5, %v7884_v43, %v10288_v62  ;;  %v10312_v31 = vunpack.i.l.bf16 %v10311_v9 }
0x1376   : > { %8007 = vadd.xlane.f32.xlu2 %v15170_v51  ;;  %v7834_v8 = vsel %vm7819_vm1, %v7817_v29, %v10302_v55 }
0x1379   : > { %v7948_v18 = vpop.f32.mrf.mxu0 }
0x137a   : > { %v7949_v61 = vadd.f32 %v7948_v18, %v15143_v15 }
0x137b   : > { %v7656_v10 = vpop.permute.xlu1 %7655  ;;  %v7786_v22 = vpop.permute.xlu2 %7785 }
0x137c   : > { %v15177_v26 = vadd.f32 %v10898_v7, %v7949_v61  ;;  %v10303_v61 = vunpack.i.h.bf16 %v10301_v2 }
0x137e   : > { %8009 = vadd.xlane.f32.xlu1 %v15177_v26  ;;  %8013 = vadd.xlane.f32.xlu2 %v15175_v58  ;;  %v7835_v42 = vsel %vm7819_vm1, %v7818_v52, %v10303_v61 }
0x1381   : > { %v7951_v48 = vpop.f32.mrf.mxu0 }
0x1382   : > { %v7952_v11 = vadd.f32 %v7951_v48, %v15143_v15  ;;  %v10900_v48 = vld [vmem:[#allocation2 + $0x8] sm:$0xff] }
0x1383   : > { %v7658_v28 = vpop.permute.xlu1 %7657 }
0x1384   : > { %v15182_v59 = vadd.f32 %v10899_v17, %v7952_v11 }
0x1386   : > { %8011 = vadd.xlane.f32.xlu0 %v15182_v59 }
0x138e   : > { %v10291_v21 = vpop.permute.xlu0 %10290 }
0x138f   : > { %v10292_v6 = vunpack.i.l.bf16 %v10291_v21  ;;  %v10293_v19 = vunpack.i.h.bf16 %v10291_v21  ;;  %v8036_v21 = vmul.f32 128.0, %v10828_v47 }
0x1391   : > { %v7917_v39 = vsel %vm7904_vm6, %v7900_v46, %v10292_v6  ;;  %v7918_v50 = vsel %vm7904_vm6, %v7901_v24, %v10293_v19  ;;  %v8037_v3 = vsub.f32 1.0, %v8036_v21 }
0x1392   : > { %7974 = vmatmul.f32.gmra.mxu3 %v7917_v39 }
0x1393   : > { %v8038_v13 = vmul.f32 %v10828_v47, %v8037_v3  ;;  %v10907_v3 = vld [vmem:[#allocation2 + $0x70] sm:$0xff] }
0x1395   : > { %v8039_v6 = vadd.f32 %v10828_v47, %v8038_v13 }
0x1396   : > { %v10306_v25 = vpop.permute.xlu0 %10305 }
0x1397   : > { %v10307_v56 = vunpack.i.l.bf16 %v10306_v25  ;;  %v10308_v27 = vunpack.i.h.bf16 %v10306_v25  ;;  %v15221_v5 = vsel %vm8040_vm7, %v10828_v47, %v8039_v6  ;;  %v10902_v25 = vld [vmem:[#allocation2 + $0x40] sm:$0xff]  ;;  %v603_v6 = vld [vmem:[%s11370_s21 + $0xd0] sm:$0xff] }
0x1399   : > { %v7851_v30 = vsel %vm7836_vm2, %v7834_v8, %v10307_v56  ;;  %v7852_v33 = vsel %vm7836_vm2, %v7835_v42, %v10308_v27 }
0x139a   : > { %v7957_v18 = vpop.f32.mrf.mxu2  ;;  %7977 = vmatmul.f32.gmra.mxu3 %v7918_v50  ;;  %v7868_v7 = vsel %vm7853_vm3, %v7851_v30, %v10312_v31  ;;  %v7869_v63 = vsel %vm7853_vm3, %v7852_v33, %v10313_v12  ;;  %v607_v33 = vld [vmem:[%s11370_s21 + $0xf0] sm:$0xff]  ;;  %v605_v12 = vld [vmem:[%s11370_s21 + $0xe0] sm:$0xff] }
0x139b   : > { %v7958_v4 = vadd.f32 %v7957_v18, %v15143_v15  ;;  %v7885_v20 = vsel %vm7870_vm4, %v7868_v7, %v7656_v10  ;;  %v7886_v16 = vsel %vm7870_vm4, %v7869_v63, %v7658_v28  ;;  %v10903_v18 = vld [vmem:[#allocation2 + $0x20] sm:$0xff]  ;;  %8369 = vmatpush.msra.mxu3 %v607_v33  ;;  %v606_v63 = vld [vmem:[%s11370_s21 + $0xe8] sm:$0xff] }
0x139d   : > { %v15207_v11 = vadd.f32 %v10900_v48, %v7958_v4  ;;  %8370 = vmatpush.msra.mxu3 %v605_v12 }
0x139e   : > { %v7720_v17 = vpop.permute.xlu0 %7719 }
0x139f   : > { %v7902_v57 = vsel %vm7887_vm5, %v7885_v20, %v7720_v17  ;;  %8015 = vadd.xlane.f32.xlu0 %v15207_v11  ;;  %8371 = vmatpush.msra.mxu3 %v603_v6 }
0x13a0   : > { %v7919_v37 = vsel %vm7904_vm6, %v7902_v57, %v7784_v45  ;;  %v10905_v57 = vld [vmem:[#allocation2 + $0x38] sm:$0xff] }
0x13a2   : > { %7980 = vmatmul.f32.gmra.mxu3 %v7919_v37  ;;  %v7960_v39 = vpop.f32.mrf.mxu2  ;;  %v608_v37 = vld [vmem:[%s11370_s21 + $0xf8] sm:$0xff] }
0x13a3   : > { %v7961_v36 = vadd.f32 %v7960_v39, %v15143_v15  ;;  %8434 = vmatpush.msrb.mxu0 %v608_v37  ;;  %v599_v39 = vld [vmem:[%s11370_s21 + $0xb0] sm:$0xff] }
0x13a5   : > { %v15234_v14 = vadd.f32 %v10901_v40, %v7961_v36  ;;  %8435 = vmatpush.msrb.mxu0 %v606_v63  ;;  %v597_v36 = vld [vmem:[%s11370_s21 + $0xa0] sm:$0xff]  ;;  %v595_v40 = vld [vmem:[%s11370_s21 + $0x90] sm:$0xff] }
0x13a6   : > { %v7722_v60 = vpop.permute.xlu0 %7721 }
0x13a7   : > { %v7903_v23 = vsel %vm7887_vm5, %v7886_v16, %v7722_v60 }
0x13a8   : > { %v7920_v54 = vsel %vm7904_vm6, %v7903_v23, %v7786_v22 }
0x13aa   : > { %7983 = vmatmul.f32.gmra.mxu3 %v7920_v54 }
0x13c0   : > { %v7963_v9 = vpop.f32.mrf.mxu2 }
0x13c1   : > { %v7964_v19 = vadd.f32 %v7963_v9, %v15143_v15  ;;  %v593_v9 = vld [vmem:[%s11370_s21 + $0x80] sm:$0xff] }
0x13c3   : > { %v15240_v38 = vadd.f32 %v10902_v25, %v7964_v19  ;;  %v594_v19 = vld [vmem:[%s11370_s21 + $0x88] sm:$0xff]  ;;  %v591_v25 = vld [vmem:[%s11370_s21 + $0x70] sm:$0xff] }
0x13c8   : > { %v7966_v8 = vpop.f32.mrf.mxu2 }
0x13c9   : > { %v7967_v31 = vadd.f32 %v7966_v8, %v15143_v15  ;;  %v587_v8 = vld [vmem:[%s11370_s21 + $0x50] sm:$0xff] }
0x13cb   : > { %v15254_v61 = vadd.f32 %v10903_v18, %v7967_v31  ;;  %v585_v31 = vld [vmem:[%s11370_s21 + $0x40] sm:$0xff]  ;;  %v584_v18 = vld [vmem:[%s11370_s21 + $0x38] sm:$0xff] }
0x13cd   : > { %v8004_v0 = vpop.xlane.xlu1 %8003 }
0x13ce   : > { %v8042_v46 = vmul.f32 %v15221_v5, %v8004_v0  ;;  %v604_v0 = vld [vmem:[%s11370_s21 + $0xd8] sm:$0xff] }
0x13cf   : > { %8436 = vmatpush.msrb.mxu0 %v604_v0 }
0x13d0   : > { %v15225_v53 = vsub.f32 %v15154_v44, %v8042_v46  ;;  %v601_v46 = vld [vmem:[%s11370_s21 + $0xc0] sm:$0xff] }
0x13d1   : > { %8372 = vmatpush.msra.mxu3 %v601_v46 }
0x13d2   : > { %v8074_v2 = vmul.f32 %v15225_v53, %v15225_v53 }
0x13d3   : > { %8373 = vmatpush.msra.mxu3 %v599_v39 }
0x13d4   : > { %8090 = vadd.xlane.f32.xlu1 %v8074_v2  ;;  %v602_v2 = vld [vmem:[%s11370_s21 + $0xc8] sm:$0xff] }
0x13d5   : > { %v8006_v1 = vpop.xlane.xlu0 %8005  ;;  %8437 = vmatpush.msrb.mxu0 %v602_v2  ;;  %8374 = vmatpush.msra.mxu3 %v597_v36  ;;  %v10908_v2 = vld [vmem:[#allocation2 + $0x78] sm:$0xff] }
0x13d6   : > { %v8043_v62 = vmul.f32 %v15221_v5, %v8006_v1  ;;  %v600_v1 = vld [vmem:[%s11370_s21 + $0xb8] sm:$0xff] }
0x13d7   : > { %8438 = vmatpush.msrb.mxu0 %v600_v1  ;;  %8375 = vmatpush.msra.mxu3 %v595_v40  ;;  %v15341_v1 = vperm.slane %v15140_v34, 4 }
0x13d8   : > { %v15232_v55 = vsub.f32 %v15166_v49, %v8043_v62  ;;  %v598_v62 = vld [vmem:[%s11370_s21 + $0xa8] sm:$0xff] }
0x13d9   : > { %8439 = vmatpush.msrb.mxu0 %v598_v62  ;;  %8376 = vmatpush.msra.mxu3 %v593_v9 }
0x13da   : > { %v8075_v44 = vmul.f32 %v15232_v55, %v15232_v55 }
0x13db   : > { %8377 = vmatpush.msra.mxu3 %v591_v25 }
0x13dc   : > { %8017 = vadd.xlane.f32.xlu1 %v15234_v14  ;;  %8092 = vadd.xlane.f32.xlu2 %v8075_v44  ;;  %v596_v44 = vld [vmem:[%s11370_s21 + $0x98] sm:$0xff] }
0x13dd   : > { %8440 = vmatpush.msrb.mxu0 %v596_v44 }
0x13df   : > { %8441 = vmatpush.msrb.mxu0 %v594_v19 }
0x13e2   : > { %v7969_v10 = vpop.f32.mrf.mxu2  ;;  %v7972_v20 = vpop.f32.mrf.mxu3 }
0x13e3   : > { %v7970_v27 = vadd.f32 %v7969_v10, %v15143_v15  ;;  %v582_v10 = vld [vmem:[%s11370_s21 + $0x28] sm:$0xff] }
0x13e4   : > { %8019 = vadd.xlane.f32.xlu2 %v15240_v38 }
0x13e5   : > { %v15268_v52 = vadd.f32 %v10904_v35, %v7970_v27  ;;  %v577_v27 = vld [vmem:[%s11370_s21] sm:$0xff] }
0x13e9   : > { %v8008_v29 = vpop.xlane.xlu2 %8007 }
0x13ea   : > { %v8044_v49 = vmul.f32 %v15221_v5, %v8008_v29  ;;  %v592_v29 = vld [vmem:[%s11370_s21 + $0x78] sm:$0xff] }
0x13eb   : > { %8442 = vmatpush.msrb.mxu0 %v592_v29 }
0x13ec   : > { %v15245_v56 = vsub.f32 %v15170_v51, %v8044_v49  ;;  %v589_v49 = vld [vmem:[%s11370_s21 + $0x60] sm:$0xff] }
0x13ed   : > { %8378 = vmatpush.msra.mxu3 %v589_v49 }
0x13ee   : > { %v8076_v43 = vmul.f32 %v15245_v56, %v15245_v56 }
0x13ef   : > { %8379 = vmatpush.msra.mxu3 %v587_v8 }
0x13f0   : > { %8094 = vadd.xlane.f32.xlu0 %v8076_v43  ;;  %v590_v43 = vld [vmem:[%s11370_s21 + $0x68] sm:$0xff] }
0x13f1   : > { %v8010_v24 = vpop.xlane.xlu1 %8009  ;;  %v8014_v41 = vpop.xlane.xlu2 %8013  ;;  %8443 = vmatpush.msrb.mxu0 %v590_v43  ;;  %8380 = vmatpush.msra.mxu3 %v585_v31 }
0x13f2   : > { %v8045_v30 = vmul.f32 %v15221_v5, %v8010_v24  ;;  %v8047_v4 = vmul.f32 %v15221_v5, %v8014_v41  ;;  %v588_v24 = vld [vmem:[%s11370_s21 + $0x58] sm:$0xff]  ;;  %v583_v41 = vld [vmem:[%s11370_s21 + $0x30] sm:$0xff] }
0x13f3   : > { %8444 = vmatpush.msrb.mxu0 %v588_v24  ;;  %8381 = vmatpush.msra.mxu3 %v583_v41 }
0x13f4   : > { %v15252_v50 = vsub.f32 %v15177_v26, %v8045_v30  ;;  %v15263_v45 = vsub.f32 %v15175_v58, %v8047_v4  ;;  %v7973_v58 = vadd.f32 %v7972_v20, %v15143_v15  ;;  %v586_v30 = vld [vmem:[%s11370_s21 + $0x48] sm:$0xff]  ;;  %v579_v4 = vld [vmem:[%s11370_s21 + $0x10] sm:$0xff] }
0x13f5   : > { %8445 = vmatpush.msrb.mxu0 %v586_v30 }
0x13f6   : > { %v8077_v51 = vmul.f32 %v15252_v50, %v15252_v50  ;;  %v8079_v42 = vmul.f32 %v15263_v45, %v15263_v45 }
0x13f7   : > { %8446 = vmatpush.msrb.mxu0 %v584_v18 }
0x13f8   : > { %8096 = vadd.xlane.f32.xlu1 %v8077_v51  ;;  %8021 = vadd.xlane.f32.xlu0 %v15254_v61  ;;  %v581_v51 = vld [vmem:[%s11370_s21 + $0x20] sm:$0xff] }
0x13f9   : > { %v8012_v7 = vpop.xlane.xlu0 %8011  ;;  %8382 = vmatpush.msra.mxu3 %v581_v51  ;;  %8447 = vmatpush.msrb.mxu0 %v582_v10 }
0x13fa   : > { %v8046_v26 = vmul.f32 %v15221_v5, %v8012_v7  ;;  %v580_v7 = vld [vmem:[%s11370_s21 + $0x18] sm:$0xff] }
0x13fb   : > { %8383 = vmatpush.msra.mxu3 %v579_v4  ;;  %8448 = vmatpush.msrb.mxu0 %v580_v7 }
0x13fc   : > { %v15266_v48 = vsub.f32 %v15182_v59, %v8046_v26  ;;  %v15276_v59 = vadd.f32 %v10905_v57, %v7973_v58  ;;  %v578_v26 = vld [vmem:[%s11370_s21 + $0x8] sm:$0xff] }
0x13fd   : > { %8384 = vmatpush.msra.mxu3 %v577_v27  ;;  %8449 = vmatpush.msrb.mxu0 %v578_v26 }
0x13fe   : > { %v8078_v17 = vmul.f32 %v15266_v48, %v15266_v48 }
0x1400   : > { %8023 = vadd.xlane.f32.xlu1 %v15268_v52  ;;  %8098 = vadd.xlane.f32.xlu2 %v8078_v17 }
0x1401   : > { %8100 = vadd.xlane.f32.xlu0 %v8079_v42 }
0x1408   : > { %8025 = vadd.xlane.f32.xlu2 %v15276_v59 }
0x1412   : > { %v8016_v28 = vpop.xlane.xlu0 %8015 }
0x1413   : > { %v8048_v60 = vmul.f32 %v15221_v5, %v8016_v28 }
0x1415   : > { %v15285_v16 = vsub.f32 %v15207_v11, %v8048_v60  ;;  %v7975_v22 = vpop.f32.mrf.mxu3 }
0x1416   : > { %v7976_v23 = vadd.f32 %v7975_v22, %v15143_v15 }
0x1417   : > { %v8080_v54 = vmul.f32 %v15285_v16, %v15285_v16 }
0x1418   : > { %v15290_v47 = vadd.f32 %v10906_v32, %v7976_v23 }
0x1419   : > { %8102 = vadd.xlane.f32.xlu1 %v8080_v54 }
0x141a   : > { %8027 = vadd.xlane.f32.xlu0 %v15290_v47 }
0x141d   : > { %v7978_v21 = vpop.f32.mrf.mxu3 }
0x141e   : > { %v7979_v11 = vadd.f32 %v7978_v21, %v15143_v15 }
0x1420   : > { %v15294_v13 = vadd.f32 %v10907_v3, %v7979_v11 }
0x1422   : > { %8029 = vadd.xlane.f32.xlu1 %v15294_v13 }
0x1425   : > { %v7981_v28 = vpop.f32.mrf.mxu3 }
0x1426   : > { %v7982_v21 = vadd.f32 %v7981_v28, %v15143_v15 }
0x1428   : > { %v15338_v39 = vadd.f32 %v10908_v2, %v7982_v21 }
0x142d   : > { %v7984_v62 = vpop.f32.mrf.mxu3 }
0x142e   : > { %v7985_v25 = vadd.f32 %v7984_v62, %v15143_v15 }
0x1447   : > { %v8091_v35 = vpop.xlane.xlu1 %8090 }
0x1448   : > { %v8122_v17 = vmul.f32 %v8091_v35, %v15221_v5 }
0x144a   : > { %v8138_v20 = vadd.f32 1e-05, %v8122_v17 }
0x144c   : > { %10829 = vrsqrt.f32 %v8138_v20  ;;  %vm8160_vm9 = vweird.f32 %v8138_v20 }
0x144f   : > { %v8018_v42 = vpop.xlane.xlu1 %8017  ;;  %v8093_v58 = vpop.xlane.xlu2 %8092 }
0x1450   : > { %v8049_v57 = vmul.f32 %v15221_v5, %v8018_v42  ;;  %v8123_v33 = vmul.f32 %v8093_v58, %v15221_v5 }
0x1452   : > { %v10830_v37 = vpop.eup %10829  ;;  %v15329_v12 = vsub.f32 %v15234_v14, %v8049_v57  ;;  %v8139_v63 = vadd.f32 1e-05, %v8123_v33 }
0x1453   : > { %v8155_v60 = vmul.f32 %v10830_v37, %v8138_v20  ;;  %vm8161_vm8 = vweird.f32 %v10830_v37 }
0x1454   : > { %10831 = vrsqrt.f32 %v8139_v63  ;;  %v8081_v22 = vmul.f32 %v15329_v12, %v15329_v12  ;;  %vm8162_vm10 = vmor %vm8160_vm9, %vm8161_vm8  ;;  %vm8170_vm12 = vweird.f32 %v8139_v63 }
0x1455   : > { %v8156_v23 = vmul.f32 %v10830_v37, %v8155_v60 }
0x1456   : > { %8104 = vadd.xlane.f32.xlu2 %v8081_v22 }
0x1457   : > { %v8157_v54 = vmul.f32 0.5, %v8156_v23  ;;  %v8020_v32 = vpop.xlane.xlu2 %8019 }
0x1458   : > { %v8050_v11 = vmul.f32 %v15221_v5, %v8020_v32 }
0x1459   : > { %v8158_v3 = vsub.f32 1.5, %v8157_v54 }
0x145a   : > { %v10832_v6 = vpop.eup %10831  ;;  %v15336_v14 = vsub.f32 %v15240_v38, %v8050_v11  ;;  %v15348_v38 = vperm.slane %v15140_v34, 5 }
0x145b   : > { %v8159_v0 = vmul.f32 %v10830_v37, %v8158_v3  ;;  %v8165_v46 = vmul.f32 %v10832_v6, %v8139_v63  ;;  %vm8171_vm11 = vweird.f32 %v10832_v6 }
0x145c   : > { %v8082_v36 = vmul.f32 %v15336_v14, %v15336_v14  ;;  %vm8172_vm13 = vmor %vm8170_vm12, %vm8171_vm11 }
0x145d   : > { %v8163_v40 = vsel %vm8162_vm10, %v10830_v37, %v8159_v0  ;;  %v8166_v44 = vmul.f32 %v10832_v6, %v8165_v46 }
0x145e   : > { %v8314_v9 = vmul.f32 %v8163_v40, %v15225_v53  ;;  %8031 = vadd.xlane.f32.xlu2 %v15338_v39  ;;  %8106 = vadd.xlane.f32.xlu0 %v8082_v36  ;;  %v10909_v53 = vld [vmem:[#allocation2 + $0x28] sm:$0xff] }
0x145f   : > { %v8167_v19 = vmul.f32 0.5, %v8166_v44  ;;  %v15355_v31 = vadd.f32 %v10909_v53, %v7985_v25 }
0x1460   : > { %v8331_v29 = vmul.f32 %v15341_v1, %v8314_v9 }
0x1461   : > { %v8168_v49 = vsub.f32 1.5, %v8167_v19 }
0x1462   : > { %v15353_v43 = vadd.f32 %v15348_v38, %v8331_v29 }
0x1463   : > { %v8169_v8 = vmul.f32 %v10832_v6, %v8168_v49  ;;  %v8095_v24 = vpop.xlane.xlu0 %8094 }
0x1464   : > { %8385 = vmatmul.f32.vlgmr.msra.gmra.mxu3 %v15353_v43  ;;  %8450 = vmatmul.f32.vlgmr.msrb.gmra.mxu0 %v15353_v43  ;;  %v8124_v34 = vmul.f32 %v8095_v24, %v15221_v5 }
0x1465   : > { %v8173_v15 = vsel %vm8172_vm13, %v10832_v6, %v8169_v8 }
0x1466   : > { %v8140_v30 = vadd.f32 1e-05, %v8124_v34  ;;  %8033 = vadd.xlane.f32.xlu0 %v15355_v31  ;;  %v8315_v41 = vmul.f32 %v8173_v15, %v15232_v55 }
0x1468   : > { %10833 = vrsqrt.f32 %v8140_v30  ;;  %v8332_v18 = vmul.f32 %v15341_v1, %v8315_v41  ;;  %vm8180_vm15 = vweird.f32 %v8140_v30 }
0x146a   : > { %v15364_v51 = vadd.f32 %v15348_v38, %v8332_v18 }
0x146b   : > { %v8097_v10 = vpop.xlane.xlu1 %8096  ;;  %v8022_v4 = vpop.xlane.xlu0 %8021 }
0x146c   : > { %v8125_v7 = vmul.f32 %v8097_v10, %v15221_v5  ;;  %v8051_v27 = vmul.f32 %v15221_v5, %v8022_v4  ;;  %8388 = vmatmul.f32.gmra.mxu3 %v15364_v51  ;;  %8453 = vmatmul.f32.gmra.mxu0 %v15364_v51 }
0x146e   : > { %v10834_v26 = vpop.eup %10833  ;;  %v8141_v35 = vadd.f32 1e-05, %v8125_v7  ;;  %v15371_v55 = vsub.f32 %v15254_v61, %v8051_v27 }
0x146f   : > { %v8175_v17 = vmul.f32 %v10834_v26, %v8140_v30  ;;  %vm8181_vm14 = vweird.f32 %v10834_v26 }
0x1470   : > { %10835 = vrsqrt.f32 %v8141_v35  ;;  %v8083_v20 = vmul.f32 %v15371_v55, %v15371_v55  ;;  %vm8182_vm0 = vmor %vm8180_vm15, %vm8181_vm14  ;;  %vm8190_vm2 = vweird.f32 %v8141_v35 }
0x1471   : > { %v8176_v42 = vmul.f32 %v10834_v26, %v8175_v17 }
0x1472   : > { %8108 = vadd.xlane.f32.xlu1 %v8083_v20 }
0x1473   : > { %v8177_v58 = vmul.f32 0.5, %v8176_v42  ;;  %v8024_v57 = vpop.xlane.xlu1 %8023  ;;  %v8099_v33 = vpop.xlane.xlu2 %8098 }
0x1474   : > { %v8052_v37 = vmul.f32 %v15221_v5, %v8024_v57  ;;  %v8101_v63 = vpop.xlane.xlu0 %8100  ;;  %v8126_v28 = vmul.f32 %v8099_v33, %v15221_v5 }
0x1475   : > { %v8178_v60 = vsub.f32 1.5, %v8177_v58  ;;  %v8127_v61 = vmul.f32 %v8101_v63, %v15221_v5 }
0x1476   : > { %v10836_v22 = vpop.eup %10835  ;;  %v15379_v23 = vsub.f32 %v15268_v52, %v8052_v37  ;;  %v8142_v54 = vadd.f32 1e-05, %v8126_v28 }
0x1477   : > { %v8179_v32 = vmul.f32 %v10834_v26, %v8178_v60  ;;  %v8185_v21 = vmul.f32 %v10836_v22, %v8141_v35  ;;  %v8143_v11 = vadd.f32 1e-05, %v8127_v61  ;;  %vm8191_vm1 = vweird.f32 %v10836_v22  ;;  %v639_v35 = vld [vmem:[%s11388_s30 + $0xf0] sm:$0xff] }
0x1478   : > { %10837 = vrsqrt.f32 %v8142_v54  ;;  %v8084_v3 = vmul.f32 %v15379_v23, %v15379_v23  ;;  %vm8192_vm3 = vmor %vm8190_vm2, %vm8191_vm1  ;;  %vm8200_vm6 = vweird.f32 %v8142_v54 }
0x1479   : > { %v8183_v6 = vsel %vm8182_vm0, %v10834_v26, %v8179_v32  ;;  %v8186_v0 = vmul.f32 %v10836_v22, %v8185_v21  ;;  %10839 = vrsqrt.f32 %v8143_v11  ;;  %vm8210_vm8 = vweird.f32 %v8143_v11  ;;  %v640_v26 = vld [vmem:[%s11388_s30 + $0xf8] sm:$0xff] }
0x147a   : > { %8110 = vadd.xlane.f32.xlu2 %v8084_v3  ;;  %v8316_v46 = vmul.f32 %v8183_v6, %v15245_v56  ;;  %8597 = vmatpush.msrb.mxu2 %v640_v26  ;;  %v628_v26 = vld [vmem:[%s11388_s30 + $0x98] sm:$0xff] }
0x147b   : > { %v8187_v2 = vmul.f32 0.5, %v8186_v0  ;;  %v8026_v36 = vpop.xlane.xlu2 %8025 }
0x147c   : > { %v8053_v52 = vmul.f32 %v15221_v5, %v8026_v36  ;;  %v8333_v62 = vmul.f32 %v15341_v1, %v8316_v46  ;;  %8598 = vmatpush.msrb.mxu2 %v639_v35  ;;  %v614_v35 = vld [vmem:[%s11388_s30 + $0x28] sm:$0xff] }
0x147d   : > { %v8188_v40 = vsub.f32 1.5, %v8187_v2 }
0x147e   : > { %v10838_v44 = vpop.eup %10837  ;;  %v15387_v9 = vsub.f32 %v15276_v59, %v8053_v52  ;;  %v15390_v19 = vadd.f32 %v15348_v38, %v8333_v62 }
0x147f   : > { %v10840_v25 = vpop.eup %10839  ;;  %v8189_v29 = vmul.f32 %v10836_v22, %v8188_v40  ;;  %v8195_v49 = vmul.f32 %v10838_v44, %v8142_v54  ;;  %vm8201_vm4 = vweird.f32 %v10838_v44  ;;  %v638_v40 = vld [vmem:[%s11388_s30 + $0xe8] sm:$0xff] }
0x1480   : > { %v8205_v56 = vmul.f32 %v10840_v25, %v8143_v11  ;;  %8391 = vmatmul.f32.gmra.mxu3 %v15390_v19  ;;  %8456 = vmatmul.f32.gmra.mxu0 %v15390_v19  ;;  %v8085_v8 = vmul.f32 %v15387_v9, %v15387_v9  ;;  %vm8211_vm5 = vweird.f32 %v10840_v25  ;;  %vm8202_vm7 = vmor %vm8200_vm6, %vm8201_vm4 }
0x1481   : > { %v8193_v24 = vsel %vm8192_vm3, %v10836_v22, %v8189_v29  ;;  %v8196_v53 = vmul.f32 %v10838_v44, %v8195_v49  ;;  %vm8212_vm9 = vmor %vm8210_vm8, %vm8211_vm5  ;;  %8599 = vmatpush.msrb.mxu2 %v638_v40  ;;  %v636_v29 = vld [vmem:[%s11388_s30 + $0xd8] sm:$0xff]  ;;  %v622_v49 = vld [vmem:[%s11388_s30 + $0x68] sm:$0xff] }
0x1482   : > { %v8206_v59 = vmul.f32 %v10840_v25, %v8205_v56  ;;  %8112 = vadd.xlane.f32.xlu1 %v8085_v8  ;;  %v8317_v34 = vmul.f32 %v8193_v24, %v15252_v50  ;;  %v635_v56 = vld [vmem:[%s11388_s30 + $0xd0] sm:$0xff]  ;;  %v621_v8 = vld [vmem:[%s11388_s30 + $0x60] sm:$0xff]  ;;  %v634_v24 = vld [vmem:[%s11388_s30 + $0xc8] sm:$0xff] }
0x1483   : > { %v8197_v15 = vmul.f32 0.5, %v8196_v53  ;;  %v620_v53 = vld [vmem:[%s11388_s30 + $0x58] sm:$0xff] }
0x1484   : > { %v8207_v30 = vmul.f32 0.5, %v8206_v59  ;;  %v8334_v41 = vmul.f32 %v15341_v1, %v8317_v34  ;;  %v633_v59 = vld [vmem:[%s11388_s30 + $0xc0] sm:$0xff]  ;;  %v619_v34 = vld [vmem:[%s11388_s30 + $0x50] sm:$0xff] }
0x1485   : > { %v8198_v18 = vsub.f32 1.5, %v8197_v15  ;;  %v632_v15 = vld [vmem:[%s11388_s30 + $0xb8] sm:$0xff] }
0x1486   : > { %v8208_v10 = vsub.f32 1.5, %v8207_v30  ;;  %v15399_v4 = vadd.f32 %v15348_v38, %v8334_v41  ;;  %v618_v30 = vld [vmem:[%s11388_s30 + $0x48] sm:$0xff]  ;;  %v631_v41 = vld [vmem:[%s11388_s30 + $0xb0] sm:$0xff] }
0x1487   : > { %v8199_v7 = vmul.f32 %v10838_v44, %v8198_v18  ;;  %v617_v18 = vld [vmem:[%s11388_s30 + $0x40] sm:$0xff] }
0x1488   : > { %v8209_v27 = vmul.f32 %v10840_v25, %v8208_v10  ;;  %8394 = vmatmul.f32.gmra.mxu3 %v15399_v4  ;;  %8459 = vmatmul.f32.gmra.mxu0 %v15399_v4  ;;  %v630_v10 = vld [vmem:[%s11388_s30 + $0xa8] sm:$0xff] }
0x1489   : > { %v8203_v50 = vsel %vm8202_vm7, %v10838_v44, %v8199_v7  ;;  %v624_v44 = vld [vmem:[%s11388_s30 + $0x78] sm:$0xff] }
0x148a   : > { %v8318_v17 = vmul.f32 %v8203_v50, %v15266_v48  ;;  %v8213_v20 = vsel %vm8212_vm9, %v10840_v25, %v8209_v27  ;;  %v637_v25 = vld [vmem:[%s11388_s30 + $0xe0] sm:$0xff]  ;;  %8532 = vmatpush.msrb.mxu1 %v624_v44  ;;  %v616_v7 = vld [vmem:[%s11388_s30 + $0x38] sm:$0xff]  ;;  %v615_v50 = vld [vmem:[%s11388_s30 + $0x30] sm:$0xff] }
0x148b   : > { %v8319_v28 = vmul.f32 %v8213_v20, %v15263_v45  ;;  %8600 = vmatpush.msrb.mxu2 %v637_v25  ;;  %v629_v27 = vld [vmem:[%s11388_s30 + $0xa0] sm:$0xff] }
0x148c   : > { %v8103_v42 = vpop.xlane.xlu1 %8102  ;;  %v8335_v58 = vmul.f32 %v15341_v1, %v8318_v17  ;;  %v627_v17 = vld [vmem:[%s11388_s30 + $0x90] sm:$0xff]  ;;  %v613_v20 = vld [vmem:[%s11388_s30 + $0x20] sm:$0xff] }
0x148d   : > { %v8128_v57 = vmul.f32 %v8103_v42, %v15221_v5  ;;  %v8028_v33 = vpop.xlane.xlu0 %8027  ;;  %v8336_v22 = vmul.f32 %v15341_v1, %v8319_v28  ;;  %8601 = vmatpush.msrb.mxu2 %v636_v29  ;;  %v626_v42 = vld [vmem:[%s11388_s30 + $0x88] sm:$0xff]  ;;  %v643_v25 = vld [vmem:[%s11386_s1] sm:$0x3] }
0x148e   : > { %v8054_v37 = vmul.f32 %v15221_v5, %v8028_v33  ;;  %v15410_v63 = vadd.f32 %v15348_v38, %v8335_v58  ;;  %v612_v58 = vld [vmem:[%s11388_s30 + $0x18] sm:$0xff]  ;;  %v611_v33 = vld [vmem:[%s11388_s30 + $0x10] sm:$0xff]  ;;  %v610_v28 = vld [vmem:[%s11388_s30 + $0x8] sm:$0xff] }
0x148f   : > { %v8144_v60 = vadd.f32 1e-05, %v8128_v57  ;;  %v15423_v45 = vadd.f32 %v15348_v38, %v8336_v22  ;;  %8602 = vmatpush.msrb.mxu2 %v635_v56  ;;  %v625_v57 = vld [vmem:[%s11388_s30 + $0x80] sm:$0xff] }
0x1490   : > { %v15414_v61 = vsub.f32 %v15290_v47, %v8054_v37  ;;  %8397 = vmatmul.f32.gmra.mxu3 %v15410_v63  ;;  %8462 = vmatmul.f32.gmra.mxu0 %v15410_v63 }
0x1491   : > { %10841 = vrsqrt.f32 %v8144_v60  ;;  %vm8220_vm11 = vweird.f32 %v8144_v60  ;;  %8603 = vmatpush.msrb.mxu2 %v634_v24 }
0x1492   : > { %v8086_v48 = vmul.f32 %v15414_v61, %v15414_v61 }
0x1493   : > { %8604 = vmatpush.msrb.mxu2 %v633_v59 }
0x1494   : > { %8114 = vadd.xlane.f32.xlu0 %v8086_v48  ;;  %v609_v48 = vld [vmem:[%s11388_s30] sm:$0xff] }
0x1495   : > { %v8030_v54 = vpop.xlane.xlu1 %8029  ;;  %8605 = vmatpush.msrb.mxu2 %v632_v15 }
0x1496   : > { %v8055_v32 = vmul.f32 %v15221_v5, %v8030_v54 }
0x1497   : > { %v10842_v21 = vpop.eup %10841  ;;  %8606 = vmatpush.msrb.mxu2 %v631_v41 }
0x1498   : > { %v8215_v47 = vmul.f32 %v10842_v21, %v8144_v60  ;;  %v15426_v11 = vsub.f32 %v15294_v13, %v8055_v32  ;;  %8400 = vmatmul.f32.gmra.mxu3 %v15423_v45  ;;  %8465 = vmatmul.f32.gmra.mxu0 %v15423_v45  ;;  %vm8221_vm10 = vweird.f32 %v10842_v21 }
0x1499   : > { %vm8222_vm12 = vmor %vm8220_vm11, %vm8221_vm10  ;;  %8607 = vmatpush.msrb.mxu2 %v630_v10 }
0x149a   : > { %v8216_v3 = vmul.f32 %v10842_v21, %v8215_v47  ;;  %v8087_v6 = vmul.f32 %v15426_v11, %v15426_v11 }
0x149b   : > { %8608 = vmatpush.msrb.mxu2 %v629_v27 }
0x149c   : > { %v8217_v0 = vmul.f32 0.5, %v8216_v3  ;;  %8116 = vadd.xlane.f32.xlu2 %v8087_v6 }
0x149d   : > { %8609 = vmatpush.msrb.mxu2 %v628_v26 }
0x149e   : > { %v8218_v46 = vsub.f32 1.5, %v8217_v0 }
0x149f   : > { %8610 = vmatpush.msrb.mxu2 %v627_v17 }
0x14a0   : > { %v8219_v2 = vmul.f32 %v10842_v21, %v8218_v46 }
0x14a1   : > { %8611 = vmatpush.msrb.mxu2 %v626_v42 }
0x14a2   : > { %v8223_v13 = vsel %vm8222_vm12, %v10842_v21, %v8219_v2 }
0x14a3   : > { %v8320_v36 = vmul.f32 %v8223_v13, %v15285_v16  ;;  %v623_v16 = vld [vmem:[%s11388_s30 + $0x70] sm:$0xff]  ;;  %8612 = vmatpush.msrb.mxu2 %v625_v57 }
0x14a4   : > { %8533 = vmatpush.msrb.mxu1 %v623_v16 }
0x14a5   : > { %v8337_v52 = vmul.f32 %v15341_v1, %v8320_v36 }
0x14a6   : > { %8534 = vmatpush.msrb.mxu1 %v622_v49 }
0x14a7   : > { %v15435_v62 = vadd.f32 %v15348_v38, %v8337_v52 }
0x14a8   : > { %8535 = vmatpush.msrb.mxu1 %v621_v8  ;;  %v15484_v8 = vperm.slane %v643_v25, 1 }
0x14a9   : > { %8403 = vmatmul.f32.gmra.mxu3 %v15435_v62  ;;  %8468 = vmatmul.f32.gmra.mxu0 %v15435_v62 }
0x14aa   : > { %8536 = vmatpush.msrb.mxu1 %v620_v53 }
0x14ac   : > { %8537 = vmatpush.msrb.mxu1 %v619_v34 }
0x14ae   : > { %8538 = vmatpush.msrb.mxu1 %v618_v30 }
0x14b0   : > { %8539 = vmatpush.msrb.mxu1 %v617_v18 }
0x14b2   : > { %8540 = vmatpush.msrb.mxu1 %v616_v7  ;;  %v15492_v7 = vperm.slane %v643_v25, 0 }
0x14b4   : > { %8541 = vmatpush.msrb.mxu1 %v615_v50 }
0x14b6   : > { %8542 = vmatpush.msrb.mxu1 %v614_v35 }
0x14b8   : > { %8543 = vmatpush.msrb.mxu1 %v613_v20 }
0x14ba   : > { %8544 = vmatpush.msrb.mxu1 %v612_v58 }
0x14bc   : > { %8545 = vmatpush.msrb.mxu1 %v611_v33 }
0x14be   : > { %8546 = vmatpush.msrb.mxu1 %v610_v28 }
0x14c0   : > { %8547 = vmatpush.msrb.mxu1 %v609_v48 }
0x14c9   : > { %v8105_v37 = vpop.xlane.xlu2 %8104 }
0x14ca   : > { %v8129_v60 = vmul.f32 %v8105_v37, %v15221_v5 }
0x14cc   : > { %v8145_v22 = vadd.f32 1e-05, %v8129_v60 }
0x14ce   : > { %10843 = vrsqrt.f32 %v8145_v22  ;;  %vm8230_vm14 = vweird.f32 %v8145_v22 }
0x14d1   : > { %v8107_v54 = vpop.xlane.xlu0 %8106  ;;  %v8032_v32 = vpop.xlane.xlu2 %8031 }
0x14d2   : > { %v8130_v21 = vmul.f32 %v8107_v54, %v15221_v5  ;;  %v8056_v47 = vmul.f32 %v15221_v5, %v8032_v32 }
0x14d4   : > { %v10844_v3 = vpop.eup %10843  ;;  %v8146_v6 = vadd.f32 1e-05, %v8130_v21  ;;  %v15473_v0 = vsub.f32 %v15338_v39, %v8056_v47 }
0x14d5   : > { %v8225_v46 = vmul.f32 %v10844_v3, %v8145_v22  ;;  %vm8231_vm13 = vweird.f32 %v10844_v3 }
0x14d6   : > { %10845 = vrsqrt.f32 %v8146_v6  ;;  %v8088_v2 = vmul.f32 %v15473_v0, %v15473_v0  ;;  %vm8232_vm15 = vmor %vm8230_vm14, %vm8231_vm13  ;;  %vm8240_vm1 = vweird.f32 %v8146_v6 }
0x14d7   : > { %v8226_v13 = vmul.f32 %v10844_v3, %v8225_v46 }
0x14d8   : > { %8118 = vadd.xlane.f32.xlu1 %v8088_v2 }
0x14d9   : > { %v8227_v36 = vmul.f32 0.5, %v8226_v13  ;;  %v8034_v52 = vpop.xlane.xlu0 %8033 }
0x14da   : > { %v8057_v40 = vmul.f32 %v15221_v5, %v8034_v52 }
0x14db   : > { %v8228_v44 = vsub.f32 1.5, %v8227_v36 }
0x14dc   : > { %v10846_v16 = vpop.eup %10845  ;;  %v15480_v29 = vsub.f32 %v15355_v31, %v8057_v40 }
0x14dd   : > { %v8229_v39 = vmul.f32 %v10844_v3, %v8228_v44  ;;  %v8235_v49 = vmul.f32 %v10846_v16, %v8146_v6  ;;  %vm8241_vm0 = vweird.f32 %v10846_v16 }
0x14de   : > { %v8089_v56 = vmul.f32 %v15480_v29, %v15480_v29  ;;  %vm8242_vm2 = vmor %vm8240_vm1, %vm8241_vm0 }
0x14df   : > { %v8233_v24 = vsel %vm8232_vm15, %v10844_v3, %v8229_v39  ;;  %v8236_v53 = vmul.f32 %v10846_v16, %v8235_v49 }
0x14e0   : > { %8120 = vadd.xlane.f32.xlu0 %v8089_v56  ;;  %v8321_v59 = vmul.f32 %v8233_v24, %v15329_v12 }
0x14e1   : > { %v8237_v34 = vmul.f32 0.5, %v8236_v53  ;;  %v8451_v15 = vpop.f32.mrf.mxu0 }
0x14e2   : > { %v8452_v30 = vadd.f32 %v8451_v15, %v15484_v8  ;;  %v8338_v31 = vmul.f32 %v15341_v1, %v8321_v59 }
0x14e3   : > { %v8238_v41 = vsub.f32 1.5, %v8237_v34 }
0x14e4   : > { %v8500_v18 = vmax.f32 %v8452_v30, 0.0  ;;  %v15490_v10 = vadd.f32 %v15348_v38, %v8338_v31 }
0x14e5   : > { %v8239_v27 = vmul.f32 %v10846_v16, %v8238_v41  ;;  %v8109_v50 = vpop.xlane.xlu1 %8108 }
0x14e6   : > { %8613 = vmatmul.f32.vlgmr.msrb.gmra.mxu2 %v8500_v18  ;;  %v8131_v12 = vmul.f32 %v8109_v50, %v15221_v5  ;;  %8406 = vmatmul.f32.gmra.mxu3 %v15490_v10 }
0x14e7   : > { %v8243_v26 = vsel %vm8242_vm2, %v10846_v16, %v8239_v27  ;;  %8471 = vmatmul.f32.gmra.mxu0 %v15490_v10  ;;  %v8386_v35 = vpop.f32.mrf.mxu3 }
0x14e8   : > { %v8147_v17 = vadd.f32 1e-05, %v8131_v12  ;;  %v8387_v20 = vadd.f32 %v8386_v35, %v15492_v7  ;;  %v8322_v42 = vmul.f32 %v8243_v26, %v15336_v14 }
0x14e9   : > { %v8454_v58 = vpop.f32.mrf.mxu0 }
0x14ea   : > { %10847 = vrsqrt.f32 %v8147_v17  ;;  %v8499_v57 = vmax.f32 %v8387_v20, 0.0  ;;  %v8455_v33 = vadd.f32 %v8454_v58, %v15484_v8  ;;  %v8339_v37 = vmul.f32 %v15341_v1, %v8322_v42 }
0x14eb   : > { %vm8250_vm4 = vweird.f32 %v8147_v17 }
0x14ec   : > { %v8502_v28 = vmax.f32 %v8455_v33, 0.0  ;;  %8548 = vmatmul.f32.vlgmr.msrb.gmra.mxu1 %v8499_v57  ;;  %v15502_v60 = vadd.f32 %v15348_v38, %v8339_v37 }
0x14ed   : > { %v8111_v48 = vpop.xlane.xlu2 %8110 }
0x14ee   : > { %8616 = vmatmul.f32.gmra.mxu2 %v8502_v28  ;;  %v8132_v22 = vmul.f32 %v8111_v48, %v15221_v5  ;;  %8409 = vmatmul.f32.gmra.mxu3 %v15502_v60 }
0x14ef   : > { %8474 = vmatmul.f32.gmra.mxu0 %v15502_v60  ;;  %v8389_v14 = vpop.f32.mrf.mxu3 }
0x14f0   : > { %v10848_v54 = vpop.eup %10847  ;;  %v8148_v32 = vadd.f32 1e-05, %v8132_v22  ;;  %v8390_v21 = vadd.f32 %v8389_v14, %v15492_v7 }
0x14f1   : > { %v8245_v47 = vmul.f32 %v10848_v54, %v8147_v17  ;;  %vm8251_vm3 = vweird.f32 %v10848_v54 }
0x14f2   : > { %10849 = vrsqrt.f32 %v8148_v32  ;;  %v8501_v3 = vmax.f32 %v8390_v21, 0.0  ;;  %vm8252_vm5 = vmor %vm8250_vm4, %vm8251_vm3  ;;  %vm8260_vm7 = vweird.f32 %v8148_v32 }
0x14f3   : > { %v8246_v6 = vmul.f32 %v10848_v54, %v8245_v47 }
0x14f4   : > { %8551 = vmatmul.f32.gmra.mxu1 %v8501_v3 }
0x14f5   : > { %v8247_v46 = vmul.f32 0.5, %v8246_v6  ;;  %v8113_v2 = vpop.xlane.xlu1 %8112 }
0x14f6   : > { %v8133_v13 = vmul.f32 %v8113_v2, %v15221_v5 }
0x14f7   : > { %v8248_v36 = vsub.f32 1.5, %v8247_v46 }
0x14f8   : > { %v10850_v52 = vpop.eup %10849  ;;  %v8149_v40 = vadd.f32 1e-05, %v8133_v13 }
0x14f9   : > { %v8249_v44 = vmul.f32 %v10848_v54, %v8248_v36  ;;  %v8255_v25 = vmul.f32 %v10850_v52, %v8148_v32  ;;  %vm8261_vm6 = vweird.f32 %v10850_v52 }
0x14fa   : > { %10851 = vrsqrt.f32 %v8149_v40  ;;  %vm8262_vm8 = vmor %vm8260_vm7, %vm8261_vm6  ;;  %vm8270_vm10 = vweird.f32 %v8149_v40 }
0x14fb   : > { %v8253_v16 = vsel %vm8252_vm5, %v10848_v54, %v8249_v44  ;;  %v8256_v39 = vmul.f32 %v10850_v52, %v8255_v25 }
0x14fc   : > { %v8323_v49 = vmul.f32 %v8253_v16, %v15371_v55 }
0x14fd   : > { %v8257_v56 = vmul.f32 0.5, %v8256_v39  ;;  %v8457_v24 = vpop.f32.mrf.mxu0 }
0x14fe   : > { %v8458_v53 = vadd.f32 %v8457_v24, %v15484_v8  ;;  %v8340_v59 = vmul.f32 %v15341_v1, %v8323_v49 }
0x14ff   : > { %v8258_v34 = vsub.f32 1.5, %v8257_v56 }
0x1500   : > { %v10852_v15 = vpop.eup %10851  ;;  %v8504_v30 = vmax.f32 %v8458_v53, 0.0  ;;  %v15513_v31 = vadd.f32 %v15348_v38, %v8340_v59 }
0x1501   : > { %v8259_v41 = vmul.f32 %v10850_v52, %v8258_v34  ;;  %v8265_v18 = vmul.f32 %v10852_v15, %v8149_v40  ;;  %vm8271_vm9 = vweird.f32 %v10852_v15 }
0x1502   : > { %8412 = vmatmul.f32.gmra.mxu3 %v15513_v31  ;;  %8477 = vmatmul.f32.gmra.mxu0 %v15513_v31  ;;  %vm8272_vm11 = vmor %vm8270_vm10, %vm8271_vm9 }
0x1503   : > { %v8263_v55 = vsel %vm8262_vm8, %v10850_v52, %v8259_v41  ;;  %v8266_v27 = vmul.f32 %v10852_v15, %v8265_v18  ;;  %8619 = vmatmul.f32.gmra.mxu2 %v8504_v30  ;;  %v8392_v50 = vpop.f32.mrf.mxu3 }
0x1504   : > { %v8393_v12 = vadd.f32 %v8392_v50, %v15492_v7  ;;  %v8324_v26 = vmul.f32 %v8263_v55, %v15379_v23 }
0x1505   : > { %v8267_v35 = vmul.f32 0.5, %v8266_v27  ;;  %v8460_v17 = vpop.f32.mrf.mxu0 }
0x1506   : > { %v8503_v20 = vmax.f32 %v8393_v12, 0.0  ;;  %v8461_v42 = vadd.f32 %v8460_v17, %v15484_v8  ;;  %v8341_v58 = vmul.f32 %v15341_v1, %v8324_v26 }
0x1507   : > { %v8268_v57 = vsub.f32 1.5, %v8267_v35  ;;  %v8115_v33 = vpop.xlane.xlu0 %8114 }
0x1508   : > { %v8506_v37 = vmax.f32 %v8461_v42, 0.0  ;;  %v8134_v28 = vmul.f32 %v8115_v33, %v15221_v5  ;;  %8554 = vmatmul.f32.gmra.mxu1 %v8503_v20  ;;  %v15523_v48 = vadd.f32 %v15348_v38, %v8341_v58 }
0x1509   : > { %v8269_v22 = vmul.f32 %v10852_v15, %v8268_v57 }
0x150a   : > { %v8150_v23 = vadd.f32 1e-05, %v8134_v28  ;;  %8415 = vmatmul.f32.gmra.mxu3 %v15523_v48  ;;  %8480 = vmatmul.f32.gmra.mxu0 %v15523_v48 }
0x150b   : > { %v8273_v14 = vsel %vm8272_vm11, %v10852_v15, %v8269_v22  ;;  %8622 = vmatmul.f32.gmra.mxu2 %v8506_v37  ;;  %v8395_v54 = vpop.f32.mrf.mxu3 }
0x150c   : > { %10853 = vrsqrt.f32 %v8150_v23  ;;  %v8396_v32 = vadd.f32 %v8395_v54, %v15492_v7  ;;  %v8325_v21 = vmul.f32 %v8273_v14, %v15387_v9  ;;  %vm8280_vm13 = vweird.f32 %v8150_v23 }
0x150d   : > { %v8463_v47 = vpop.f32.mrf.mxu0 }
0x150e   : > { %v8505_v3 = vmax.f32 %v8396_v32, 0.0  ;;  %v8464_v6 = vadd.f32 %v8463_v47, %v15484_v8  ;;  %v8342_v46 = vmul.f32 %v15341_v1, %v8325_v21 }
0x150f   : > { %v8117_v2 = vpop.xlane.xlu2 %8116 }
0x1510   : > { %v8508_v13 = vmax.f32 %v8464_v6, 0.0  ;;  %v8135_v36 = vmul.f32 %v8117_v2, %v15221_v5  ;;  %8557 = vmatmul.f32.gmra.mxu1 %v8505_v3  ;;  %v15533_v52 = vadd.f32 %v15348_v38, %v8342_v46 }
0x1512   : > { %v10854_v40 = vpop.eup %10853  ;;  %v8151_v44 = vadd.f32 1e-05, %v8135_v36  ;;  %8418 = vmatmul.f32.gmra.mxu3 %v15533_v52  ;;  %8483 = vmatmul.f32.gmra.mxu0 %v15533_v52 }
0x1513   : > { %v8275_v9 = vmul.f32 %v10854_v40, %v8150_v23  ;;  %8625 = vmatmul.f32.gmra.mxu2 %v8508_v13  ;;  %v8398_v25 = vpop.f32.mrf.mxu3  ;;  %vm8281_vm12 = vweird.f32 %v10854_v40 }
0x1514   : > { %10855 = vrsqrt.f32 %v8151_v44  ;;  %v8399_v16 = vadd.f32 %v8398_v25, %v15492_v7  ;;  %vm8282_vm14 = vmor %vm8280_vm13, %vm8281_vm12  ;;  %vm8290_vm0 = vweird.f32 %v8151_v44 }
0x1515   : > { %v8276_v39 = vmul.f32 %v10854_v40, %v8275_v9  ;;  %v8466_v49 = vpop.f32.mrf.mxu0 }
0x1516   : > { %v8507_v56 = vmax.f32 %v8399_v16, 0.0  ;;  %v8467_v24 = vadd.f32 %v8466_v49, %v15484_v8 }
0x1517   : > { %v8277_v53 = vmul.f32 0.5, %v8276_v39 }
0x1518   : > { %v8510_v59 = vmax.f32 %v8467_v24, 0.0  ;;  %8560 = vmatmul.f32.gmra.mxu1 %v8507_v56 }
0x1519   : > { %v8278_v34 = vsub.f32 1.5, %v8277_v53 }
0x151a   : > { %v10856_v15 = vpop.eup %10855 }
0x151b   : > { %v8279_v30 = vmul.f32 %v10854_v40, %v8278_v34  ;;  %v8285_v41 = vmul.f32 %v10856_v15, %v8151_v44  ;;  %8628 = vmatmul.f32.gmra.mxu2 %v8510_v59  ;;  %v8401_v18 = vpop.f32.mrf.mxu3  ;;  %vm8291_vm15 = vweird.f32 %v10856_v15 }
0x151c   : > { %v8402_v55 = vadd.f32 %v8401_v18, %v15492_v7  ;;  %vm8292_vm1 = vmor %vm8290_vm0, %vm8291_vm15 }
0x151d   : > { %v8283_v27 = vsel %vm8282_vm14, %v10854_v40, %v8279_v30  ;;  %v8286_v50 = vmul.f32 %v10856_v15, %v8285_v41  ;;  %v15565_v41 = vld [vmem:[%s11381_s9] sm:$0xff] }
0x151e   : > { %v8509_v12 = vmax.f32 %v8402_v55, 0.0  ;;  %v8326_v26 = vmul.f32 %v8283_v27, %v15414_v61  ;;  %v15568_v18 = vperm.slane %v15565_v41, 6 }
0x151f   : > { %v8287_v35 = vmul.f32 0.5, %v8286_v50 }
0x1520   : > { %8563 = vmatmul.f32.gmra.mxu1 %v8509_v12  ;;  %v8343_v17 = vmul.f32 %v15341_v1, %v8326_v26 }
0x1521   : > { %v8288_v20 = vsub.f32 1.5, %v8287_v35 }
0x1522   : > { %v15543_v42 = vadd.f32 %v15348_v38, %v8343_v17 }
0x1523   : > { %v8289_v58 = vmul.f32 %v10856_v15, %v8288_v20 }
0x1524   : > { %8421 = vmatmul.f32.gmra.mxu3 %v15543_v42  ;;  %8486 = vmatmul.f32.gmra.mxu0 %v15543_v42 }
0x1525   : > { %v8293_v57 = vsel %vm8292_vm1, %v10856_v15, %v8289_v58 }
0x1526   : > { %v8469_v33 = vpop.f32.mrf.mxu0  ;;  %v8327_v61 = vmul.f32 %v8293_v57, %v15426_v11 }
0x1527   : > { %v8470_v37 = vadd.f32 %v8469_v33, %v15484_v8 }
0x1528   : > { %v8344_v28 = vmul.f32 %v15341_v1, %v8327_v61 }
0x1529   : > { %v8512_v22 = vmax.f32 %v8470_v37, 0.0 }
0x152a   : > { %v15551_v23 = vadd.f32 %v15348_v38, %v8344_v28 }
0x152b   : > { %8631 = vmatmul.f32.gmra.mxu2 %v8512_v22 }
0x152c   : > { %v8404_v14 = vpop.f32.mrf.mxu3  ;;  %8424 = vmatmul.f32.gmra.mxu3 %v15551_v23  ;;  %8489 = vmatmul.f32.gmra.mxu0 %v15551_v23 }
0x152d   : > { %v8405_v54 = vadd.f32 %v8404_v14, %v15492_v7 }
0x152f   : > { %v8511_v32 = vmax.f32 %v8405_v54, 0.0 }
0x1531   : > { %8566 = vmatmul.f32.gmra.mxu1 %v8511_v32 }
0x154b   : > { %v8119_v21 = vpop.xlane.xlu1 %8118 }
0x154c   : > { %v8136_v11 = vmul.f32 %v8119_v21, %v15221_v5 }
0x154e   : > { %v8152_v47 = vadd.f32 1e-05, %v8136_v11 }
0x1550   : > { %10857 = vrsqrt.f32 %v8152_v47  ;;  %vm8300_vm3 = vweird.f32 %v8152_v47 }
0x1553   : > { %v8121_v3 = vpop.xlane.xlu0 %8120 }
0x1554   : > { %v8137_v6 = vmul.f32 %v8121_v3, %v15221_v5 }
0x1556   : > { %v10858_v46 = vpop.eup %10857  ;;  %v8153_v2 = vadd.f32 1e-05, %v8137_v6 }
0x1557   : > { %v8295_v13 = vmul.f32 %v10858_v46, %v8152_v47  ;;  %vm8301_vm2 = vweird.f32 %v10858_v46 }
0x1558   : > { %10859 = vrsqrt.f32 %v8153_v2  ;;  %vm8302_vm4 = vmor %vm8300_vm3, %vm8301_vm2  ;;  %vm8310_vm6 = vweird.f32 %v8153_v2 }
0x1559   : > { %v8296_v36 = vmul.f32 %v10858_v46, %v8295_v13 }
0x155b   : > { %v8297_v40 = vmul.f32 0.5, %v8296_v36 }
0x155d   : > { %v8298_v44 = vsub.f32 1.5, %v8297_v40 }
0x155e   : > { %v10860_v9 = vpop.eup %10859 }
0x155f   : > { %v8299_v25 = vmul.f32 %v10858_v46, %v8298_v44  ;;  %v8305_v16 = vmul.f32 %v10860_v9, %v8153_v2  ;;  %vm8311_vm5 = vweird.f32 %v10860_v9 }
0x1560   : > { %vm8312_vm7 = vmor %vm8310_vm6, %vm8311_vm5 }
0x1561   : > { %v8303_v39 = vsel %vm8302_vm4, %v10858_v46, %v8299_v25  ;;  %v8306_v49 = vmul.f32 %v10860_v9, %v8305_v16 }
0x1562   : > { %v8328_v56 = vmul.f32 %v8303_v39, %v15473_v0 }
0x1563   : > { %v8307_v24 = vmul.f32 0.5, %v8306_v49 }
0x1564   : > { %v8472_v53 = vpop.f32.mrf.mxu0  ;;  %v8345_v59 = vmul.f32 %v15341_v1, %v8328_v56 }
0x1565   : > { %v8308_v34 = vsub.f32 1.5, %v8307_v24  ;;  %v8473_v15 = vadd.f32 %v8472_v53, %v15484_v8 }
0x1566   : > { %v15562_v30 = vadd.f32 %v15348_v38, %v8345_v59 }
0x1567   : > { %v8309_v55 = vmul.f32 %v10860_v9, %v8308_v34  ;;  %v8514_v27 = vmax.f32 %v8473_v15, 0.0 }
0x1568   : > { %8427 = vmatmul.f32.gmra.mxu3 %v15562_v30  ;;  %8492 = vmatmul.f32.gmra.mxu0 %v15562_v30 }
0x1569   : > { %v8313_v0 = vsel %vm8312_vm7, %v10860_v9, %v8309_v55  ;;  %8634 = vmatmul.f32.gmra.mxu2 %v8514_v27  ;;  %v8407_v50 = vpop.f32.mrf.mxu3  ;;  %v8549_v12 = vpop.f32.mrf.mxu1 }
0x156a   : > { %v8408_v26 = vadd.f32 %v8407_v50, %v15492_v7  ;;  %v8550_v35 = vadd.f32 %v8549_v12, %v15568_v18  ;;  %v8614_v17 = vpop.f32.mrf.mxu2  ;;  %v8329_v20 = vmul.f32 %v8313_v0, %v15480_v29 }
0x156c   : > { %v8513_v58 = vmax.f32 %v8408_v26, 0.0  ;;  %v8615_v57 = vadd.f32 %v8614_v17, %v8550_v35  ;;  %v8475_v33 = vpop.f32.mrf.mxu0  ;;  %v8346_v61 = vmul.f32 %v15341_v1, %v8329_v20 }
0x156d   : > { %v8476_v37 = vadd.f32 %v8475_v33, %v15484_v8 }
0x156e   : > { %v15578_v28 = vadd.f32 %v8615_v57, %v15353_v43  ;;  %8569 = vmatmul.f32.gmra.mxu1 %v8513_v58  ;;  %v15581_v22 = vadd.f32 %v15348_v38, %v8346_v61 }
0x156f   : > { %v8516_v14 = vmax.f32 %v8476_v37, 0.0 }
0x1570   : > { %8678 = vadd.xlane.f32.xlu2 %v15578_v28  ;;  %8430 = vmatmul.f32.gmra.mxu3 %v15581_v22 }
0x1571   : > { %8495 = vmatmul.f32.gmra.mxu0 %v15581_v22  ;;  %8637 = vmatmul.f32.gmra.mxu2 %v8516_v14  ;;  %v8552_v29 = vpop.f32.mrf.mxu1  ;;  %v8410_v54 = vpop.f32.mrf.mxu3 }
0x1572   : > { %v8553_v1 = vadd.f32 %v8552_v29, %v15568_v18  ;;  %v8411_v32 = vadd.f32 %v8410_v54, %v15492_v7  ;;  %v8617_v43 = vpop.f32.mrf.mxu2 }
0x1574   : > { %v8618_v21 = vadd.f32 %v8617_v43, %v8553_v1  ;;  %v8515_v11 = vmax.f32 %v8411_v32, 0.0 }
0x1576   : > { %v15589_v38 = vadd.f32 %v8618_v21, %v15364_v51  ;;  %8572 = vmatmul.f32.gmra.mxu1 %v8515_v11 }
0x1578   : > { %8680 = vadd.xlane.f32.xlu1 %v15589_v38 }
0x157f   : > { %v8478_v47 = vpop.f32.mrf.mxu0 }
0x1580   : > { %v8479_v3 = vadd.f32 %v8478_v47, %v15484_v8 }
0x1582   : > { %v8518_v6 = vmax.f32 %v8479_v3, 0.0 }
0x1584   : > { %8640 = vmatmul.f32.gmra.mxu2 %v8518_v6 }
0x1585   : > { %v8413_v46 = vpop.f32.mrf.mxu3  ;;  %v8555_v2 = vpop.f32.mrf.mxu1 }
0x1586   : > { %v8414_v13 = vadd.f32 %v8413_v46, %v15492_v7  ;;  %v8556_v36 = vadd.f32 %v8555_v2, %v15568_v18  ;;  %v8620_v40 = vpop.f32.mrf.mxu2 }
0x1587   : > { %v8481_v44 = vpop.f32.mrf.mxu0 }
0x1588   : > { %v8517_v9 = vmax.f32 %v8414_v13, 0.0  ;;  %v8621_v25 = vadd.f32 %v8620_v40, %v8556_v36  ;;  %v8482_v51 = vadd.f32 %v8481_v44, %v15484_v8 }
0x158a   : > { %v15597_v16 = vadd.f32 %v8621_v25, %v15390_v19  ;;  %v8520_v39 = vmax.f32 %v8482_v51, 0.0  ;;  %8575 = vmatmul.f32.gmra.mxu1 %v8517_v9 }
0x158c   : > { %8682 = vadd.xlane.f32.xlu0 %v15597_v16  ;;  %8643 = vmatmul.f32.gmra.mxu2 %v8520_v39 }
0x158d   : > { %v8416_v49 = vpop.f32.mrf.mxu3  ;;  %v8558_v56 = vpop.f32.mrf.mxu1 }
0x158e   : > { %v8417_v24 = vadd.f32 %v8416_v49, %v15492_v7  ;;  %v8559_v53 = vadd.f32 %v8558_v56, %v15568_v18  ;;  %v8623_v59 = vpop.f32.mrf.mxu2 }
0x158f   : > { %v8484_v34 = vpop.f32.mrf.mxu0 }
0x1590   : > { %v8519_v15 = vmax.f32 %v8417_v24, 0.0  ;;  %v8624_v55 = vadd.f32 %v8623_v59, %v8559_v53  ;;  %v8485_v27 = vadd.f32 %v8484_v34, %v15484_v8 }
0x1592   : > { %v15604_v19 = vadd.f32 %v8624_v55, %v15399_v4  ;;  %v8522_v0 = vmax.f32 %v8485_v27, 0.0  ;;  %8578 = vmatmul.f32.gmra.mxu1 %v8519_v15 }
0x1594   : > { %8684 = vadd.xlane.f32.xlu2 %v15604_v19  ;;  %8646 = vmatmul.f32.gmra.mxu2 %v8522_v0 }
0x1595   : > { %v8419_v50 = vpop.f32.mrf.mxu3  ;;  %v8561_v12 = vpop.f32.mrf.mxu1 }
0x1596   : > { %v8420_v26 = vadd.f32 %v8419_v50, %v15492_v7  ;;  %v8562_v35 = vadd.f32 %v8561_v12, %v15568_v18  ;;  %v8626_v17 = vpop.f32.mrf.mxu2 }
0x1598   : > { %v8521_v20 = vmax.f32 %v8420_v26, 0.0  ;;  %v8627_v58 = vadd.f32 %v8626_v17, %v8562_v35 }
0x159a   : > { %v15610_v57 = vadd.f32 %v8627_v58, %v15410_v63  ;;  %8581 = vmatmul.f32.gmra.mxu1 %v8521_v20 }
0x159c   : > { %8686 = vadd.xlane.f32.xlu1 %v15610_v57 }
0x159d   : > { %v8564_v4 = vpop.f32.mrf.mxu1 }
0x159e   : > { %v8565_v33 = vadd.f32 %v8564_v4, %v15568_v18  ;;  %v8629_v61 = vpop.f32.mrf.mxu2 }
0x15a0   : > { %v8630_v37 = vadd.f32 %v8629_v61, %v8565_v33 }
0x15a1   : > { %v8487_v14 = vpop.f32.mrf.mxu0 }
0x15a2   : > { %v15615_v29 = vadd.f32 %v8630_v37, %v15423_v45  ;;  %v8488_v54 = vadd.f32 %v8487_v14, %v15484_v8 }
0x15a4   : > { %v8524_v1 = vmax.f32 %v8488_v54, 0.0  ;;  %8688 = vadd.xlane.f32.xlu0 %v15615_v29 }
0x15a6   : > { %8649 = vmatmul.f32.gmra.mxu2 %v8524_v1 }
0x15a7   : > { %v8422_v63 = vpop.f32.mrf.mxu3 }
0x15a8   : > { %v8423_v32 = vadd.f32 %v8422_v63, %v15492_v7 }
0x15a9   : > { %v8490_v43 = vpop.f32.mrf.mxu0 }
0x15aa   : > { %v8523_v21 = vmax.f32 %v8423_v32, 0.0  ;;  %v8491_v11 = vadd.f32 %v8490_v43, %v15484_v8 }
0x15ac   : > { %v8526_v47 = vmax.f32 %v8491_v11, 0.0  ;;  %8584 = vmatmul.f32.gmra.mxu1 %v8523_v21 }
0x15ae   : > { %v8567_v3 = vpop.f32.mrf.mxu1  ;;  %8652 = vmatmul.f32.gmra.mxu2 %v8526_v47  ;;  %v8632_v46 = vpop.f32.mrf.mxu2 }
0x15af   : > { %v8568_v45 = vadd.f32 %v8567_v3, %v15568_v18  ;;  %v8425_v6 = vpop.f32.mrf.mxu3 }
0x15b0   : > { %v8426_v2 = vadd.f32 %v8425_v6, %v15492_v7 }
0x15b1   : > { %v8633_v13 = vadd.f32 %v8632_v46, %v8568_v45 }
0x15b2   : > { %v8525_v36 = vmax.f32 %v8426_v2, 0.0 }
0x15b3   : > { %v15624_v40 = vadd.f32 %v8633_v13, %v15435_v62 }
0x15b4   : > { %8587 = vmatmul.f32.gmra.mxu1 %v8525_v36 }
0x15b5   : > { %8690 = vadd.xlane.f32.xlu2 %v15624_v40 }
0x15e3   : > { %v8679_v6 = vpop.xlane.xlu2 %8678 }
0x15e5   : > { %v8493_v44 = vpop.f32.mrf.mxu0 }
0x15e6   : > { %v8494_v9 = vadd.f32 %v8493_v44, %v15484_v8 }
0x15e8   : > { %v8528_v25 = vmax.f32 %v8494_v9, 0.0 }
0x15ea   : > { %8655 = vmatmul.f32.gmra.mxu2 %v8528_v25 }
0x15eb   : > { %v8570_v51 = vpop.f32.mrf.mxu1  ;;  %v8428_v56 = vpop.f32.mrf.mxu3 }
0x15ec   : > { %v8571_v39 = vadd.f32 %v8570_v51, %v15568_v18  ;;  %v8635_v49 = vpop.f32.mrf.mxu2  ;;  %v8429_v24 = vadd.f32 %v8428_v56, %v15492_v7 }
0x15ee   : > { %v8636_v53 = vadd.f32 %v8635_v49, %v8571_v39  ;;  %v8496_v59 = vpop.f32.mrf.mxu0  ;;  %v8527_v34 = vmax.f32 %v8429_v24, 0.0 }
0x15ef   : > { %v8497_v62 = vadd.f32 %v8496_v59, %v15484_v8 }
0x15f0   : > { %v15632_v15 = vadd.f32 %v8636_v53, %v15490_v10  ;;  %8590 = vmatmul.f32.gmra.mxu1 %v8527_v34 }
0x15f1   : > { %v8530_v55 = vmax.f32 %v8497_v62, 0.0 }
0x15f2   : > { %8692 = vadd.xlane.f32.xlu1 %v15632_v15 }
0x15f3   : > { %8658 = vmatmul.f32.gmra.mxu2 %v8530_v55  ;;  %v8431_v27 = vpop.f32.mrf.mxu3  ;;  %v8573_v0 = vpop.f32.mrf.mxu1 }
0x15f4   : > { %v8432_v50 = vadd.f32 %v8431_v27, %v15492_v7  ;;  %v8574_v12 = vadd.f32 %v8573_v0, %v15568_v18  ;;  %v8638_v26 = vpop.f32.mrf.mxu2 }
0x15f6   : > { %v8529_v35 = vmax.f32 %v8432_v50, 0.0  ;;  %v8639_v17 = vadd.f32 %v8638_v26, %v8574_v12 }
0x15f8   : > { %v15638_v20 = vadd.f32 %v8639_v17, %v15502_v60  ;;  %8593 = vmatmul.f32.gmra.mxu1 %v8529_v35 }
0x15fa   : > { %8694 = vadd.xlane.f32.xlu0 %v15638_v20 }
0x15ff   : > { %v8683_v27 = vpop.xlane.xlu0 %8682 }
0x1600   : > { %v8712_v35 = vmul.f32 %v8683_v27, %v15221_v5 }
0x1607   : > { %v8576_v8 = vpop.f32.mrf.mxu1  ;;  %v8641_v10 = vpop.f32.mrf.mxu2 }
0x1608   : > { %v8577_v58 = vadd.f32 %v8576_v8, %v15568_v18 }
0x160a   : > { %v8642_v4 = vadd.f32 %v8641_v10, %v8577_v58 }
0x160c   : > { %v15643_v33 = vadd.f32 %v8642_v4, %v15513_v31 }
0x160e   : > { %8696 = vadd.xlane.f32.xlu2 %v15643_v33 }
0x160f   : > { %v8579_v7 = vpop.f32.mrf.mxu1  ;;  %v8644_v37 = vpop.f32.mrf.mxu2 }
0x1610   : > { %v8580_v61 = vadd.f32 %v8579_v7, %v15568_v18 }
0x1612   : > { %v8645_v14 = vadd.f32 %v8644_v37, %v8580_v61 }
0x1614   : > { %v15648_v60 = vadd.f32 %v8645_v14, %v15523_v48 }
0x1616   : > { %8698 = vadd.xlane.f32.xlu1 %v15648_v60 }
0x1617   : > { %v8582_v54 = vpop.f32.mrf.mxu1  ;;  %v8647_v63 = vpop.f32.mrf.mxu2 }
0x1618   : > { %v8583_v1 = vadd.f32 %v8582_v54, %v15568_v18  ;;  %v8689_v10 = vpop.xlane.xlu0 %8688 }
0x161a   : > { %v8648_v32 = vadd.f32 %v8647_v63, %v8583_v1 }
0x161c   : > { %v15653_v31 = vadd.f32 %v8648_v32, %v15533_v52  ;;  %v8710_v52 = vmul.f32 %v8679_v6, %v15221_v5 }
0x161e   : > { %8700 = vadd.xlane.f32.xlu0 %v15653_v31  ;;  %v15668_v36 = vsub.f32 %v15578_v28, %v8710_v52 }
0x1620   : > { %v8742_v9 = vmul.f32 %v15668_v36, %v15668_v36 }
0x1629   : > { %v8585_v43 = vpop.f32.mrf.mxu1  ;;  %v8650_v21 = vpop.f32.mrf.mxu2 }
0x162a   : > { %v8586_v11 = vadd.f32 %v8585_v43, %v15568_v18 }
0x162c   : > { %v8651_v47 = vadd.f32 %v8650_v21, %v8586_v11 }
0x162e   : > { %v15658_v48 = vadd.f32 %v8651_v47, %v15543_v42  ;;  %v8685_v42 = vpop.xlane.xlu2 %8684 }
0x162f   : > { %v8713_v44 = vmul.f32 %v8685_v42, %v15221_v5 }
0x1630   : > { %8702 = vadd.xlane.f32.xlu2 %v15658_v48 }
0x1631   : > { %v8588_v3 = vpop.f32.mrf.mxu1  ;;  %v8653_v46 = vpop.f32.mrf.mxu2  ;;  %v15674_v25 = vsub.f32 %v15604_v19, %v8713_v44 }
0x1632   : > { %v8589_v45 = vadd.f32 %v8588_v3, %v15568_v18  ;;  %v8681_v19 = vpop.xlane.xlu1 %8680 }
0x1633   : > { %v8711_v34 = vmul.f32 %v8681_v19, %v15221_v5 }
0x1634   : > { %v8654_v2 = vadd.f32 %v8653_v46, %v8589_v45 }
0x1636   : > { %v15664_v13 = vadd.f32 %v8654_v2, %v15551_v23  ;;  %v8691_v51 = vpop.xlane.xlu2 %8690  ;;  %v8745_v23 = vmul.f32 %v15674_v25, %v15674_v25 }
0x1637   : > { %v8716_v39 = vmul.f32 %v8691_v51, %v15221_v5 }
0x1638   : > { %8704 = vadd.xlane.f32.xlu1 %v15664_v13 }
0x1639   : > { %v15680_v28 = vsub.f32 %v15624_v40, %v8716_v39  ;;  %v15691_v40 = vsub.f32 %v15589_v38, %v8711_v34  ;;  %v15703_v38 = vsub.f32 %v15597_v16, %v8712_v35  ;;  %v15764_v35 = vperm.slane %v15565_v41, 7 }
0x163a   : > { %v8687_v50 = vpop.xlane.xlu1 %8686 }
0x163b   : > { %v8748_v49 = vmul.f32 %v15680_v28, %v15680_v28  ;;  %v8714_v17 = vmul.f32 %v8687_v50, %v15221_v5  ;;  %v8744_v37 = vmul.f32 %v15703_v38, %v15703_v38 }
0x1640   : > { %8758 = vadd.xlane.f32.xlu1 %v8742_v9 }
0x1648   : > { %8764 = vadd.xlane.f32.xlu1 %v8745_v23 }
0x1650   : > { %8770 = vadd.xlane.f32.xlu1 %v8748_v49 }
0x1665   : > { %v8693_v58 = vpop.xlane.xlu1 %8692 }
0x1666   : > { %v8717_v61 = vmul.f32 %v8693_v58, %v15221_v5 }
0x1668   : > { %v15724_v1 = vsub.f32 %v15632_v15, %v8717_v61 }
0x166a   : > { %v8749_v11 = vmul.f32 %v15724_v1, %v15724_v1 }
0x166d   : > { %v8591_v56 = vpop.f32.mrf.mxu1  ;;  %v8656_v24 = vpop.f32.mrf.mxu2 }
0x166e   : > { %v8592_v53 = vadd.f32 %v8591_v56, %v15568_v18  ;;  %v8695_v63 = vpop.xlane.xlu0 %8694 }
0x166f   : > { %v8718_v43 = vmul.f32 %v8695_v63, %v15221_v5 }
0x1670   : > { %v8657_v59 = vadd.f32 %v8656_v24, %v8592_v53 }
0x1672   : > { %v15687_v62 = vadd.f32 %v8657_v59, %v15562_v30  ;;  %v8743_v30 = vmul.f32 %v15691_v40, %v15691_v40 }
0x1674   : > { %8706 = vadd.xlane.f32.xlu0 %v15687_v62 }
0x1675   : > { %v8594_v55 = vpop.f32.mrf.mxu1 }
0x1676   : > { %v8595_v0 = vadd.f32 %v8594_v55, %v15568_v18  ;;  %v8659_v12 = vpop.f32.mrf.mxu2  ;;  %v15706_v18 = vsub.f32 %v15610_v57, %v8714_v17 }
0x1678   : > { %v8660_v26 = vadd.f32 %v8659_v12, %v8595_v0  ;;  %v8746_v14 = vmul.f32 %v15706_v18, %v15706_v18 }
0x167a   : > { %v15697_v8 = vadd.f32 %v8660_v26, %v15581_v22  ;;  %v8715_v22 = vmul.f32 %v8689_v10, %v15221_v5  ;;  %v15767_v10 = vld [vmem:[%s11381_s9 + $0x8] ss:$0 sm:$0xff] }
0x167c   : > { %8708 = vadd.xlane.f32.xlu2 %v15697_v8  ;;  %8760 = vadd.xlane.f32.xlu0 %v8743_v30  ;;  %v15721_v54 = vsub.f32 %v15615_v29, %v8715_v22  ;;  %v15733_v29 = vsub.f32 %v15638_v20, %v8718_v43 }
0x167e   : > { %v8750_v45 = vmul.f32 %v15733_v29, %v15733_v29 }
0x1681   : > { %v8697_v4 = vpop.xlane.xlu2 %8696 }
0x1682   : > { %v8719_v7 = vmul.f32 %v8697_v4, %v15221_v5 }
0x1684   : > { %v15716_v16 = vsub.f32 %v15643_v33, %v8719_v7  ;;  %8762 = vadd.xlane.f32.xlu2 %v8744_v37  ;;  %8766 = vadd.xlane.f32.xlu0 %v8746_v14  ;;  %v8747_v33 = vmul.f32 %v15721_v54, %v15721_v54 }
0x1686   : > { %v8751_v57 = vmul.f32 %v15716_v16, %v15716_v16 }
0x1688   : > { %8776 = vadd.xlane.f32.xlu1 %v8751_v57 }
0x1689   : > { %v8699_v32 = vpop.xlane.xlu1 %8698 }
0x168a   : > { %v8720_v21 = vmul.f32 %v8699_v32, %v15221_v5 }
0x168c   : > { %8768 = vadd.xlane.f32.xlu2 %v8747_v33  ;;  %8772 = vadd.xlane.f32.xlu0 %v8749_v11  ;;  %v15736_v15 = vsub.f32 %v15648_v60, %v8720_v21 }
0x168e   : > { %v8752_v6 = vmul.f32 %v15736_v15, %v15736_v15 }
0x1691   : > { %v8701_v47 = vpop.xlane.xlu0 %8700 }
0x1692   : > { %v8721_v3 = vmul.f32 %v8701_v47, %v15221_v5 }
0x1694   : > { %8774 = vadd.xlane.f32.xlu2 %v8750_v45  ;;  %8778 = vadd.xlane.f32.xlu0 %v8752_v6  ;;  %v15744_v46 = vsub.f32 %v15653_v31, %v8721_v3 }
0x1696   : > { %v8753_v20 = vmul.f32 %v15744_v46, %v15744_v46 }
0x169c   : > { %8780 = vadd.xlane.f32.xlu2 %v8753_v20 }
0x16a3   : > { %v8703_v60 = vpop.xlane.xlu2 %8702 }
0x16a4   : > { %v8722_v2 = vmul.f32 %v8703_v60, %v15221_v5 }
0x16a6   : > { %v15750_v52 = vsub.f32 %v15658_v48, %v8722_v2 }
0x16a8   : > { %v8754_v42 = vmul.f32 %v15750_v52, %v15750_v52 }
0x16aa   : > { %8782 = vadd.xlane.f32.xlu1 %v8754_v42 }
0x16ab   : > { %v8705_v44 = vpop.xlane.xlu1 %8704 }
0x16ac   : > { %v8723_v9 = vmul.f32 %v8705_v44, %v15221_v5 }
0x16ae   : > { %v15756_v31 = vsub.f32 %v15664_v13, %v8723_v9 }
0x16b0   : > { %v8755_v51 = vmul.f32 %v15756_v31, %v15756_v31 }
0x16b2   : > { %8784 = vadd.xlane.f32.xlu0 %v8755_v51 }
0x16b3   : > { %v8759_v39 = vpop.xlane.xlu1 %8758 }
0x16b4   : > { %v8790_v23 = vmul.f32 %v8759_v39, %v15221_v5 }
0x16b6   : > { %v8806_v49 = vadd.f32 1e-05, %v8790_v23 }
0x16b8   : > { %10861 = vrsqrt.f32 %v8806_v49  ;;  %vm8828_vm9 = vweird.f32 %v8806_v49 }
0x16bb   : > { %v8765_v48 = vpop.xlane.xlu1 %8764 }
0x16bc   : > { %v8793_v56 = vmul.f32 %v8765_v48, %v15221_v5 }
0x16be   : > { %v10862_v24 = vpop.eup %10861  ;;  %v8809_v53 = vadd.f32 1e-05, %v8793_v56 }
0x16bf   : > { %v8823_v19 = vmul.f32 %v10862_v24, %v8806_v49  ;;  %vm8829_vm8 = vweird.f32 %v10862_v24 }
0x16c0   : > { %10863 = vrsqrt.f32 %v8809_v53  ;;  %vm8830_vm10 = vmor %vm8828_vm9, %vm8829_vm8  ;;  %vm8858_vm12 = vweird.f32 %v8809_v53 }
0x16c1   : > { %v8824_v59 = vmul.f32 %v10862_v24, %v8823_v19 }
0x16c3   : > { %v8825_v13 = vmul.f32 0.5, %v8824_v59  ;;  %v8771_v34 = vpop.xlane.xlu1 %8770 }
0x16c4   : > { %v8796_v55 = vmul.f32 %v8771_v34, %v15221_v5 }
0x16c5   : > { %v8826_v27 = vsub.f32 1.5, %v8825_v13 }
0x16c6   : > { %v10864_v0 = vpop.eup %10863  ;;  %v8812_v50 = vadd.f32 1e-05, %v8796_v55 }
0x16c7   : > { %v8827_v12 = vmul.f32 %v10862_v24, %v8826_v27  ;;  %v8853_v26 = vmul.f32 %v10864_v0, %v8809_v53  ;;  %vm8859_vm11 = vweird.f32 %v10864_v0 }
0x16c8   : > { %10865 = vrsqrt.f32 %v8812_v50  ;;  %vm8860_vm13 = vmor %vm8858_vm12, %vm8859_vm11  ;;  %vm8888_vm15 = vweird.f32 %v8812_v50 }
0x16c9   : > { %v8831_v17 = vsel %vm8830_vm10, %v10862_v24, %v8827_v12  ;;  %v8854_v30 = vmul.f32 %v10864_v0, %v8853_v26 }
0x16ca   : > { %v8982_v58 = vmul.f32 %v8831_v17, %v15668_v36 }
0x16cb   : > { %v8855_v4 = vmul.f32 0.5, %v8854_v30 }
0x16cc   : > { %v8999_v7 = vmul.f32 %v15764_v35, %v8982_v58 }
0x16cd   : > { %v8856_v22 = vsub.f32 1.5, %v8855_v4 }
0x16ce   : > { %v10866_v61 = vpop.eup %10865  ;;  %v15772_v37 = vadd.f32 %v15767_v10, %v8999_v7 }
0x16cf   : > { %v8857_v14 = vmul.f32 %v10864_v0, %v8856_v22  ;;  %v8883_v41 = vmul.f32 %v10866_v61, %v8812_v50  ;;  %vm8889_vm14 = vweird.f32 %v10866_v61 }
0x16d0   : > { %9032 = vst [vmem:[#allocation2 + $0x30] sm:$0xff] %v15772_v37  ;;  %vm8890_vm0 = vmor %vm8888_vm15, %vm8889_vm14 }
0x16d1   : > { %v8861_v57 = vsel %vm8860_vm13, %v10864_v0, %v8857_v14  ;;  %v8884_v63 = vmul.f32 %v10866_v61, %v8883_v41 }
0x16d2   : > { %v8985_v32 = vmul.f32 %v8861_v57, %v15674_v25 }
0x16d3   : > { %v8885_v36 = vmul.f32 0.5, %v8884_v63 }
0x16d4   : > { %v9002_v43 = vmul.f32 %v15764_v35, %v8985_v32 }
0x16d5   : > { %v8886_v21 = vsub.f32 1.5, %v8885_v36 }
0x16d6   : > { %v15778_v33 = vadd.f32 %v15767_v10, %v9002_v43 }
0x16d7   : > { %v8887_v11 = vmul.f32 %v10866_v61, %v8886_v21 }
0x16d8   : > { %9035 = vst [vmem:[#allocation2 + $0x18] sm:$0xff] %v15778_v33 }
0x16d9   : > { %v8891_v47 = vsel %vm8890_vm0, %v10866_v61, %v8887_v11 }
0x16da   : > { %v8988_v3 = vmul.f32 %v8891_v47, %v15680_v28 }
0x16dc   : > { %v9005_v45 = vmul.f32 %v15764_v35, %v8988_v3 }
0x16de   : > { %v15784_v25 = vadd.f32 %v15767_v10, %v9005_v45 }
0x16e0   : > { %9038 = vst [vmem:[#allocation2 + $0x8] sm:$0xff] %v15784_v25 }
0x16e7   : > { %v8707_v6 = vpop.xlane.xlu0 %8706 }
0x16e8   : > { %v8724_v20 = vmul.f32 %v8707_v6, %v15221_v5 }
0x16ea   : > { %v15789_v60 = vsub.f32 %v15687_v62, %v8724_v20 }
0x16ec   : > { %v8756_v2 = vmul.f32 %v15789_v60, %v15789_v60 }
0x16ee   : > { %8786 = vadd.xlane.f32.xlu2 %v8756_v2 }
0x16ef   : > { %v8761_v42 = vpop.xlane.xlu0 %8760  ;;  %v8709_v44 = vpop.xlane.xlu2 %8708 }
0x16f0   : > { %v8791_v28 = vmul.f32 %v8761_v42, %v15221_v5  ;;  %v8725_v9 = vmul.f32 %v8709_v44, %v15221_v5 }
0x16f2   : > { %v8807_v51 = vadd.f32 1e-05, %v8791_v28  ;;  %v15796_v39 = vsub.f32 %v15697_v8, %v8725_v9 }
0x16f4   : > { %10867 = vrsqrt.f32 %v8807_v51  ;;  %v8757_v23 = vmul.f32 %v15796_v39, %v15796_v39  ;;  %vm8838_vm2 = vweird.f32 %v8807_v51 }
0x16f6   : > { %8788 = vadd.xlane.f32.xlu1 %v8757_v23 }
0x16f7   : > { %v8767_v62 = vpop.xlane.xlu0 %8766  ;;  %v8763_v49 = vpop.xlane.xlu2 %8762 }
0x16f8   : > { %v8794_v48 = vmul.f32 %v8767_v62, %v15221_v5  ;;  %v8792_v56 = vmul.f32 %v8763_v49, %v15221_v5 }
0x16fa   : > { %v10868_v24 = vpop.eup %10867  ;;  %v8810_v53 = vadd.f32 1e-05, %v8794_v48  ;;  %v15802_v19 = vadd.f32 1e-05, %v8792_v56 }
0x16fb   : > { %v8777_v59 = vpop.xlane.xlu1 %8776  ;;  %v8833_v13 = vmul.f32 %v10868_v24, %v8807_v51  ;;  %vm8839_vm1 = vweird.f32 %v10868_v24 }
0x16fc   : > { %v8799_v8 = vmul.f32 %v8777_v59, %v15221_v5  ;;  %10869 = vrsqrt.f32 %v8810_v53  ;;  %vm8840_vm3 = vmor %vm8838_vm2, %vm8839_vm1  ;;  %vm8868_vm4 = vweird.f32 %v8810_v53  ;;  %vm8848_vm7 = vweird.f32 %v15802_v19 }
0x16fd   : > { %v8834_v34 = vmul.f32 %v10868_v24, %v8833_v13  ;;  %10871 = vrsqrt.f32 %v15802_v19 }
0x16fe   : > { %v15806_v55 = vadd.f32 1e-05, %v8799_v8 }
0x16ff   : > { %v8835_v27 = vmul.f32 0.5, %v8834_v34  ;;  %v8773_v0 = vpop.xlane.xlu0 %8772  ;;  %v8769_v50 = vpop.xlane.xlu2 %8768 }
0x1700   : > { %10873 = vrsqrt.f32 %v15806_v55  ;;  %v8797_v12 = vmul.f32 %v8773_v0, %v15221_v5  ;;  %v8795_v26 = vmul.f32 %v8769_v50, %v15221_v5  ;;  %vm8918_vm11 = vweird.f32 %v15806_v55 }
0x1701   : > { %v8836_v17 = vsub.f32 1.5, %v8835_v27 }
0x1702   : > { %v10870_v30 = vpop.eup %10869  ;;  %v15811_v58 = vadd.f32 1e-05, %v8797_v12  ;;  %v15813_v4 = vadd.f32 1e-05, %v8795_v26 }
0x1703   : > { %v10872_v7 = vpop.eup %10871  ;;  %v8837_v22 = vmul.f32 %v10868_v24, %v8836_v17  ;;  %v8863_v61 = vmul.f32 %v10870_v30, %v8810_v53  ;;  %vm8869_vm5 = vweird.f32 %v10870_v30 }
0x1704   : > { %v8843_v14 = vmul.f32 %v10872_v7, %v15802_v19  ;;  %10875 = vrsqrt.f32 %v15811_v58  ;;  %vm8849_vm6 = vweird.f32 %v10872_v7  ;;  %vm8870_vm8 = vmor %vm8868_vm4, %vm8869_vm5  ;;  %vm8898_vm15 = vweird.f32 %v15811_v58 }
0x1705   : > { %v8841_v57 = vsel %vm8840_vm3, %v10868_v24, %v8837_v22  ;;  %v8864_v63 = vmul.f32 %v10870_v30, %v8863_v61  ;;  %10877 = vrsqrt.f32 %v15813_v4  ;;  %vm8850_vm10 = vmor %vm8848_vm7, %vm8849_vm6  ;;  %vm8878_vm1 = vweird.f32 %v15813_v4 }
0x1706   : > { %v10874_v41 = vpop.eup %10873  ;;  %v8983_v32 = vmul.f32 %v8841_v57, %v15691_v40  ;;  %v8844_v36 = vmul.f32 %v10872_v7, %v8843_v14 }
0x1707   : > { %v8913_v43 = vmul.f32 %v10874_v41, %v15806_v55  ;;  %v8865_v21 = vmul.f32 0.5, %v8864_v63  ;;  %v8779_v11 = vpop.xlane.xlu0 %8778  ;;  %v8775_v47 = vpop.xlane.xlu2 %8774  ;;  %vm8919_vm9 = vweird.f32 %v10874_v41 }
0x1708   : > { %v9000_v3 = vmul.f32 %v15764_v35, %v8983_v32  ;;  %v8845_v45 = vmul.f32 0.5, %v8844_v36  ;;  %v8800_v20 = vmul.f32 %v8779_v11, %v15221_v5  ;;  %v8798_v42 = vmul.f32 %v8775_v47, %v15221_v5  ;;  %vm8920_vm12 = vmor %vm8918_vm11, %vm8919_vm9 }
0x1709   : > { %v8914_v6 = vmul.f32 %v10874_v41, %v8913_v43  ;;  %v8866_v2 = vsub.f32 1.5, %v8865_v21 }
0x170a   : > { %v10876_v44 = vpop.eup %10875  ;;  %v15824_v40 = vadd.f32 %v15767_v10, %v9000_v3  ;;  %v8846_v28 = vsub.f32 1.5, %v8845_v45  ;;  %v15826_v51 = vadd.f32 1e-05, %v8800_v20  ;;  %v15830_v48 = vadd.f32 1e-05, %v8798_v42 }
0x170b   : > { %v8915_v9 = vmul.f32 0.5, %v8914_v6  ;;  %v10878_v23 = vpop.eup %10877  ;;  %v8867_v62 = vmul.f32 %v10870_v30, %v8866_v2  ;;  %v8893_v49 = vmul.f32 %v10876_v44, %v15811_v58  ;;  %vm8899_vm13 = vweird.f32 %v10876_v44 }
0x170c   : > { %9033 = vst [vmem:[#allocation2] sm:$0xff] %v15824_v40  ;;  %v8847_v56 = vmul.f32 %v10872_v7, %v8846_v28  ;;  %v8873_v59 = vmul.f32 %v10878_v23, %v15813_v4  ;;  %10879 = vrsqrt.f32 %v15826_v51  ;;  %vm8879_vm14 = vweird.f32 %v10878_v23  ;;  %vm8900_vm0 = vmor %vm8898_vm15, %vm8899_vm13 }
0x170d   : > { %v8916_v24 = vsub.f32 1.5, %v8915_v9  ;;  %v8871_v13 = vsel %vm8870_vm8, %v10870_v30, %v8867_v62  ;;  %v8894_v8 = vmul.f32 %v10876_v44, %v8893_v49  ;;  %10881 = vrsqrt.f32 %v15830_v48  ;;  %vm8880_vm2 = vmor %vm8878_vm1, %vm8879_vm14 }
0x170e   : > { %v8986_v19 = vmul.f32 %v8871_v13, %v15706_v18  ;;  %v8851_v34 = vsel %vm8850_vm10, %v10872_v7, %v8847_v56  ;;  %v8874_v0 = vmul.f32 %v10878_v23, %v8873_v59  ;;  %vm8928_vm4 = vweird.f32 %v15826_v51 }
0x170f   : > { %v8917_v27 = vmul.f32 %v10874_v41, %v8916_v24  ;;  %v8984_v53 = vmul.f32 %v8851_v34, %v15703_v38  ;;  %v8895_v50 = vmul.f32 0.5, %v8894_v8  ;;  %v8781_v12 = vpop.xlane.xlu2 %8780  ;;  %vm8908_vm7 = vweird.f32 %v15830_v48 }
0x1710   : > { %v9003_v26 = vmul.f32 %v15764_v35, %v8986_v19  ;;  %v8875_v30 = vmul.f32 0.5, %v8874_v0  ;;  %v8801_v55 = vmul.f32 %v8781_v12, %v15221_v5 }
0x1711   : > { %v8921_v17 = vsel %vm8920_vm12, %v10874_v41, %v8917_v27  ;;  %v9001_v22 = vmul.f32 %v15764_v35, %v8984_v53  ;;  %v8896_v7 = vsub.f32 1.5, %v8895_v50 }
0x1712   : > { %v8991_v18 = vmul.f32 %v8921_v17, %v15716_v16  ;;  %v15846_v61 = vadd.f32 %v15767_v10, %v9003_v26  ;;  %v8876_v38 = vsub.f32 1.5, %v8875_v30  ;;  %v8817_v14 = vadd.f32 1e-05, %v8801_v55  ;;  %v10880_v57 = vpop.eup %10879 }
0x1713   : > { %v15849_v63 = vadd.f32 %v15767_v10, %v9001_v22  ;;  %v8897_v32 = vmul.f32 %v10876_v44, %v8896_v7  ;;  %v8923_v36 = vmul.f32 %v10880_v57, %v15826_v51  ;;  %v10882_v43 = vpop.eup %10881  ;;  %vm8929_vm3 = vweird.f32 %v10880_v57 }
0x1714   : > { %v9008_v41 = vmul.f32 %v15764_v35, %v8991_v18  ;;  %9036 = vst [vmem:[#allocation2 + $0x50] sm:$0xff] %v15846_v61  ;;  %v8877_v16 = vmul.f32 %v10878_v23, %v8876_v38  ;;  %10883 = vrsqrt.f32 %v8817_v14  ;;  %v8903_v45 = vmul.f32 %v10882_v43, %v15830_v48  ;;  %vm8930_vm6 = vmor %vm8928_vm4, %vm8929_vm3 }
0x1715   : > { %9034 = vst [vmem:[#allocation2 + $0x58] sm:$0xff] %v15849_v63  ;;  %v8901_v11 = vsel %vm8900_vm0, %v10876_v44, %v8897_v32  ;;  %v8924_v3 = vmul.f32 %v10880_v57, %v8923_v36  ;;  %vm8909_vm5 = vweird.f32 %v10882_v43  ;;  %vm8938_vm10 = vweird.f32 %v8817_v14 }
0x1716   : > { %v15858_v21 = vadd.f32 %v15767_v10, %v9008_v41  ;;  %v8989_v58 = vmul.f32 %v8901_v11, %v15724_v1  ;;  %v8881_v47 = vsel %vm8880_vm2, %v10878_v23, %v8877_v16  ;;  %v8904_v2 = vmul.f32 %v10882_v43, %v8903_v45  ;;  %vm8910_vm8 = vmor %vm8908_vm7, %vm8909_vm5 }
0x1717   : > { %v8987_v4 = vmul.f32 %v8881_v47, %v15721_v54  ;;  %v8925_v20 = vmul.f32 0.5, %v8924_v3 }
0x1718   : > { %9041 = vst [vmem:[#allocation2 + $0x20] sm:$0xff] %v15858_v21  ;;  %v9006_v6 = vmul.f32 %v15764_v35, %v8989_v58  ;;  %v8905_v1 = vmul.f32 0.5, %v8904_v2 }
0x1719   : > { %v9004_v42 = vmul.f32 %v15764_v35, %v8987_v4  ;;  %v8926_v9 = vsub.f32 1.5, %v8925_v20 }
0x171a   : > { %v10884_v28 = vpop.eup %10883  ;;  %v15868_v44 = vadd.f32 %v15767_v10, %v9006_v6  ;;  %v8906_v49 = vsub.f32 1.5, %v8905_v1 }
0x171b   : > { %v15871_v23 = vadd.f32 %v15767_v10, %v9004_v42  ;;  %v8933_v62 = vmul.f32 %v10884_v28, %v8817_v14  ;;  %v8927_v54 = vmul.f32 %v10880_v57, %v8926_v9  ;;  %vm8939_vm9 = vweird.f32 %v10884_v28 }
0x171c   : > { %9039 = vst [vmem:[#allocation2 + $0x48] sm:$0xff] %v15868_v44  ;;  %v8907_v8 = vmul.f32 %v10882_v43, %v8906_v49  ;;  %vm8940_vm11 = vmor %vm8938_vm10, %vm8939_vm9 }
0x171d   : > { %v8783_v56 = vpop.xlane.xlu1 %8782  ;;  %9037 = vst [vmem:[#allocation2 + $0x68] sm:$0xff] %v15871_v23  ;;  %v8934_v24 = vmul.f32 %v10884_v28, %v8933_v62  ;;  %v8931_v13 = vsel %vm8930_vm6, %v10880_v57, %v8927_v54 }
0x171e   : > { %v8802_v59 = vmul.f32 %v8783_v56, %v15221_v5  ;;  %v8992_v19 = vmul.f32 %v8931_v13, %v15736_v15  ;;  %v8911_v0 = vsel %vm8910_vm8, %v10882_v43, %v8907_v8 }
0x171f   : > { %v8935_v34 = vmul.f32 0.5, %v8934_v24  ;;  %v8990_v53 = vmul.f32 %v8911_v0, %v15733_v29 }
0x1720   : > { %v8818_v27 = vadd.f32 1e-05, %v8802_v59  ;;  %v9009_v51 = vmul.f32 %v15764_v35, %v8992_v19 }
0x1721   : > { %v8936_v50 = vsub.f32 1.5, %v8935_v34  ;;  %v9007_v26 = vmul.f32 %v15764_v35, %v8990_v53 }
0x1722   : > { %10885 = vrsqrt.f32 %v8818_v27  ;;  %v15882_v12 = vadd.f32 %v15767_v10, %v9009_v51  ;;  %vm8948_vm13 = vweird.f32 %v8818_v27 }
0x1723   : > { %v8937_v17 = vmul.f32 %v10884_v28, %v8936_v50  ;;  %v15887_v48 = vadd.f32 %v15767_v10, %v9007_v26 }
0x1724   : > { %9042 = vst [vmem:[#allocation2 + $0x10] sm:$0xff] %v15882_v12 }
0x1725   : > { %v8785_v15 = vpop.xlane.xlu0 %8784  ;;  %v8941_v30 = vsel %vm8940_vm11, %v10884_v28, %v8937_v17  ;;  %9040 = vst [vmem:[#allocation2 + $0x40] sm:$0xff] %v15887_v48 }
0x1726   : > { %v8803_v55 = vmul.f32 %v8785_v15, %v15221_v5  ;;  %v8993_v29 = vmul.f32 %v8941_v30, %v15744_v46 }
0x1728   : > { %v10886_v22 = vpop.eup %10885  ;;  %v8819_v18 = vadd.f32 1e-05, %v8803_v55  ;;  %v9010_v7 = vmul.f32 %v15764_v35, %v8993_v29 }
0x1729   : > { %v8943_v38 = vmul.f32 %v10886_v22, %v8818_v27  ;;  %vm8949_vm12 = vweird.f32 %v10886_v22 }
0x172a   : > { %10887 = vrsqrt.f32 %v8819_v18  ;;  %v15894_v14 = vadd.f32 %v15767_v10, %v9010_v7  ;;  %vm8950_vm14 = vmor %vm8948_vm13, %vm8949_vm12  ;;  %vm8958_vm0 = vweird.f32 %v8819_v18 }
0x172b   : > { %v8944_v57 = vmul.f32 %v10886_v22, %v8943_v38 }
0x172c   : > { %9043 = vst [vmem:[#allocation2 + $0x38] sm:$0xff] %v15894_v14 }
0x172d   : > { %v8945_v41 = vmul.f32 0.5, %v8944_v57 }
0x172f   : > { %v8946_v32 = vsub.f32 1.5, %v8945_v41 }
0x1730   : > { %v10888_v16 = vpop.eup %10887 }
0x1731   : > { %v8947_v36 = vmul.f32 %v10886_v22, %v8946_v32  ;;  %v8953_v46 = vmul.f32 %v10888_v16, %v8819_v18  ;;  %vm8959_vm15 = vweird.f32 %v10888_v16 }
0x1732   : > { %vm8960_vm1 = vmor %vm8958_vm0, %vm8959_vm15 }
0x1733   : > { %v8951_v43 = vsel %vm8950_vm14, %v10886_v22, %v8947_v36  ;;  %v8954_v11 = vmul.f32 %v10888_v16, %v8953_v46 }
0x1734   : > { %v8994_v58 = vmul.f32 %v8951_v43, %v15750_v52 }
0x1735   : > { %v8955_v47 = vmul.f32 0.5, %v8954_v11 }
0x1736   : > { %v9011_v3 = vmul.f32 %v15764_v35, %v8994_v58 }
0x1737   : > { %v8956_v45 = vsub.f32 1.5, %v8955_v47 }
0x1738   : > { %v9028_v4 = vadd.f32 %v15767_v10, %v9011_v3 }
0x1739   : > { %v8957_v6 = vmul.f32 %v10888_v16, %v8956_v45 }
0x173a   : > { %9044 = vst [vmem:[#allocation2 + $0x60] sm:$0xff] %v9028_v4 }
0x173b   : > { %v8961_v20 = vsel %vm8960_vm1, %v10888_v16, %v8957_v6 }
0x173c   : > { %v8995_v2 = vmul.f32 %v8961_v20, %v15756_v31 }
0x173e   : > { %v9012_v42 = vmul.f32 %v15764_v35, %v8995_v2 }
0x1740   : > { %v9029_v28 = vadd.f32 %v15767_v10, %v9012_v42 }
0x1742   : > { %9045 = vst [vmem:[#allocation2 + $0x70] sm:$0xff] %v9029_v28 }
0x1761   : > { %v8787_v52 = vpop.xlane.xlu2 %8786 }
0x1762   : > { %v8804_v9 = vmul.f32 %v8787_v52, %v15221_v5 }
0x1764   : > { %v8820_v1 = vadd.f32 1e-05, %v8804_v9 }
0x1766   : > { %10889 = vrsqrt.f32 %v8820_v1  ;;  %vm8968_vm3 = vweird.f32 %v8820_v1 }
0x1769   : > { %v8789_v62 = vpop.xlane.xlu1 %8788 }
0x176a   : > { %v8805_v54 = vmul.f32 %v8789_v62, %v15221_v5 }
0x176c   : > { %v10890_v49 = vpop.eup %10889  ;;  %v8821_v56 = vadd.f32 1e-05, %v8805_v54 }
0x176d   : > { %v8963_v24 = vmul.f32 %v10890_v49, %v8820_v1  ;;  %vm8969_vm2 = vweird.f32 %v10890_v49 }
0x176e   : > { %10891 = vrsqrt.f32 %v8821_v56  ;;  %vm8970_vm4 = vmor %vm8968_vm3, %vm8969_vm2  ;;  %vm8978_vm6 = vweird.f32 %v8821_v56 }
0x176f   : > { %v8964_v59 = vmul.f32 %v10890_v49, %v8963_v24 }
0x1771   : > { %v8965_v13 = vmul.f32 0.5, %v8964_v59 }
0x1773   : > { %v8966_v31 = vsub.f32 1.5, %v8965_v13 }
0x1774   : > { %v10892_v8 = vpop.eup %10891 }
0x1775   : > { %v8967_v19 = vmul.f32 %v10890_v49, %v8966_v31  ;;  %v8973_v34 = vmul.f32 %v10892_v8, %v8821_v56  ;;  %vm8979_vm5 = vweird.f32 %v10892_v8 }
0x1776   : > { %vm8980_vm7 = vmor %vm8978_vm6, %vm8979_vm5 }
0x1777   : > { %v8971_v27 = vsel %vm8970_vm4, %v10890_v49, %v8967_v19  ;;  %v8974_v0 = vmul.f32 %v10892_v8, %v8973_v34 }
0x1778   : > { %v8996_v51 = vmul.f32 %v8971_v27, %v15789_v60 }
0x1779   : > { %v8975_v53 = vmul.f32 0.5, %v8974_v0 }
0x177a   : > { %v9013_v5 = vmul.f32 %v15764_v35, %v8996_v51 }
0x177b   : > { %v8976_v50 = vsub.f32 1.5, %v8975_v53 }
0x177c   : > { %v9030_v26 = vadd.f32 %v15767_v10, %v9013_v5 }
0x177d   : > { %v8977_v17 = vmul.f32 %v10892_v8, %v8976_v50 }
0x177e   : > { %9046 = vst [vmem:[#allocation2 + $0x78] sm:$0xff] %v9030_v26 }
0x177f   : > { %v8981_v15 = vsel %vm8980_vm7, %v10892_v8, %v8977_v17 }
0x1780   : > { %v8997_v30 = vmul.f32 %v8981_v15, %v15796_v39 }
0x1782   : > { %v9014_v55 = vmul.f32 %v15764_v35, %v8997_v30  ;;  %9051 = sbr.rel (%p9635_p7) target bundleno = 6039 (0x1797), region = 76 }
0x1784   : > { %v9031_v29 = vadd.f32 %v15767_v10, %v9014_v55 }
0x1786   : > { %9047 = vst [vmem:[#allocation2 + $0x28] sm:$0xff] %v9031_v29 }
0x1787   : > { %9052 = vst [vmem:[#allocation12] sm:$0xff] %v15772_v37 }
0x1788   : > { %9053 = vst [vmem:[#allocation12 + $0x8] sm:$0xff] %v15824_v40 }
0x1789   : > { %9054 = vst [vmem:[#allocation12 + $0x10] sm:$0xff] %v15849_v63 }
0x178a   : > { %9055 = vst [vmem:[#allocation12 + $0x18] sm:$0xff] %v15778_v33 }
0x178b   : > { %9056 = vst [vmem:[#allocation12 + $0x20] sm:$0xff] %v15846_v61 }
0x178c   : > { %9057 = vst [vmem:[#allocation12 + $0x28] sm:$0xff] %v15871_v23 }
0x178d   : > { %9058 = vst [vmem:[#allocation12 + $0x30] sm:$0xff] %v15784_v25 }
0x178e   : > { %9059 = vst [vmem:[#allocation12 + $0x38] sm:$0xff] %v15868_v44 }
0x178f   : > { %9060 = vst [vmem:[#allocation12 + $0x40] sm:$0xff] %v15887_v48 }
0x1790   : > { %9061 = vst [vmem:[#allocation12 + $0x48] sm:$0xff] %v15858_v21 }
0x1791   : > { %9062 = vst [vmem:[#allocation12 + $0x50] sm:$0xff] %v15882_v12 }
0x1792   : > { %9063 = vst [vmem:[#allocation12 + $0x58] sm:$0xff] %v15894_v14 }
0x1793   : > { %9064 = vst [vmem:[#allocation12 + $0x60] sm:$0xff] %v9028_v4 }
0x1794   : > { %9065 = vst [vmem:[#allocation12 + $0x68] sm:$0xff] %v9029_v28 }
0x1795   : > { %9066 = vst [vmem:[#allocation12 + $0x70] sm:$0xff] %v9030_v26 }
0x1796   : > { %9067 = vst [vmem:[#allocation12 + $0x78] sm:$0xff] %v9031_v29 }
0x1797 PF: > { %p9717_p10 = scmp.eq.s32.totalorder %s11288_s14, 1  ;;  %s11152_s27 = smov [#allocation12]  }
0x1798   : > { %s9073_s13 = sshll.u32 %s11152_s27, 4  ;;  %s9075_s17 = sshll.u32 %s15948_s7, 4  ;;  %s9074_s13 = int_to_ptr.vmem [resolvable:$true] %s9073_s13  ;;  %s9076_s17 = int_to_ptr.hbm [resolvable:$true] %s9075_s17 }
0x1799   : > { %s11153_s21 = smov 128   ;;  %s11154_s22 = smov 8  }
0x179a   : > { %9694 = dma.vmem_to_hbm [thread:$0]  (%p9717_p10), %s9074_s13, 2048, %s9076_s17, [#allocation5], %s11153_s21, %s11153_s21, %s11154_s22  }
0x179b   : > { %11118 = dma.done.wait (%p9717_p10), [#allocation5], 2048  }
0x179c   : > { %11120 = vsyncadd (%p9717_p10), [#allocation5], 4294965248 }
0x179d PF: > { %s16631_s10 = sld [smem:[#allocation17_spill]]  ;;  %p22_p13 = scmp.ge.s32.totalorder %s11216_s28, 4  }
0x179e   : > { %s16632_s26 = sld [smem:[#allocation18_spill]]  ;;  %s16633_s24 = smov %s11127_s25 }
0x179f   : > { %s16635_s27 = smov %s11216_s28  ;;  %24 = sbr.rel (!%p22_p13) target bundleno = 11 (0xb), region = 139 }
0x17a3   : > { %s16634_s25 = smov %s16631_s10 }
0x17a4   :  { %9092 = vsyncpa [#allocation4], 1 }
0x17a5   :  { %9094 = vsyncpa [#allocation4 + $0x1], 1 }
0x17a6   :  { %9095 = vsyncpa [#allocation7], 1 }
0x17a7   :  { %9097 = vsyncpa [#allocation7 + $0x1], 1 }
0x17a8   :  { %9098 = vsyncpa [#allocation10], 1 }
0x17a9   :  { %9100 = vsyncpa [#allocation10 + $0x1], 1 }
0x17aa   :  { %9101 = vsyncpa [#allocation5], 1 }
0x17ab   :  { %9103 = vsyncpa [#allocation5 + $0x1], 1 }

</bundles_post_ra>
